<compile_context>
chip_gen: v7x
topology: tpu7x:2x2x1
jax: 0.10.0
libtpu: 0.0.40
codegen_flags: <defaults>
</compile_context>

<pallas_src>
import jax
import jax.numpy as jnp
from jax.experimental import pallas as pl
from jax.experimental.pallas import tpu as pltpu

N, CIN, H, W = 1, 192, 14, 14
COUT = 768
EPS = 1e-3
M = N * H * W  # 196


def _fused_kernel(x1_ref, x2_ref, w_ref, gamma_ref, beta_ref, o_ref):
    # x1_ref, x2_ref : (CIN, M)     -- NCHW tensors viewed as (C, H*W)
    # w_ref          : (blk, CIN)   -- 1x1 conv weight rows for this COUT block
    # gamma_ref/beta_ref : (blk, 1)
    # o_ref          : (blk, M)
    x = x1_ref[...] + x2_ref[...]                                    # VPU add
    y = jnp.dot(w_ref[...], x, preferred_element_type=jnp.float32)   # MXU: (blk, M)

    # One-pass batch statistics per output channel (rows), biased variance.
    inv_m = 1.0 / M
    s1 = jnp.sum(y, axis=-1, keepdims=True)          # (blk, 1)
    s2 = jnp.sum(y * y, axis=-1, keepdims=True)      # (blk, 1)
    mean = s1 * inv_m
    var = s2 * inv_m - mean * mean

    # Fold the affine into per-channel scale/shift vectors (tiny (blk,1) work),
    # then touch the big tile with just mul + add.
    scale = gamma_ref[...] * jax.lax.rsqrt(var + EPS)  # (blk, 1)
    shift = beta_ref[...] - mean * scale               # (blk, 1)
    o_ref[...] = y * scale + shift


def _num_cout_blocks():
    """2 blocks on multi-TensorCore chips (v7x) to use both cores; 1 otherwise."""
    try:
        kind = jax.devices()[0].device_kind.lower()
    except Exception:
        return 1
    return 2 if ("v7" in kind or "tpu7" in kind) else 1


def fused_add_conv1x1_bn(x146, x131, weight, gamma, beta, cout_blocks=None):
    """x146, x131: (N, CIN, H, W) f32. weight: (COUT, CIN, 1, 1). gamma/beta: (COUT,)."""
    if cout_blocks is None:
        cout_blocks = _num_cout_blocks()
    assert COUT % cout_blocks == 0
    blk = COUT // cout_blocks

    # NCHW -> (C, H*W): a pure reshape (contiguous layout), no transpose ops.
    x1 = x146.reshape(CIN, M)
    x2 = x131.reshape(CIN, M)
    w = weight.reshape(COUT, CIN)        # (768, 192)
    g = gamma.reshape(COUT, 1)
    b = beta.reshape(COUT, 1)

    out_mat = pl.pallas_call(
        _fused_kernel,
        out_shape=jax.ShapeDtypeStruct((COUT, M), jnp.float32),
        grid=(cout_blocks,),
        in_specs=[
            pl.BlockSpec((CIN, M), lambda i: (0, 0)),    # x1: whole, replicated over grid
            pl.BlockSpec((CIN, M), lambda i: (0, 0)),    # x2: whole, replicated over grid
            pl.BlockSpec((blk, CIN), lambda i: (i, 0)),  # weight rows for this COUT block
            pl.BlockSpec((blk, 1), lambda i: (i, 0)),    # gamma
            pl.BlockSpec((blk, 1), lambda i: (i, 0)),    # beta
        ],
        out_specs=pl.BlockSpec((blk, M), lambda i: (i, 0)),
        compiler_params=pltpu.CompilerParams(
            dimension_semantics=("parallel",),
        ),
        cost_estimate=pl.CostEstimate(
            flops=2 * M * CIN * COUT,
            transcendentals=COUT,  # rsqrt per output channel
            bytes_accessed=(2 * CIN * M + COUT * CIN + COUT * M + 2 * COUT) * 4,
        ),
    )(x1, x2, w, g, b)

    # (COUT, H*W) -> (N, COUT, H, W): pure reshape, no transpose.
    return out_mat.reshape(N, COUT, H, W)


def _reference(x146, x131, weight, gamma, beta):
    # Independent reference in the original (rows = pixels) orientation.
    x = x146 + x131
    xm = jnp.transpose(x, (0, 2, 3, 1)).reshape(M, CIN)
    y = xm @ weight.reshape(COUT, CIN).T
    mean = jnp.mean(y, axis=0, keepdims=True)
    var = jnp.mean((y - mean) ** 2, axis=0, keepdims=True)
    y = (y - mean) / jnp.sqrt(var + EPS) * gamma.reshape(1, COUT) + beta.reshape(1, COUT)
    return jnp.transpose(y.reshape(N, H, W, COUT), (0, 3, 1, 2))


if __name__ == "__main__":
    key = jax.random.PRNGKey(0)
    k1, k2, k3, k4, k5 = jax.random.split(key, 5)

    x146 = jax.random.normal(k1, (N, CIN, H, W), dtype=jnp.float32)
    x131 = jax.random.normal(k2, (N, CIN, H, W), dtype=jnp.float32)

    # Deterministic parameter init (shapes from the module's __init__)
    weight = jax.random.normal(k3, (COUT, CIN, 1, 1), dtype=jnp.float32) * 0.05
    gamma = 1.0 + 0.1 * jax.random.normal(k4, (COUT,), dtype=jnp.float32)
    beta = 0.1 * jax.random.normal(k5, (COUT,), dtype=jnp.float32)

    out = fused_add_conv1x1_bn(x146, x131, weight, gamma, beta)
    out = jax.block_until_ready(out)

    ref = _reference(x146, x131, weight, gamma, beta)
    assert out.shape == (N, COUT, H, W)
    assert jnp.allclose(out, ref, atol=2e-3, rtol=2e-3), "mismatch vs reference"

    print("KERNEL_OK")
</pallas_src>

<mosaic_0001>
module attributes {stable_mosaic.version = 11 : i64} {
  func.func @_fused_kernel(%arg0: i32, %arg1: memref<192x196xf32, #tpu.memory_space<vmem>>, %arg2: memref<192x196xf32, #tpu.memory_space<vmem>>, %arg3: memref<768x192xf32, #tpu.memory_space<vmem>>, %arg4: memref<768x1xf32, #tpu.memory_space<vmem>>, %arg5: memref<768x1xf32, #tpu.memory_space<vmem>>, %arg6: memref<768x196xf32, #tpu.memory_space<vmem>>) attributes {dimension_semantics = [#tpu.dimension_semantics<parallel>], iteration_bounds = array<i64: 1>, scalar_prefetch = 0 : i64, scratch_operands = 0 : i64, tpu.core_type = #tpu.core_type<tc>, window_params = [{pipeline_mode = #tpu.pipeline_mode<synchronous>, transform_indices = @transform_0, window_bounds = array<i64: 192, 196>}, {pipeline_mode = #tpu.pipeline_mode<synchronous>, transform_indices = @transform_1, window_bounds = array<i64: 192, 196>}, {transform_indices = @transform_2, window_bounds = array<i64: 768, 192>}, {transform_indices = @transform_3, window_bounds = array<i64: 768, 1>}, {transform_indices = @transform_4, window_bounds = array<i64: 768, 1>}, {transform_indices = @transform_5, window_bounds = array<i64: 768, 196>}]} {
    %c0 = arith.constant 0 : index
    %c0_0 = arith.constant 0 : index
    %0 = vector.load %arg1[%c0, %c0_0] : memref<192x196xf32, #tpu.memory_space<vmem>>, vector<192x196xf32>
    %c0_1 = arith.constant 0 : index
    %c0_2 = arith.constant 0 : index
    %1 = vector.load %arg2[%c0_1, %c0_2] : memref<192x196xf32, #tpu.memory_space<vmem>>, vector<192x196xf32>
    %2 = arith.addf %0, %1 : vector<192x196xf32>
    %c0_3 = arith.constant 0 : index
    %c0_4 = arith.constant 0 : index
    %3 = vector.load %arg3[%c0_3, %c0_4] : memref<768x192xf32, #tpu.memory_space<vmem>>, vector<768x192xf32>
    %cst = arith.constant dense<0.000000e+00> : vector<768x196xf32>
    %4 = tpu.matmul %3, %2, %cst {dimension_numbers = #tpu.dot_dimension_numbers<[1], [0], [0], [1], [0, 0, 1, 1], [], []>} : vector<768x192xf32>, vector<192x196xf32>, vector<768x196xf32> -> vector<768x196xf32>
    %cst_5 = arith.constant dense<0.000000e+00> : vector<768xf32>
    %5 = vector.multi_reduction <add>, %4, %cst_5 [1] : vector<768x196xf32> to vector<768xf32>
    %6 = vector.shape_cast %5 : vector<768xf32> to vector<768x1xf32>
    %7 = arith.mulf %4, %4 : vector<768x196xf32>
    %cst_6 = arith.constant dense<0.000000e+00> : vector<768xf32>
    %8 = vector.multi_reduction <add>, %7, %cst_6 [1] : vector<768x196xf32> to vector<768xf32>
    %9 = vector.shape_cast %8 : vector<768xf32> to vector<768x1xf32>
    %cst_7 = arith.constant 0.00510204071 : f32
    %10 = vector.broadcast %cst_7 : f32 to vector<768x1xf32>
    %11 = arith.mulf %6, %10 : vector<768x1xf32>
    %cst_8 = arith.constant 0.00510204071 : f32
    %12 = vector.broadcast %cst_8 : f32 to vector<768x1xf32>
    %13 = arith.mulf %9, %12 : vector<768x1xf32>
    %14 = arith.mulf %11, %11 : vector<768x1xf32>
    %15 = arith.subf %13, %14 : vector<768x1xf32>
    %c0_9 = arith.constant 0 : index
    %c0_10 = arith.constant 0 : index
    %16 = vector.load %arg4[%c0_9, %c0_10] : memref<768x1xf32, #tpu.memory_space<vmem>>, vector<768x1xf32>
    %cst_11 = arith.constant 1.000000e-03 : f32
    %17 = vector.broadcast %cst_11 : f32 to vector<768x1xf32>
    %18 = arith.addf %15, %17 : vector<768x1xf32>
    %19 = math.rsqrt %18 : vector<768x1xf32>
    %20 = arith.mulf %16, %19 : vector<768x1xf32>
    %c0_12 = arith.constant 0 : index
    %c0_13 = arith.constant 0 : index
    %21 = vector.load %arg5[%c0_12, %c0_13] : memref<768x1xf32, #tpu.memory_space<vmem>>, vector<768x1xf32>
    %22 = arith.mulf %11, %20 : vector<768x1xf32>
    %23 = arith.subf %21, %22 : vector<768x1xf32>
    %24 = vector.broadcast %20 : vector<768x1xf32> to vector<768x196xf32>
    %25 = arith.mulf %4, %24 : vector<768x196xf32>
    %26 = vector.broadcast %23 : vector<768x1xf32> to vector<768x196xf32>
    %27 = arith.addf %25, %26 : vector<768x196xf32>
    %c0_14 = arith.constant 0 : index
    %c0_15 = arith.constant 0 : index
    %28 = vector.load %arg6[%c0_14, %c0_15] : memref<768x196xf32, #tpu.memory_space<vmem>>, vector<768x196xf32>
    tpu.vector_store %arg6[%c0_14, %c0_15], %27 {strides = array<i32>} : memref<768x196xf32, #tpu.memory_space<vmem>>, vector<768x196xf32>,
    return
  }
  func.func @transform_0(%arg0: i32) -> (i32, i32) {
    %c0_i32 = arith.constant 0 : i32
    %c0_i32_0 = arith.constant 0 : i32
    %c0_i32_1 = arith.constant 0 : i32
    return %c0_i32, %c0_i32_0 : i32, i32
  }
  func.func @transform_1(%arg0: i32) -> (i32, i32) {
    %c0_i32 = arith.constant 0 : i32
    %c0_i32_0 = arith.constant 0 : i32
    %c0_i32_1 = arith.constant 0 : i32
    return %c0_i32, %c0_i32_0 : i32, i32
  }
  func.func @transform_2(%arg0: i32) -> (i32, i32) {
    %c0_i32 = arith.constant 0 : i32
    %c0_i32_0 = arith.constant 0 : i32
    return %arg0, %c0_i32 : i32, i32
  }
  func.func @transform_3(%arg0: i32) -> (i32, i32) {
    %c0_i32 = arith.constant 0 : i32
    %c0_i32_0 = arith.constant 0 : i32
    return %arg0, %c0_i32 : i32, i32
  }
  func.func @transform_4(%arg0: i32) -> (i32, i32) {
    %c0_i32 = arith.constant 0 : i32
    %c0_i32_0 = arith.constant 0 : i32
    return %arg0, %c0_i32 : i32, i32
  }
  func.func @transform_5(%arg0: i32) -> (i32, i32) {
    %c0_i32 = arith.constant 0 : i32
    %c0_i32_0 = arith.constant 0 : i32
    return %arg0, %c0_i32 : i32, i32
  }
}

</mosaic_0001>

<bundles_post_ra>
// kernel: tpu_custom_call.1
= control target key start
LH: loop header
LB: loop body
LE: loop exit
PB: predicated region body
PF: predicated region fallthrough
CT: control target
= control target key end

     0   :  { %vm356_vm0 = vcmask 523264   ;;  %vm1286_vm1 = vcmask 556032   ;;  %s11196_s0 = inlined_call_operand.vmem [shape: f32[192,196], index: 0, kind: input, shape index: {}]   ;;  %s11197_s1 = inlined_call_operand.vmem [shape: f32[192,196], index: 1, kind: input, shape index: {}]   ;;  %s11198_s2 = inlined_call_operand.vmem [shape: f32[768,192], index: 2, kind: input, shape index: {}]   ;;  %s11199_s3 = inlined_call_operand.vmem [shape: f32[768,1], index: 3, kind: input, shape index: {}]   ;;  %s11200_s4 = inlined_call_operand.vmem [shape: f32[768,1], index: 4, kind: input, shape index: {}]   ;;  %s11201_s5 = inlined_call_operand.vmem [shape: f32[768,196], index: 5, kind: output, shape index: {}]  }
   0x1   :  { %v21_v0 = vld [vmem:[%s11196_s0 + $0x8] sm:$0xff]  ;;  %v23_v1 = vld [vmem:[%s11196_s0 + $0x18] sm:$0xff]  ;;  %v20_v5 = vld [vmem:[%s11196_s0] sm:$0xff] }
   0x2   :  { %v69_v2 = vld [vmem:[%s11197_s1 + $0x8] sm:$0xff]  ;;  %v71_v3 = vld [vmem:[%s11197_s1 + $0x18] sm:$0xff]  ;;  %v22_v6 = vld [vmem:[%s11196_s0 + $0x10] sm:$0xff] }
   0x3   :  { %v117_v4 = vadd.f32 %v69_v2, %v21_v0  ;;  %v119_v7 = vadd.f32 %v71_v3, %v23_v1  ;;  %v68_v8 = vld [vmem:[%s11197_s1] sm:$0xff]  ;;  %v70_v9 = vld [vmem:[%s11197_s1 + $0x10] sm:$0xff]  ;;  %v25_v10 = vld [vmem:[%s11196_s0 + $0x28] sm:$0xff] }
   0x4   :  { %v116_v11 = vadd.f32 %v68_v8, %v20_v5  ;;  %v118_v12 = vadd.f32 %v70_v9, %v22_v6  ;;  %v27_v13 = vld [vmem:[%s11196_s0 + $0x38] sm:$0xff]  ;;  %v73_v14 = vld [vmem:[%s11197_s1 + $0x28] sm:$0xff]  ;;  %v24_v19 = vld [vmem:[%s11196_s0 + $0x20] sm:$0xff] }
   0x5   :  { %v75_v15 = vld [vmem:[%s11197_s1 + $0x38] sm:$0xff]  ;;  %v4939_v16 = vpack.c.bf16 %v119_v7, %v117_v4  ;;  %v121_v17 = vadd.f32 %v73_v14, %v25_v10  ;;  %v26_v20 = vld [vmem:[%s11196_s0 + $0x30] sm:$0xff]  ;;  %v72_v21 = vld [vmem:[%s11197_s1 + $0x20] sm:$0xff] }
   0x6   :  { %v123_v18 = vadd.f32 %v75_v15, %v27_v13  ;;  %v4941_v22 = vpack.c.bf16 %v118_v12, %v116_v11  ;;  %v74_v23 = vld [vmem:[%s11197_s1 + $0x30] sm:$0xff]  ;;  %v120_v24 = vadd.f32 %v72_v21, %v24_v19  ;;  %v29_v25 = vld [vmem:[%s11196_s0 + $0x48] sm:$0xff]  ;;  %v31_v26 = vld [vmem:[%s11196_s0 + $0x58] sm:$0xff] }
   0x7   :  { %4940 = vmatprep.subr.bf16.mxu0 %v4939_v16  ;;  %4987 = vmatprep.subr.bf16.mxu1 %v4939_v16  ;;  %v122_v28 = vadd.f32 %v74_v23, %v26_v20  ;;  %v77_v29 = vld [vmem:[%s11197_s1 + $0x48] sm:$0xff]  ;;  %v79_v30 = vld [vmem:[%s11197_s1 + $0x58] sm:$0xff]  ;;  %v28_v31 = vld [vmem:[%s11196_s0 + $0x40] sm:$0xff] }
   0x8   :  { %v4943_v27 = vpack.c.bf16 %v123_v18, %v121_v17  ;;  %4942 = vmatpush1.bf16.msra.mxu0 %v4941_v22  ;;  %4999 = vmatpush1.bf16.msra.mxu1 %v4941_v22  ;;  %v125_v32 = vadd.f32 %v77_v29, %v29_v25  ;;  %v127_v33 = vadd.f32 %v79_v30, %v31_v26  ;;  %v30_v34 = vld [vmem:[%s11196_s0 + $0x50] sm:$0xff]  ;;  %v76_v35 = vld [vmem:[%s11197_s1 + $0x40] sm:$0xff]  ;;  %v33_v40 = vld [vmem:[%s11196_s0 + $0x68] sm:$0xff] }
   0x9   :  { %v78_v36 = vld [vmem:[%s11197_s1 + $0x50] sm:$0xff]  ;;  %v4945_v37 = vpack.c.bf16 %v122_v28, %v120_v24  ;;  %v124_v38 = vadd.f32 %v76_v35, %v28_v31  ;;  %v35_v41 = vld [vmem:[%s11196_s0 + $0x78] sm:$0xff]  ;;  %v81_v42 = vld [vmem:[%s11197_s1 + $0x68] sm:$0xff] }
   0xa   :  { %4944 = vmatprep.subr.bf16.mxu0 %v4943_v27  ;;  %4988 = vmatprep.subr.bf16.mxu1 %v4943_v27  ;;  %v126_v39 = vadd.f32 %v78_v36, %v30_v34  ;;  %v4947_v43 = vpack.c.bf16 %v127_v33, %v125_v32  ;;  %v83_v44 = vld [vmem:[%s11197_s1 + $0x78] sm:$0xff]  ;;  %v129_v45 = vadd.f32 %v81_v42, %v33_v40  ;;  %v32_v46 = vld [vmem:[%s11196_s0 + $0x60] sm:$0xff]  ;;  %v34_v47 = vld [vmem:[%s11196_s0 + $0x70] sm:$0xff] }
   0xb   :  { %v131_v48 = vadd.f32 %v83_v44, %v35_v41  ;;  %v80_v49 = vld [vmem:[%s11197_s1 + $0x60] sm:$0xff]  ;;  %v82_v50 = vld [vmem:[%s11197_s1 + $0x70] sm:$0xff]  ;;  %v37_v51 = vld [vmem:[%s11196_s0 + $0x88] sm:$0xff] }
   0xc   :  { %4946 = vmatpush1.bf16.msra.mxu0 %v4945_v37  ;;  %5000 = vmatpush1.bf16.msra.mxu1 %v4945_v37  ;;  %v4949_v52 = vpack.c.bf16 %v126_v39, %v124_v38  ;;  %v128_v53 = vadd.f32 %v80_v49, %v32_v46  ;;  %v130_v54 = vadd.f32 %v82_v50, %v34_v47  ;;  %v39_v55 = vld [vmem:[%s11196_s0 + $0x98] sm:$0xff]  ;;  %v85_v56 = vld [vmem:[%s11197_s1 + $0x88] sm:$0xff]  ;;  %v36_v61 = vld [vmem:[%s11196_s0 + $0x80] sm:$0xff] }
   0xd   :  { %v87_v57 = vld [vmem:[%s11197_s1 + $0x98] sm:$0xff]  ;;  %4948 = vmatprep.subr.bf16.mxu0 %v4947_v43  ;;  %4989 = vmatprep.subr.bf16.mxu1 %v4947_v43  ;;  %v4951_v58 = vpack.c.bf16 %v131_v48, %v129_v45  ;;  %v133_v59 = vadd.f32 %v85_v56, %v37_v51  ;;  %v38_v62 = vld [vmem:[%s11196_s0 + $0x90] sm:$0xff]  ;;  %v84_v63 = vld [vmem:[%s11197_s1 + $0x80] sm:$0xff] }
   0xe   :  { %v135_v60 = vadd.f32 %v87_v57, %v39_v55  ;;  %v86_v0 = vld [vmem:[%s11197_s1 + $0x90] sm:$0xff]  ;;  %v41_v1 = vld [vmem:[%s11196_s0 + $0xa8] sm:$0xff]  ;;  %v43_v2 = vld [vmem:[%s11196_s0 + $0xb8] sm:$0xff]  ;;  %v4953_v5 = vpack.c.bf16 %v130_v54, %v128_v53  ;;  %v132_v6 = vadd.f32 %v84_v63, %v36_v61 }
   0xf   :  { %v89_v3 = vld [vmem:[%s11197_s1 + $0xa8] sm:$0xff]  ;;  %v91_v4 = vld [vmem:[%s11197_s1 + $0xb8] sm:$0xff]  ;;  %v134_v7 = vadd.f32 %v86_v0, %v38_v62  ;;  %v40_v8 = vld [vmem:[%s11196_s0 + $0xa0] sm:$0xff] }
  0x10   :  { %4950 = vmatpush1.bf16.msra.mxu0 %v4949_v52  ;;  %5001 = vmatpush1.bf16.msra.mxu1 %v4949_v52  ;;  %v42_v9 = vld [vmem:[%s11196_s0 + $0xb0] sm:$0xff]  ;;  %v4955_v10 = vpack.c.bf16 %v135_v60, %v133_v59  ;;  %v137_v11 = vadd.f32 %v89_v3, %v41_v1  ;;  %v139_v12 = vadd.f32 %v91_v4, %v43_v2  ;;  %v88_v13 = vld [vmem:[%s11197_s1 + $0xa0] sm:$0xff]  ;;  %v45_v15 = vld [vmem:[%s11196_s0 + $0xc8] sm:$0xff] }
  0x11   :  { %4952 = vmatprep.subr.bf16.mxu0 %v4951_v58  ;;  %4990 = vmatprep.subr.bf16.mxu1 %v4951_v58  ;;  %v90_v14 = vld [vmem:[%s11197_s1 + $0xb0] sm:$0xff]  ;;  %v47_v16 = vld [vmem:[%s11196_s0 + $0xd8] sm:$0xff]  ;;  %v93_v17 = vld [vmem:[%s11197_s1 + $0xc8] sm:$0xff]  ;;  %v4957_v19 = vpack.c.bf16 %v134_v7, %v132_v6  ;;  %v136_v20 = vadd.f32 %v88_v13, %v40_v8 }
  0x12   :  { %v95_v18 = vld [vmem:[%s11197_s1 + $0xd8] sm:$0xff]  ;;  %v138_v21 = vadd.f32 %v90_v14, %v42_v9  ;;  %v44_v22 = vld [vmem:[%s11196_s0 + $0xc0] sm:$0xff]  ;;  %v46_v23 = vld [vmem:[%s11196_s0 + $0xd0] sm:$0xff]  ;;  %v4959_v24 = vpack.c.bf16 %v139_v12, %v137_v11  ;;  %v141_v25 = vadd.f32 %v93_v17, %v45_v15 }
  0x13   :  { %v143_v26 = vadd.f32 %v95_v18, %v47_v16  ;;  %v92_v27 = vld [vmem:[%s11197_s1 + $0xc0] sm:$0xff]  ;;  %v94_v28 = vld [vmem:[%s11197_s1 + $0xd0] sm:$0xff]  ;;  %v49_v29 = vld [vmem:[%s11196_s0 + $0xe8] sm:$0xff] }
  0x14   :  { %4954 = vmatpush1.bf16.msra.mxu0 %v4953_v5  ;;  %5002 = vmatpush1.bf16.msra.mxu1 %v4953_v5  ;;  %v51_v30 = vld [vmem:[%s11196_s0 + $0xf8] sm:$0xff]  ;;  %v97_v31 = vld [vmem:[%s11197_s1 + $0xe8] sm:$0xff]  ;;  %v4961_v33 = vpack.c.bf16 %v138_v21, %v136_v20  ;;  %v140_v34 = vadd.f32 %v92_v27, %v44_v22  ;;  %v142_v35 = vadd.f32 %v94_v28, %v46_v23  ;;  %v48_v36 = vld [vmem:[%s11196_s0 + $0xe0] sm:$0xff] }
  0x15   :  { %4956 = vmatprep.subr.bf16.mxu0 %v4955_v10  ;;  %4991 = vmatprep.subr.bf16.mxu1 %v4955_v10  ;;  %v99_v32 = vld [vmem:[%s11197_s1 + $0xf8] sm:$0xff]  ;;  %v50_v37 = vld [vmem:[%s11196_s0 + $0xf0] sm:$0xff]  ;;  %v4963_v38 = vpack.c.bf16 %v143_v26, %v141_v25  ;;  %v145_v39 = vadd.f32 %v97_v31, %v49_v29  ;;  %v96_v41 = vld [vmem:[%s11197_s1 + $0xe0] sm:$0xff] }
  0x16   :  { %v147_v40 = vadd.f32 %v99_v32, %v51_v30  ;;  %v98_v42 = vld [vmem:[%s11197_s1 + $0xf0] sm:$0xff]  ;;  %v53_v43 = vld [vmem:[%s11196_s0 + $0x108] sm:$0xff]  ;;  %v55_v44 = vld [vmem:[%s11196_s0 + $0x118] sm:$0xff]  ;;  %v4965_v47 = vpack.c.bf16 %v142_v35, %v140_v34  ;;  %v144_v48 = vadd.f32 %v96_v41, %v48_v36 }
  0x17   :  { %v101_v45 = vld [vmem:[%s11197_s1 + $0x108] sm:$0xff]  ;;  %v103_v46 = vld [vmem:[%s11197_s1 + $0x118] sm:$0xff]  ;;  %v146_v49 = vadd.f32 %v98_v42, %v50_v37  ;;  %v52_v50 = vld [vmem:[%s11196_s0 + $0x100] sm:$0xff] }
  0x18   :  { %4958 = vmatpush1.bf16.msra.mxu0 %v4957_v19  ;;  %5003 = vmatpush1.bf16.msra.mxu1 %v4957_v19  ;;  %v54_v51 = vld [vmem:[%s11196_s0 + $0x110] sm:$0xff]  ;;  %v4967_v52 = vpack.c.bf16 %v147_v40, %v145_v39  ;;  %v149_v53 = vadd.f32 %v101_v45, %v53_v43  ;;  %v151_v54 = vadd.f32 %v103_v46, %v55_v44  ;;  %v100_v55 = vld [vmem:[%s11197_s1 + $0x100] sm:$0xff]  ;;  %v57_v57 = vld [vmem:[%s11196_s0 + $0x128] sm:$0xff] }
  0x19   :  { %4960 = vmatprep.subr.bf16.mxu0 %v4959_v24  ;;  %4992 = vmatprep.subr.bf16.mxu1 %v4959_v24  ;;  %v102_v56 = vld [vmem:[%s11197_s1 + $0x110] sm:$0xff]  ;;  %v59_v58 = vld [vmem:[%s11196_s0 + $0x138] sm:$0xff]  ;;  %v105_v59 = vld [vmem:[%s11197_s1 + $0x128] sm:$0xff]  ;;  %v4969_v62 = vpack.c.bf16 %v146_v49, %v144_v48  ;;  %v148_v63 = vadd.f32 %v100_v55, %v52_v50 }
  0x1a   :  { %v107_v60 = vld [vmem:[%s11197_s1 + $0x138] sm:$0xff]  ;;  %v56_v61 = vld [vmem:[%s11196_s0 + $0x120] sm:$0xff]  ;;  %v150_v0 = vadd.f32 %v102_v56, %v54_v51  ;;  %v58_v1 = vld [vmem:[%s11196_s0 + $0x130] sm:$0xff]  ;;  %v4971_v4 = vpack.c.bf16 %v151_v54, %v149_v53  ;;  %v153_v5 = vadd.f32 %v105_v59, %v57_v57 }
  0x1b   :  { %v104_v2 = vld [vmem:[%s11197_s1 + $0x120] sm:$0xff]  ;;  %v106_v3 = vld [vmem:[%s11197_s1 + $0x130] sm:$0xff]  ;;  %v155_v6 = vadd.f32 %v107_v60, %v59_v58  ;;  %v61_v7 = vld [vmem:[%s11196_s0 + $0x148] sm:$0xff] }
  0x1c   :  { %4962 = vmatpush1.bf16.msra.mxu0 %v4961_v33  ;;  %5004 = vmatpush1.bf16.msra.mxu1 %v4961_v33  ;;  %v165_v8 = vld [vmem:[%s11198_s2 + $0x8] sm:$0xff]  ;;  %v63_v10 = vld [vmem:[%s11196_s0 + $0x158] sm:$0xff]  ;;  %v4973_v13 = vpack.c.bf16 %v150_v0, %v148_v63  ;;  %v152_v14 = vadd.f32 %v104_v2, %v56_v61  ;;  %v154_v15 = vadd.f32 %v106_v3, %v58_v1  ;;  %v60_v16 = vld [vmem:[%s11196_s0 + $0x140] sm:$0xff] }
  0x1d   :  { %4964 = vmatprep.subr.bf16.mxu0 %v4963_v38  ;;  %4993 = vmatprep.subr.bf16.mxu1 %v4963_v38  ;;  %v261_v9 = vld [vmem:[%s11198_s2 + $0x308] sm:$0xff]  ;;  %v111_v12 = vld [vmem:[%s11197_s1 + $0x158] sm:$0xff]  ;;  %v62_v17 = vld [vmem:[%s11196_s0 + $0x150] sm:$0xff]  ;;  %v4975_v18 = vpack.c.bf16 %v155_v6, %v153_v5 }
  0x1e   :  { %v109_v11 = vld [vmem:[%s11197_s1 + $0x148] sm:$0xff]  ;;  %4843 = vmatprep.mubr.msk.f32.mxu0 %vm356_vm0, %v165_v8  ;;  %4891 = vmatprep.mubr.msk.f32.mxu1 %vm356_vm0, %v261_v9  ;;  %v159_v20 = vadd.f32 %v111_v12, %v63_v10  ;;  %v108_v21 = vld [vmem:[%s11197_s1 + $0x140] sm:$0xff]  ;;  %v110_v22 = vld [vmem:[%s11197_s1 + $0x150] sm:$0xff]  ;;  %v4977_v27 = vpack.c.bf16 %v154_v15, %v152_v14 }
  0x1f   :  { %v157_v19 = vadd.f32 %v109_v11, %v61_v7  ;;  %v65_v23 = vld [vmem:[%s11196_s0 + $0x168] sm:$0xff]  ;;  %v67_v24 = vld [vmem:[%s11196_s0 + $0x178] sm:$0xff]  ;;  %v156_v28 = vadd.f32 %v108_v21, %v60_v16  ;;  %v158_v29 = vadd.f32 %v110_v22, %v62_v17  ;;  %v64_v30 = vld [vmem:[%s11196_s0 + $0x160] sm:$0xff] }
  0x20   :  { %4966 = vmatpush1.bf16.msra.mxu0 %v4965_v47  ;;  %5005 = vmatpush1.bf16.msra.mxu1 %v4965_v47  ;;  %v113_v25 = vld [vmem:[%s11197_s1 + $0x168] sm:$0xff]  ;;  %v115_v26 = vld [vmem:[%s11197_s1 + $0x178] sm:$0xff]  ;;  %v66_v34 = vld [vmem:[%s11196_s0 + $0x170] sm:$0xff] }
  0x21   :  { %4968 = vmatprep.subr.bf16.mxu0 %v4967_v52  ;;  %4994 = vmatprep.subr.bf16.mxu1 %v4967_v52  ;;  %v4979_v31 = vpack.c.bf16 %v159_v20, %v157_v19  ;;  %v161_v32 = vadd.f32 %v113_v25, %v65_v23  ;;  %v163_v33 = vadd.f32 %v115_v26, %v67_v24  ;;  %v112_v35 = vld [vmem:[%s11197_s1 + $0x160] sm:$0xff]  ;;  %v114_v36 = vld [vmem:[%s11197_s1 + $0x170] sm:$0xff]  ;;  %v167_v44 = vld [vmem:[%s11198_s2 + $0x18] sm:$0xff] }
  0x22   :  { %v4981_v37 = vpack.c.bf16 %v158_v29, %v156_v28  ;;  %v160_v38 = vadd.f32 %v112_v35, %v64_v30  ;;  %v162_v39 = vadd.f32 %v114_v36, %v66_v34  ;;  %v164_v42 = vld [vmem:[%s11198_s2] sm:$0xff]  ;;  %v263_v45 = vld [vmem:[%s11198_s2 + $0x318] sm:$0xff]  ;;  %v166_v46 = vld [vmem:[%s11198_s2 + $0x10] sm:$0xff] }
  0x23   :  { %v4983_v40 = vpack.c.bf16 %v163_v33, %v161_v32  ;;  %v260_v43 = vld [vmem:[%s11198_s2 + $0x300] sm:$0xff]  ;;  %v262_v47 = vld [vmem:[%s11198_s2 + $0x310] sm:$0xff]  ;;  %v169_v48 = vld [vmem:[%s11198_s2 + $0x28] sm:$0xff] }
  0x24   :  { %4970 = vmatpush1.bf16.msra.mxu0 %v4969_v62  ;;  %5006 = vmatpush1.bf16.msra.mxu1 %v4969_v62  ;;  %v4985_v41 = vpack.c.bf16 %v162_v39, %v160_v38  ;;  %v265_v49 = vld [vmem:[%s11198_s2 + $0x328] sm:$0xff]  ;;  %v168_v50 = vld [vmem:[%s11198_s2 + $0x20] sm:$0xff]  ;;  %v171_v52 = vld [vmem:[%s11198_s2 + $0x38] sm:$0xff] }
  0x25   :  { %4972 = vmatprep.subr.bf16.mxu0 %v4971_v4  ;;  %4995 = vmatprep.subr.bf16.mxu1 %v4971_v4  ;;  %v264_v51 = vld [vmem:[%s11198_s2 + $0x320] sm:$0xff]  ;;  %v267_v53 = vld [vmem:[%s11198_s2 + $0x338] sm:$0xff]  ;;  %v170_v54 = vld [vmem:[%s11198_s2 + $0x30] sm:$0xff] }
  0x26   :  { %v266_v55 = vld [vmem:[%s11198_s2 + $0x330] sm:$0xff]  ;;  %v173_v56 = vld [vmem:[%s11198_s2 + $0x48] sm:$0xff]  ;;  %v172_v58 = vld [vmem:[%s11198_s2 + $0x40] sm:$0xff] }
  0x27   :  { %v269_v57 = vld [vmem:[%s11198_s2 + $0x348] sm:$0xff]  ;;  %v268_v59 = vld [vmem:[%s11198_s2 + $0x340] sm:$0xff]  ;;  %v175_v60 = vld [vmem:[%s11198_s2 + $0x58] sm:$0xff] }
  0x28   :  { %4974 = vmatpush1.bf16.msra.mxu0 %v4973_v13  ;;  %5007 = vmatpush1.bf16.msra.mxu1 %v4973_v13  ;;  %v271_v61 = vld [vmem:[%s11198_s2 + $0x358] sm:$0xff]  ;;  %v174_v62 = vld [vmem:[%s11198_s2 + $0x50] sm:$0xff]  ;;  %v177_v0 = vld [vmem:[%s11198_s2 + $0x68] sm:$0xff] }
  0x29   :  { %4976 = vmatprep.subr.bf16.mxu0 %v4975_v18  ;;  %4996 = vmatprep.subr.bf16.mxu1 %v4975_v18  ;;  %v270_v63 = vld [vmem:[%s11198_s2 + $0x350] sm:$0xff]  ;;  %v273_v1 = vld [vmem:[%s11198_s2 + $0x368] sm:$0xff]  ;;  %v176_v2 = vld [vmem:[%s11198_s2 + $0x60] sm:$0xff] }
  0x2a   :  { %v272_v3 = vld [vmem:[%s11198_s2 + $0x360] sm:$0xff]  ;;  %v179_v4 = vld [vmem:[%s11198_s2 + $0x78] sm:$0xff]  ;;  %v178_v6 = vld [vmem:[%s11198_s2 + $0x70] sm:$0xff] }
  0x2b   :  { %v275_v5 = vld [vmem:[%s11198_s2 + $0x378] sm:$0xff]  ;;  %v274_v7 = vld [vmem:[%s11198_s2 + $0x370] sm:$0xff]  ;;  %v181_v8 = vld [vmem:[%s11198_s2 + $0x88] sm:$0xff] }
  0x2c   :  { %4978 = vmatpush1.bf16.msra.mxu0 %v4977_v27  ;;  %5008 = vmatpush1.bf16.msra.mxu1 %v4977_v27  ;;  %v277_v9 = vld [vmem:[%s11198_s2 + $0x388] sm:$0xff]  ;;  %v180_v10 = vld [vmem:[%s11198_s2 + $0x80] sm:$0xff]  ;;  %v183_v12 = vld [vmem:[%s11198_s2 + $0x98] sm:$0xff] }
  0x2d   :  { %4980 = vmatprep.subr.bf16.mxu0 %v4979_v31  ;;  %4997 = vmatprep.subr.bf16.mxu1 %v4979_v31  ;;  %v276_v11 = vld [vmem:[%s11198_s2 + $0x380] sm:$0xff]  ;;  %v279_v13 = vld [vmem:[%s11198_s2 + $0x398] sm:$0xff]  ;;  %v182_v14 = vld [vmem:[%s11198_s2 + $0x90] sm:$0xff] }
  0x2e   :  { %v278_v15 = vld [vmem:[%s11198_s2 + $0x390] sm:$0xff]  ;;  %v185_v16 = vld [vmem:[%s11198_s2 + $0xa8] sm:$0xff]  ;;  %v184_v18 = vld [vmem:[%s11198_s2 + $0xa0] sm:$0xff] }
  0x2f   :  { %v281_v17 = vld [vmem:[%s11198_s2 + $0x3a8] sm:$0xff]  ;;  %v280_v19 = vld [vmem:[%s11198_s2 + $0x3a0] sm:$0xff]  ;;  %v187_v20 = vld [vmem:[%s11198_s2 + $0xb8] sm:$0xff] }
  0x30   :  { %4982 = vmatpush1.bf16.msra.mxu0 %v4981_v37  ;;  %5009 = vmatpush1.bf16.msra.mxu1 %v4981_v37  ;;  %v283_v21 = vld [vmem:[%s11198_s2 + $0x3b8] sm:$0xff]  ;;  %v186_v22 = vld [vmem:[%s11198_s2 + $0xb0] sm:$0xff]  ;;  %v189_v24 = vld [vmem:[%s11198_s2 + $0xc8] sm:$0xff] }
  0x31   :  { %4984 = vmatprep.subr.bf16.mxu0 %v4983_v40  ;;  %4998 = vmatprep.subr.bf16.mxu1 %v4983_v40  ;;  %v282_v23 = vld [vmem:[%s11198_s2 + $0x3b0] sm:$0xff]  ;;  %v285_v25 = vld [vmem:[%s11198_s2 + $0x3c8] sm:$0xff]  ;;  %v188_v26 = vld [vmem:[%s11198_s2 + $0xc0] sm:$0xff] }
  0x32   :  { %v284_v27 = vld [vmem:[%s11198_s2 + $0x3c0] sm:$0xff]  ;;  %v191_v28 = vld [vmem:[%s11198_s2 + $0xd8] sm:$0xff]  ;;  %v190_v30 = vld [vmem:[%s11198_s2 + $0xd0] sm:$0xff] }
  0x33   :  { %v287_v29 = vld [vmem:[%s11198_s2 + $0x3d8] sm:$0xff]  ;;  %v286_v31 = vld [vmem:[%s11198_s2 + $0x3d0] sm:$0xff]  ;;  %v193_v32 = vld [vmem:[%s11198_s2 + $0xe8] sm:$0xff] }
  0x34   :  { %4986 = vmatpush1.bf16.msra.mxu0 %v4985_v41  ;;  %5010 = vmatpush1.bf16.msra.mxu1 %v4985_v41  ;;  %v289_v33 = vld [vmem:[%s11198_s2 + $0x3e8] sm:$0xff]  ;;  %v192_v34 = vld [vmem:[%s11198_s2 + $0xe0] sm:$0xff]  ;;  %v195_v36 = vld [vmem:[%s11198_s2 + $0xf8] sm:$0xff] }
  0x35   :  { %v288_v35 = vld [vmem:[%s11198_s2 + $0x3e0] sm:$0xff]  ;;  %v291_v37 = vld [vmem:[%s11198_s2 + $0x3f8] sm:$0xff]  ;;  %v194_v38 = vld [vmem:[%s11198_s2 + $0xf0] sm:$0xff] }
  0x36   :  { %v290_v39 = vld [vmem:[%s11198_s2 + $0x3f0] sm:$0xff]  ;;  %v197_v40 = vld [vmem:[%s11198_s2 + $0x108] sm:$0xff] }
  0x37   :  { %710 = vmatmul.mubr.f32.vlgmr.msra.gmra.mrb[0].mxu0 %v164_v42  ;;  %998 = vmatmul.mubr.f32.vlgmr.msra.gmra.mrb[0].mxu1 %v260_v43  ;;  %v293_v41 = vld [vmem:[%s11198_s2 + $0x408] sm:$0xff]  ;;  %v196_v42 = vld [vmem:[%s11198_s2 + $0x100] sm:$0xff] }
  0x38   :  { %4844 = vmatprep.mubr.msk.f32.mxu0 %vm356_vm0, %v167_v44  ;;  %4892 = vmatprep.mubr.msk.f32.mxu1 %vm356_vm0, %v263_v45  ;;  %v292_v43 = vld [vmem:[%s11198_s2 + $0x400] sm:$0xff]  ;;  %v199_v44 = vld [vmem:[%s11198_s2 + $0x118] sm:$0xff] }
  0x39   :  { %v295_v45 = vld [vmem:[%s11198_s2 + $0x418] sm:$0xff] }
  0x3b   :  { %716 = vmatmul.mubr.f32.gmra.mrb[2].mxu0 %v166_v46  ;;  %1004 = vmatmul.mubr.f32.gmra.mrb[2].mxu1 %v262_v47  ;;  %v198_v46 = vld [vmem:[%s11198_s2 + $0x110] sm:$0xff] }
  0x3c   :  { %4845 = vmatprep.mubr.msk.f32.mxu0 %vm356_vm0, %v169_v48  ;;  %4893 = vmatprep.mubr.msk.f32.mxu1 %vm356_vm0, %v265_v49  ;;  %v294_v47 = vld [vmem:[%s11198_s2 + $0x410] sm:$0xff]  ;;  %v201_v48 = vld [vmem:[%s11198_s2 + $0x128] sm:$0xff] }
  0x3d   :  { %v297_v49 = vld [vmem:[%s11198_s2 + $0x428] sm:$0xff] }
  0x3f   :  { %722 = vmatmul.mubr.f32.gmra.mrb[4].mxu0 %v168_v50  ;;  %1010 = vmatmul.mubr.f32.gmra.mrb[4].mxu1 %v264_v51  ;;  %v200_v50 = vld [vmem:[%s11198_s2 + $0x120] sm:$0xff] }
  0x40   :  { %4846 = vmatprep.mubr.msk.f32.mxu0 %vm356_vm0, %v171_v52  ;;  %4894 = vmatprep.mubr.msk.f32.mxu1 %vm356_vm0, %v267_v53  ;;  %v296_v51 = vld [vmem:[%s11198_s2 + $0x420] sm:$0xff]  ;;  %v203_v52 = vld [vmem:[%s11198_s2 + $0x138] sm:$0xff] }
  0x41   :  { %v299_v53 = vld [vmem:[%s11198_s2 + $0x438] sm:$0xff] }
  0x43   :  { %728 = vmatmul.mubr.f32.gmra.mrb[6].mxu0 %v170_v54  ;;  %1016 = vmatmul.mubr.f32.gmra.mrb[6].mxu1 %v266_v55  ;;  %v202_v54 = vld [vmem:[%s11198_s2 + $0x130] sm:$0xff] }
  0x44   :  { %4847 = vmatprep.mubr.msk.f32.mxu0 %vm356_vm0, %v173_v56  ;;  %4895 = vmatprep.mubr.msk.f32.mxu1 %vm356_vm0, %v269_v57  ;;  %v298_v55 = vld [vmem:[%s11198_s2 + $0x430] sm:$0xff]  ;;  %v205_v56 = vld [vmem:[%s11198_s2 + $0x148] sm:$0xff] }
  0x45   :  { %v301_v57 = vld [vmem:[%s11198_s2 + $0x448] sm:$0xff] }
  0x47   :  { %734 = vmatmul.mubr.f32.gmra.mrb[8].mxu0 %v172_v58  ;;  %1022 = vmatmul.mubr.f32.gmra.mrb[8].mxu1 %v268_v59  ;;  %v204_v58 = vld [vmem:[%s11198_s2 + $0x140] sm:$0xff] }
  0x48   :  { %4848 = vmatprep.mubr.msk.f32.mxu0 %vm356_vm0, %v175_v60  ;;  %4896 = vmatprep.mubr.msk.f32.mxu1 %vm356_vm0, %v271_v61  ;;  %v300_v59 = vld [vmem:[%s11198_s2 + $0x440] sm:$0xff]  ;;  %v207_v60 = vld [vmem:[%s11198_s2 + $0x158] sm:$0xff] }
  0x49   :  { %v303_v61 = vld [vmem:[%s11198_s2 + $0x458] sm:$0xff] }
  0x4b   :  { %740 = vmatmul.mubr.f32.gmra.mrb[10].mxu0 %v174_v62  ;;  %1028 = vmatmul.mubr.f32.gmra.mrb[10].mxu1 %v270_v63  ;;  %v206_v62 = vld [vmem:[%s11198_s2 + $0x150] sm:$0xff] }
  0x4c   :  { %4849 = vmatprep.mubr.msk.f32.mxu0 %vm356_vm0, %v177_v0  ;;  %4897 = vmatprep.mubr.msk.f32.mxu1 %vm356_vm0, %v273_v1  ;;  %v302_v63 = vld [vmem:[%s11198_s2 + $0x450] sm:$0xff]  ;;  %v209_v0 = vld [vmem:[%s11198_s2 + $0x168] sm:$0xff] }
  0x4d   :  { %v305_v1 = vld [vmem:[%s11198_s2 + $0x468] sm:$0xff] }
  0x4f   :  { %746 = vmatmul.mubr.f32.gmra.mrb[12].mxu0 %v176_v2  ;;  %1034 = vmatmul.mubr.f32.gmra.mrb[12].mxu1 %v272_v3  ;;  %v208_v2 = vld [vmem:[%s11198_s2 + $0x160] sm:$0xff] }
  0x50   :  { %4850 = vmatprep.mubr.msk.f32.mxu0 %vm356_vm0, %v179_v4  ;;  %4898 = vmatprep.mubr.msk.f32.mxu1 %vm356_vm0, %v275_v5  ;;  %v304_v3 = vld [vmem:[%s11198_s2 + $0x460] sm:$0xff]  ;;  %v211_v4 = vld [vmem:[%s11198_s2 + $0x178] sm:$0xff] }
  0x51   :  { %v307_v5 = vld [vmem:[%s11198_s2 + $0x478] sm:$0xff] }
  0x53   :  { %752 = vmatmul.mubr.f32.gmra.mrb[14].mxu0 %v178_v6  ;;  %1040 = vmatmul.mubr.f32.gmra.mrb[14].mxu1 %v274_v7  ;;  %v210_v6 = vld [vmem:[%s11198_s2 + $0x170] sm:$0xff] }
  0x54   :  { %4851 = vmatprep.mubr.msk.f32.mxu0 %vm356_vm0, %v181_v8  ;;  %4899 = vmatprep.mubr.msk.f32.mxu1 %vm356_vm0, %v277_v9  ;;  %v306_v7 = vld [vmem:[%s11198_s2 + $0x470] sm:$0xff]  ;;  %v213_v8 = vld [vmem:[%s11198_s2 + $0x188] sm:$0xff] }
  0x55   :  { %v309_v9 = vld [vmem:[%s11198_s2 + $0x488] sm:$0xff] }
  0x57   :  { %758 = vmatmul.mubr.f32.gmra.mrb[16].mxu0 %v180_v10  ;;  %1046 = vmatmul.mubr.f32.gmra.mrb[16].mxu1 %v276_v11  ;;  %v212_v10 = vld [vmem:[%s11198_s2 + $0x180] sm:$0xff] }
  0x58   :  { %4852 = vmatprep.mubr.msk.f32.mxu0 %vm356_vm0, %v183_v12  ;;  %4900 = vmatprep.mubr.msk.f32.mxu1 %vm356_vm0, %v279_v13  ;;  %v308_v11 = vld [vmem:[%s11198_s2 + $0x480] sm:$0xff]  ;;  %v215_v12 = vld [vmem:[%s11198_s2 + $0x198] sm:$0xff] }
  0x59   :  { %v311_v13 = vld [vmem:[%s11198_s2 + $0x498] sm:$0xff] }
  0x5b   :  { %764 = vmatmul.mubr.f32.gmra.mrb[18].mxu0 %v182_v14  ;;  %1052 = vmatmul.mubr.f32.gmra.mrb[18].mxu1 %v278_v15  ;;  %v214_v14 = vld [vmem:[%s11198_s2 + $0x190] sm:$0xff] }
  0x5c   :  { %4853 = vmatprep.mubr.msk.f32.mxu0 %vm356_vm0, %v185_v16  ;;  %4901 = vmatprep.mubr.msk.f32.mxu1 %vm356_vm0, %v281_v17  ;;  %v310_v15 = vld [vmem:[%s11198_s2 + $0x490] sm:$0xff]  ;;  %v217_v16 = vld [vmem:[%s11198_s2 + $0x1a8] sm:$0xff] }
  0x5d   :  { %v313_v17 = vld [vmem:[%s11198_s2 + $0x4a8] sm:$0xff] }
  0x5f   :  { %770 = vmatmul.mubr.f32.gmra.mrb[20].mxu0 %v184_v18  ;;  %1058 = vmatmul.mubr.f32.gmra.mrb[20].mxu1 %v280_v19  ;;  %v216_v18 = vld [vmem:[%s11198_s2 + $0x1a0] sm:$0xff] }
  0x60   :  { %4854 = vmatprep.mubr.msk.f32.mxu0 %vm356_vm0, %v187_v20  ;;  %4902 = vmatprep.mubr.msk.f32.mxu1 %vm356_vm0, %v283_v21  ;;  %v312_v19 = vld [vmem:[%s11198_s2 + $0x4a0] sm:$0xff]  ;;  %v219_v20 = vld [vmem:[%s11198_s2 + $0x1b8] sm:$0xff] }
  0x61   :  { %v315_v21 = vld [vmem:[%s11198_s2 + $0x4b8] sm:$0xff] }
  0x63   :  { %776 = vmatmul.mubr.f32.gmra.mrb[22].mxu0 %v186_v22  ;;  %1064 = vmatmul.mubr.f32.gmra.mrb[22].mxu1 %v282_v23  ;;  %v218_v22 = vld [vmem:[%s11198_s2 + $0x1b0] sm:$0xff] }
  0x64   :  { %4855 = vmatprep.mubr.msk.f32.mxu0 %vm356_vm0, %v189_v24  ;;  %4903 = vmatprep.mubr.msk.f32.mxu1 %vm356_vm0, %v285_v25  ;;  %v314_v23 = vld [vmem:[%s11198_s2 + $0x4b0] sm:$0xff]  ;;  %v221_v24 = vld [vmem:[%s11198_s2 + $0x1c8] sm:$0xff] }
  0x65   :  { %v317_v25 = vld [vmem:[%s11198_s2 + $0x4c8] sm:$0xff] }
  0x67   :  { %782 = vmatmul.mubr.f32.gmra.mrb[24].mxu0 %v188_v26  ;;  %1070 = vmatmul.mubr.f32.gmra.mrb[24].mxu1 %v284_v27  ;;  %v220_v26 = vld [vmem:[%s11198_s2 + $0x1c0] sm:$0xff] }
  0x68   :  { %4856 = vmatprep.mubr.msk.f32.mxu0 %vm356_vm0, %v191_v28  ;;  %4904 = vmatprep.mubr.msk.f32.mxu1 %vm356_vm0, %v287_v29  ;;  %v316_v27 = vld [vmem:[%s11198_s2 + $0x4c0] sm:$0xff]  ;;  %v223_v28 = vld [vmem:[%s11198_s2 + $0x1d8] sm:$0xff] }
  0x69   :  { %v319_v29 = vld [vmem:[%s11198_s2 + $0x4d8] sm:$0xff] }
  0x6b   :  { %788 = vmatmul.mubr.f32.gmra.mrb[26].mxu0 %v190_v30  ;;  %1076 = vmatmul.mubr.f32.gmra.mrb[26].mxu1 %v286_v31  ;;  %v222_v30 = vld [vmem:[%s11198_s2 + $0x1d0] sm:$0xff] }
  0x6c   :  { %4857 = vmatprep.mubr.msk.f32.mxu0 %vm356_vm0, %v193_v32  ;;  %4905 = vmatprep.mubr.msk.f32.mxu1 %vm356_vm0, %v289_v33  ;;  %v318_v31 = vld [vmem:[%s11198_s2 + $0x4d0] sm:$0xff]  ;;  %v225_v32 = vld [vmem:[%s11198_s2 + $0x1e8] sm:$0xff] }
  0x6d   :  { %v321_v33 = vld [vmem:[%s11198_s2 + $0x4e8] sm:$0xff] }
  0x6f   :  { %794 = vmatmul.mubr.f32.gmra.mrb[28].mxu0 %v192_v34  ;;  %1082 = vmatmul.mubr.f32.gmra.mrb[28].mxu1 %v288_v35  ;;  %v224_v34 = vld [vmem:[%s11198_s2 + $0x1e0] sm:$0xff] }
  0x70   :  { %4858 = vmatprep.mubr.msk.f32.mxu0 %vm356_vm0, %v195_v36  ;;  %4906 = vmatprep.mubr.msk.f32.mxu1 %vm356_vm0, %v291_v37  ;;  %v320_v35 = vld [vmem:[%s11198_s2 + $0x4e0] sm:$0xff]  ;;  %v227_v36 = vld [vmem:[%s11198_s2 + $0x1f8] sm:$0xff] }
  0x71   :  { %v323_v37 = vld [vmem:[%s11198_s2 + $0x4f8] sm:$0xff] }
  0x73   :  { %800 = vmatmul.mubr.f32.gmra.mrb[30].mxu0 %v194_v38  ;;  %1088 = vmatmul.mubr.f32.gmra.mrb[30].mxu1 %v290_v39  ;;  %v226_v38 = vld [vmem:[%s11198_s2 + $0x1f0] sm:$0xff] }
  0x74   :  { %4859 = vmatprep.mubr.msk.f32.mxu0 %vm356_vm0, %v197_v40  ;;  %4907 = vmatprep.mubr.msk.f32.mxu1 %vm356_vm0, %v293_v41  ;;  %v322_v39 = vld [vmem:[%s11198_s2 + $0x4f0] sm:$0xff]  ;;  %v229_v40 = vld [vmem:[%s11198_s2 + $0x208] sm:$0xff]  ;;  %v228_v41 = vld [vmem:[%s11198_s2 + $0x200] sm:$0xff] }
  0x77   :  { %806 = vmatmul.mubr.f32.gmra.mrb[32].mxu0 %v196_v42  ;;  %1094 = vmatmul.mubr.f32.gmra.mrb[32].mxu1 %v292_v43  ;;  %v231_v42 = vld [vmem:[%s11198_s2 + $0x218] sm:$0xff]  ;;  %v325_v43 = vld [vmem:[%s11198_s2 + $0x508] sm:$0xff] }
  0x78   :  { %4860 = vmatprep.mubr.msk.f32.mxu0 %vm356_vm0, %v199_v44  ;;  %4908 = vmatprep.mubr.msk.f32.mxu1 %vm356_vm0, %v295_v45  ;;  %v230_v44 = vld [vmem:[%s11198_s2 + $0x210] sm:$0xff]  ;;  %v324_v45 = vld [vmem:[%s11198_s2 + $0x500] sm:$0xff] }
  0x7b   :  { %812 = vmatmul.mubr.f32.gmra.mrb[34].mxu0 %v198_v46  ;;  %1100 = vmatmul.mubr.f32.gmra.mrb[34].mxu1 %v294_v47  ;;  %v327_v46 = vld [vmem:[%s11198_s2 + $0x518] sm:$0xff]  ;;  %v326_v47 = vld [vmem:[%s11198_s2 + $0x510] sm:$0xff] }
  0x7c   :  { %4861 = vmatprep.mubr.msk.f32.mxu0 %vm356_vm0, %v201_v48  ;;  %4909 = vmatprep.mubr.msk.f32.mxu1 %vm356_vm0, %v297_v49  ;;  %v233_v48 = vld [vmem:[%s11198_s2 + $0x228] sm:$0xff]  ;;  %v232_v49 = vld [vmem:[%s11198_s2 + $0x220] sm:$0xff] }
  0x7f   :  { %818 = vmatmul.mubr.f32.gmra.mrb[36].mxu0 %v200_v50  ;;  %1106 = vmatmul.mubr.f32.gmra.mrb[36].mxu1 %v296_v51  ;;  %v235_v50 = vld [vmem:[%s11198_s2 + $0x238] sm:$0xff]  ;;  %v329_v51 = vld [vmem:[%s11198_s2 + $0x528] sm:$0xff] }
  0x80   :  { %4862 = vmatprep.mubr.msk.f32.mxu0 %vm356_vm0, %v203_v52  ;;  %4910 = vmatprep.mubr.msk.f32.mxu1 %vm356_vm0, %v299_v53  ;;  %v234_v52 = vld [vmem:[%s11198_s2 + $0x230] sm:$0xff]  ;;  %v328_v53 = vld [vmem:[%s11198_s2 + $0x520] sm:$0xff] }
  0x83   :  { %824 = vmatmul.mubr.f32.gmra.mrb[38].mxu0 %v202_v54  ;;  %1112 = vmatmul.mubr.f32.gmra.mrb[38].mxu1 %v298_v55  ;;  %v331_v54 = vld [vmem:[%s11198_s2 + $0x538] sm:$0xff]  ;;  %v330_v55 = vld [vmem:[%s11198_s2 + $0x530] sm:$0xff] }
  0x84   :  { %4863 = vmatprep.mubr.msk.f32.mxu0 %vm356_vm0, %v205_v56  ;;  %4911 = vmatprep.mubr.msk.f32.mxu1 %vm356_vm0, %v301_v57  ;;  %v237_v56 = vld [vmem:[%s11198_s2 + $0x248] sm:$0xff]  ;;  %v236_v57 = vld [vmem:[%s11198_s2 + $0x240] sm:$0xff] }
  0x87   :  { %830 = vmatmul.mubr.f32.gmra.mrb[40].mxu0 %v204_v58  ;;  %1118 = vmatmul.mubr.f32.gmra.mrb[40].mxu1 %v300_v59  ;;  %v239_v58 = vld [vmem:[%s11198_s2 + $0x258] sm:$0xff]  ;;  %v333_v59 = vld [vmem:[%s11198_s2 + $0x548] sm:$0xff] }
  0x88   :  { %4864 = vmatprep.mubr.msk.f32.mxu0 %vm356_vm0, %v207_v60  ;;  %4912 = vmatprep.mubr.msk.f32.mxu1 %vm356_vm0, %v303_v61  ;;  %v238_v60 = vld [vmem:[%s11198_s2 + $0x250] sm:$0xff]  ;;  %v332_v61 = vld [vmem:[%s11198_s2 + $0x540] sm:$0xff] }
  0x8b   :  { %836 = vmatmul.mubr.f32.gmra.mrb[42].mxu0 %v206_v62  ;;  %1124 = vmatmul.mubr.f32.gmra.mrb[42].mxu1 %v302_v63  ;;  %v335_v62 = vld [vmem:[%s11198_s2 + $0x558] sm:$0xff]  ;;  %v334_v63 = vld [vmem:[%s11198_s2 + $0x550] sm:$0xff] }
  0x8c   :  { %4865 = vmatprep.mubr.msk.f32.mxu0 %vm356_vm0, %v209_v0  ;;  %4913 = vmatprep.mubr.msk.f32.mxu1 %vm356_vm0, %v305_v1  ;;  %v241_v0 = vld [vmem:[%s11198_s2 + $0x268] sm:$0xff]  ;;  %v240_v1 = vld [vmem:[%s11198_s2 + $0x260] sm:$0xff] }
  0x8f   :  { %842 = vmatmul.mubr.f32.gmra.mrb[44].mxu0 %v208_v2  ;;  %1130 = vmatmul.mubr.f32.gmra.mrb[44].mxu1 %v304_v3  ;;  %v243_v2 = vld [vmem:[%s11198_s2 + $0x278] sm:$0xff]  ;;  %v337_v3 = vld [vmem:[%s11198_s2 + $0x568] sm:$0xff] }
  0x90   :  { %4866 = vmatprep.mubr.msk.f32.mxu0 %vm356_vm0, %v211_v4  ;;  %4914 = vmatprep.mubr.msk.f32.mxu1 %vm356_vm0, %v307_v5  ;;  %v242_v4 = vld [vmem:[%s11198_s2 + $0x270] sm:$0xff]  ;;  %v336_v5 = vld [vmem:[%s11198_s2 + $0x560] sm:$0xff] }
  0x93   :  { %848 = vmatmul.mubr.f32.gmra.mrb[46].mxu0 %v210_v6  ;;  %1136 = vmatmul.mubr.f32.gmra.mrb[46].mxu1 %v306_v7  ;;  %v339_v6 = vld [vmem:[%s11198_s2 + $0x578] sm:$0xff]  ;;  %v338_v7 = vld [vmem:[%s11198_s2 + $0x570] sm:$0xff] }
  0x94   :  { %4867 = vmatprep.mubr.msk.f32.mxu0 %vm356_vm0, %v213_v8  ;;  %4915 = vmatprep.mubr.msk.f32.mxu1 %vm356_vm0, %v309_v9  ;;  %v245_v8 = vld [vmem:[%s11198_s2 + $0x288] sm:$0xff]  ;;  %v244_v9 = vld [vmem:[%s11198_s2 + $0x280] sm:$0xff] }
  0x97   :  { %854 = vmatmul.mubr.f32.gmra.mrb[48].mxu0 %v212_v10  ;;  %1142 = vmatmul.mubr.f32.gmra.mrb[48].mxu1 %v308_v11  ;;  %v341_v10 = vld [vmem:[%s11198_s2 + $0x588] sm:$0xff]  ;;  %v340_v11 = vld [vmem:[%s11198_s2 + $0x580] sm:$0xff] }
  0x98   :  { %4868 = vmatprep.mubr.msk.f32.mxu0 %vm356_vm0, %v215_v12  ;;  %4916 = vmatprep.mubr.msk.f32.mxu1 %vm356_vm0, %v311_v13 }
  0x9b   :  { %860 = vmatmul.mubr.f32.gmra.mrb[50].mxu0 %v214_v14  ;;  %1148 = vmatmul.mubr.f32.gmra.mrb[50].mxu1 %v310_v15 }
  0x9c   :  { %4869 = vmatprep.mubr.msk.f32.mxu0 %vm356_vm0, %v217_v16  ;;  %4917 = vmatprep.mubr.msk.f32.mxu1 %vm356_vm0, %v313_v17 }
  0x9f   :  { %866 = vmatmul.mubr.f32.gmra.mrb[52].mxu0 %v216_v18  ;;  %1154 = vmatmul.mubr.f32.gmra.mrb[52].mxu1 %v312_v19 }
  0xa0   :  { %4870 = vmatprep.mubr.msk.f32.mxu0 %vm356_vm0, %v219_v20  ;;  %4918 = vmatprep.mubr.msk.f32.mxu1 %vm356_vm0, %v315_v21 }
  0xa3   :  { %872 = vmatmul.mubr.f32.gmra.mrb[54].mxu0 %v218_v22  ;;  %1160 = vmatmul.mubr.f32.gmra.mrb[54].mxu1 %v314_v23 }
  0xa4   :  { %4871 = vmatprep.mubr.msk.f32.mxu0 %vm356_vm0, %v221_v24  ;;  %4919 = vmatprep.mubr.msk.f32.mxu1 %vm356_vm0, %v317_v25 }
  0xa7   :  { %878 = vmatmul.mubr.f32.gmra.mrb[56].mxu0 %v220_v26  ;;  %1166 = vmatmul.mubr.f32.gmra.mrb[56].mxu1 %v316_v27 }
  0xa8   :  { %4872 = vmatprep.mubr.msk.f32.mxu0 %vm356_vm0, %v223_v28  ;;  %4920 = vmatprep.mubr.msk.f32.mxu1 %vm356_vm0, %v319_v29 }
  0xab   :  { %884 = vmatmul.mubr.f32.gmra.mrb[58].mxu0 %v222_v30  ;;  %1172 = vmatmul.mubr.f32.gmra.mrb[58].mxu1 %v318_v31 }
  0xac   :  { %4873 = vmatprep.mubr.msk.f32.mxu0 %vm356_vm0, %v225_v32  ;;  %4921 = vmatprep.mubr.msk.f32.mxu1 %vm356_vm0, %v321_v33 }
  0xaf   :  { %890 = vmatmul.mubr.f32.gmra.mrb[60].mxu0 %v224_v34  ;;  %1178 = vmatmul.mubr.f32.gmra.mrb[60].mxu1 %v320_v35 }
  0xb0   :  { %4874 = vmatprep.mubr.msk.f32.mxu0 %vm356_vm0, %v227_v36  ;;  %4922 = vmatprep.mubr.msk.f32.mxu1 %vm356_vm0, %v323_v37 }
  0xb3   :  { %896 = vmatmul.mubr.f32.gmra.mrb[62].mxu0 %v226_v38  ;;  %1184 = vmatmul.mubr.f32.gmra.mrb[62].mxu1 %v322_v39 }
  0xb4   :  { %4875 = vmatprep.mubr.msk.f32.mxu0 %vm356_vm0, %v229_v40  ;;  %4923 = vmatprep.mubr.msk.f32.mxu1 %vm356_vm0, %v325_v43 }
  0xb7   :  { %902 = vmatmul.mubr.f32.gmra.mrb[64].mxu0 %v228_v41  ;;  %1190 = vmatmul.mubr.f32.gmra.mrb[64].mxu1 %v324_v45 }
  0xb8   :  { %4876 = vmatprep.mubr.msk.f32.mxu0 %vm356_vm0, %v231_v42  ;;  %4924 = vmatprep.mubr.msk.f32.mxu1 %vm356_vm0, %v327_v46 }
  0xbb   :  { %908 = vmatmul.mubr.f32.gmra.mrb[66].mxu0 %v230_v44  ;;  %1196 = vmatmul.mubr.f32.gmra.mrb[66].mxu1 %v326_v47 }
  0xbc   :  { %4877 = vmatprep.mubr.msk.f32.mxu0 %vm356_vm0, %v233_v48  ;;  %4925 = vmatprep.mubr.msk.f32.mxu1 %vm356_vm0, %v329_v51 }
  0xbf   :  { %914 = vmatmul.mubr.f32.gmra.mrb[68].mxu0 %v232_v49  ;;  %1202 = vmatmul.mubr.f32.gmra.mrb[68].mxu1 %v328_v53 }
  0xc0   :  { %4878 = vmatprep.mubr.msk.f32.mxu0 %vm356_vm0, %v235_v50  ;;  %4926 = vmatprep.mubr.msk.f32.mxu1 %vm356_vm0, %v331_v54 }
  0xc3   :  { %920 = vmatmul.mubr.f32.gmra.mrb[70].mxu0 %v234_v52  ;;  %1208 = vmatmul.mubr.f32.gmra.mrb[70].mxu1 %v330_v55 }
  0xc4   :  { %4879 = vmatprep.mubr.msk.f32.mxu0 %vm356_vm0, %v237_v56  ;;  %4927 = vmatprep.mubr.msk.f32.mxu1 %vm356_vm0, %v333_v59 }
  0xc7   :  { %926 = vmatmul.mubr.f32.gmra.mrb[72].mxu0 %v236_v57  ;;  %1214 = vmatmul.mubr.f32.gmra.mrb[72].mxu1 %v332_v61 }
  0xc8   :  { %4880 = vmatprep.mubr.msk.f32.mxu0 %vm356_vm0, %v239_v58  ;;  %4928 = vmatprep.mubr.msk.f32.mxu1 %vm356_vm0, %v335_v62 }
  0xcb   :  { %932 = vmatmul.mubr.f32.gmra.mrb[74].mxu0 %v238_v60  ;;  %1220 = vmatmul.mubr.f32.gmra.mrb[74].mxu1 %v334_v63 }
  0xcc   :  { %4881 = vmatprep.mubr.msk.f32.mxu0 %vm356_vm0, %v241_v0  ;;  %4929 = vmatprep.mubr.msk.f32.mxu1 %vm356_vm0, %v337_v3 }
  0xcf   :  { %938 = vmatmul.mubr.f32.gmra.mrb[76].mxu0 %v240_v1  ;;  %1226 = vmatmul.mubr.f32.gmra.mrb[76].mxu1 %v336_v5 }
  0xd0   :  { %4882 = vmatprep.mubr.msk.f32.mxu0 %vm356_vm0, %v243_v2  ;;  %4930 = vmatprep.mubr.msk.f32.mxu1 %vm356_vm0, %v339_v6 }
  0xd3   :  { %944 = vmatmul.mubr.f32.gmra.mrb[78].mxu0 %v242_v4  ;;  %1232 = vmatmul.mubr.f32.gmra.mrb[78].mxu1 %v338_v7 }
  0xd4   :  { %4883 = vmatprep.mubr.msk.f32.mxu0 %vm356_vm0, %v245_v8  ;;  %4931 = vmatprep.mubr.msk.f32.mxu1 %vm356_vm0, %v341_v10 }
  0xd7   :  { %950 = vmatmul.mubr.f32.gmra.mrb[80].mxu0 %v244_v9  ;;  %1238 = vmatmul.mubr.f32.gmra.mrb[80].mxu1 %v340_v11 }
 0x10a   :  { %v6099_v12 = vpop.f32.mrb[0].mxu0  ;;  %v6101_v13 = vpop.f32.mrb[0].mxu1 }
 0x10b   :  { %11603 = vst [vmem:[#allocation2_spill] sm:$0xff] %v6099_v12  ;;  %11604 = vst [vmem:[#allocation3_spill] sm:$0xff] %v6101_v13  ;;  %v6103_v14 = vpop.f32.mrb[1].mxu0  ;;  %v6105_v15 = vpop.f32.mrb[1].mxu1  ;;  %v1671_v16 = vmul.f32 %v6099_v12, %v6099_v12  ;;  %v1767_v23 = vmul.f32 %v6101_v13, %v6101_v13 }
 0x10c   :  { %11605 = vst [vmem:[#allocation4_spill] sm:$0xff] %v6103_v14  ;;  %11606 = vst [vmem:[#allocation5_spill] sm:$0xff] %v6105_v15  ;;  %v1672_v17 = vmul.f32 %v6103_v14, %v6103_v14  ;;  %v1768_v18 = vmul.f32 %v6105_v15, %v6105_v15  ;;  %v1287_v19 = vsel %vm1286_vm1, %v6103_v14, 0.0  ;;  %v1479_v20 = vsel %vm1286_vm1, %v6105_v15, 0.0 }
 0x10d   :  { %v1288_v21 = vadd.f32 %v1287_v19, %v6099_v12  ;;  %v1480_v22 = vadd.f32 %v1479_v20, %v6101_v13 }
 0x10e   :  { %v6121_v24 = vpop.f32.mrb[2].mxu0  ;;  %v6123_v25 = vpop.f32.mrb[2].mxu1  ;;  %v1863_v26 = vsel %vm1286_vm1, %v1672_v17, 0.0  ;;  %v2055_v27 = vsel %vm1286_vm1, %v1768_v18, 0.0 }
 0x10f   :  { %11607 = vst [vmem:[#allocation6_spill] sm:$0xff] %v6121_v24  ;;  %11608 = vst [vmem:[#allocation7_spill] sm:$0xff] %v6123_v25  ;;  %v6127_v28 = vpop.f32.mrb[3].mxu1  ;;  %1289 = vadd.xlane.f32.xlu0 %v1288_v21  ;;  %v6129_v29 = vpop.f32.mrb[3].mxu0  ;;  %v1864_v30 = vadd.f32 %v1863_v26, %v1671_v16  ;;  %v1673_v31 = vmul.f32 %v6121_v24, %v6121_v24  ;;  %v2056_v32 = vadd.f32 %v2055_v27, %v1767_v23 }
 0x110   :  { %11609 = vst [vmem:[#allocation8_spill] sm:$0xff] %v6127_v28  ;;  %11610 = vst [vmem:[#allocation9_spill] sm:$0xff] %v6129_v29  ;;  %v1770_v33 = vmul.f32 %v6127_v28, %v6127_v28  ;;  %v1674_v34 = vmul.f32 %v6129_v29, %v6129_v29  ;;  %v1483_v35 = vsel %vm1286_vm1, %v6127_v28, 0.0  ;;  %v1291_v36 = vsel %vm1286_vm1, %v6129_v29, 0.0 }
 0x111   :  { %v1484_v37 = vadd.f32 %v1483_v35, %v6123_v25  ;;  %v1769_v38 = vmul.f32 %v6123_v25, %v6123_v25  ;;  %v1292_v39 = vadd.f32 %v1291_v36, %v6121_v24 }
 0x112   :  { %v1867_v40 = vsel %vm1286_vm1, %v1674_v34, 0.0  ;;  %v6146_v41 = vpop.f32.mrb[4].mxu0  ;;  %v2059_v42 = vsel %vm1286_vm1, %v1770_v33, 0.0  ;;  %v6149_v43 = vpop.f32.mrb[4].mxu1 }
 0x113   :  { %11611 = vst [vmem:[#allocation10_spill] sm:$0xff] %v6146_v41  ;;  %11612 = vst [vmem:[#allocation11_spill] sm:$0xff] %v6149_v43  ;;  %1485 = vadd.xlane.f32.xlu1 %v1484_v37  ;;  %1481 = vadd.xlane.f32.xlu0 %v1480_v22  ;;  %v1868_v44 = vadd.f32 %v1867_v40, %v1673_v31  ;;  %v6151_v45 = vpop.f32.mrb[5].mxu0  ;;  %v2060_v46 = vadd.f32 %v2059_v42, %v1769_v38  ;;  %v6153_v47 = vpop.f32.mrb[5].mxu1 }
 0x114   :  { %11613 = vst [vmem:[#allocation12_spill] sm:$0xff] %v6151_v45  ;;  %11614 = vst [vmem:[#allocation13_spill] sm:$0xff] %v6153_v47  ;;  %v1675_v48 = vmul.f32 %v6146_v41, %v6146_v41  ;;  %v1676_v49 = vmul.f32 %v6151_v45, %v6151_v45  ;;  %v1772_v50 = vmul.f32 %v6153_v47, %v6153_v47  ;;  %v1295_v51 = vsel %vm1286_vm1, %v6151_v45, 0.0 }
 0x115   :  { %v1487_v52 = vsel %vm1286_vm1, %v6153_v47, 0.0  ;;  %v1296_v53 = vadd.f32 %v1295_v51, %v6146_v41  ;;  %v1771_v55 = vmul.f32 %v6149_v43, %v6149_v43 }
 0x116   :  { %v1488_v54 = vadd.f32 %v1487_v52, %v6149_v43  ;;  %v6169_v56 = vpop.f32.mrb[6].mxu0  ;;  %v6171_v57 = vpop.f32.mrb[6].mxu1  ;;  %v1871_v58 = vsel %vm1286_vm1, %v1676_v49, 0.0  ;;  %v2063_v59 = vsel %vm1286_vm1, %v1772_v50, 0.0 }
 0x117   :  { %11615 = vst [vmem:[#allocation14_spill] sm:$0xff] %v6169_v56  ;;  %11616 = vst [vmem:[#allocation15_spill] sm:$0xff] %v6171_v57  ;;  %1865 = vadd.xlane.f32.xlu0 %v1864_v30  ;;  %1869 = vadd.xlane.f32.xlu1 %v1868_v44  ;;  %v6175_v60 = vpop.f32.mrb[7].mxu0  ;;  %v6177_v61 = vpop.f32.mrb[7].mxu1  ;;  %v6179_v62 = vadd.f32 %v1871_v58, %v1675_v48  ;;  %v6181_v63 = vadd.f32 %v2063_v59, %v1771_v55 }
 0x118   :  { %11617 = vst [vmem:[#allocation16_spill] sm:$0xff] %v6175_v60  ;;  %11618 = vst [vmem:[#allocation17_spill] sm:$0xff] %v6177_v61  ;;  %v1677_v0 = vmul.f32 %v6169_v56, %v6169_v56  ;;  %v1678_v1 = vmul.f32 %v6175_v60, %v6175_v60  ;;  %v1774_v2 = vmul.f32 %v6177_v61, %v6177_v61  ;;  %v1299_v3 = vsel %vm1286_vm1, %v6175_v60, 0.0 }
 0x119   :  { %v1491_v4 = vsel %vm1286_vm1, %v6177_v61, 0.0  ;;  %v1300_v5 = vadd.f32 %v1299_v3, %v6169_v56  ;;  %v1773_v7 = vmul.f32 %v6171_v57, %v6171_v57 }
 0x11a   :  { %v1492_v6 = vadd.f32 %v1491_v4, %v6171_v57  ;;  %v6197_v8 = vpop.f32.mrb[8].mxu0  ;;  %v1875_v9 = vsel %vm1286_vm1, %v1678_v1, 0.0  ;;  %v6200_v10 = vpop.f32.mrb[8].mxu1  ;;  %v2067_v11 = vsel %vm1286_vm1, %v1774_v2, 0.0 }
 0x11b   :  { %11619 = vst [vmem:[#allocation18_spill] sm:$0xff] %v6197_v8  ;;  %11620 = vst [vmem:[#allocation19_spill] sm:$0xff] %v6200_v10  ;;  %2057 = vadd.xlane.f32.xlu0 %v2056_v32  ;;  %2061 = vadd.xlane.f32.xlu1 %v2060_v46  ;;  %v6203_v16 = vpop.f32.mrb[9].mxu0  ;;  %v6205_v17 = vadd.f32 %v1875_v9, %v1677_v0  ;;  %v6207_v18 = vpop.f32.mrb[9].mxu1  ;;  %v6209_v19 = vadd.f32 %v2067_v11, %v1773_v7 }
 0x11c   :  { %11621 = vst [vmem:[#allocation20_spill] sm:$0xff] %v6203_v16  ;;  %11622 = vst [vmem:[#allocation21_spill] sm:$0xff] %v6207_v18  ;;  %v1679_v20 = vmul.f32 %v6197_v8, %v6197_v8  ;;  %v1680_v21 = vmul.f32 %v6203_v16, %v6203_v16  ;;  %v1776_v22 = vmul.f32 %v6207_v18, %v6207_v18  ;;  %v1303_v23 = vsel %vm1286_vm1, %v6203_v16, 0.0 }
 0x11d   :  { %v1495_v26 = vsel %vm1286_vm1, %v6207_v18, 0.0  ;;  %v6222_v27 = vadd.f32 %v1303_v23, %v6197_v8  ;;  %v1775_v31 = vmul.f32 %v6200_v10, %v6200_v10 }
 0x11e   :  { %v6225_v30 = vadd.f32 %v1495_v26, %v6200_v10  ;;  %v6229_v32 = vpop.f32.mrb[10].mxu0  ;;  %v6231_v33 = vpop.f32.mrb[10].mxu1  ;;  %v1879_v34 = vsel %vm1286_vm1, %v1680_v21, 0.0  ;;  %v2071_v35 = vsel %vm1286_vm1, %v1776_v22, 0.0 }
 0x11f   :  { %11623 = vst [vmem:[#allocation22_spill] sm:$0xff] %v6229_v32  ;;  %11624 = vst [vmem:[#allocation23_spill] sm:$0xff] %v6231_v33  ;;  %1293 = vadd.xlane.f32.xlu0 %v1292_v39  ;;  %1297 = vadd.xlane.f32.xlu1 %v1296_v53  ;;  %v6235_v36 = vpop.f32.mrb[11].mxu0  ;;  %v6237_v37 = vpop.f32.mrb[11].mxu1  ;;  %v6239_v38 = vadd.f32 %v1879_v34, %v1679_v20  ;;  %v6241_v40 = vadd.f32 %v2071_v35, %v1775_v31 }
 0x120   :  { %11625 = vst [vmem:[#allocation24_spill] sm:$0xff] %v6235_v36  ;;  %11626 = vst [vmem:[#allocation25_spill] sm:$0xff] %v6237_v37  ;;  %v1681_v42 = vmul.f32 %v6229_v32, %v6229_v32  ;;  %v1682_v44 = vmul.f32 %v6235_v36, %v6235_v36  ;;  %v1778_v46 = vmul.f32 %v6237_v37, %v6237_v37  ;;  %v1307_v39 = vsel %vm1286_vm1, %v6235_v36, 0.0 }
 0x121   :  { %v1499_v48 = vsel %vm1286_vm1, %v6237_v37, 0.0  ;;  %v6254_v49 = vadd.f32 %v1307_v39, %v6229_v32  ;;  %v1777_v51 = vmul.f32 %v6231_v33, %v6231_v33 }
 0x122   :  { %v6257_v50 = vadd.f32 %v1499_v48, %v6231_v33  ;;  %v6261_v52 = vpop.f32.mrb[12].mxu0  ;;  %v1883_v53 = vsel %vm1286_vm1, %v1682_v44, 0.0  ;;  %v6264_v55 = vpop.f32.mrb[12].mxu1  ;;  %v2075_v58 = vsel %vm1286_vm1, %v1778_v46, 0.0 }
 0x123   :  { %11627 = vst [vmem:[#allocation26_spill] sm:$0xff] %v6261_v52  ;;  %11628 = vst [vmem:[#allocation27_spill] sm:$0xff] %v6264_v55  ;;  %1489 = vadd.xlane.f32.xlu0 %v1488_v54  ;;  %1301 = vadd.xlane.f32.xlu1 %v1300_v5  ;;  %v6267_v59 = vpop.f32.mrb[13].mxu0  ;;  %v6269_v0 = vadd.f32 %v1883_v53, %v1681_v42  ;;  %v6271_v1 = vpop.f32.mrb[13].mxu1  ;;  %v6273_v2 = vadd.f32 %v2075_v58, %v1777_v51  ;;  %v247_v58 = vld [vmem:[%s11198_s2 + $0x298] sm:$0xff] }
 0x124   :  { %11629 = vst [vmem:[#allocation28_spill] sm:$0xff] %v6267_v59  ;;  %11630 = vst [vmem:[#allocation29_spill] sm:$0xff] %v6271_v1  ;;  %v1683_v3 = vmul.f32 %v6261_v52, %v6261_v52  ;;  %v1684_v4 = vmul.f32 %v6267_v59, %v6267_v59  ;;  %v1780_v7 = vmul.f32 %v6271_v1, %v6271_v1  ;;  %v1311_v54 = vsel %vm1286_vm1, %v6267_v59, 0.0 }
 0x125   :  { %v1503_v5 = vsel %vm1286_vm1, %v6271_v1, 0.0  ;;  %v6286_v9 = vadd.f32 %v1311_v54, %v6261_v52  ;;  %v1779_v20 = vmul.f32 %v6264_v55, %v6264_v55  ;;  %4884 = vmatprep.mubr.msk.f32.mxu0 %vm356_vm0, %v247_v58 }
 0x126   :  { %v6289_v11 = vadd.f32 %v1503_v5, %v6264_v55  ;;  %v6293_v21 = vpop.f32.mrb[14].mxu0  ;;  %v6295_v22 = vpop.f32.mrb[14].mxu1  ;;  %v1887_v23 = vsel %vm1286_vm1, %v1684_v4, 0.0  ;;  %v2079_v26 = vsel %vm1286_vm1, %v1780_v7, 0.0  ;;  %v246_v5 = vld [vmem:[%s11198_s2 + $0x290] sm:$0xff] }
 0x127   :  { %11631 = vst [vmem:[#allocation30_spill] sm:$0xff] %v6293_v21  ;;  %11632 = vst [vmem:[#allocation31_spill] sm:$0xff] %v6295_v22  ;;  %1873 = vadd.xlane.f32.xlu0 %v6179_v62  ;;  %1493 = vadd.xlane.f32.xlu1 %v1492_v6  ;;  %v6300_v31 = vpop.f32.mrb[15].mxu0  ;;  %v6302_v34 = vpop.f32.mrb[15].mxu1  ;;  %v6304_v35 = vadd.f32 %v1887_v23, %v1683_v3  ;;  %v6306_v42 = vadd.f32 %v2079_v26, %v1779_v20 }
 0x128   :  { %11633 = vst [vmem:[#allocation32_spill] sm:$0xff] %v6300_v31  ;;  %11634 = vst [vmem:[#allocation33_spill] sm:$0xff] %v6302_v34  ;;  %v1685_v44 = vmul.f32 %v6293_v21, %v6293_v21  ;;  %v1686_v46 = vmul.f32 %v6300_v31, %v6300_v31  ;;  %v1782_v39 = vmul.f32 %v6302_v34, %v6302_v34  ;;  %v1315_v62 = vsel %vm1286_vm1, %v6300_v31, 0.0 }
 0x129   :  { %v1507_v6 = vsel %vm1286_vm1, %v6302_v34, 0.0  ;;  %v6319_v48 = vadd.f32 %v1315_v62, %v6293_v21  ;;  %v1781_v53 = vmul.f32 %v6295_v22, %v6295_v22  ;;  %956 = vmatmul.mubr.f32.gmra.mrb[82].mxu0 %v246_v5 }
 0x12a   :  { %v6322_v51 = vadd.f32 %v1507_v6, %v6295_v22  ;;  %v6329_v3 = vpop.f32.mrb[16].mxu0  ;;  %v1891_v4 = vsel %vm1286_vm1, %v1686_v46, 0.0  ;;  %v6332_v7 = vpop.f32.mrb[16].mxu1  ;;  %v2083_v54 = vsel %vm1286_vm1, %v1782_v39, 0.0 }
 0x12b   :  { %11635 = vst [vmem:[#allocation34_spill] sm:$0xff] %v6329_v3  ;;  %11636 = vst [vmem:[#allocation35_spill] sm:$0xff] %v6332_v7  ;;  %2065 = vadd.xlane.f32.xlu0 %v6181_v63  ;;  %1877 = vadd.xlane.f32.xlu1 %v6205_v17  ;;  %v6341_v20 = vpop.f32.mrb[17].mxu0  ;;  %v6343_v23 = vadd.f32 %v1891_v4, %v1685_v44  ;;  %v6345_v26 = vpop.f32.mrb[17].mxu1  ;;  %v6347_v46 = vadd.f32 %v2083_v54, %v1781_v53  ;;  %v343_v4 = vld [vmem:[%s11198_s2 + $0x598] sm:$0xff] }
 0x12c   :  { %11637 = vst [vmem:[#allocation36_spill] sm:$0xff] %v6341_v20  ;;  %11638 = vst [vmem:[#allocation37_spill] sm:$0xff] %v6345_v26  ;;  %v1687_v39 = vmul.f32 %v6329_v3, %v6329_v3  ;;  %v1688_v62 = vmul.f32 %v6341_v20, %v6341_v20  ;;  %v1784_v6 = vmul.f32 %v6345_v26, %v6345_v26  ;;  %v1319_v63 = vsel %vm1286_vm1, %v6341_v20, 0.0 }
 0x12d   :  { %v1511_v17 = vsel %vm1286_vm1, %v6345_v26, 0.0  ;;  %v6360_v44 = vadd.f32 %v1319_v63, %v6329_v3  ;;  %v1783_v58 = vmul.f32 %v6332_v7, %v6332_v7  ;;  %4932 = vmatprep.mubr.msk.f32.mxu1 %vm356_vm0, %v343_v4  ;;  %v342_v63 = vld [vmem:[%s11198_s2 + $0x590] sm:$0xff] }
 0x12e   :  { %v6363_v53 = vadd.f32 %v1511_v17, %v6332_v7  ;;  %v6370_v54 = vpop.f32.mrb[18].mxu0  ;;  %v6372_v1 = vpop.f32.mrb[18].mxu1  ;;  %v1895_v26 = vsel %vm1286_vm1, %v1688_v62, 0.0  ;;  %v2087_v5 = vsel %vm1286_vm1, %v1784_v6, 0.0  ;;  %1244 = vmatmul.mubr.f32.gmra.mrb[82].mxu1 %v342_v63 }
 0x12f   :  { %11639 = vst [vmem:[#allocation38_spill] sm:$0xff] %v6370_v54  ;;  %11640 = vst [vmem:[#allocation39_spill] sm:$0xff] %v6372_v1  ;;  %2069 = vadd.xlane.f32.xlu1 %v6209_v19  ;;  %1305 = vadd.xlane.f32.xlu0 %v6222_v27  ;;  %v6382_v17 = vpop.f32.mrb[19].mxu0  ;;  %v6384_v7 = vpop.f32.mrb[19].mxu1  ;;  %v6386_v55 = vadd.f32 %v1895_v26, %v1687_v39  ;;  %v6388_v18 = vadd.f32 %v2087_v5, %v1783_v58 }
 0x130   :  { %11641 = vst [vmem:[#allocation40_spill] sm:$0xff] %v6382_v17  ;;  %11642 = vst [vmem:[#allocation41_spill] sm:$0xff] %v6384_v7  ;;  %v1689_v62 = vmul.f32 %v6370_v54, %v6370_v54  ;;  %v1690_v6 = vmul.f32 %v6382_v17, %v6382_v17  ;;  %v1786_v4 = vmul.f32 %v6384_v7, %v6384_v7  ;;  %v1323_v19 = vsel %vm1286_vm1, %v6382_v17, 0.0 }
 0x131   :  { %v1515_v27 = vsel %vm1286_vm1, %v6384_v7, 0.0  ;;  %v6401_v26 = vadd.f32 %v1323_v19, %v6370_v54  ;;  %v1785_v58 = vmul.f32 %v6372_v1, %v6372_v1 }
 0x132   :  { %v6404_v39 = vadd.f32 %v1515_v27, %v6372_v1  ;;  %v6408_v5 = vpop.f32.mrb[20].mxu0  ;;  %v1899_v10 = vsel %vm1286_vm1, %v1690_v6, 0.0  ;;  %v6411_v47 = vpop.f32.mrb[20].mxu1  ;;  %v2091_v43 = vsel %vm1286_vm1, %v1786_v4, 0.0 }
 0x133   :  { %11643 = vst [vmem:[#allocation42_spill] sm:$0xff] %v6408_v5  ;;  %11644 = vst [vmem:[#allocation43_spill] sm:$0xff] %v6411_v47  ;;  %1497 = vadd.xlane.f32.xlu0 %v6225_v30  ;;  %1309 = vadd.xlane.f32.xlu1 %v6254_v49  ;;  %v6416_v63 = vpop.f32.mrb[21].mxu0  ;;  %v6418_v19 = vadd.f32 %v1899_v10, %v1689_v62  ;;  %v6420_v27 = vpop.f32.mrb[21].mxu1  ;;  %v6422_v15 = vadd.f32 %v2091_v43, %v1785_v58 }
 0x134   :  { %11645 = vst [vmem:[#allocation44_spill] sm:$0xff] %v6416_v63  ;;  %11646 = vst [vmem:[#allocation45_spill] sm:$0xff] %v6420_v27  ;;  %v1691_v13 = vmul.f32 %v6408_v5, %v6408_v5  ;;  %v1692_v6 = vmul.f32 %v6416_v63, %v6416_v63  ;;  %v1788_v4 = vmul.f32 %v6420_v27, %v6420_v27  ;;  %v1327_v30 = vsel %vm1286_vm1, %v6416_v63, 0.0 }
 0x135   :  { %v1519_v10 = vsel %vm1286_vm1, %v6420_v27, 0.0  ;;  %v6435_v49 = vadd.f32 %v1327_v30, %v6408_v5  ;;  %v1787_v62 = vmul.f32 %v6411_v47, %v6411_v47 }
 0x136   :  { %v6438_v43 = vadd.f32 %v1519_v10, %v6411_v47  ;;  %v6442_v58 = vpop.f32.mrb[22].mxu0  ;;  %v6444_v7 = vpop.f32.mrb[22].mxu1  ;;  %v1903_v1 = vsel %vm1286_vm1, %v1692_v6, 0.0  ;;  %v2095_v34 = vsel %vm1286_vm1, %v1788_v4, 0.0 }
 0x137   :  { %11647 = vst [vmem:[#allocation46_spill] sm:$0xff] %v6442_v58  ;;  %11648 = vst [vmem:[#allocation47_spill] sm:$0xff] %v6444_v7  ;;  %1881 = vadd.xlane.f32.xlu0 %v6239_v38  ;;  %1501 = vadd.xlane.f32.xlu1 %v6257_v50  ;;  %v6450_v30 = vpop.f32.mrb[23].mxu0  ;;  %v6452_v27 = vpop.f32.mrb[23].mxu1  ;;  %v6454_v10 = vadd.f32 %v1903_v1, %v1691_v13  ;;  %v6456_v22 = vadd.f32 %v2095_v34, %v1787_v62 }
 0x138   :  { %11649 = vst [vmem:[#allocation48_spill] sm:$0xff] %v6450_v30  ;;  %11650 = vst [vmem:[#allocation49_spill] sm:$0xff] %v6452_v27  ;;  %v1693_v47 = vmul.f32 %v6442_v58, %v6442_v58  ;;  %v1694_v6 = vmul.f32 %v6450_v30, %v6450_v30  ;;  %v1790_v4 = vmul.f32 %v6452_v27, %v6452_v27  ;;  %v1331_v38 = vsel %vm1286_vm1, %v6450_v30, 0.0 }
 0x139   :  { %v1523_v50 = vsel %vm1286_vm1, %v6452_v27, 0.0  ;;  %v6469_v13 = vadd.f32 %v1331_v38, %v6442_v58  ;;  %v1789_v34 = vmul.f32 %v6444_v7, %v6444_v7 }
 0x13a   :  { %v6472_v1 = vadd.f32 %v1523_v50, %v6444_v7  ;;  %v6476_v62 = vpop.f32.mrb[24].mxu0  ;;  %v1907_v37 = vsel %vm1286_vm1, %v1694_v6, 0.0  ;;  %v6479_v33 = vpop.f32.mrb[24].mxu1  ;;  %v2099_v61 = vsel %vm1286_vm1, %v1790_v4, 0.0  ;;  %v249_v6 = vld [vmem:[%s11198_s2 + $0x2a8] sm:$0xff] }
 0x13b   :  { %11651 = vst [vmem:[#allocation50_spill] sm:$0xff] %v6476_v62  ;;  %11652 = vst [vmem:[#allocation51_spill] sm:$0xff] %v6479_v33  ;;  %2073 = vadd.xlane.f32.xlu0 %v6241_v40  ;;  %1885 = vadd.xlane.f32.xlu1 %v6269_v0  ;;  %v6484_v38 = vpop.f32.mrb[25].mxu0  ;;  %v6486_v27 = vadd.f32 %v1907_v37, %v1693_v47  ;;  %v6488_v50 = vpop.f32.mrb[25].mxu1  ;;  %v6490_v57 = vadd.f32 %v2099_v61, %v1789_v34  ;;  %v248_v37 = vld [vmem:[%s11198_s2 + $0x2a0] sm:$0xff] }
 0x13c   :  { %11653 = vst [vmem:[#allocation52_spill] sm:$0xff] %v6484_v38  ;;  %11654 = vst [vmem:[#allocation53_spill] sm:$0xff] %v6488_v50  ;;  %v1695_v7 = vmul.f32 %v6476_v62, %v6476_v62  ;;  %v1696_v40 = vmul.f32 %v6484_v38, %v6484_v38  ;;  %v1792_v0 = vmul.f32 %v6488_v50, %v6488_v50  ;;  %v1335_v47 = vsel %vm1286_vm1, %v6484_v38, 0.0 }
 0x13d   :  { %v1527_v61 = vsel %vm1286_vm1, %v6488_v50, 0.0  ;;  %4885 = vmatprep.mubr.msk.f32.mxu0 %vm356_vm0, %v249_v6  ;;  %v6510_v4 = vadd.f32 %v1335_v47, %v6476_v62  ;;  %v1791_v28 = vmul.f32 %v6479_v33, %v6479_v33 }
 0x13e   :  { %v6513_v34 = vadd.f32 %v1527_v61, %v6479_v33  ;;  %962 = vmatmul.mubr.f32.gmra.mrb[84].mxu0 %v248_v37  ;;  %v6517_v25 = vpop.f32.mrb[26].mxu0  ;;  %v6519_v38 = vpop.f32.mrb[26].mxu1  ;;  %v1911_v6 = vsel %vm1286_vm1, %v1696_v40, 0.0  ;;  %v2103_v50 = vsel %vm1286_vm1, %v1792_v0, 0.0  ;;  %v345_v40 = vld [vmem:[%s11198_s2 + $0x5a8] sm:$0xff] }
 0x13f   :  { %11655 = vst [vmem:[#allocation54_spill] sm:$0xff] %v6517_v25  ;;  %11656 = vst [vmem:[#allocation55_spill] sm:$0xff] %v6519_v38  ;;  %2077 = vadd.xlane.f32.xlu1 %v6273_v2  ;;  %1313 = vadd.xlane.f32.xlu0 %v6286_v9  ;;  %v6525_v47 = vpop.f32.mrb[27].mxu0  ;;  %v6527_v61 = vpop.f32.mrb[27].mxu1  ;;  %v6529_v62 = vadd.f32 %v1911_v6, %v1695_v7  ;;  %v6531_v33 = vadd.f32 %v2103_v50, %v1791_v28  ;;  %v344_v7 = vld [vmem:[%s11198_s2 + $0x5a0] sm:$0xff] }
 0x140   :  { %11657 = vst [vmem:[#allocation56_spill] sm:$0xff] %v6525_v47  ;;  %11658 = vst [vmem:[#allocation57_spill] sm:$0xff] %v6527_v61  ;;  %v1697_v37 = vmul.f32 %v6517_v25, %v6517_v25  ;;  %v1698_v2 = vmul.f32 %v6525_v47, %v6525_v47  ;;  %v1794_v9 = vmul.f32 %v6527_v61, %v6527_v61  ;;  %v1339_v0 = vsel %vm1286_vm1, %v6525_v47, 0.0 }
 0x141   :  { %v1531_v28 = vsel %vm1286_vm1, %v6527_v61, 0.0  ;;  %4933 = vmatprep.mubr.msk.f32.mxu1 %vm356_vm0, %v345_v40  ;;  %v6551_v50 = vadd.f32 %v1339_v0, %v6517_v25  ;;  %v1793_v63 = vmul.f32 %v6519_v38, %v6519_v38 }
 0x142   :  { %v6554_v6 = vadd.f32 %v1531_v28, %v6519_v38  ;;  %1250 = vmatmul.mubr.f32.gmra.mrb[84].mxu1 %v344_v7  ;;  %v6558_v5 = vpop.f32.mrb[28].mxu0  ;;  %v1915_v61 = vsel %vm1286_vm1, %v1698_v2, 0.0  ;;  %v6561_v47 = vpop.f32.mrb[28].mxu1  ;;  %v2107_v40 = vsel %vm1286_vm1, %v1794_v9, 0.0 }
 0x143   :  { %11659 = vst [vmem:[#allocation58_spill] sm:$0xff] %v6558_v5  ;;  %11660 = vst [vmem:[#allocation59_spill] sm:$0xff] %v6561_v47  ;;  %1505 = vadd.xlane.f32.xlu0 %v6289_v11  ;;  %1317 = vadd.xlane.f32.xlu1 %v6319_v48  ;;  %v6566_v0 = vpop.f32.mrb[29].mxu0  ;;  %v6568_v28 = vadd.f32 %v1915_v61, %v1697_v37  ;;  %v6570_v25 = vpop.f32.mrb[29].mxu1  ;;  %v6572_v38 = vadd.f32 %v2107_v40, %v1793_v63 }
 0x144   :  { %11661 = vst [vmem:[#allocation60_spill] sm:$0xff] %v6566_v0  ;;  %11662 = vst [vmem:[#allocation61_spill] sm:$0xff] %v6570_v25  ;;  %v1699_v7 = vmul.f32 %v6558_v5, %v6558_v5  ;;  %v1700_v2 = vmul.f32 %v6566_v0, %v6566_v0  ;;  %v1796_v9 = vmul.f32 %v6570_v25, %v6570_v25  ;;  %v1343_v11 = vsel %vm1286_vm1, %v6566_v0, 0.0 }
 0x145   :  { %v1535_v48 = vsel %vm1286_vm1, %v6570_v25, 0.0  ;;  %v6585_v61 = vadd.f32 %v1343_v11, %v6558_v5  ;;  %v1795_v37 = vmul.f32 %v6561_v47, %v6561_v47 }
 0x146   :  { %v6588_v63 = vadd.f32 %v1535_v48, %v6561_v47  ;;  %v6592_v40 = vpop.f32.mrb[30].mxu0  ;;  %v6594_v30 = vpop.f32.mrb[30].mxu1  ;;  %v1919_v58 = vsel %vm1286_vm1, %v1700_v2, 0.0  ;;  %v2111_v0 = vsel %vm1286_vm1, %v1796_v9, 0.0 }
 0x147   :  { %11663 = vst [vmem:[#allocation62_spill] sm:$0xff] %v6592_v40  ;;  %11664 = vst [vmem:[#allocation63_spill] sm:$0xff] %v6594_v30  ;;  %1889 = vadd.xlane.f32.xlu0 %v6304_v35  ;;  %1509 = vadd.xlane.f32.xlu1 %v6322_v51  ;;  %v6600_v11 = vpop.f32.mrb[31].mxu0  ;;  %v6602_v25 = vpop.f32.mrb[31].mxu1  ;;  %v6604_v48 = vadd.f32 %v1919_v58, %v1699_v7  ;;  %v6606_v5 = vadd.f32 %v2111_v0, %v1795_v37 }
 0x148   :  { %11665 = vst [vmem:[#allocation64_spill] sm:$0xff] %v6600_v11  ;;  %11666 = vst [vmem:[#allocation65_spill] sm:$0xff] %v6602_v25  ;;  %v1701_v47 = vmul.f32 %v6592_v40, %v6592_v40  ;;  %v1702_v2 = vmul.f32 %v6600_v11, %v6600_v11  ;;  %v1798_v9 = vmul.f32 %v6602_v25, %v6602_v25  ;;  %v1347_v35 = vsel %vm1286_vm1, %v6600_v11, 0.0 }
 0x149   :  { %v1539_v51 = vsel %vm1286_vm1, %v6602_v25, 0.0  ;;  %v6619_v58 = vadd.f32 %v1347_v35, %v6592_v40  ;;  %v1797_v7 = vmul.f32 %v6594_v30, %v6594_v30 }
 0x14a   :  { %v6622_v0 = vadd.f32 %v1539_v51, %v6594_v30  ;;  %v6626_v37 = vpop.f32.mrb[32].mxu0  ;;  %v1923_v20 = vsel %vm1286_vm1, %v1702_v2, 0.0  ;;  %v6629_v3 = vpop.f32.mrb[32].mxu1  ;;  %v2115_v11 = vsel %vm1286_vm1, %v1798_v9, 0.0 }
 0x14b   :  { %11667 = vst [vmem:[#allocation66_spill] sm:$0xff] %v6626_v37  ;;  %11668 = vst [vmem:[#allocation67_spill] sm:$0xff] %v6629_v3  ;;  %2081 = vadd.xlane.f32.xlu0 %v6306_v42  ;;  %1893 = vadd.xlane.f32.xlu1 %v6343_v23  ;;  %v6634_v35 = vpop.f32.mrb[33].mxu0  ;;  %v6636_v25 = vadd.f32 %v1923_v20, %v1701_v47  ;;  %v6638_v51 = vpop.f32.mrb[33].mxu1  ;;  %v6640_v40 = vadd.f32 %v2115_v11, %v1797_v7 }
 0x14c   :  { %11669 = vst [vmem:[#allocation68_spill] sm:$0xff] %v6634_v35  ;;  %11670 = vst [vmem:[#allocation69_spill] sm:$0xff] %v6638_v51  ;;  %v1703_v30 = vmul.f32 %v6626_v37, %v6626_v37  ;;  %v1704_v2 = vmul.f32 %v6634_v35, %v6634_v35  ;;  %v1800_v9 = vmul.f32 %v6638_v51, %v6638_v51  ;;  %v1351_v42 = vsel %vm1286_vm1, %v6634_v35, 0.0 }
 0x14d   :  { %v1543_v20 = vsel %vm1286_vm1, %v6638_v51, 0.0  ;;  %v6653_v23 = vadd.f32 %v1351_v42, %v6626_v37  ;;  %v1799_v11 = vmul.f32 %v6629_v3, %v6629_v3 }
 0x14e   :  { %v6656_v47 = vadd.f32 %v1543_v20, %v6629_v3  ;;  %v6660_v7 = vpop.f32.mrb[34].mxu0  ;;  %v6662_v59 = vpop.f32.mrb[34].mxu1  ;;  %v1927_v52 = vsel %vm1286_vm1, %v1704_v2, 0.0  ;;  %v2119_v35 = vsel %vm1286_vm1, %v1800_v9, 0.0 }
 0x14f   :  { %11671 = vst [vmem:[#allocation70_spill] sm:$0xff] %v6660_v7  ;;  %11672 = vst [vmem:[#allocation71_spill] sm:$0xff] %v6662_v59  ;;  %2085 = vadd.xlane.f32.xlu1 %v6347_v46  ;;  %1321 = vadd.xlane.f32.xlu0 %v6360_v44  ;;  %v6668_v42 = vpop.f32.mrb[35].mxu0  ;;  %v6670_v51 = vpop.f32.mrb[35].mxu1  ;;  %v6672_v20 = vadd.f32 %v1927_v52, %v1703_v30  ;;  %v6674_v37 = vadd.f32 %v2119_v35, %v1799_v11 }
 0x150   :  { %11673 = vst [vmem:[#allocation72_spill] sm:$0xff] %v6668_v42  ;;  %11674 = vst [vmem:[#allocation73_spill] sm:$0xff] %v6670_v51  ;;  %v1705_v3 = vmul.f32 %v6660_v7, %v6660_v7  ;;  %v1706_v2 = vmul.f32 %v6668_v42, %v6668_v42  ;;  %v1802_v9 = vmul.f32 %v6670_v51, %v6670_v51  ;;  %v1355_v46 = vsel %vm1286_vm1, %v6668_v42, 0.0 }
 0x151   :  { %v1547_v44 = vsel %vm1286_vm1, %v6670_v51, 0.0  ;;  %v6687_v52 = vadd.f32 %v1355_v46, %v6660_v7  ;;  %v1801_v35 = vmul.f32 %v6662_v59, %v6662_v59 }
 0x152   :  { %v6690_v30 = vadd.f32 %v1547_v44, %v6662_v59  ;;  %v6694_v11 = vpop.f32.mrb[36].mxu0  ;;  %v1931_v31 = vsel %vm1286_vm1, %v1706_v2, 0.0  ;;  %v6697_v21 = vpop.f32.mrb[36].mxu1  ;;  %v2123_v42 = vsel %vm1286_vm1, %v1802_v9, 0.0 }
 0x153   :  { %11675 = vst [vmem:[#allocation74_spill] sm:$0xff] %v6694_v11  ;;  %11676 = vst [vmem:[#allocation75_spill] sm:$0xff] %v6697_v21  ;;  %1513 = vadd.xlane.f32.xlu0 %v6363_v53  ;;  %1325 = vadd.xlane.f32.xlu1 %v6401_v26  ;;  %v6702_v46 = vpop.f32.mrb[37].mxu0  ;;  %v6704_v51 = vadd.f32 %v1931_v31, %v1705_v3  ;;  %v6706_v44 = vpop.f32.mrb[37].mxu1  ;;  %v6708_v7 = vadd.f32 %v2123_v42, %v1801_v35 }
 0x154   :  { %11677 = vst [vmem:[#allocation76_spill] sm:$0xff] %v6702_v46  ;;  %11678 = vst [vmem:[#allocation77_spill] sm:$0xff] %v6706_v44  ;;  %v1707_v59 = vmul.f32 %v6694_v11, %v6694_v11  ;;  %v1708_v2 = vmul.f32 %v6702_v46, %v6702_v46  ;;  %v1804_v9 = vmul.f32 %v6706_v44, %v6706_v44  ;;  %v1359_v53 = vsel %vm1286_vm1, %v6702_v46, 0.0 }
 0x155   :  { %v1551_v31 = vsel %vm1286_vm1, %v6706_v44, 0.0  ;;  %v6721_v3 = vadd.f32 %v1359_v53, %v6694_v11  ;;  %v1803_v42 = vmul.f32 %v6697_v21, %v6697_v21 }
 0x156   :  { %v6724_v26 = vadd.f32 %v1551_v31, %v6697_v21  ;;  %v6728_v35 = vpop.f32.mrb[38].mxu0  ;;  %v6730_v17 = vpop.f32.mrb[38].mxu1  ;;  %v1935_v54 = vsel %vm1286_vm1, %v1708_v2, 0.0  ;;  %v2127_v46 = vsel %vm1286_vm1, %v1804_v9, 0.0 }
 0x157   :  { %11679 = vst [vmem:[#allocation78_spill] sm:$0xff] %v6728_v35  ;;  %11680 = vst [vmem:[#allocation79_spill] sm:$0xff] %v6730_v17  ;;  %1897 = vadd.xlane.f32.xlu0 %v6386_v55  ;;  %1517 = vadd.xlane.f32.xlu1 %v6404_v39  ;;  %v6736_v53 = vpop.f32.mrb[39].mxu0  ;;  %v6738_v44 = vpop.f32.mrb[39].mxu1  ;;  %v6740_v31 = vadd.f32 %v1935_v54, %v1707_v59  ;;  %v6742_v11 = vadd.f32 %v2127_v46, %v1803_v42 }
 0x158   :  { %11681 = vst [vmem:[#allocation80_spill] sm:$0xff] %v6736_v53  ;;  %11682 = vst [vmem:[#allocation81_spill] sm:$0xff] %v6738_v44  ;;  %v1709_v21 = vmul.f32 %v6728_v35, %v6728_v35  ;;  %v1710_v2 = vmul.f32 %v6736_v53, %v6736_v53  ;;  %v1806_v9 = vmul.f32 %v6738_v44, %v6738_v44  ;;  %v1363_v55 = vsel %vm1286_vm1, %v6736_v53, 0.0 }
 0x159   :  { %v1555_v39 = vsel %vm1286_vm1, %v6738_v44, 0.0  ;;  %v6755_v59 = vadd.f32 %v1363_v55, %v6728_v35  ;;  %v1805_v46 = vmul.f32 %v6730_v17, %v6730_v17 }
 0x15a   :  { %v6758_v54 = vadd.f32 %v1555_v39, %v6730_v17  ;;  %v6762_v42 = vpop.f32.mrb[40].mxu0  ;;  %v1939_v36 = vsel %vm1286_vm1, %v1710_v2, 0.0  ;;  %v6765_v32 = vpop.f32.mrb[40].mxu1  ;;  %v2131_v53 = vsel %vm1286_vm1, %v1806_v9, 0.0 }
 0x15b   :  { %11683 = vst [vmem:[#allocation82_spill] sm:$0xff] %v6762_v42  ;;  %11684 = vst [vmem:[#allocation83_spill] sm:$0xff] %v6765_v32  ;;  %2089 = vadd.xlane.f32.xlu0 %v6388_v18  ;;  %1901 = vadd.xlane.f32.xlu1 %v6418_v19  ;;  %v6770_v55 = vpop.f32.mrb[41].mxu0  ;;  %v6772_v44 = vadd.f32 %v1939_v36, %v1709_v21  ;;  %v6774_v39 = vpop.f32.mrb[41].mxu1  ;;  %v6776_v35 = vadd.f32 %v2131_v53, %v1805_v46 }
 0x15c   :  { %11685 = vst [vmem:[#allocation84_spill] sm:$0xff] %v6770_v55  ;;  %11686 = vst [vmem:[#allocation85_spill] sm:$0xff] %v6774_v39  ;;  %v1711_v17 = vmul.f32 %v6762_v42, %v6762_v42  ;;  %v1712_v2 = vmul.f32 %v6770_v55, %v6770_v55  ;;  %v1808_v9 = vmul.f32 %v6774_v39, %v6774_v39  ;;  %v1367_v18 = vsel %vm1286_vm1, %v6770_v55, 0.0 }
 0x15d   :  { %v1559_v36 = vsel %vm1286_vm1, %v6774_v39, 0.0  ;;  %v6789_v21 = vadd.f32 %v1367_v18, %v6762_v42  ;;  %v1807_v53 = vmul.f32 %v6765_v32, %v6765_v32 }
 0x15e   :  { %v6792_v19 = vadd.f32 %v1559_v36, %v6765_v32  ;;  %v6796_v46 = vpop.f32.mrb[42].mxu0  ;;  %v6798_v16 = vpop.f32.mrb[42].mxu1  ;;  %v1943_v8 = vsel %vm1286_vm1, %v1712_v2, 0.0  ;;  %v2135_v55 = vsel %vm1286_vm1, %v1808_v9, 0.0 }
 0x15f   :  { %11687 = vst [vmem:[#allocation86_spill] sm:$0xff] %v6796_v46  ;;  %11688 = vst [vmem:[#allocation87_spill] sm:$0xff] %v6798_v16  ;;  %2093 = vadd.xlane.f32.xlu1 %v6422_v15  ;;  %1329 = vadd.xlane.f32.xlu0 %v6435_v49  ;;  %v6804_v18 = vpop.f32.mrb[43].mxu0  ;;  %v6806_v39 = vpop.f32.mrb[43].mxu1  ;;  %v6808_v36 = vadd.f32 %v1943_v8, %v1711_v17  ;;  %v6810_v42 = vadd.f32 %v2135_v55, %v1807_v53 }
 0x160   :  { %11689 = vst [vmem:[#allocation88_spill] sm:$0xff] %v6804_v18  ;;  %11690 = vst [vmem:[#allocation89_spill] sm:$0xff] %v6806_v39  ;;  %v1713_v32 = vmul.f32 %v6796_v46, %v6796_v46  ;;  %v1714_v2 = vmul.f32 %v6804_v18, %v6804_v18  ;;  %v1810_v9 = vmul.f32 %v6806_v39, %v6806_v39  ;;  %v1371_v15 = vsel %vm1286_vm1, %v6804_v18, 0.0 }
 0x161   :  { %v1563_v49 = vsel %vm1286_vm1, %v6806_v39, 0.0  ;;  %v6823_v8 = vadd.f32 %v1371_v15, %v6796_v46  ;;  %v1809_v55 = vmul.f32 %v6798_v16, %v6798_v16 }
 0x162   :  { %v6826_v17 = vadd.f32 %v1563_v49, %v6798_v16  ;;  %v6830_v53 = vpop.f32.mrb[44].mxu0  ;;  %v1947_v60 = vsel %vm1286_vm1, %v1714_v2, 0.0  ;;  %v6833_v56 = vpop.f32.mrb[44].mxu1  ;;  %v2139_v18 = vsel %vm1286_vm1, %v1810_v9, 0.0 }
 0x163   :  { %11691 = vst [vmem:[#allocation90_spill] sm:$0xff] %v6830_v53  ;;  %11692 = vst [vmem:[#allocation91_spill] sm:$0xff] %v6833_v56  ;;  %1521 = vadd.xlane.f32.xlu0 %v6438_v43  ;;  %1333 = vadd.xlane.f32.xlu1 %v6469_v13  ;;  %v6838_v15 = vpop.f32.mrb[45].mxu0  ;;  %v6840_v39 = vadd.f32 %v1947_v60, %v1713_v32  ;;  %v6842_v49 = vpop.f32.mrb[45].mxu1  ;;  %v6844_v46 = vadd.f32 %v2139_v18, %v1809_v55 }
 0x164   :  { %11693 = vst [vmem:[#allocation92_spill] sm:$0xff] %v6838_v15  ;;  %11694 = vst [vmem:[#allocation93_spill] sm:$0xff] %v6842_v49  ;;  %v1715_v16 = vmul.f32 %v6830_v53, %v6830_v53  ;;  %v1716_v2 = vmul.f32 %v6838_v15, %v6838_v15  ;;  %v1812_v9 = vmul.f32 %v6842_v49, %v6842_v49  ;;  %v1375_v43 = vsel %vm1286_vm1, %v6838_v15, 0.0 }
 0x165   :  { %v1567_v60 = vsel %vm1286_vm1, %v6842_v49, 0.0  ;;  %v6857_v32 = vadd.f32 %v1375_v43, %v6830_v53  ;;  %v1811_v18 = vmul.f32 %v6833_v56, %v6833_v56 }
 0x166   :  { %v6860_v13 = vadd.f32 %v1567_v60, %v6833_v56  ;;  %v6864_v55 = vpop.f32.mrb[46].mxu0  ;;  %v6866_v45 = vpop.f32.mrb[46].mxu1  ;;  %v1951_v41 = vsel %vm1286_vm1, %v1716_v2, 0.0  ;;  %v2143_v15 = vsel %vm1286_vm1, %v1812_v9, 0.0 }
 0x167   :  { %11695 = vst [vmem:[#allocation94_spill] sm:$0xff] %v6864_v55  ;;  %11696 = vst [vmem:[#allocation95_spill] sm:$0xff] %v6866_v45  ;;  %1905 = vadd.xlane.f32.xlu0 %v6454_v10  ;;  %1525 = vadd.xlane.f32.xlu1 %v6472_v1  ;;  %v6872_v43 = vpop.f32.mrb[47].mxu0  ;;  %v6874_v49 = vpop.f32.mrb[47].mxu1  ;;  %v6876_v60 = vadd.f32 %v1951_v41, %v1715_v16  ;;  %v6878_v53 = vadd.f32 %v2143_v15, %v1811_v18 }
 0x168   :  { %11697 = vst [vmem:[#allocation96_spill] sm:$0xff] %v6872_v43  ;;  %11698 = vst [vmem:[#allocation97_spill] sm:$0xff] %v6874_v49  ;;  %v1717_v56 = vmul.f32 %v6864_v55, %v6864_v55  ;;  %v1718_v2 = vmul.f32 %v6872_v43, %v6872_v43  ;;  %v1814_v9 = vmul.f32 %v6874_v49, %v6874_v49  ;;  %v1379_v10 = vsel %vm1286_vm1, %v6872_v43, 0.0 }
 0x169   :  { %v1571_v1 = vsel %vm1286_vm1, %v6874_v49, 0.0  ;;  %v6891_v41 = vadd.f32 %v1379_v10, %v6864_v55  ;;  %v1813_v15 = vmul.f32 %v6866_v45, %v6866_v45 }
 0x16a   :  { %v6894_v16 = vadd.f32 %v1571_v1, %v6866_v45  ;;  %v6898_v18 = vpop.f32.mrb[48].mxu0  ;;  %v1955_v29 = vsel %vm1286_vm1, %v1718_v2, 0.0  ;;  %v6901_v24 = vpop.f32.mrb[48].mxu1  ;;  %v2147_v43 = vsel %vm1286_vm1, %v1814_v9, 0.0 }
 0x16b   :  { %11699 = vst [vmem:[#allocation98_spill] sm:$0xff] %v6898_v18  ;;  %11700 = vst [vmem:[#allocation99_spill] sm:$0xff] %v6901_v24  ;;  %2097 = vadd.xlane.f32.xlu0 %v6456_v22  ;;  %1909 = vadd.xlane.f32.xlu1 %v6486_v27  ;;  %v1719_v10 = vmul.f32 %v6898_v18, %v6898_v18  ;;  %v6908_v1 = vpop.f32.mrb[49].mxu0  ;;  %v6910_v49 = vadd.f32 %v1955_v29, %v1717_v56  ;;  %v6912_v45 = vpop.f32.mrb[49].mxu1 }
 0x16c   :  { %11701 = vst [vmem:[#allocation100_spill] sm:$0xff] %v6908_v1  ;;  %11703 = vst [vmem:[#allocation102_spill] sm:$0xff] %v6912_v45  ;;  %v1720_v2 = vmul.f32 %v6908_v1, %v6908_v1  ;;  %v1575_v55 = vsel %vm1286_vm1, %v6912_v45, 0.0  ;;  %v1816_v22 = vmul.f32 %v6912_v45, %v6912_v45  ;;  %v6920_v9 = vadd.f32 %v2147_v43, %v1813_v15 }
 0x16d   :  { %11702 = vst [vmem:[#allocation101_spill] sm:$0xff] %v6910_v49  ;;  %v1815_v27 = vmul.f32 %v6901_v24, %v6901_v24  ;;  %v1383_v29 = vsel %vm1286_vm1, %v6908_v1, 0.0  ;;  %v6927_v56 = vadd.f32 %v1575_v55, %v6901_v24 }
 0x16e   :  { %v6929_v14 = vpop.f32.mrb[50].mxu0  ;;  %v6932_v12 = vadd.f32 %v1383_v29, %v6898_v18  ;;  %v6934_v49 = vpop.f32.mrb[50].mxu1  ;;  %v1959_v45 = vsel %vm1286_vm1, %v1720_v2, 0.0  ;;  %v2151_v43 = vsel %vm1286_vm1, %v1816_v22, 0.0 }
 0x16f   :  { %11704 = vst [vmem:[#allocation103_spill] sm:$0xff] %v6927_v56  ;;  %11705 = vst [vmem:[#allocation104_spill] sm:$0xff] %v6929_v14  ;;  %2101 = vadd.xlane.f32.xlu1 %v6490_v57  ;;  %1337 = vadd.xlane.f32.xlu0 %v6510_v4  ;;  %v1721_v15 = vmul.f32 %v6929_v14, %v6929_v14  ;;  %v6942_v55 = vpop.f32.mrb[51].mxu0  ;;  %v6944_v24 = vpop.f32.mrb[51].mxu1  ;;  %v6946_v1 = vadd.f32 %v1959_v45, %v1719_v10 }
 0x170   :  { %11706 = vst [vmem:[#allocation105_spill] sm:$0xff] %v6932_v12  ;;  %11707 = vst [vmem:[#allocation106_spill] sm:$0xff] %v6934_v49  ;;  %v1722_v29 = vmul.f32 %v6942_v55, %v6942_v55  ;;  %v1579_v2 = vsel %vm1286_vm1, %v6944_v24, 0.0  ;;  %v1818_v57 = vmul.f32 %v6944_v24, %v6944_v24  ;;  %v1387_v4 = vsel %vm1286_vm1, %v6942_v55, 0.0 }
 0x171   :  { %11708 = vst [vmem:[#allocation107_spill] sm:$0xff] %v6942_v55  ;;  %11709 = vst [vmem:[#allocation108_spill] sm:$0xff] %v6944_v24  ;;  %v1817_v22 = vmul.f32 %v6934_v49, %v6934_v49  ;;  %v6959_v18 = vadd.f32 %v1387_v4, %v6929_v14  ;;  %v6962_v45 = vadd.f32 %v1579_v2, %v6934_v49 }
 0x172   :  { %11710 = vst [vmem:[#allocation109_spill] sm:$0xff] %v6946_v1  ;;  %v6964_v10 = vadd.f32 %v2151_v43, %v1815_v27  ;;  %v6966_v1 = vpop.f32.mrb[52].mxu0  ;;  %v1963_v56 = vsel %vm1286_vm1, %v1722_v29, 0.0  ;;  %v6969_v12 = vpop.f32.mrb[52].mxu1  ;;  %v2155_v24 = vsel %vm1286_vm1, %v1818_v57, 0.0 }
 0x173   :  { %11712 = vst [vmem:[#allocation111_spill] sm:$0xff] %v6966_v1  ;;  %11713 = vst [vmem:[#allocation112_spill] sm:$0xff] %v6969_v12  ;;  %1529 = vadd.xlane.f32.xlu0 %v6513_v34  ;;  %1341 = vadd.xlane.f32.xlu1 %v6551_v50  ;;  %v1723_v4 = vmul.f32 %v6966_v1, %v6966_v1  ;;  %v6976_v55 = vpop.f32.mrb[53].mxu0  ;;  %v6978_v2 = vadd.f32 %v1963_v56, %v1721_v15  ;;  %v6980_v27 = vpop.f32.mrb[53].mxu1 }
 0x174   :  { %11711 = vst [vmem:[#allocation110_spill] sm:$0xff] %v6964_v10  ;;  %11714 = vst [vmem:[#allocation113_spill] sm:$0xff] %v6976_v55  ;;  %v1391_v43 = vsel %vm1286_vm1, %v6976_v55, 0.0  ;;  %v1724_v29 = vmul.f32 %v6976_v55, %v6976_v55  ;;  %v1583_v34 = vsel %vm1286_vm1, %v6980_v27, 0.0  ;;  %v1820_v50 = vmul.f32 %v6980_v27, %v6980_v27 }
 0x175   :  { %11715 = vst [vmem:[#allocation114_spill] sm:$0xff] %v6978_v2  ;;  %11716 = vst [vmem:[#allocation115_spill] sm:$0xff] %v6980_v27  ;;  %v1819_v57 = vmul.f32 %v6969_v12, %v6969_v12  ;;  %v6992_v49 = vadd.f32 %v2155_v24, %v1817_v22  ;;  %v6995_v56 = vadd.f32 %v1391_v43, %v6966_v1  ;;  %v251_v27 = vld [vmem:[%s11198_s2 + $0x2b8] sm:$0xff] }
 0x176   :  { %v6998_v15 = vadd.f32 %v1583_v34, %v6969_v12  ;;  %v7000_v14 = vpop.f32.mrb[54].mxu0  ;;  %v7002_v55 = vpop.f32.mrb[54].mxu1  ;;  %v1967_v2 = vsel %vm1286_vm1, %v1724_v29, 0.0  ;;  %v2159_v10 = vsel %vm1286_vm1, %v1820_v50, 0.0  ;;  %v250_v29 = vld [vmem:[%s11198_s2 + $0x2b0] sm:$0xff]  ;;  %4886 = vmatprep.mubr.msk.f32.mxu0 %vm356_vm0, %v251_v27 }
 0x177   :  { %11717 = vst [vmem:[#allocation116_spill] sm:$0xff] %v6995_v56  ;;  %11719 = vst [vmem:[#allocation118_spill] sm:$0xff] %v7000_v14  ;;  %1913 = vadd.xlane.f32.xlu0 %v6529_v62  ;;  %1533 = vadd.xlane.f32.xlu1 %v6554_v6  ;;  %v1725_v24 = vmul.f32 %v7000_v14, %v7000_v14  ;;  %v7013_v22 = vpop.f32.mrb[55].mxu0  ;;  %v7015_v43 = vpop.f32.mrb[55].mxu1  ;;  %v7017_v34 = vadd.f32 %v1967_v2, %v1723_v4 }
 0x178   :  { %11718 = vst [vmem:[#allocation117_spill] sm:$0xff] %v6998_v15  ;;  %11720 = vst [vmem:[#allocation119_spill] sm:$0xff] %v7002_v55  ;;  %v1395_v50 = vsel %vm1286_vm1, %v7013_v22, 0.0  ;;  %v1726_v62 = vmul.f32 %v7013_v22, %v7013_v22  ;;  %v1587_v6 = vsel %vm1286_vm1, %v7015_v43, 0.0  ;;  %v1822_v12 = vmul.f32 %v7015_v43, %v7015_v43  ;;  %968 = vmatmul.mubr.f32.gmra.mrb[86].mxu0 %v250_v29 }
 0x179   :  { %11721 = vst [vmem:[#allocation120_spill] sm:$0xff] %v7013_v22  ;;  %11722 = vst [vmem:[#allocation121_spill] sm:$0xff] %v7015_v43  ;;  %v1821_v4 = vmul.f32 %v7002_v55, %v7002_v55  ;;  %v7034_v2 = vadd.f32 %v1395_v50, %v7000_v14  ;;  %v7037_v1 = vadd.f32 %v1587_v6, %v7002_v55  ;;  %v347_v43 = vld [vmem:[%s11198_s2 + $0x5b8] sm:$0xff] }
 0x17a   :  { %11723 = vst [vmem:[#allocation122_spill] sm:$0xff] %v7017_v34  ;;  %v7039_v34 = vadd.f32 %v2159_v10, %v1819_v57  ;;  %v7041_v22 = vpop.f32.mrb[56].mxu0  ;;  %v1971_v15 = vsel %vm1286_vm1, %v1726_v62, 0.0  ;;  %v7044_v56 = vpop.f32.mrb[56].mxu1  ;;  %v2163_v27 = vsel %vm1286_vm1, %v1822_v12, 0.0  ;;  %v346_v12 = vld [vmem:[%s11198_s2 + $0x5b0] sm:$0xff]  ;;  %4934 = vmatprep.mubr.msk.f32.mxu1 %vm356_vm0, %v347_v43 }
 0x17b   :  { %11724 = vst [vmem:[#allocation123_spill] sm:$0xff] %v7041_v22  ;;  %11725 = vst [vmem:[#allocation124_spill] sm:$0xff] %v7044_v56  ;;  %2105 = vadd.xlane.f32.xlu0 %v6531_v33  ;;  %1917 = vadd.xlane.f32.xlu1 %v6568_v28  ;;  %v1727_v10 = vmul.f32 %v7041_v22, %v7041_v22  ;;  %v7054_v57 = vpop.f32.mrb[57].mxu0  ;;  %v7056_v29 = vadd.f32 %v1971_v15, %v1725_v24  ;;  %v7058_v50 = vpop.f32.mrb[57].mxu1 }
 0x17c   :  { %11726 = vst [vmem:[#allocation125_spill] sm:$0xff] %v7054_v57  ;;  %11728 = vst [vmem:[#allocation127_spill] sm:$0xff] %v7058_v50  ;;  %v1399_v62 = vsel %vm1286_vm1, %v7054_v57, 0.0  ;;  %v1728_v33 = vmul.f32 %v7054_v57, %v7054_v57  ;;  %v1591_v28 = vsel %vm1286_vm1, %v7058_v50, 0.0  ;;  %v1824_v6 = vmul.f32 %v7058_v50, %v7058_v50  ;;  %1256 = vmatmul.mubr.f32.gmra.mrb[86].mxu1 %v346_v12 }
 0x17d   :  { %11727 = vst [vmem:[#allocation126_spill] sm:$0xff] %v7056_v29  ;;  %v1823_v15 = vmul.f32 %v7044_v56, %v7044_v56  ;;  %v7074_v24 = vadd.f32 %v2163_v27, %v1821_v4  ;;  %v7077_v55 = vadd.f32 %v1399_v62, %v7041_v22  ;;  %v7080_v14 = vadd.f32 %v1591_v28, %v7044_v56 }
 0x17e   :  { %v7082_v57 = vpop.f32.mrb[58].mxu0  ;;  %v7084_v29 = vpop.f32.mrb[58].mxu1  ;;  %v1975_v50 = vsel %vm1286_vm1, %v1728_v33, 0.0  ;;  %v2167_v43 = vsel %vm1286_vm1, %v1824_v6, 0.0  ;;  %v253_v6 = vld [vmem:[%s11198_s2 + $0x2c8] sm:$0xff] }
 0x17f   :  { %11729 = vst [vmem:[#allocation128_spill] sm:$0xff] %v7080_v14  ;;  %11730 = vst [vmem:[#allocation129_spill] sm:$0xff] %v7082_v57  ;;  %2109 = vadd.xlane.f32.xlu1 %v6572_v38  ;;  %1345 = vadd.xlane.f32.xlu0 %v6585_v61  ;;  %v1729_v4 = vmul.f32 %v7082_v57, %v7082_v57  ;;  %v7092_v27 = vpop.f32.mrb[59].mxu0  ;;  %v7094_v62 = vpop.f32.mrb[59].mxu1  ;;  %v7096_v12 = vadd.f32 %v1975_v50, %v1727_v10 }
 0x180   :  { %11731 = vst [vmem:[#allocation130_spill] sm:$0xff] %v7084_v29  ;;  %11732 = vst [vmem:[#allocation131_spill] sm:$0xff] %v7092_v27  ;;  %v1403_v28 = vsel %vm1286_vm1, %v7092_v27, 0.0  ;;  %v1730_v33 = vmul.f32 %v7092_v27, %v7092_v27  ;;  %v1595_v38 = vsel %vm1286_vm1, %v7094_v62, 0.0  ;;  %v1826_v61 = vmul.f32 %v7094_v62, %v7094_v62  ;;  %4887 = vmatprep.mubr.msk.f32.mxu0 %vm356_vm0, %v253_v6 }
 0x181   :  { %11733 = vst [vmem:[#allocation132_spill] sm:$0xff] %v7094_v62  ;;  %11734 = vst [vmem:[#allocation133_spill] sm:$0xff] %v7096_v12  ;;  %v1825_v10 = vmul.f32 %v7084_v29, %v7084_v29  ;;  %v7112_v50 = vadd.f32 %v1403_v28, %v7082_v57  ;;  %v7115_v56 = vadd.f32 %v1595_v38, %v7084_v29  ;;  %v252_v62 = vld [vmem:[%s11198_s2 + $0x2c0] sm:$0xff] }
 0x182   :  { %v7117_v22 = vadd.f32 %v2167_v43, %v1823_v15  ;;  %v7123_v27 = vpop.f32.mrb[60].mxu0  ;;  %v1979_v12 = vsel %vm1286_vm1, %v1730_v33, 0.0  ;;  %v7126_v14 = vpop.f32.mrb[60].mxu1  ;;  %v2171_v28 = vsel %vm1286_vm1, %v1826_v61, 0.0  ;;  %974 = vmatmul.mubr.f32.gmra.mrb[88].mxu0 %v252_v62  ;;  %v349_v33 = vld [vmem:[%s11198_s2 + $0x5c8] sm:$0xff] }
 0x183   :  { %11735 = vst [vmem:[#allocation134_spill] sm:$0xff] %v7123_v27  ;;  %11736 = vst [vmem:[#allocation135_spill] sm:$0xff] %v7126_v14  ;;  %1537 = vadd.xlane.f32.xlu0 %v6588_v63  ;;  %1349 = vadd.xlane.f32.xlu1 %v6619_v58  ;;  %v1731_v15 = vmul.f32 %v7123_v27, %v7123_v27  ;;  %v7133_v43 = vpop.f32.mrb[61].mxu0  ;;  %v7135_v38 = vadd.f32 %v1979_v12, %v1729_v4  ;;  %v7137_v6 = vpop.f32.mrb[61].mxu1 }
 0x184   :  { %11737 = vst [vmem:[#allocation136_spill] sm:$0xff] %v7133_v43  ;;  %11739 = vst [vmem:[#allocation138_spill] sm:$0xff] %v7137_v6  ;;  %v1407_v62 = vsel %vm1286_vm1, %v7133_v43, 0.0  ;;  %v1732_v63 = vmul.f32 %v7133_v43, %v7133_v43  ;;  %v1599_v58 = vsel %vm1286_vm1, %v7137_v6, 0.0  ;;  %v1828_v61 = vmul.f32 %v7137_v6, %v7137_v6  ;;  %4935 = vmatprep.mubr.msk.f32.mxu1 %vm356_vm0, %v349_v33  ;;  %v348_v43 = vld [vmem:[%s11198_s2 + $0x5c0] sm:$0xff] }
 0x185   :  { %11738 = vst [vmem:[#allocation137_spill] sm:$0xff] %v7135_v38  ;;  %v1827_v4 = vmul.f32 %v7126_v14, %v7126_v14  ;;  %v7153_v12 = vadd.f32 %v2171_v28, %v1825_v10  ;;  %v7156_v29 = vadd.f32 %v1407_v62, %v7123_v27  ;;  %v7159_v57 = vadd.f32 %v1599_v58, %v7126_v14 }
 0x186   :  { %v7164_v38 = vpop.f32.mrb[62].mxu0  ;;  %v7166_v6 = vpop.f32.mrb[62].mxu1  ;;  %1262 = vmatmul.mubr.f32.gmra.mrb[88].mxu1 %v348_v43  ;;  %v1983_v33 = vsel %vm1286_vm1, %v1732_v63, 0.0  ;;  %v2175_v10 = vsel %vm1286_vm1, %v1828_v61, 0.0 }
 0x187   :  { %11740 = vst [vmem:[#allocation139_spill] sm:$0xff] %v7156_v29  ;;  %11741 = vst [vmem:[#allocation140_spill] sm:$0xff] %v7159_v57  ;;  %1921 = vadd.xlane.f32.xlu0 %v6604_v48  ;;  %1541 = vadd.xlane.f32.xlu1 %v6622_v0  ;;  %v1733_v28 = vmul.f32 %v7164_v38, %v7164_v38  ;;  %v7174_v62 = vpop.f32.mrb[63].mxu0  ;;  %v1829_v58 = vmul.f32 %v7166_v6, %v7166_v6  ;;  %v7178_v14 = vpop.f32.mrb[63].mxu1 }
 0x188   :  { %11742 = vst [vmem:[#allocation141_spill] sm:$0xff] %v7164_v38  ;;  %11743 = vst [vmem:[#allocation142_spill] sm:$0xff] %v7166_v6  ;;  %v7180_v27 = vadd.f32 %v1983_v33, %v1731_v15  ;;  %v1411_v43 = vsel %vm1286_vm1, %v7174_v62, 0.0  ;;  %v1734_v48 = vmul.f32 %v7174_v62, %v7174_v62  ;;  %v1603_v0 = vsel %vm1286_vm1, %v7178_v14, 0.0 }
 0x189   :  { %11744 = vst [vmem:[#allocation143_spill] sm:$0xff] %v7174_v62  ;;  %11745 = vst [vmem:[#allocation144_spill] sm:$0xff] %v7178_v14  ;;  %v1830_v63 = vmul.f32 %v7178_v14, %v7178_v14  ;;  %v7191_v61 = vadd.f32 %v1411_v43, %v7164_v38  ;;  %v7194_v57 = vadd.f32 %v1603_v0, %v7166_v6 }
 0x18a   :  { %11746 = vst [vmem:[#allocation145_spill] sm:$0xff] %v7180_v27  ;;  %v7196_v15 = vadd.f32 %v2175_v10, %v1827_v4  ;;  %v7198_v33 = vpop.f32.mrb[64].mxu0  ;;  %v1987_v27 = vsel %vm1286_vm1, %v1734_v48, 0.0  ;;  %v7216_v0 = vpop.f32.mrb[64].mxu1 }
 0x18b   :  { %11747 = vst [vmem:[#allocation146_spill] sm:$0xff] %v7198_v33  ;;  %v2179_v62 = vsel %vm1286_vm1, %v1830_v63, 0.0  ;;  %2113 = vadd.xlane.f32.xlu0 %v6606_v5  ;;  %1925 = vadd.xlane.f32.xlu1 %v6636_v25  ;;  %v7204_v29 = vpop.f32.mrb[65].mxu0  ;;  %v7206_v14 = vadd.f32 %v1987_v27, %v1733_v28  ;;  %v1735_v4 = vmul.f32 %v7198_v33, %v7198_v33  ;;  %11749 = vst [vmem:[#allocation148_spill] sm:$0xff] %v7216_v0  ;;  %v7223_v27 = vpop.f32.mrb[65].mxu1 }
 0x18c   :  { %11748 = vst [vmem:[#allocation147_spill] sm:$0xff] %v7204_v29  ;;  %v7208_v43 = vadd.f32 %v2179_v62, %v1829_v58  ;;  %v1415_v10 = vsel %vm1286_vm1, %v7204_v29, 0.0  ;;  %v1736_v48 = vmul.f32 %v7204_v29, %v7204_v29  ;;  %11751 = vst [vmem:[#allocation150_spill] sm:$0xff] %v7223_v27  ;;  %v1607_v58 = vsel %vm1286_vm1, %v7223_v27, 0.0 }
 0x18d   :  { %v7219_v5 = vadd.f32 %v1415_v10, %v7198_v33  ;;  %v1832_v63 = vmul.f32 %v7223_v27, %v7223_v27  ;;  %v1831_v6 = vmul.f32 %v7216_v0, %v7216_v0  ;;  %v7247_v33 = vadd.f32 %v1607_v58, %v7216_v0 }
 0x18e   :  { %v7221_v25 = vpop.f32.mrb[66].mxu0  ;;  %v1991_v28 = vsel %vm1286_vm1, %v1736_v48, 0.0  ;;  %v7244_v29 = vpop.f32.mrb[66].mxu1 }
 0x18f   :  { %11750 = vst [vmem:[#allocation149_spill] sm:$0xff] %v7221_v25  ;;  %2117 = vadd.xlane.f32.xlu1 %v6640_v40  ;;  %1353 = vadd.xlane.f32.xlu0 %v6653_v23  ;;  %v7228_v62 = vpop.f32.mrb[67].mxu0  ;;  %v7234_v10 = vadd.f32 %v1991_v28, %v1735_v4  ;;  %v1737_v48 = vmul.f32 %v7221_v25, %v7221_v25  ;;  %11754 = vst [vmem:[#allocation153_spill] sm:$0xff] %v7244_v29  ;;  %v2183_v28 = vsel %vm1286_vm1, %v1832_v63, 0.0  ;;  %v7253_v27 = vpop.f32.mrb[67].mxu1 }
 0x190   :  { %11752 = vst [vmem:[#allocation151_spill] sm:$0xff] %v7228_v62  ;;  %v1419_v40 = vsel %vm1286_vm1, %v7228_v62, 0.0  ;;  %v1738_v23 = vmul.f32 %v7228_v62, %v7228_v62  ;;  %11755 = vst [vmem:[#allocation154_spill] sm:$0xff] %v7253_v27  ;;  %v7255_v38 = vadd.f32 %v2183_v28, %v1831_v6  ;;  %v1833_v62 = vmul.f32 %v7244_v29, %v7244_v29 }
 0x191   :  { %11753 = vst [vmem:[#allocation152_spill] sm:$0xff] %v7234_v10  ;;  %v7250_v4 = vadd.f32 %v1419_v40, %v7221_v25  ;;  %v1611_v58 = vsel %vm1286_vm1, %v7253_v27, 0.0  ;;  %v1834_v40 = vmul.f32 %v7253_v27, %v7253_v27 }
 0x192   :  { %v1995_v10 = vsel %vm1286_vm1, %v1738_v23, 0.0  ;;  %v7269_v6 = vadd.f32 %v1611_v58, %v7244_v29  ;;  %v7291_v58 = vpop.f32.mrb[68].mxu1 }
 0x193   :  { %1545 = vadd.xlane.f32.xlu0 %v6656_v47  ;;  %1357 = vadd.xlane.f32.xlu1 %v6687_v52  ;;  %v7266_v63 = vadd.f32 %v1995_v10, %v1737_v48  ;;  %v2187_v23 = vsel %vm1286_vm1, %v1834_v40, 0.0  ;;  %v7276_v47 = vpop.f32.mrb[68].mxu0  ;;  %11761 = vst [vmem:[#allocation160_spill] sm:$0xff] %v7291_v58 }
 0x194   :  { %v7272_v28 = vadd.f32 %v2187_v23, %v1833_v62  ;;  %11758 = vst [vmem:[#allocation157_spill] sm:$0xff] %v7276_v47  ;;  %v7278_v52 = vpop.f32.mrb[69].mxu0  ;;  %v7298_v23 = vpop.f32.mrb[69].mxu1 }
 0x195   :  { %11756 = vst [vmem:[#allocation155_spill] sm:$0xff] %v7266_v63  ;;  %11759 = vst [vmem:[#allocation158_spill] sm:$0xff] %v7278_v52  ;;  %v1423_v10 = vsel %vm1286_vm1, %v7278_v52, 0.0  ;;  %v1740_v48 = vmul.f32 %v7278_v52, %v7278_v52  ;;  %v1615_v29 = vsel %vm1286_vm1, %v7298_v23, 0.0 }
 0x196   :  { %11757 = vst [vmem:[#allocation156_spill] sm:$0xff] %v7272_v28  ;;  %v7293_v40 = vpop.f32.mrb[70].mxu0  ;;  %11764 = vst [vmem:[#allocation163_spill] sm:$0xff] %v7298_v23 }
 0x197   :  { %1929 = vadd.xlane.f32.xlu0 %v6672_v20  ;;  %1549 = vadd.xlane.f32.xlu1 %v6690_v30  ;;  %v1739_v20 = vmul.f32 %v7276_v47, %v7276_v47  ;;  %v7289_v30 = vadd.f32 %v1423_v10, %v7276_v47  ;;  %11762 = vst [vmem:[#allocation161_spill] sm:$0xff] %v7293_v40 }
 0x198   :  { %v1835_v47 = vmul.f32 %v7291_v58, %v7291_v58 }
 0x199   :  { %11760 = vst [vmem:[#allocation159_spill] sm:$0xff] %v7289_v30 }
 0x19b   :  { %2121 = vadd.xlane.f32.xlu0 %v6674_v37  ;;  %1933 = vadd.xlane.f32.xlu1 %v6704_v51  ;;  %v1999_v37 = vsel %vm1286_vm1, %v1740_v48, 0.0  ;;  %v7296_v51 = vpop.f32.mrb[71].mxu0 }
 0x19c   :  { %v1290_v62 = vpop.xlane.xlu0 %1289  ;;  %11763 = vst [vmem:[#allocation162_spill] sm:$0xff] %v7296_v51  ;;  %v7300_v0 = vadd.f32 %v1999_v37, %v1739_v20  ;;  %v1427_v10 = vsel %vm1286_vm1, %v7296_v51, 0.0  ;;  %v1742_v27 = vmul.f32 %v7296_v51, %v7296_v51  ;;  %v1741_v20 = vmul.f32 %v7293_v40, %v7293_v40  ;;  %v7321_v51 = vpop.f32.mrb[70].mxu1 }
 0x19d   :  { %v7319_v37 = vmul.f32 0.0051020407, %v1290_v62  ;;  %11766 = vst [vmem:[#allocation165_spill] sm:$0xff] %v7321_v51  ;;  %v7324_v25 = vadd.f32 %v1427_v10, %v7293_v40  ;;  %v7327_v30 = vpop.f32.mrb[71].mxu1 }
 0x19e   :  { %11765 = vst [vmem:[#allocation164_spill] sm:$0xff] %v7300_v0  ;;  %v2003_v0 = vsel %vm1286_vm1, %v1742_v27, 0.0  ;;  %11768 = vst [vmem:[#allocation167_spill] sm:$0xff] %v7327_v30  ;;  %v1619_v62 = vsel %vm1286_vm1, %v7327_v30, 0.0 }
 0x19f   :  { %2125 = vadd.xlane.f32.xlu1 %v6708_v7  ;;  %1361 = vadd.xlane.f32.xlu0 %v6721_v3  ;;  %v1836_v7 = vmul.f32 %v7298_v23, %v7298_v23  ;;  %v7317_v3 = vadd.f32 %v1615_v29, %v7291_v58  ;;  %11767 = vst [vmem:[#allocation166_spill] sm:$0xff] %v7324_v25 }
 0x1a0   :  { %v1486_v48 = vpop.xlane.xlu1 %1485  ;;  %v1482_v52 = vpop.xlane.xlu0 %1481  ;;  %v7330_v63 = vadd.f32 %v2003_v0, %v1741_v20  ;;  %v1837_v29 = vmul.f32 %v7321_v51, %v7321_v51  ;;  %v1838_v58 = vmul.f32 %v7327_v30, %v7327_v30  ;;  %v7343_v0 = vadd.f32 %v1619_v62, %v7321_v51 }
 0x1a1   :  { %v2191_v28 = vsel %vm1286_vm1, %v1836_v7, 0.0  ;;  %v7338_v10 = vmul.f32 0.0051020407, %v1486_v48 }
 0x1a2   :  { %11769 = vst [vmem:[#allocation168_spill] sm:$0xff] %v7330_v63  ;;  %11771 = vst [vmem:[#allocation170_spill] sm:$0xff] %v7343_v0  ;;  %v7345_v20 = vadd.f32 %v2191_v28, %v1835_v47  ;;  %v2195_v40 = vsel %vm1286_vm1, %v1838_v58, 0.0 }
 0x1a3   :  { %1553 = vadd.xlane.f32.xlu0 %v6724_v26  ;;  %1365 = vadd.xlane.f32.xlu1 %v6755_v59  ;;  %11770 = vst [vmem:[#allocation169_spill] sm:$0xff] %v7338_v10  ;;  %v2439_v26 = vmul.f32 %v7319_v37, %v7319_v37  ;;  %v7349_v59 = vmul.f32 0.0051020407, %v1482_v52  ;;  %v7354_v63 = vadd.f32 %v2195_v40, %v1837_v29 }
 0x1a4   :  { %v1866_v23 = vpop.xlane.xlu0 %1865  ;;  %v1870_v27 = vpop.xlane.xlu1 %1869  ;;  %11772 = vst [vmem:[#allocation171_spill] sm:$0xff] %v7345_v20  ;;  %v7358_v62 = vmul.f32 %v7338_v10, %v7338_v10 }
 0x1a5   :  { %11773 = vst [vmem:[#allocation172_spill] sm:$0xff] %v7349_v59  ;;  %v2343_v7 = vmul.f32 0.0051020407, %v1866_v23  ;;  %11774 = vst [vmem:[#allocation173_spill] sm:$0xff] %v7354_v63  ;;  %v7362_v52 = vmul.f32 %v7349_v59, %v7349_v59  ;;  %v2344_v59 = vmul.f32 0.0051020407, %v1870_v27 }
 0x1a6   :  { %11775 = vst [vmem:[#allocation174_spill] sm:$0xff] %v7358_v62 }
 0x1a7   :  { %v2535_v48 = vsub.f32 %v2343_v7, %v2439_v26  ;;  %1937 = vadd.xlane.f32.xlu0 %v6740_v31  ;;  %1557 = vadd.xlane.f32.xlu1 %v6758_v54  ;;  %11776 = vst [vmem:[#allocation175_spill] sm:$0xff] %v7362_v52  ;;  %v7368_v31 = vpop.f32.mrb[72].mxu0 }
 0x1a8   :  { %v2058_v28 = vpop.xlane.xlu0 %2057  ;;  %v2062_v47 = vpop.xlane.xlu1 %2061  ;;  %11779 = vst [vmem:[#allocation178_spill] sm:$0xff] %v7368_v31 }
 0x1a9   :  { %v2727_v23 = vadd.f32 0.001, %v2535_v48  ;;  %v7364_v30 = vmul.f32 0.0051020407, %v2058_v28  ;;  %v7366_v58 = vmul.f32 0.0051020407, %v2062_v47  ;;  %v1743_v48 = vmul.f32 %v7368_v31, %v7368_v31 }
 0x1aa   :  { %v7376_v29 = vpop.f32.mrb[73].mxu0 }
 0x1ab   :  { %11777 = vst [vmem:[#allocation176_spill] sm:$0xff] %v7364_v30  ;;  %11778 = vst [vmem:[#allocation177_spill] sm:$0xff] %v7366_v58  ;;  %5014 = vrsqrt.f32 %v2727_v23  ;;  %2129 = vadd.xlane.f32.xlu0 %v6742_v11  ;;  %1941 = vadd.xlane.f32.xlu1 %v6772_v44  ;;  %v1431_v28 = vsel %vm1286_vm1, %v7376_v29, 0.0  ;;  %v1744_v47 = vmul.f32 %v7376_v29, %v7376_v29  ;;  %v7391_v44 = vpop.f32.mrb[72].mxu1  ;;  %v7393_v54 = vpop.f32.mrb[74].mxu0 }
 0x1ac   :  { %11780 = vst [vmem:[#allocation179_spill] sm:$0xff] %v7376_v29  ;;  %v1294_v26 = vpop.xlane.xlu0 %1293  ;;  %v1298_v7 = vpop.xlane.xlu1 %1297  ;;  %v7387_v40 = vadd.f32 %v1431_v28, %v7368_v31  ;;  %11783 = vst [vmem:[#allocation182_spill] sm:$0xff] %v7391_v44  ;;  %v1839_v27 = vmul.f32 %v7391_v44, %v7391_v44 }
 0x1ad   :  { %v7384_v23 = vmul.f32 0.0051020407, %v1294_v26  ;;  %v7389_v11 = vmul.f32 0.0051020407, %v1298_v7  ;;  %11784 = vst [vmem:[#allocation183_spill] sm:$0xff] %v7393_v54  ;;  %v2007_v51 = vsel %vm1286_vm1, %v1744_v47, 0.0 }
 0x1ae   :  { %11781 = vst [vmem:[#allocation180_spill] sm:$0xff] %v7387_v40  ;;  %v7400_v26 = vpop.f32.mrb[75].mxu0  ;;  %v7402_v28 = vpop.f32.mrb[73].mxu1  ;;  %v7404_v7 = vadd.f32 %v2007_v51, %v1743_v48 }
 0x1af   :  { %11782 = vst [vmem:[#allocation181_spill] sm:$0xff] %v7389_v11  ;;  %v2440_v10 = vmul.f32 %v7384_v23, %v7384_v23  ;;  %2133 = vadd.xlane.f32.xlu1 %v6776_v35  ;;  %1369 = vadd.xlane.f32.xlu0 %v6789_v21  ;;  %11785 = vst [vmem:[#allocation184_spill] sm:$0xff] %v7400_v26  ;;  %v7408_v47 = vmul.f32 %v7389_v11, %v7389_v11  ;;  %v1435_v35 = vsel %vm1286_vm1, %v7400_v26, 0.0  ;;  %v7414_v21 = vpop.f32.mrb[74].mxu1 }
 0x1b0   :  { %11786 = vst [vmem:[#allocation185_spill] sm:$0xff] %v7402_v28  ;;  %11787 = vst [vmem:[#allocation186_spill] sm:$0xff] %v7404_v7  ;;  %v1490_v29 = vpop.xlane.xlu0 %1489  ;;  %v1302_v31 = vpop.xlane.xlu1 %1301  ;;  %v1746_v58 = vmul.f32 %v7400_v26, %v7400_v26  ;;  %v1623_v51 = vsel %vm1286_vm1, %v7402_v28, 0.0  ;;  %v7425_v48 = vadd.f32 %v1435_v35, %v7393_v54  ;;  %v1745_v26 = vmul.f32 %v7393_v54, %v7393_v54 }
 0x1b1   :  { %v2536_v62 = vsub.f32 %v2344_v59, %v2440_v10  ;;  %11788 = vst [vmem:[#allocation187_spill] sm:$0xff] %v7414_v21  ;;  %v1840_v10 = vmul.f32 %v7402_v28, %v7402_v28  ;;  %v7422_v59 = vpop.f32.mrb[75].mxu1  ;;  %v7427_v52 = vmul.f32 0.0051020407, %v1490_v29  ;;  %v1841_v30 = vmul.f32 %v7414_v21, %v7414_v21  ;;  %v2631_v28 = vld [vmem:[%s11199_s3] sm:$0xff] }
 0x1b2   :  { %11789 = vst [vmem:[#allocation188_spill] sm:$0xff] %v7422_v59  ;;  %11790 = vst [vmem:[#allocation189_spill] sm:$0xff] %v7425_v48  ;;  %v7446_v48 = vmul.f32 0.0051020407, %v1302_v31  ;;  %v2011_v0 = vsel %vm1286_vm1, %v1746_v58, 0.0 }
 0x1b3   :  { %v2728_v11 = vadd.f32 0.001, %v2536_v62  ;;  %11791 = vst [vmem:[#allocation190_spill] sm:$0xff] %v7427_v52  ;;  %1561 = vadd.xlane.f32.xlu0 %v6792_v19  ;;  %1373 = vadd.xlane.f32.xlu1 %v6823_v8  ;;  %v1627_v62 = vsel %vm1286_vm1, %v7422_v59, 0.0  ;;  %v1842_v19 = vmul.f32 %v7422_v59, %v7422_v59  ;;  %v7443_v8 = vadd.f32 %v1623_v51, %v7391_v44 }
 0x1b4   :  { %v1874_v7 = vpop.xlane.xlu0 %1873  ;;  %v1494_v35 = vpop.xlane.xlu1 %1493  ;;  %v2199_v29 = vsel %vm1286_vm1, %v1840_v10, 0.0  ;;  %v7451_v63 = vadd.f32 %v1627_v62, %v7414_v21  ;;  %v7463_v31 = vadd.f32 %v2011_v0, %v1745_v26 }
 0x1b5   :  { %v5015_v54 = vpop.eup %5014  ;;  %5016 = vrsqrt.f32 %v2728_v11  ;;  %v7448_v40 = vmul.f32 0.0051020407, %v1874_v7  ;;  %v7453_v20 = vadd.f32 %v2199_v29, %v1839_v27  ;;  %v2203_v59 = vsel %vm1286_vm1, %v1842_v19, 0.0  ;;  %v7481_v26 = vpop.f32.mrb[76].mxu0 }
 0x1b6   :  { %v7457_v25 = vmul.f32 %v5015_v54, %v2631_v28  ;;  %v7467_v11 = vmul.f32 %v7427_v52, %v7427_v52  ;;  %v7469_v58 = vadd.f32 %v2203_v59, %v1841_v30  ;;  %v2442_v28 = vmul.f32 %v7446_v48, %v7446_v48  ;;  %11795 = vst [vmem:[#allocation194_spill] sm:$0xff] %v7481_v26  ;;  %v7487_v30 = vpop.f32.mrb[77].mxu0 }
 0x1b7   :  { %1945 = vadd.xlane.f32.xlu0 %v6808_v36  ;;  %1565 = vadd.xlane.f32.xlu1 %v6826_v17  ;;  %v7477_v36 = vmul.f32 0.0051020407, %v1494_v35  ;;  %11796 = vst [vmem:[#allocation195_spill] sm:$0xff] %v7487_v30  ;;  %v1747_v35 = vmul.f32 %v7481_v26, %v7481_v26  ;;  %v1439_v19 = vsel %vm1286_vm1, %v7487_v30, 0.0  ;;  %v1748_v29 = vmul.f32 %v7487_v30, %v7487_v30  ;;  %v7509_v10 = vpop.f32.mrb[78].mxu0 }
 0x1b8   :  { %11792 = vst [vmem:[#allocation191_spill] sm:$0xff] %v7467_v11  ;;  %v2066_v7 = vpop.xlane.xlu0 %2065  ;;  %v1878_v27 = vpop.xlane.xlu1 %1877  ;;  %v7473_v54 = vmul.f32 %v7457_v25, %v7319_v37  ;;  %11800 = vst [vmem:[#allocation199_spill] sm:$0xff] %v7509_v10  ;;  %v351_v11 = vld [vmem:[%s11198_s2 + $0x5d8] sm:$0xff] }
 0x1b9   :  { %11794 = vst [vmem:[#allocation193_spill] sm:$0xff] %v7477_v36  ;;  %v7479_v17 = vmul.f32 0.0051020407, %v2066_v7  ;;  %v2346_v0 = vmul.f32 0.0051020407, %v1878_v27  ;;  %v2632_v7 = vld [vmem:[%s11199_s3 + $0x8] sm:$0xff]  ;;  %4936 = vmatprep.mubr.msk.f32.mxu1 %vm356_vm0, %v351_v11 }
 0x1ba   :  { %11793 = vst [vmem:[#allocation192_spill] sm:$0xff] %v7473_v54  ;;  %v2015_v51 = vsel %vm1286_vm1, %v1748_v29, 0.0 }
 0x1bb   :  { %v2538_v62 = vsub.f32 %v2346_v0, %v2442_v28  ;;  %2137 = vadd.xlane.f32.xlu0 %v6810_v42  ;;  %1949 = vadd.xlane.f32.xlu1 %v6840_v39  ;;  %v7500_v42 = vmul.f32 %v7477_v36, %v7477_v36  ;;  %v7505_v28 = vadd.f32 %v1439_v19, %v7481_v26  ;;  %v7507_v0 = vpop.f32.mrb[76].mxu1 }
 0x1bc   :  { %v2070_v37 = vpop.xlane.xlu1 %2069  ;;  %v1306_v59 = vpop.xlane.xlu0 %1305  ;;  %11799 = vst [vmem:[#allocation198_spill] sm:$0xff] %v7507_v0  ;;  %v7522_v19 = vadd.f32 %v2015_v51, %v1747_v35 }
 0x1bd   :  { %11797 = vst [vmem:[#allocation196_spill] sm:$0xff] %v7500_v42  ;;  %v2730_v39 = vadd.f32 0.001, %v2538_v62  ;;  %v7502_v27 = vmul.f32 0.0051020407, %v2070_v37  ;;  %v7518_v62 = vpop.f32.mrb[79].mxu0 }
 0x1be   :  { %v7514_v30 = vmul.f32 0.0051020407, %v1306_v59  ;;  %11802 = vst [vmem:[#allocation201_spill] sm:$0xff] %v7518_v62  ;;  %v7520_v37 = vpop.f32.mrb[77].mxu1 }
 0x1bf   :  { %11798 = vst [vmem:[#allocation197_spill] sm:$0xff] %v7502_v27  ;;  %v5017_v44 = vpop.eup %5016  ;;  %2141 = vadd.xlane.f32.xlu1 %v6844_v46  ;;  %1377 = vadd.xlane.f32.xlu0 %v6857_v32  ;;  %11803 = vst [vmem:[#allocation202_spill] sm:$0xff] %v7520_v37  ;;  %5018 = vrsqrt.f32 %v2730_v39  ;;  %v1443_v46 = vsel %vm1286_vm1, %v7518_v62, 0.0  ;;  %v1750_v32 = vmul.f32 %v7518_v62, %v7518_v62  ;;  %v1631_v59 = vsel %vm1286_vm1, %v7520_v37, 0.0  ;;  %v7536_v51 = vpop.f32.mrb[78].mxu1 }
 0x1c0   :  { %11801 = vst [vmem:[#allocation200_spill] sm:$0xff] %v7514_v30  ;;  %v7524_v26 = vmul.f32 %v5017_v44, %v2632_v7  ;;  %v1498_v29 = vpop.xlane.xlu0 %1497  ;;  %v1310_v52 = vpop.xlane.xlu1 %1309  ;;  %11806 = vst [vmem:[#allocation205_spill] sm:$0xff] %v7536_v51  ;;  %v255_v44 = vld [vmem:[%s11198_s2 + $0x2d8] sm:$0xff]  ;;  %v7546_v35 = vmul.f32 %v7514_v30, %v7514_v30  ;;  %v1843_v39 = vmul.f32 %v7507_v0, %v7507_v0 }
 0x1c1   :  { %v7548_v7 = vmul.f32 0.0051020407, %v1498_v29  ;;  %v1844_v62 = vmul.f32 %v7520_v37, %v7520_v37  ;;  %v7556_v36 = vpop.f32.mrb[79].mxu1  ;;  %v1749_v30 = vmul.f32 %v7509_v10, %v7509_v10  ;;  %v1845_v29 = vmul.f32 %v7536_v51, %v7536_v51  ;;  %4888 = vmatprep.mubr.msk.f32.mxu0 %vm356_vm0, %v255_v44  ;;  %v257_v44 = vld [vmem:[%s11198_s2 + $0x2e8] sm:$0xff] }
 0x1c2   :  { %11804 = vst [vmem:[#allocation203_spill] sm:$0xff] %v7524_v26  ;;  %v7528_v21 = vmul.f32 %v7524_v26, %v7384_v23  ;;  %v254_v23 = vld [vmem:[%s11198_s2 + $0x2d0] sm:$0xff]  ;;  %11807 = vst [vmem:[#allocation206_spill] sm:$0xff] %v7546_v35  ;;  %v7567_v27 = vmul.f32 0.0051020407, %v1310_v52  ;;  %v7572_v54 = vadd.f32 %v1631_v59, %v7507_v0  ;;  %v7575_v26 = vadd.f32 %v1443_v46, %v7509_v10  ;;  %v256_v52 = vld [vmem:[%s11198_s2 + $0x2e0] sm:$0xff] }
 0x1c3   :  { %11808 = vst [vmem:[#allocation207_spill] sm:$0xff] %v7548_v7  ;;  %1569 = vadd.xlane.f32.xlu0 %v6860_v13  ;;  %1381 = vadd.xlane.f32.xlu1 %v6891_v41  ;;  %11809 = vst [vmem:[#allocation208_spill] sm:$0xff] %v7556_v36  ;;  %v1635_v13 = vsel %vm1286_vm1, %v7556_v36, 0.0  ;;  %v1846_v41 = vmul.f32 %v7556_v36, %v7556_v36  ;;  %v2207_v59 = vsel %vm1286_vm1, %v1844_v62, 0.0 }
 0x1c4   :  { %11805 = vst [vmem:[#allocation204_spill] sm:$0xff] %v7528_v21  ;;  %v1882_v21 = vpop.xlane.xlu0 %1881  ;;  %v1502_v42 = vpop.xlane.xlu1 %1501  ;;  %980 = vmatmul.mubr.f32.gmra.mrb[90].mxu0 %v254_v23  ;;  %v7592_v46 = vadd.f32 %v1635_v13, %v7536_v51  ;;  %v2019_v23 = vsel %vm1286_vm1, %v1750_v32, 0.0  ;;  %v7605_v36 = vmul.f32 %v7548_v7, %v7548_v7 }
 0x1c5   :  { %v7569_v37 = vmul.f32 0.0051020407, %v1882_v21  ;;  %4889 = vmatprep.mubr.msk.f32.mxu0 %vm356_vm0, %v257_v44  ;;  %v350_v21 = vld [vmem:[%s11198_s2 + $0x5d0] sm:$0xff]  ;;  %v2211_v0 = vsel %vm1286_vm1, %v1846_v41, 0.0  ;;  %v7601_v44 = vadd.f32 %v2207_v59, %v1843_v39  ;;  %v7607_v62 = vadd.f32 %v2019_v23, %v1749_v30  ;;  %v2634_v41 = vld [vmem:[%s11199_s3 + $0x18] sm:$0xff]  ;;  %v353_v30 = vld [vmem:[%s11198_s2 + $0x5e8] sm:$0xff] }
 0x1c6   :  { %1268 = vmatmul.mubr.f32.gmra.mrb[90].mxu1 %v350_v21  ;;  %v7609_v32 = vadd.f32 %v2211_v0, %v1845_v29  ;;  %v352_v0 = vld [vmem:[%s11198_s2 + $0x5e0] sm:$0xff]  ;;  %v7630_v23 = vpop.f32.mrb[80].mxu0 }
 0x1c7   :  { %1953 = vadd.xlane.f32.xlu0 %v6876_v60  ;;  %1573 = vadd.xlane.f32.xlu1 %v6894_v16  ;;  %v2444_v60 = vmul.f32 %v7567_v27, %v7567_v27  ;;  %v7616_v16 = vmul.f32 0.0051020407, %v1502_v42  ;;  %v11811_v42 = vld [vmem:[#allocation101_spill] sm:$0xff] }
 0x1c8   :  { %v2074_v13 = vpop.xlane.xlu0 %2073  ;;  %v1886_v51 = vpop.xlane.xlu1 %1885  ;;  %986 = vmatmul.mubr.f32.gmra.mrb[92].mxu0 %v256_v52  ;;  %11812 = vst [vmem:[#allocation101_spill] sm:$0xff] %v7630_v23  ;;  %4937 = vmatprep.mubr.msk.f32.mxu1 %vm356_vm0, %v353_v30 }
 0x1c9   :  { %11810 = vst [vmem:[#allocation209_spill] sm:$0xff] %v7616_v16  ;;  %v7618_v39 = vmul.f32 0.0051020407, %v2074_v13  ;;  %v2348_v59 = vmul.f32 0.0051020407, %v1886_v51  ;;  %v5019_v11 = vpop.eup %5018  ;;  %v7637_v10 = vmul.f32 %v7616_v16, %v7616_v16  ;;  %v7653_v30 = vpop.f32.mrb[80].mxu1 }
 0x1ca   :  { %v7632_v51 = vmul.f32 %v5019_v11, %v2634_v41  ;;  %1274 = vmatmul.mubr.f32.gmra.mrb[92].mxu1 %v352_v0  ;;  %v11818_v41 = vld [vmem:[#allocation105_spill] sm:$0xff]  ;;  %v11822_v11 = vld [vmem:[#allocation103_spill] sm:$0xff] }
 0x1cb   :  { %v2540_v21 = vsub.f32 %v2348_v59, %v2444_v60  ;;  %2145 = vadd.xlane.f32.xlu0 %v6878_v53  ;;  %1957 = vadd.xlane.f32.xlu1 %v11811_v42  ;;  %11814 = vst [vmem:[#allocation211_spill] sm:$0xff] %v7637_v10  ;;  %v7645_v60 = vpop.f32.mrb[81].mxu0  ;;  %11819 = vst [vmem:[#allocation105_spill] sm:$0xff] %v7653_v30  ;;  %v11832_v10 = vld [vmem:[#allocation114_spill] sm:$0xff] }
 0x1cc   :  { %11813 = vst [vmem:[#allocation210_spill] sm:$0xff] %v7632_v51  ;;  %v2078_v52 = vpop.xlane.xlu1 %2077  ;;  %v1314_v13 = vpop.xlane.xlu0 %1313  ;;  %v7643_v53 = vmul.f32 %v7632_v51, %v7446_v48  ;;  %11817 = vst [vmem:[#allocation214_spill] sm:$0xff] %v7645_v60  ;;  %v1447_v59 = vsel %vm1286_vm1, %v7645_v60, 0.0  ;;  %v1752_v42 = vmul.f32 %v7645_v60, %v7645_v60  ;;  %v11827_v51 = vld [vmem:[#allocation109_spill] sm:$0xff] }
 0x1cd   :  { %v2732_v7 = vadd.f32 0.001, %v2540_v21  ;;  %v7639_v35 = vmul.f32 0.0051020407, %v2078_v52  ;;  %v7655_v0 = vmul.f32 0.0051020407, %v1314_v13  ;;  %v7660_v52 = vadd.f32 %v1447_v59, %v7630_v23 }
 0x1ce   :  { %11816 = vst [vmem:[#allocation213_spill] sm:$0xff] %v7643_v53 }
 0x1cf   :  { %11815 = vst [vmem:[#allocation212_spill] sm:$0xff] %v7639_v35  ;;  %2149 = vadd.xlane.f32.xlu1 %v6920_v9  ;;  %1385 = vadd.xlane.f32.xlu0 %v11818_v41  ;;  %5020 = vrsqrt.f32 %v2732_v7  ;;  %11820 = vst [vmem:[#allocation215_spill] sm:$0xff] %v7655_v0  ;;  %v1751_v9 = vmul.f32 %v7630_v23, %v7630_v23  ;;  %v7664_v41 = vpop.f32.mrb[81].mxu1  ;;  %v7670_v7 = vmul.f32 %v7655_v0, %v7655_v0 }
 0x1d0   :  { %v1506_v21 = vpop.xlane.xlu0 %1505  ;;  %v1318_v48 = vpop.xlane.xlu1 %1317  ;;  %11821 = vst [vmem:[#allocation216_spill] sm:$0xff] %v7664_v41  ;;  %v1639_v59 = vsel %vm1286_vm1, %v7664_v41, 0.0 }
 0x1d1   :  { %11823 = vst [vmem:[#allocation103_spill] sm:$0xff] %v7670_v7  ;;  %v7672_v13 = vmul.f32 0.0051020407, %v1506_v21  ;;  %v7676_v16 = vmul.f32 0.0051020407, %v1318_v48  ;;  %v7681_v53 = vadd.f32 %v1639_v59, %v7653_v30  ;;  %v11836_v7 = vld [vmem:[#allocation117_spill] sm:$0xff] }
 0x1d3   :  { %1577 = vadd.xlane.f32.xlu0 %v11822_v11  ;;  %1389 = vadd.xlane.f32.xlu1 %v6959_v18  ;;  %11824 = vst [vmem:[#allocation217_spill] sm:$0xff] %v7672_v13  ;;  %11825 = vst [vmem:[#allocation218_spill] sm:$0xff] %v7676_v16  ;;  %v2023_v18 = vsel %vm1286_vm1, %v1752_v42, 0.0  ;;  %v1848_v11 = vmul.f32 %v7664_v41, %v7664_v41  ;;  %v7696_v48 = vmul.f32 %v7672_v13, %v7672_v13 }
 0x1d4   :  { %v1890_v29 = vpop.xlane.xlu0 %1889  ;;  %v1510_v60 = vpop.xlane.xlu1 %1509  ;;  %v7686_v0 = vadd.f32 %v2023_v18, %v1751_v9  ;;  %v2636_v9 = vld [vmem:[%s11199_s3 + $0x28] sm:$0xff]  ;;  %v7703_v18 = vmul.f32 %v7676_v16, %v7676_v16 }
 0x1d5   :  { %v7678_v23 = vmul.f32 0.0051020407, %v1890_v29  ;;  %v1847_v29 = vmul.f32 %v7653_v30, %v7653_v30  ;;  %11828 = vst [vmem:[#allocation109_spill] sm:$0xff] %v7696_v48  ;;  %v2215_v30 = vsel %vm1286_vm1, %v1848_v11, 0.0 }
 0x1d7   :  { %11826 = vst [vmem:[#allocation219_spill] sm:$0xff] %v7678_v23  ;;  %1961 = vadd.xlane.f32.xlu0 %v11827_v51  ;;  %1581 = vadd.xlane.f32.xlu1 %v6962_v45  ;;  %v7705_v51 = vmul.f32 0.0051020407, %v1510_v60  ;;  %v11831_v23 = vld [vmem:[#allocation110_spill] sm:$0xff]  ;;  %v7718_v16 = vadd.f32 %v2215_v30, %v1847_v29  ;;  %v5206_v29 = vmov 0  }
 0x1d8   :  { %v2082_v42 = vpop.xlane.xlu0 %2081  ;;  %v1894_v59 = vpop.xlane.xlu1 %1893  ;;  %5013 = vset.pattern.permute.xlu1 %v5206_v29  ;;  %5012 = vset.pattern.permute.xlu0 %v5206_v29 }
 0x1d9   :  { %11829 = vst [vmem:[#allocation220_spill] sm:$0xff] %v7705_v51  ;;  %v7707_v45 = vmul.f32 0.0051020407, %v2082_v42  ;;  %v7709_v21 = vmul.f32 0.0051020407, %v1894_v59  ;;  %v5021_v41 = vpop.eup %5020  ;;  %v7724_v59 = vmul.f32 %v7705_v51, %v7705_v51 }
 0x1da   :  { %v7720_v35 = vmul.f32 %v5021_v41, %v2636_v9 }
 0x1db   :  { %11830 = vst [vmem:[#allocation221_spill] sm:$0xff] %v7707_v45  ;;  %2153 = vadd.xlane.f32.xlu0 %v11831_v23  ;;  %1965 = vadd.xlane.f32.xlu1 %v11832_v10  ;;  %v11835_v10 = vld [vmem:[#allocation116_spill] sm:$0xff] }
 0x1dc   :  { %v2086_v60 = vpop.xlane.xlu1 %2085  ;;  %v1322_v42 = vpop.xlane.xlu0 %1321  ;;  %11833 = vst [vmem:[#allocation110_spill] sm:$0xff] %v7720_v35  ;;  %v7730_v13 = vmul.f32 %v7720_v35, %v7567_v27 }
 0x1dd   :  { %v7726_v11 = vmul.f32 0.0051020407, %v2086_v60  ;;  %v2255_v9 = vmul.f32 0.0051020407, %v1322_v42 }
 0x1de   :  { %11834 = vst [vmem:[#allocation114_spill] sm:$0xff] %v7730_v13 }
 0x1df   :  { %2157 = vadd.xlane.f32.xlu1 %v6992_v49  ;;  %1393 = vadd.xlane.f32.xlu0 %v11835_v10  ;;  %v2447_v13 = vmul.f32 %v2255_v9, %v2255_v9  ;;  %v11838_v10 = vld [vmem:[#allocation122_spill] sm:$0xff] }
 0x1e0   :  { %v1514_v30 = vpop.xlane.xlu0 %1513  ;;  %v1326_v41 = vpop.xlane.xlu1 %1325 }
 0x1e1   :  { %v7738_v60 = vmul.f32 0.0051020407, %v1514_v30  ;;  %v7740_v23 = vmul.f32 0.0051020407, %v1326_v41 }
 0x1e3   :  { %1585 = vadd.xlane.f32.xlu0 %v11836_v7  ;;  %1397 = vadd.xlane.f32.xlu1 %v7034_v2  ;;  %11837 = vst [vmem:[#allocation116_spill] sm:$0xff] %v7738_v60  ;;  %v7746_v42 = vmul.f32 %v7738_v60, %v7738_v60  ;;  %v2448_v29 = vmul.f32 %v7740_v23, %v7740_v23 }
 0x1e4   :  { %v1898_v27 = vpop.xlane.xlu0 %1897  ;;  %v1518_v51 = vpop.xlane.xlu1 %1517 }
 0x1e5   :  { %v2351_v49 = vmul.f32 0.0051020407, %v1898_v27  ;;  %11839 = vst [vmem:[#allocation117_spill] sm:$0xff] %v7746_v42  ;;  %v7748_v7 = vmul.f32 0.0051020407, %v1518_v51 }
 0x1e7   :  { %v2543_v35 = vsub.f32 %v2351_v49, %v2447_v13  ;;  %1969 = vadd.xlane.f32.xlu0 %v11838_v10  ;;  %1589 = vadd.xlane.f32.xlu1 %v7037_v1  ;;  %11840 = vst [vmem:[#allocation122_spill] sm:$0xff] %v7748_v7  ;;  %v11842_v49 = vld [vmem:[#allocation126_spill] sm:$0xff]  ;;  %v7760_v60 = vmul.f32 %v7748_v7, %v7748_v7  ;;  %v11850_v13 = vld [vmem:[#allocation133_spill] sm:$0xff] }
 0x1e8   :  { %v2090_v2 = vpop.xlane.xlu0 %2089  ;;  %v1902_v30 = vpop.xlane.xlu1 %1901 }
 0x1e9   :  { %v2735_v48 = vadd.f32 0.001, %v2543_v35  ;;  %v7752_v41 = vmul.f32 0.0051020407, %v2090_v2  ;;  %v2352_v27 = vmul.f32 0.0051020407, %v1902_v30 }
 0x1eb   :  { %11841 = vst [vmem:[#allocation222_spill] sm:$0xff] %v7752_v41  ;;  %5022 = vrsqrt.f32 %v2735_v48  ;;  %v2544_v1 = vsub.f32 %v2352_v27, %v2448_v29  ;;  %2161 = vadd.xlane.f32.xlu0 %v7039_v34  ;;  %1973 = vadd.xlane.f32.xlu1 %v11842_v49  ;;  %v11844_v29 = vld [vmem:[#allocation128_spill] sm:$0xff]  ;;  %v2639_v27 = vld [vmem:[%s11199_s3 + $0x40] sm:$0xff] }
 0x1ec   :  { %v2094_v51 = vpop.xlane.xlu1 %2093  ;;  %v1330_v10 = vpop.xlane.xlu0 %1329 }
 0x1ed   :  { %v2736_v45 = vadd.f32 0.001, %v2544_v1  ;;  %v7762_v35 = vmul.f32 0.0051020407, %v2094_v51  ;;  %v7768_v30 = vmul.f32 0.0051020407, %v1330_v10 }
 0x1ef   :  { %2165 = vadd.xlane.f32.xlu1 %v7074_v24  ;;  %1401 = vadd.xlane.f32.xlu0 %v7077_v55  ;;  %5024 = vrsqrt.f32 %v2736_v45  ;;  %11843 = vst [vmem:[#allocation126_spill] sm:$0xff] %v7768_v30  ;;  %v7779_v55 = vmul.f32 %v7768_v30, %v7768_v30 }
 0x1f0   :  { %v1522_v34 = vpop.xlane.xlu0 %1521  ;;  %v1334_v2 = vpop.xlane.xlu1 %1333 }
 0x1f1   :  { %v7775_v1 = vmul.f32 0.0051020407, %v1522_v34  ;;  %11846 = vst [vmem:[#allocation223_spill] sm:$0xff] %v7779_v55  ;;  %v7781_v45 = vmul.f32 0.0051020407, %v1334_v2  ;;  %v2640_v2 = vld [vmem:[%s11199_s3 + $0x48] sm:$0xff] }
 0x1f3   :  { %1593 = vadd.xlane.f32.xlu0 %v11844_v29  ;;  %1405 = vadd.xlane.f32.xlu1 %v7112_v50  ;;  %11845 = vst [vmem:[#allocation128_spill] sm:$0xff] %v7775_v1  ;;  %11847 = vst [vmem:[#allocation224_spill] sm:$0xff] %v7781_v45  ;;  %v7793_v34 = vmul.f32 %v7775_v1, %v7775_v1 }
 0x1f4   :  { %v1906_v49 = vpop.xlane.xlu0 %1905  ;;  %v1526_v51 = vpop.xlane.xlu1 %1525 }
 0x1f5   :  { %v5023_v24 = vpop.eup %5022  ;;  %v7783_v10 = vmul.f32 0.0051020407, %v1906_v49  ;;  %11851 = vst [vmem:[#allocation133_spill] sm:$0xff] %v7793_v34  ;;  %v7803_v49 = vmul.f32 %v7781_v45, %v7781_v45  ;;  %v11863_v34 = vld [vmem:[#allocation140_spill] sm:$0xff] }
 0x1f6   :  { %v7785_v29 = vmul.f32 %v5023_v24, %v2639_v27 }
 0x1f7   :  { %11848 = vst [vmem:[#allocation225_spill] sm:$0xff] %v7783_v10  ;;  %1977 = vadd.xlane.f32.xlu0 %v11850_v13  ;;  %1597 = vadd.xlane.f32.xlu1 %v7115_v56  ;;  %v7805_v13 = vmul.f32 0.0051020407, %v1526_v51 }
 0x1f8   :  { %11849 = vst [vmem:[#allocation226_spill] sm:$0xff] %v7785_v29  ;;  %v2098_v48 = vpop.xlane.xlu0 %2097  ;;  %v1910_v7 = vpop.xlane.xlu1 %1909  ;;  %v7799_v27 = vmul.f32 %v7785_v29, %v2255_v9  ;;  %v11855_v9 = vld [vmem:[#allocation137_spill] sm:$0xff] }
 0x1f9   :  { %11853 = vst [vmem:[#allocation228_spill] sm:$0xff] %v7805_v13  ;;  %v7807_v56 = vmul.f32 0.0051020407, %v2098_v48  ;;  %v7809_v24 = vmul.f32 0.0051020407, %v1910_v7  ;;  %v5025_v50 = vpop.eup %5024  ;;  %v7821_v48 = vmul.f32 %v7805_v13, %v7805_v13 }
 0x1fa   :  { %11852 = vst [vmem:[#allocation227_spill] sm:$0xff] %v7799_v27  ;;  %v7817_v27 = vmul.f32 %v5025_v50, %v2640_v2 }
 0x1fb   :  { %11854 = vst [vmem:[#allocation229_spill] sm:$0xff] %v7807_v56  ;;  %2169 = vadd.xlane.f32.xlu0 %v7117_v22  ;;  %1981 = vadd.xlane.f32.xlu1 %v11855_v9  ;;  %v11858_v22 = vld [vmem:[#allocation139_spill] sm:$0xff] }
 0x1fc   :  { %11856 = vst [vmem:[#allocation137_spill] sm:$0xff] %v7817_v27  ;;  %v2102_v45 = vpop.xlane.xlu1 %2101  ;;  %v1338_v51 = vpop.xlane.xlu0 %1337  ;;  %v7827_v1 = vmul.f32 %v7817_v27, %v7740_v23 }
 0x1fd   :  { %v7823_v7 = vmul.f32 0.0051020407, %v2102_v45  ;;  %v7833_v50 = vpop.f32.mrb[82].mxu0  ;;  %v7835_v29 = vmul.f32 0.0051020407, %v1338_v51 }
 0x1fe   :  { %11857 = vst [vmem:[#allocation230_spill] sm:$0xff] %v7827_v1  ;;  %11859 = vst [vmem:[#allocation139_spill] sm:$0xff] %v7833_v50  ;;  %v7837_v13 = vpop.f32.mrb[83].mxu0  ;;  %v1753_v51 = vmul.f32 %v7833_v50, %v7833_v50 }
 0x1ff   :  { %2173 = vadd.xlane.f32.xlu1 %v7153_v12  ;;  %1409 = vadd.xlane.f32.xlu0 %v11858_v22  ;;  %11860 = vst [vmem:[#allocation231_spill] sm:$0xff] %v7835_v29  ;;  %11861 = vst [vmem:[#allocation232_spill] sm:$0xff] %v7837_v13  ;;  %v1451_v23 = vsel %vm1286_vm1, %v7837_v13, 0.0 }
 0x200   :  { %v1530_v2 = vpop.xlane.xlu0 %1529  ;;  %v1342_v9 = vpop.xlane.xlu1 %1341  ;;  %v7854_v55 = vadd.f32 %v1451_v23, %v7833_v50 }
 0x201   :  { %v7839_v45 = vmul.f32 0.0051020407, %v1530_v2  ;;  %v7845_v12 = vpop.f32.mrb[82].mxu1  ;;  %v7847_v22 = vmul.f32 0.0051020407, %v1342_v9  ;;  %v1754_v2 = vmul.f32 %v7837_v13, %v7837_v13 }
 0x202   :  { %11864 = vst [vmem:[#allocation140_spill] sm:$0xff] %v7845_v12  ;;  %v1849_v9 = vmul.f32 %v7845_v12, %v7845_v12  ;;  %v7864_v10 = vpop.f32.mrb[83].mxu1 }
 0x203   :  { %11862 = vst [vmem:[#allocation233_spill] sm:$0xff] %v7839_v45  ;;  %1601 = vadd.xlane.f32.xlu0 %v11863_v34  ;;  %1413 = vadd.xlane.f32.xlu1 %v7191_v61  ;;  %11865 = vst [vmem:[#allocation234_spill] sm:$0xff] %v7847_v22  ;;  %v7858_v61 = vmul.f32 %v7835_v29, %v7835_v29  ;;  %v1643_v42 = vsel %vm1286_vm1, %v7864_v10, 0.0  ;;  %v1850_v13 = vmul.f32 %v7864_v10, %v7864_v10  ;;  %v11869_v29 = vld [vmem:[#allocation145_spill] sm:$0xff] }
 0x204   :  { %v1914_v30 = vpop.xlane.xlu0 %1913  ;;  %v1534_v56 = vpop.xlane.xlu1 %1533  ;;  %11868 = vst [vmem:[#allocation237_spill] sm:$0xff] %v7864_v10  ;;  %v2027_v23 = vsel %vm1286_vm1, %v1754_v2, 0.0  ;;  %v7880_v41 = vmul.f32 %v7839_v45, %v7839_v45  ;;  %v7884_v1 = vmul.f32 %v7847_v22, %v7847_v22 }
 0x205   :  { %11866 = vst [vmem:[#allocation235_spill] sm:$0xff] %v7858_v61  ;;  %v7860_v34 = vmul.f32 0.0051020407, %v1914_v30  ;;  %v7876_v30 = vadd.f32 %v1643_v42, %v7845_v12  ;;  %v7886_v27 = vadd.f32 %v2027_v23, %v1753_v51  ;;  %v2219_v50 = vsel %vm1286_vm1, %v1850_v13, 0.0 }
 0x206   :  { %11870 = vst [vmem:[#allocation145_spill] sm:$0xff] %v7880_v41  ;;  %v7895_v12 = vadd.f32 %v2219_v50, %v1849_v9  ;;  %v354_v41 = vld [vmem:[%s11198_s2 + $0x5f0] sm:$0xff] }
 0x207   :  { %11867 = vst [vmem:[#allocation236_spill] sm:$0xff] %v7860_v34  ;;  %1985 = vadd.xlane.f32.xlu0 %v11869_v29  ;;  %1605 = vadd.xlane.f32.xlu1 %v7194_v57  ;;  %v7889_v29 = vmul.f32 0.0051020407, %v1534_v56 }
 0x208   :  { %v2106_v10 = vpop.xlane.xlu0 %2105  ;;  %v1918_v2 = vpop.xlane.xlu1 %1917 }
 0x209   :  { %11871 = vst [vmem:[#allocation238_spill] sm:$0xff] %v7889_v29  ;;  %v7891_v57 = vmul.f32 0.0051020407, %v2106_v10  ;;  %v7893_v42 = vmul.f32 0.0051020407, %v1918_v2  ;;  %v7905_v10 = vmul.f32 %v7889_v29, %v7889_v29 }
 0x20b   :  { %11872 = vst [vmem:[#allocation239_spill] sm:$0xff] %v7891_v57  ;;  %2177 = vadd.xlane.f32.xlu0 %v7196_v15  ;;  %1989 = vadd.xlane.f32.xlu1 %v7206_v14  ;;  %11873 = vst [vmem:[#allocation240_spill] sm:$0xff] %v7905_v10  ;;  %v259_v14 = vld [vmem:[%s11198_s2 + $0x2f8] sm:$0xff] }
 0x20c   :  { %v2110_v51 = vpop.xlane.xlu1 %2109  ;;  %v1346_v13 = vpop.xlane.xlu0 %1345  ;;  %4890 = vmatprep.mubr.msk.f32.mxu0 %vm356_vm0, %v259_v14 }
 0x20d   :  { %v7907_v56 = vmul.f32 0.0051020407, %v2110_v51  ;;  %v7916_v15 = vmul.f32 0.0051020407, %v1346_v13  ;;  %v258_v51 = vld [vmem:[%s11198_s2 + $0x2f0] sm:$0xff] }
 0x20e   :  { %992 = vmatmul.mubr.f32.gmra.mrb[94].mxu0 %v258_v51 }
 0x20f   :  { %2181 = vadd.xlane.f32.xlu1 %v7208_v43  ;;  %1417 = vadd.xlane.f32.xlu0 %v7219_v5  ;;  %11874 = vst [vmem:[#allocation241_spill] sm:$0xff] %v7916_v15  ;;  %v355_v5 = vld [vmem:[%s11198_s2 + $0x5f8] sm:$0xff] }
 0x210   :  { %v1538_v9 = vpop.xlane.xlu0 %1537  ;;  %v1350_v23 = vpop.xlane.xlu1 %1349  ;;  %4938 = vmatprep.mubr.msk.f32.mxu1 %vm356_vm0, %v355_v5 }
 0x211   :  { %v7919_v2 = vpop.f32.mrb[84].mxu0  ;;  %v7931_v13 = vmul.f32 0.0051020407, %v1538_v9  ;;  %1280 = vmatmul.mubr.f32.gmra.mrb[94].mxu1 %v354_v41 }
 0x212   :  { %11875 = vst [vmem:[#allocation242_spill] sm:$0xff] %v7919_v2  ;;  %v7926_v43 = vpop.f32.mrb[85].mxu0 }
 0x213   :  { %1609 = vadd.xlane.f32.xlu0 %v7247_v33  ;;  %1421 = vadd.xlane.f32.xlu1 %v7250_v4  ;;  %11876 = vst [vmem:[#allocation243_spill] sm:$0xff] %v7926_v43  ;;  %11877 = vst [vmem:[#allocation244_spill] sm:$0xff] %v7931_v13  ;;  %v1455_v50 = vsel %vm1286_vm1, %v7926_v43, 0.0  ;;  %v7940_v33 = vmul.f32 %v7916_v15, %v7916_v15  ;;  %v7942_v4 = vmul.f32 0.0051020407, %v1350_v23 }
 0x214   :  { %v1922_v45 = vpop.xlane.xlu0 %1921  ;;  %v7933_v14 = vpop.xlane.xlu1 %1541  ;;  %v7949_v9 = vadd.f32 %v1455_v50, %v7919_v2  ;;  %v1756_v51 = vmul.f32 %v7926_v43, %v7926_v43  ;;  %v1755_v50 = vmul.f32 %v7919_v2, %v7919_v2  ;;  %v7971_v41 = vmul.f32 %v7931_v13, %v7931_v13 }
 0x215   :  { %11878 = vst [vmem:[#allocation245_spill] sm:$0xff] %v7940_v33  ;;  %11879 = vst [vmem:[#allocation246_spill] sm:$0xff] %v7942_v4  ;;  %v7944_v22 = vmul.f32 0.0051020407, %v1922_v45  ;;  %v7946_v29 = vpop.f32.mrb[84].mxu1  ;;  %v11883_v45 = vld [vmem:[#allocation152_spill] sm:$0xff] }
 0x216   :  { %11881 = vst [vmem:[#allocation248_spill] sm:$0xff] %v7946_v29  ;;  %v7956_v5 = vpop.f32.mrb[85].mxu1  ;;  %11884 = vst [vmem:[#allocation152_spill] sm:$0xff] %v7971_v41  ;;  %v1851_v2 = vmul.f32 %v7946_v29, %v7946_v29  ;;  %v11898_v41 = vld [vmem:[#allocation168_spill] sm:$0xff] }
 0x217   :  { %11880 = vst [vmem:[#allocation247_spill] sm:$0xff] %v7944_v22  ;;  %11882 = vst [vmem:[#allocation249_spill] sm:$0xff] %v7956_v5  ;;  %1993 = vadd.xlane.f32.xlu0 %v11883_v45  ;;  %1613 = vadd.xlane.f32.xlu1 %v7269_v6  ;;  %v1647_v15 = vsel %vm1286_vm1, %v7956_v5, 0.0  ;;  %v7975_v45 = vmul.f32 %v7942_v4, %v7942_v4  ;;  %v1852_v33 = vmul.f32 %v7956_v5, %v7956_v5  ;;  %v11887_v5 = vld [vmem:[#allocation156_spill] sm:$0xff] }
 0x218   :  { %v2114_v57 = vpop.xlane.xlu0 %2113  ;;  %v1926_v61 = vpop.xlane.xlu1 %1925  ;;  %v7967_v43 = vadd.f32 %v1647_v15, %v7946_v29  ;;  %v2031_v15 = vsel %vm1286_vm1, %v1756_v51, 0.0  ;;  %v11888_v51 = vld [vmem:[#allocation159_spill] sm:$0xff] }
 0x219   :  { %v7977_v6 = vmul.f32 0.0051020407, %v2114_v57  ;;  %v7979_v23 = vmul.f32 0.0051020407, %v1926_v61  ;;  %v11886_v57 = vld [vmem:[#allocation155_spill] sm:$0xff]  ;;  %v7992_v61 = vadd.f32 %v2031_v15, %v1755_v50  ;;  %v2223_v34 = vsel %vm1286_vm1, %v1852_v33, 0.0 }
 0x21a   :  { %v7999_v10 = vadd.f32 %v2223_v34, %v1851_v2  ;;  %v11891_v50 = vld [vmem:[#allocation166_spill] sm:$0xff]  ;;  %v11894_v2 = vld [vmem:[#allocation164_spill] sm:$0xff] }
 0x21b   :  { %11885 = vst [vmem:[#allocation250_spill] sm:$0xff] %v7977_v6  ;;  %2185 = vadd.xlane.f32.xlu0 %v7255_v38  ;;  %1997 = vadd.xlane.f32.xlu1 %v11886_v57 }
 0x21c   :  { %v7994_v4 = vpop.xlane.xlu1 %2117  ;;  %v1354_v29 = vpop.xlane.xlu0 %1353 }
 0x21d   :  { %v8005_v38 = vmul.f32 0.0051020407, %v1354_v29  ;;  %v11895_v29 = vld [vmem:[#allocation170_spill] sm:$0xff] }
 0x21f   :  { %2189 = vadd.xlane.f32.xlu1 %v11887_v5  ;;  %1425 = vadd.xlane.f32.xlu0 %v11888_v51  ;;  %11890 = vst [vmem:[#allocation156_spill] sm:$0xff] %v8005_v38  ;;  %v8013_v33 = vmul.f32 %v8005_v38, %v8005_v38 }
 0x220   :  { %v8001_v13 = vpop.xlane.xlu0 %1545  ;;  %v8003_v22 = vpop.xlane.xlu1 %1357 }
 0x221   :  { %11889 = vst [vmem:[#allocation155_spill] sm:$0xff] %v8001_v13  ;;  %11892 = vst [vmem:[#allocation159_spill] sm:$0xff] %v8013_v33  ;;  %v11901_v13 = vld [vmem:[#allocation180_spill] sm:$0xff] }
 0x223   :  { %1617 = vadd.xlane.f32.xlu0 %v7317_v3  ;;  %1429 = vadd.xlane.f32.xlu1 %v11891_v50  ;;  %v11897_v50 = vld [vmem:[#allocation171_spill] sm:$0xff] }
 0x224   :  { %v1930_v15 = vpop.xlane.xlu0 %1929  ;;  %v8009_v57 = vpop.xlane.xlu1 %1549 }
 0x225   :  { %v8015_v5 = vmul.f32 0.0051020407, %v1930_v15  ;;  %v11900_v15 = vld [vmem:[#allocation173_spill] sm:$0xff] }
 0x227   :  { %11893 = vst [vmem:[#allocation166_spill] sm:$0xff] %v8015_v5  ;;  %2001 = vadd.xlane.f32.xlu0 %v11894_v2  ;;  %1621 = vadd.xlane.f32.xlu1 %v11895_v29  ;;  %v11903_v29 = vld [vmem:[#allocation189_spill] sm:$0xff] }
 0x228   :  { %v8021_v51 = vpop.xlane.xlu0 %2121  ;;  %v8023_v3 = vpop.xlane.xlu1 %1933 }
 0x229   :  { %11896 = vst [vmem:[#allocation164_spill] sm:$0xff] %v8021_v51 }
 0x22b   :  { %2193 = vadd.xlane.f32.xlu0 %v11897_v50  ;;  %2005 = vadd.xlane.f32.xlu1 %v11898_v41  ;;  %v11905_v41 = vld [vmem:[#allocation186_spill] sm:$0xff] }
 0x22c   :  { %v8027_v6 = vpop.xlane.xlu1 %2125  ;;  %v8029_v38 = vpop.xlane.xlu0 %1361 }
 0x22d   :  { %11899 = vst [vmem:[#allocation170_spill] sm:$0xff] %v8029_v38 }
 0x22f   :  { %2197 = vadd.xlane.f32.xlu1 %v11900_v15  ;;  %1433 = vadd.xlane.f32.xlu0 %v11901_v13 }
 0x230   :  { %v8033_v34 = vpop.xlane.xlu0 %1553  ;;  %v8035_v2 = vpop.xlane.xlu1 %1365 }
 0x231   :  { %11902 = vst [vmem:[#allocation171_spill] sm:$0xff] %v8033_v34 }
 0x233   :  { %1625 = vadd.xlane.f32.xlu0 %v7443_v8  ;;  %1437 = vadd.xlane.f32.xlu1 %v11903_v29 }
 0x234   :  { %v8039_v33 = vpop.xlane.xlu0 %1937  ;;  %v8041_v50 = vpop.xlane.xlu1 %1557 }
 0x235   :  { %11904 = vst [vmem:[#allocation168_spill] sm:$0xff] %v8039_v33 }
 0x237   :  { %2009 = vadd.xlane.f32.xlu0 %v11905_v41  ;;  %1629 = vadd.xlane.f32.xlu1 %v7451_v63 }
 0x238   :  { %v8045_v5 = vpop.xlane.xlu0 %2129  ;;  %v8047_v15 = vpop.xlane.xlu1 %1941 }
 0x239   :  { %11906 = vst [vmem:[#allocation173_spill] sm:$0xff] %v8045_v5 }
 0x23b   :  { %2201 = vadd.xlane.f32.xlu0 %v7453_v20  ;;  %2013 = vadd.xlane.f32.xlu1 %v7463_v31 }
 0x23c   :  { %v8051_v13 = vpop.xlane.xlu1 %2133  ;;  %v8053_v8 = vpop.xlane.xlu0 %1369 }
 0x23d   :  { %11907 = vst [vmem:[#allocation180_spill] sm:$0xff] %v8053_v8 }
 0x23f   :  { %2205 = vadd.xlane.f32.xlu1 %v7469_v58  ;;  %1441 = vadd.xlane.f32.xlu0 %v7505_v28 }
 0x240   :  { %v8057_v29 = vpop.xlane.xlu0 %1561  ;;  %v8059_v41 = vpop.xlane.xlu1 %1373 }
 0x241   :  { %11908 = vst [vmem:[#allocation189_spill] sm:$0xff] %v8057_v29 }
 0x243   :  { %1633 = vadd.xlane.f32.xlu0 %v7572_v54  ;;  %1445 = vadd.xlane.f32.xlu1 %v7575_v26  ;;  %v11914_v26 = vld [vmem:[#allocation176_spill] sm:$0xff] }
 0x244   :  { %v8063_v63 = vpop.xlane.xlu0 %1945  ;;  %v8065_v20 = vpop.xlane.xlu1 %1565 }
 0x245   :  { %11909 = vst [vmem:[#allocation186_spill] sm:$0xff] %v8063_v63  ;;  %11910 = vst [vmem:[#allocation251_spill] sm:$0xff] %v8065_v20  ;;  %v11915_v63 = vld [vmem:[#allocation175_spill] sm:$0xff] }
 0x246   :  { %v11916_v29 = vsub.f32 %v11914_v26, %v11915_v63 }
 0x247   :  { %2017 = vadd.xlane.f32.xlu0 %v7522_v19  ;;  %1637 = vadd.xlane.f32.xlu1 %v7592_v46 }
 0x248   :  { %v8069_v31 = vpop.xlane.xlu0 %2137  ;;  %v8071_v58 = vpop.xlane.xlu1 %1949  ;;  %v2775_v8 = vadd.f32 0.001, %v11916_v29 }
 0x249   :  { %11911 = vst [vmem:[#allocation252_spill] sm:$0xff] %v8069_v31 }
 0x24a   :  { %5026 = vrsqrt.f32 %v2775_v8 }
 0x24b   :  { %2209 = vadd.xlane.f32.xlu0 %v7601_v44  ;;  %2021 = vadd.xlane.f32.xlu1 %v7607_v62  ;;  %v8082_v5 = vpop.f32.mrb[86].mxu0 }
 0x24c   :  { %v8075_v28 = vpop.xlane.xlu1 %2141  ;;  %v8077_v54 = vpop.xlane.xlu0 %1377  ;;  %11917 = vst [vmem:[#allocation176_spill] sm:$0xff] %v8082_v5  ;;  %v1757_v62 = vmul.f32 %v8082_v5, %v8082_v5 }
 0x24d   :  { %11912 = vst [vmem:[#allocation253_spill] sm:$0xff] %v8075_v28  ;;  %11913 = vst [vmem:[#allocation254_spill] sm:$0xff] %v8077_v54  ;;  %v8086_v19 = vpop.f32.mrb[87].mxu0  ;;  %v11937_v28 = vld [vmem:[#allocation174_spill] sm:$0xff] }
 0x24e   :  { %11918 = vst [vmem:[#allocation175_spill] sm:$0xff] %v8086_v19  ;;  %v1459_v31 = vsel %vm1286_vm1, %v8086_v19, 0.0  ;;  %v1758_v29 = vmul.f32 %v8086_v19, %v8086_v19 }
 0x24f   :  { %2213 = vadd.xlane.f32.xlu1 %v7609_v32  ;;  %1449 = vadd.xlane.f32.xlu0 %v7660_v52  ;;  %v8099_v32 = vadd.f32 %v1459_v31, %v8082_v5  ;;  %v8101_v52 = vpop.f32.mrb[86].mxu1 }
 0x250   :  { %v8088_v46 = vpop.xlane.xlu0 %1569  ;;  %v8090_v44 = vpop.xlane.xlu1 %1381  ;;  %11921 = vst [vmem:[#allocation257_spill] sm:$0xff] %v8101_v52  ;;  %v2035_v63 = vsel %vm1286_vm1, %v1758_v29, 0.0  ;;  %v1853_v26 = vmul.f32 %v8101_v52, %v8101_v52 }
 0x251   :  { %11919 = vst [vmem:[#allocation255_spill] sm:$0xff] %v8088_v46  ;;  %11920 = vst [vmem:[#allocation256_spill] sm:$0xff] %v8090_v44  ;;  %v8107_v46 = vpop.f32.mrb[87].mxu1  ;;  %v8117_v19 = vadd.f32 %v2035_v63, %v1757_v62 }
 0x252   :  { %11922 = vst [vmem:[#allocation258_spill] sm:$0xff] %v8107_v46  ;;  %v1651_v8 = vsel %vm1286_vm1, %v8107_v46, 0.0  ;;  %v1854_v31 = vmul.f32 %v8107_v46, %v8107_v46 }
 0x253   :  { %1641 = vadd.xlane.f32.xlu0 %v7681_v53  ;;  %v8120_v29 = vadd.f32 %v1651_v8, %v8101_v52 }
 0x254   :  { %v8109_v54 = vpop.xlane.xlu0 %1953  ;;  %v8111_v34 = vpop.xlane.xlu1 %1573  ;;  %v2227_v5 = vsel %vm1286_vm1, %v1854_v31, 0.0 }
 0x255   :  { %11923 = vst [vmem:[#allocation259_spill] sm:$0xff] %v8109_v54  ;;  %11924 = vst [vmem:[#allocation260_spill] sm:$0xff] %v8111_v34  ;;  %v8122_v53 = vpop.f32.mrb[88].mxu0  ;;  %v8128_v33 = vadd.f32 %v2227_v5, %v1853_v26  ;;  %v5027_v46 = vpop.eup %5026 }
 0x256   :  { %11925 = vst [vmem:[#allocation261_spill] sm:$0xff] %v8122_v53  ;;  %v8126_v54 = vpop.f32.mrb[89].mxu0 }
 0x257   :  { %2025 = vadd.xlane.f32.xlu0 %v7686_v0  ;;  %11926 = vst [vmem:[#allocation262_spill] sm:$0xff] %v8126_v54  ;;  %v1463_v62 = vsel %vm1286_vm1, %v8126_v54, 0.0  ;;  %v2679_v0 = vld [vmem:[%s11199_s3 + $0x180] sm:$0xff]  ;;  %v1760_v52 = vmul.f32 %v8126_v54, %v8126_v54 }
 0x258   :  { %v8130_v51 = vpop.xlane.xlu0 %2145  ;;  %v8132_v38 = vpop.xlane.xlu1 %1957  ;;  %v8137_v63 = vadd.f32 %v1463_v62, %v8122_v53  ;;  %v8160_v34 = vmul.f32 %v5027_v46, %v2679_v0 }
 0x259   :  { %11927 = vst [vmem:[#allocation263_spill] sm:$0xff] %v8130_v51  ;;  %11928 = vst [vmem:[#allocation264_spill] sm:$0xff] %v8132_v38  ;;  %v8139_v8 = vpop.f32.mrb[88].mxu1  ;;  %v1759_v51 = vmul.f32 %v8122_v53, %v8122_v53 }
 0x25a   :  { %11929 = vst [vmem:[#allocation265_spill] sm:$0xff] %v8139_v8  ;;  %v8145_v5 = vpop.f32.mrb[89].mxu1  ;;  %11933 = vst [vmem:[#allocation269_spill] sm:$0xff] %v8160_v34  ;;  %v1855_v54 = vmul.f32 %v8139_v8, %v8139_v8 }
 0x25b   :  { %2217 = vadd.xlane.f32.xlu0 %v7718_v16  ;;  %11930 = vst [vmem:[#allocation266_spill] sm:$0xff] %v8145_v5  ;;  %v1655_v62 = vsel %vm1286_vm1, %v8145_v5, 0.0 }
 0x25c   :  { %v8147_v26 = vpop.xlane.xlu1 %2149  ;;  %v8149_v31 = vpop.xlane.xlu0 %1385  ;;  %v8158_v16 = vadd.f32 %v1655_v62, %v8139_v8  ;;  %v11936_v62 = vld [vmem:[#allocation177_spill] sm:$0xff] }
 0x25d   :  { %11931 = vst [vmem:[#allocation267_spill] sm:$0xff] %v8147_v26  ;;  %11932 = vst [vmem:[#allocation268_spill] sm:$0xff] %v8149_v31  ;;  %v1856_v31 = vmul.f32 %v8145_v5, %v8145_v5  ;;  %v2039_v26 = vsel %vm1286_vm1, %v1760_v52, 0.0  ;;  %v11938_v46 = vsub.f32 %v11936_v62, %v11937_v28 }
 0x25e   :  { %v8172_v53 = vadd.f32 %v2039_v26, %v1759_v51 }
 0x25f   :  { %v2776_v0 = vadd.f32 0.001, %v11938_v46 }
 0x260   :  { %v8162_v38 = vpop.xlane.xlu0 %1577  ;;  %v8164_v44 = vpop.xlane.xlu1 %1389  ;;  %3545 = vperm.xlu1 %5013, %v8160_v34  }
 0x261   :  { %11934 = vst [vmem:[#allocation270_spill] sm:$0xff] %v8162_v38  ;;  %11935 = vst [vmem:[#allocation271_spill] sm:$0xff] %v8164_v44  ;;  %v2231_v38 = vsel %vm1286_vm1, %v1856_v31, 0.0  ;;  %5028 = vrsqrt.f32 %v2776_v0  ;;  %v2680_v31 = vld [vmem:[%s11199_s3 + $0x188] sm:$0xff] }
 0x262   :  { %v8182_v34 = vadd.f32 %v2231_v38, %v1855_v54 }
 0x264   :  { %v8178_v20 = vpop.xlane.xlu0 %1961  ;;  %v8180_v44 = vpop.xlane.xlu1 %1581 }
 0x265   :  { %11939 = vst [vmem:[#allocation177_spill] sm:$0xff] %v8178_v20  ;;  %11940 = vst [vmem:[#allocation174_spill] sm:$0xff] %v8180_v44 }
 0x268   :  { %v8184_v8 = vpop.xlane.xlu0 %2153  ;;  %v8186_v5 = vpop.xlane.xlu1 %1965 }
 0x269   :  { %11941 = vst [vmem:[#allocation272_spill] sm:$0xff] %v8184_v8 }
 0x26b   :  { %v5029_v26 = vpop.eup %5028 }
 0x26c   :  { %v8188_v52 = vpop.xlane.xlu1 %2157  ;;  %v8190_v51 = vpop.xlane.xlu0 %1393  ;;  %v8200_v38 = vmul.f32 %v5029_v26, %v2680_v31 }
 0x26d   :  { %11942 = vst [vmem:[#allocation273_spill] sm:$0xff] %v8188_v52  ;;  %11943 = vst [vmem:[#allocation274_spill] sm:$0xff] %v8190_v51  ;;  %v11982_v52 = vld [vmem:[#allocation196_spill] sm:$0xff] }
 0x26e   :  { %11946 = vst [vmem:[#allocation277_spill] sm:$0xff] %v8200_v38 }
 0x270   :  { %v8192_v28 = vpop.xlane.xlu0 %1585  ;;  %v8194_v62 = vpop.xlane.xlu1 %1397 }
 0x271   :  { %11944 = vst [vmem:[#allocation275_spill] sm:$0xff] %v8192_v28  ;;  %11945 = vst [vmem:[#allocation276_spill] sm:$0xff] %v8194_v62  ;;  %3305 = vperm.xlu0 %5012, %v7457_v25  }
 0x274   :  { %v8202_v54 = vpop.xlane.xlu0 %1969  ;;  %v8204_v46 = vpop.xlane.xlu1 %1589 }
 0x275   :  { %11947 = vst [vmem:[#allocation278_spill] sm:$0xff] %v8202_v54  ;;  %11948 = vst [vmem:[#allocation279_spill] sm:$0xff] %v8204_v46  ;;  %3550 = vperm.xlu0 %5012, %v8200_v38  }
 0x278   :  { %v8207_v0 = vpop.xlane.xlu0 %2161  ;;  %v8209_v51 = vpop.xlane.xlu1 %1973 }
 0x279   :  { %11949 = vst [vmem:[#allocation280_spill] sm:$0xff] %v8207_v0  ;;  %11950 = vst [vmem:[#allocation281_spill] sm:$0xff] %v8209_v51  ;;  %v11981_v51 = vld [vmem:[#allocation197_spill] sm:$0xff] }
 0x27a   :  { %v11983_v44 = vsub.f32 %v11981_v51, %v11982_v52 }
 0x27c   :  { %v8211_v28 = vpop.xlane.xlu1 %2165  ;;  %v8213_v8 = vpop.xlane.xlu0 %1401 }
 0x27d   :  { %11951 = vst [vmem:[#allocation282_spill] sm:$0xff] %v8211_v28  ;;  %11952 = vst [vmem:[#allocation283_spill] sm:$0xff] %v8213_v8 }
 0x280   :  { %v8215_v20 = vpop.xlane.xlu0 %1593  ;;  %v8217_v62 = vpop.xlane.xlu1 %1405 }
 0x281   :  { %11953 = vst [vmem:[#allocation284_spill] sm:$0xff] %v8215_v20  ;;  %11954 = vst [vmem:[#allocation285_spill] sm:$0xff] %v8217_v62 }
 0x284   :  { %v8219_v25 = vpop.xlane.xlu0 %1977  ;;  %v8221_v26 = vpop.xlane.xlu1 %1597  ;;  %1453 = vadd.xlane.f32.xlu1 %v7854_v55 }
 0x285   :  { %11955 = vst [vmem:[#allocation286_spill] sm:$0xff] %v8219_v25  ;;  %11956 = vst [vmem:[#allocation287_spill] sm:$0xff] %v8221_v26 }
 0x288   :  { %v8224_v31 = vpop.xlane.xlu0 %2169  ;;  %v8226_v38 = vpop.xlane.xlu1 %1981  ;;  %1645 = vadd.xlane.f32.xlu1 %v7876_v30 }
 0x289   :  { %11957 = vst [vmem:[#allocation288_spill] sm:$0xff] %v8224_v31  ;;  %11958 = vst [vmem:[#allocation289_spill] sm:$0xff] %v8226_v38  ;;  %v11964_v31 = vsub.f32 %v7448_v40, %v7408_v47 }
 0x28b   :  { %v2729_v30 = vadd.f32 0.001, %v11964_v31 }
 0x28c   :  { %v8229_v0 = vpop.xlane.xlu0 %1409  ;;  %2029 = vadd.xlane.f32.xlu1 %v7886_v27  ;;  %v8232_v8 = vpop.xlane.xlu1 %2173  ;;  %v11965_v27 = vld [vmem:[#allocation191_spill] sm:$0xff] }
 0x28d   :  { %11959 = vst [vmem:[#allocation290_spill] sm:$0xff] %v8229_v0  ;;  %11960 = vst [vmem:[#allocation291_spill] sm:$0xff] %v8232_v8  ;;  %5030 = vrsqrt.f32 %v2729_v30  ;;  %v11966_v0 = vsub.f32 %v7479_v17, %v11965_v27 }
 0x28f   :  { %v2777_v54 = vadd.f32 0.001, %v11966_v0 }
 0x290   :  { %v8234_v20 = vpop.xlane.xlu0 %1601  ;;  %2221 = vadd.xlane.f32.xlu1 %v7895_v12  ;;  %v8237_v25 = vpop.xlane.xlu1 %1413 }
 0x291   :  { %11961 = vst [vmem:[#allocation292_spill] sm:$0xff] %v8234_v20  ;;  %11962 = vst [vmem:[#allocation293_spill] sm:$0xff] %v8237_v25  ;;  %5032 = vrsqrt.f32 %v2777_v54 }
 0x294   :  { %1457 = vadd.xlane.f32.xlu0 %v7949_v9  ;;  %v8240_v55 = vpop.xlane.xlu0 %1985  ;;  %v8249_v20 = vpop.xlane.xlu1 %1605 }
 0x295   :  { %11963 = vst [vmem:[#allocation294_spill] sm:$0xff] %v8240_v55  ;;  %11967 = vst [vmem:[#allocation191_spill] sm:$0xff] %v8249_v20 }
 0x297   :  { %v8251_v12 = vpop.f32.mrb[90].mxu0  ;;  %v5031_v38 = vpop.eup %5030 }
 0x298   :  { %1649 = vadd.xlane.f32.xlu0 %v7967_v43  ;;  %11968 = vst [vmem:[#allocation295_spill] sm:$0xff] %v8251_v12  ;;  %v8253_v25 = vpop.xlane.xlu0 %2177  ;;  %v1761_v9 = vmul.f32 %v8251_v12, %v8251_v12  ;;  %v8257_v55 = vpop.f32.mrb[91].mxu0 }
 0x299   :  { %11969 = vst [vmem:[#allocation296_spill] sm:$0xff] %v8253_v25  ;;  %11970 = vst [vmem:[#allocation297_spill] sm:$0xff] %v8257_v55  ;;  %v1467_v40 = vsel %vm1286_vm1, %v8257_v55, 0.0  ;;  %v1762_v47 = vmul.f32 %v8257_v55, %v8257_v55  ;;  %v8269_v0 = vpop.f32.mrb[90].mxu1  ;;  %v8284_v55 = vpop.xlane.xlu1 %1989 }
 0x29a   :  { %v8265_v17 = vadd.f32 %v1467_v40, %v8251_v12  ;;  %11972 = vst [vmem:[#allocation299_spill] sm:$0xff] %v8269_v0  ;;  %v8274_v27 = vpop.f32.mrb[91].mxu1  ;;  %v3015_v40 = vld [vmem:[%s11200_s4] sm:$0xff]  ;;  %11975 = vst [vmem:[#allocation302_spill] sm:$0xff] %v8284_v55 }
 0x29b   :  { %v8267_v43 = vpop.f32.mrb[92].mxu0  ;;  %v2043_v31 = vsel %vm1286_vm1, %v1762_v47, 0.0  ;;  %11974 = vst [vmem:[#allocation301_spill] sm:$0xff] %v8274_v27  ;;  %v11977_v47 = vld [vmem:[#allocation203_spill] sm:$0xff]  ;;  %v1858_v20 = vmul.f32 %v8274_v27, %v8274_v27 }
 0x29c   :  { %2033 = vadd.xlane.f32.xlu0 %v7992_v61  ;;  %11971 = vst [vmem:[#allocation298_spill] sm:$0xff] %v8267_v43  ;;  %v8272_v30 = vpop.f32.mrb[93].mxu0  ;;  %v8276_v61 = vadd.f32 %v2043_v31, %v1761_v9  ;;  %v8286_v12 = vpop.xlane.xlu0 %1417  ;;  %v1763_v25 = vmul.f32 %v8267_v43, %v8267_v43  ;;  %v1659_v31 = vsel %vm1286_vm1, %v8274_v27, 0.0 }
 0x29d   :  { %11973 = vst [vmem:[#allocation300_spill] sm:$0xff] %v8272_v30  ;;  %v1471_v54 = vsel %vm1286_vm1, %v8272_v30, 0.0  ;;  %11976 = vst [vmem:[#allocation303_spill] sm:$0xff] %v8286_v12  ;;  %v1764_v9 = vmul.f32 %v8272_v30, %v8272_v30  ;;  %v8299_v55 = vpop.f32.mrb[92].mxu1  ;;  %v2633_v30 = vld [vmem:[%s11199_s3 + $0x10] sm:$0xff]  ;;  %v8313_v28 = vadd.f32 %v1659_v31, %v8269_v0  ;;  %v2235_v27 = vsel %vm1286_vm1, %v1858_v20, 0.0 }
 0x29e   :  { %11978 = vst [vmem:[#allocation203_spill] sm:$0xff] %v8299_v55  ;;  %v8302_v12 = vadd.f32 %v1471_v54, %v8267_v43  ;;  %v8305_v26 = vpop.f32.mrb[93].mxu1  ;;  %v2778_v31 = vadd.f32 0.001, %v11983_v44 }
 0x29f   :  { %v1663_v62 = vsel %vm1286_vm1, %v8305_v26, 0.0 }
 0x2a0   :  { %2225 = vadd.xlane.f32.xlu0 %v7999_v10  ;;  %v1857_v10 = vmul.f32 %v8269_v0, %v8269_v0  ;;  %v8317_v54 = vadd.f32 %v1663_v62, %v8299_v55  ;;  %v8329_v0 = vpop.xlane.xlu1 %2181  ;;  %v8331_v20 = vpop.xlane.xlu0 %1609  ;;  %v1859_v62 = vmul.f32 %v8299_v55, %v8299_v55  ;;  %5034 = vrsqrt.f32 %v2778_v31 }
 0x2a1   :  { %3310 = vperm.xlu1 %5013, %v11977_v47   ;;  %v11979_v47 = vld [vmem:[#allocation192_spill] sm:$0xff]  ;;  %11984 = vst [vmem:[#allocation197_spill] sm:$0xff] %v8331_v20 }
 0x2a2   :  { %v3207_v8 = vsub.f32 %v3015_v40, %v11979_v47  ;;  %11980 = vst [vmem:[#allocation192_spill] sm:$0xff] %v8305_v26  ;;  %v2047_v40 = vsel %vm1286_vm1, %v1764_v9, 0.0  ;;  %v1860_v47 = vmul.f32 %v8305_v26, %v8305_v26  ;;  %v8324_v46 = vadd.f32 %v2235_v27, %v1857_v10  ;;  %v5033_v9 = vpop.eup %5032 }
 0x2a3   :  { %v8322_v43 = vadd.f32 %v2047_v40, %v1763_v25  ;;  %v2681_v25 = vld [vmem:[%s11199_s3 + $0x190] sm:$0xff] }
 0x2a4   :  { %v2239_v27 = vsel %vm1286_vm1, %v1860_v47, 0.0  ;;  %v8339_v10 = vmul.f32 %v5033_v9, %v2681_v25  ;;  %v8343_v52 = vpop.xlane.xlu1 %1421  ;;  %v8345_v51 = vpop.xlane.xlu0 %1993  ;;  %v11988_v47 = vld [vmem:[#allocation204_spill] sm:$0xff] }
 0x2a5   :  { %3977 = vperm.xlu1 %5013, %v3207_v8   ;;  %v2921_v8 = vmul.f32 %v5031_v38, %v2633_v30  ;;  %v8341_v44 = vadd.f32 %v2239_v27, %v1859_v62  ;;  %11986 = vst [vmem:[#allocation304_spill] sm:$0xff] %v8345_v51  ;;  %v3016_v38 = vld [vmem:[%s11200_s4 + $0x8] sm:$0xff]  ;;  %v2682_v62 = vld [vmem:[%s11199_s3 + $0x198] sm:$0xff] }
 0x2a6   :  { %11985 = vst [vmem:[#allocation196_spill] sm:$0xff] %v8339_v10  ;;  %v3208_v31 = vsub.f32 %v3016_v38, %v11988_v47 }
 0x2a8   :  { %v8351_v30 = vpop.xlane.xlu1 %1613  ;;  %v8353_v40 = vpop.xlane.xlu0 %2185 }
 0x2a9   :  { %3315 = vperm.xlu1 %5013, %v2921_v8   ;;  %11987 = vst [vmem:[#allocation305_spill] sm:$0xff] %v8353_v40 }
 0x2aa   :  { %v5035_v9 = vpop.eup %5034 }
 0x2ab   :  { %v8359_v25 = vmul.f32 %v5035_v9, %v2682_v62 }
 0x2ac   :  { %v8361_v27 = vpop.xlane.xlu1 %1997  ;;  %v8363_v26 = vpop.xlane.xlu0 %1425 }
 0x2ad   :  { %3555 = vperm.xlu1 %5013, %v8339_v10   ;;  %11989 = vst [vmem:[#allocation204_spill] sm:$0xff] %v8359_v25  ;;  %11990 = vst [vmem:[#allocation306_spill] sm:$0xff] %v8363_v26  ;;  %v12009_v26 = vld [vmem:[#allocation212_spill] sm:$0xff] }
 0x2b0   :  { %v8366_v55 = vpop.xlane.xlu1 %2189  ;;  %v8368_v10 = vpop.xlane.xlu0 %1617 }
 0x2b1   :  { %11991 = vst [vmem:[#allocation307_spill] sm:$0xff] %v8368_v10 }
 0x2b4   :  { %v8370_v40 = vpop.xlane.xlu1 %1429  ;;  %v8372_v38 = vpop.xlane.xlu0 %2001 }
 0x2b5   :  { %11992 = vst [vmem:[#allocation308_spill] sm:$0xff] %v8372_v38 }
 0x2b6   :  { %3982 = vperm.xlu0 %5012, %v3208_v31  }
 0x2b8   :  { %v8374_v47 = vpop.xlane.xlu1 %1621  ;;  %v8376_v20 = vpop.xlane.xlu0 %2193 }
 0x2b9   :  { %11993 = vst [vmem:[#allocation309_spill] sm:$0xff] %v8376_v20 }
 0x2ba   :  { %3560 = vperm.xlu0 %5012, %v8359_v25  }
 0x2bc   :  { %v8378_v31 = vpop.xlane.xlu1 %2005  ;;  %v8380_v9 = vpop.xlane.xlu0 %1433 }
 0x2bd   :  { %11994 = vst [vmem:[#allocation310_spill] sm:$0xff] %v8380_v9 }
 0x2c0   :  { %v8384_v62 = vpop.xlane.xlu1 %2197  ;;  %v8386_v25 = vpop.xlane.xlu0 %1625 }
 0x2c1   :  { %11995 = vst [vmem:[#allocation311_spill] sm:$0xff] %v8386_v25 }
 0x2c4   :  { %v8390_v10 = vpop.xlane.xlu1 %1437  ;;  %v8392_v38 = vpop.xlane.xlu0 %2009 }
 0x2c5   :  { %11996 = vst [vmem:[#allocation312_spill] sm:$0xff] %v8392_v38 }
 0x2c8   :  { %v8400_v20 = vpop.xlane.xlu1 %1629  ;;  %v8402_v25 = vpop.xlane.xlu0 %2201 }
 0x2c9   :  { %12000 = vst [vmem:[#allocation313_spill] sm:$0xff] %v8402_v25 }
 0x2d1   :  { %1461 = vadd.xlane.f32.xlu1 %v8099_v32  ;;  %v11997_v32 = vld [vmem:[#allocation206_spill] sm:$0xff] }
 0x2d2   :  { %11999 = vst [vmem:[#allocation206_spill] sm:$0xff] %v8400_v20 }
 0x2d5   :  { %1653 = vadd.xlane.f32.xlu1 %v8120_v29  ;;  %v11998_v29 = vsub.f32 %v7569_v37, %v11997_v32  ;;  %v8414_v37 = vpop.xlane.xlu1 %2013  ;;  %v8416_v32 = vpop.xlane.xlu0 %1441 }
 0x2d6   :  { %12004 = vst [vmem:[#allocation316_spill] sm:$0xff] %v8414_v37  ;;  %12005 = vst [vmem:[#allocation317_spill] sm:$0xff] %v8416_v32  ;;  %v12010_v32 = vld [vmem:[#allocation211_spill] sm:$0xff] }
 0x2d7   :  { %v2731_v9 = vadd.f32 0.001, %v11998_v29  ;;  %v12011_v51 = vsub.f32 %v12009_v26, %v12010_v32  ;;  %v12012_v26 = vld [vmem:[#allocation210_spill] sm:$0xff] }
 0x2d9   :  { %2037 = vadd.xlane.f32.xlu1 %v8117_v19  ;;  %1465 = vadd.xlane.f32.xlu0 %v8137_v63  ;;  %5036 = vrsqrt.f32 %v2731_v9  ;;  %v12001_v19 = vsub.f32 %v7618_v39, %v7605_v36  ;;  %v12007_v9 = vld [vmem:[#allocation181_spill] sm:$0xff]  ;;  %v2780_v20 = vadd.f32 0.001, %v12011_v51  ;;  %v8450_v32 = vpop.xlane.xlu1 %2205 }
 0x2db   :  { %v2779_v63 = vadd.f32 0.001, %v12001_v19  ;;  %v3113_v19 = vmul.f32 %v2921_v8, %v12007_v9  ;;  %v3017_v8 = vld [vmem:[%s11200_s4 + $0x10] sm:$0xff]  ;;  %v8452_v9 = vpop.xlane.xlu0 %1633 }
 0x2dc   :  { %12013 = vst [vmem:[#allocation212_spill] sm:$0xff] %v8452_v9 }
 0x2dd   :  { %2229 = vadd.xlane.f32.xlu1 %v8128_v33  ;;  %1657 = vadd.xlane.f32.xlu0 %v8158_v16  ;;  %5038 = vrsqrt.f32 %v2779_v63 }
 0x2de   :  { %5040 = vrsqrt.f32 %v2780_v20  ;;  %v3018_v20 = vld [vmem:[%s11200_s4 + $0x18] sm:$0xff] }
 0x2e1   :  { %2041 = vadd.xlane.f32.xlu0 %v8172_v53  ;;  %v8408_v33 = vpop.f32.mrb[94].mxu0 }
 0x2e2   :  { %12002 = vst [vmem:[#allocation314_spill] sm:$0xff] %v8408_v33  ;;  %v1765_v53 = vmul.f32 %v8408_v33, %v8408_v33  ;;  %v8412_v16 = vpop.f32.mrb[95].mxu0 }
 0x2e3   :  { %12003 = vst [vmem:[#allocation315_spill] sm:$0xff] %v8412_v16  ;;  %v1475_v29 = vsel %vm1286_vm1, %v8412_v16, 0.0 }
 0x2e4   :  { %v8423_v36 = vadd.f32 %v1475_v29, %v8408_v33  ;;  %v8425_v39 = vpop.f32.mrb[94].mxu1  ;;  %v2635_v33 = vld [vmem:[%s11199_s3 + $0x20] sm:$0xff] }
 0x2e5   :  { %2233 = vadd.xlane.f32.xlu0 %v8182_v34  ;;  %v1766_v34 = vmul.f32 %v8412_v16, %v8412_v16  ;;  %12006 = vst [vmem:[#allocation318_spill] sm:$0xff] %v8425_v39  ;;  %v8429_v38 = vpop.f32.mrb[95].mxu1  ;;  %v1861_v63 = vmul.f32 %v8425_v39, %v8425_v39 }
 0x2e6   :  { %12008 = vst [vmem:[#allocation181_spill] sm:$0xff] %v8429_v38  ;;  %v1667_v37 = vsel %vm1286_vm1, %v8429_v38, 0.0  ;;  %v1862_v29 = vmul.f32 %v8429_v38, %v8429_v38  ;;  %v5037_v38 = vpop.eup %5036 }
 0x2e7   :  { %v2051_v25 = vsel %vm1286_vm1, %v1766_v34, 0.0  ;;  %v8446_v34 = vadd.f32 %v1667_v37, %v8425_v39  ;;  %v8459_v37 = vmul.f32 %v5037_v38, %v2635_v33  ;;  %v5039_v39 = vpop.eup %5038 }
 0x2e8   :  { %v8438_v16 = vadd.f32 %v2051_v25, %v1765_v53  ;;  %v2243_v51 = vsel %vm1286_vm1, %v1862_v29, 0.0  ;;  %v3209_v53 = vsub.f32 %v3017_v8, %v3113_v19  ;;  %v8463_v29 = vpop.xlane.xlu0 %2017  ;;  %v12017_v8 = vld [vmem:[#allocation213_spill] sm:$0xff]  ;;  %v5041_v33 = vpop.eup %5040 }
 0x2e9   :  { %v8454_v25 = vadd.f32 %v2243_v51, %v1861_v63  ;;  %12015 = vst [vmem:[#allocation210_spill] sm:$0xff] %v8463_v29  ;;  %v2683_v63 = vld [vmem:[%s11199_s3 + $0x1a0] sm:$0xff]  ;;  %v3210_v38 = vsub.f32 %v3018_v20, %v12017_v8  ;;  %v2684_v51 = vld [vmem:[%s11199_s3 + $0x1a8] sm:$0xff] }
 0x2ea   :  { %v8472_v19 = vmul.f32 %v5039_v39, %v2683_v63  ;;  %v8483_v29 = vmul.f32 %v5041_v33, %v2684_v51 }
 0x2ec   :  { %12016 = vst [vmem:[#allocation319_spill] sm:$0xff] %v8472_v19  ;;  %v8481_v9 = vpop.xlane.xlu0 %2209  ;;  %12020 = vst [vmem:[#allocation321_spill] sm:$0xff] %v8483_v29 }
 0x2ed   :  { %12019 = vst [vmem:[#allocation320_spill] sm:$0xff] %v8481_v9 }
 0x2ee   :  { %3320 = vperm.xlu1 %5013, %v12012_v26   ;;  %v8461_v26 = vpop.xlane.xlu1 %1445 }
 0x2ef   :  { %12014 = vst [vmem:[#allocation211_spill] sm:$0xff] %v8461_v26 }
 0x2f0   :  { %v8485_v26 = vpop.xlane.xlu0 %1449 }
 0x2f1   :  { %12021 = vst [vmem:[#allocation322_spill] sm:$0xff] %v8485_v26 }
 0x2f2   :  { %3987 = vperm.xlu1 %5013, %v3209_v53   ;;  %v8479_v53 = vpop.xlane.xlu1 %1637 }
 0x2f3   :  { %12018 = vst [vmem:[#allocation213_spill] sm:$0xff] %v8479_v53 }
 0x2f4   :  { %v8490_v63 = vpop.xlane.xlu0 %1641 }
 0x2f5   :  { %12022 = vst [vmem:[#allocation323_spill] sm:$0xff] %v8490_v63 }
 0x2f6   :  { %3325 = vperm.xlu1 %5013, %v8459_v37   ;;  %v8488_v39 = vpop.xlane.xlu1 %2021 }
 0x2f8   :  { %v8494_v8 = vpop.xlane.xlu0 %2025 }
 0x2f9   :  { %12024 = vst [vmem:[#allocation325_spill] sm:$0xff] %v8494_v8 }
 0x2fa   :  { %3565 = vperm.xlu1 %5013, %v8472_v19   ;;  %v8492_v20 = vpop.xlane.xlu1 %2213 }
 0x2fb   :  { %3992 = vperm.xlu0 %5012, %v3210_v38   ;;  %12023 = vst [vmem:[#allocation324_spill] sm:$0xff] %v8492_v20 }
 0x2fc   :  { %v8498_v53 = vpop.xlane.xlu0 %2217 }
 0x2fd   :  { %12026 = vst [vmem:[#allocation327_spill] sm:$0xff] %v8498_v53 }
 0x2fe   :  { %v8496_v19 = vpop.permute.xlu1 %3545 }
 0x2ff   :  { %3570 = vperm.xlu0 %5012, %v8483_v29   ;;  %12025 = vst [vmem:[#allocation326_spill] sm:$0xff] %v8496_v19  ;;  %v12032_v19 = vld [vmem:[#allocation2_spill] sm:$0xff] }
 0x300   :  { %v3306_v33 = vpop.permute.xlu0 %3305 }
 0x301   :  { %v3783_v53 = vmul.f32 %v3306_v33, %v12032_v19 }
 0x304   :  { %v8506_v29 = vpop.permute.xlu0 %3550 }
 0x305   :  { %12030 = vst [vmem:[#allocation331_spill] sm:$0xff] %v8506_v29 }
 0x311   :  { %v8500_v9 = vpop.xlane.xlu1 %1453 }
 0x312   :  { %12027 = vst [vmem:[#allocation328_spill] sm:$0xff] %v8500_v9 }
 0x315   :  { %v8502_v38 = vpop.xlane.xlu1 %1645 }
 0x316   :  { %12028 = vst [vmem:[#allocation329_spill] sm:$0xff] %v8502_v38  ;;  %v12033_v38 = vld [vmem:[#allocation4_spill] sm:$0xff] }
 0x317   :  { %v3784_v9 = vmul.f32 %v3306_v33, %v12033_v38  ;;  %v12044_v33 = vld [vmem:[#allocation6_spill] sm:$0xff] }
 0x319   :  { %v8504_v51 = vpop.xlane.xlu1 %2029 }
 0x31a   :  { %12029 = vst [vmem:[#allocation330_spill] sm:$0xff] %v8504_v51 }
 0x31d   :  { %v8508_v26 = vpop.xlane.xlu1 %2221 }
 0x31e   :  { %12031 = vst [vmem:[#allocation332_spill] sm:$0xff] %v8508_v26  ;;  %1469 = vadd.xlane.f32.xlu1 %v8265_v17  ;;  %1473 = vadd.xlane.f32.xlu0 %v8302_v12  ;;  %v12035_v12 = vsub.f32 %v7709_v21, %v7703_v18  ;;  %v12045_v21 = vld [vmem:[#allocation9_spill] sm:$0xff] }
 0x320   :  { %v2734_v17 = vadd.f32 0.001, %v12035_v12 }
 0x321   :  { %v3311_v8 = vpop.permute.xlu1 %3310  ;;  %v8512_v63 = vpop.xlane.xlu0 %1457 }
 0x322   :  { %1661 = vadd.xlane.f32.xlu1 %v8313_v28  ;;  %1665 = vadd.xlane.f32.xlu0 %v8317_v54  ;;  %v12038_v54 = vld [vmem:[#allocation103_spill] sm:$0xff]  ;;  %5042 = vrsqrt.f32 %v2734_v17  ;;  %v3786_v18 = vmul.f32 %v3311_v8, %v12045_v21  ;;  %v12051_v21 = vld [vmem:[#allocation218_spill] sm:$0xff] }
 0x325   :  { %v3978_v51 = vpop.permute.xlu1 %3977  ;;  %v8518_v20 = vpop.xlane.xlu0 %1649 }
 0x326   :  { %v4455_v29 = vadd.f32 %v3978_v51, %v3783_v53  ;;  %v4456_v26 = vadd.f32 %v3978_v51, %v3784_v9  ;;  %2045 = vadd.xlane.f32.xlu1 %v8276_v61  ;;  %2049 = vadd.xlane.f32.xlu0 %v8322_v43  ;;  %v12037_v61 = vld [vmem:[#allocation219_spill] sm:$0xff]  ;;  %v12041_v53 = vld [vmem:[#allocation221_spill] sm:$0xff]  ;;  %v3785_v51 = vmul.f32 %v3311_v8, %v12044_v33  ;;  %v3019_v8 = vld [vmem:[%s11200_s4 + $0x20] sm:$0xff] }
 0x327   :  { %v12039_v9 = vsub.f32 %v12037_v61, %v12038_v54  ;;  %v12047_v61 = vld [vmem:[#allocation110_spill] sm:$0xff]  ;;  %v3020_v54 = vld [vmem:[%s11200_s4 + $0x28] sm:$0xff] }
 0x328   :  { %4647 = vst [vmem:[%s11201_s5] sm:$0xff] %v4455_v29  ;;  %4648 = vst.msk [vmem:[%s11201_s5 + $0x8] sm:$0xff] %vm1286_vm1, %v4456_v26  ;;  %v12040_v26 = vsub.f32 %v7726_v11, %v7724_v59  ;;  %v12046_v59 = vld [vmem:[#allocation200_spill] sm:$0xff] }
 0x329   :  { %v8529_v28 = vpop.xlane.xlu0 %2033  ;;  %v2733_v29 = vadd.f32 0.001, %v12039_v9  ;;  %v3115_v11 = vmul.f32 %v8459_v37, %v12046_v59  ;;  %v12052_v59 = vsub.f32 %v7809_v24, %v7803_v49  ;;  %v12056_v49 = vsub.f32 %v7893_v42, %v7884_v1  ;;  %v12061_v1 = vld [vmem:[#allocation230_spill] sm:$0xff] }
 0x32a   :  { %12034 = vst [vmem:[#allocation2_spill] sm:$0xff] %v8529_v28  ;;  %2237 = vadd.xlane.f32.xlu1 %v8324_v46  ;;  %2241 = vadd.xlane.f32.xlu0 %v8341_v44  ;;  %v2782_v19 = vadd.f32 0.001, %v12040_v26  ;;  %v12042_v46 = vld [vmem:[#allocation109_spill] sm:$0xff]  ;;  %v12049_v26 = vld [vmem:[#allocation114_spill] sm:$0xff] }
 0x32b   :  { %5044 = vrsqrt.f32 %v2733_v29  ;;  %v12043_v38 = vsub.f32 %v12041_v53, %v12042_v46  ;;  %v3211_v37 = vsub.f32 %v3019_v8, %v3115_v11  ;;  %v2637_v53 = vld [vmem:[%s11199_s3 + $0x30] sm:$0xff]  ;;  %v2738_v11 = vadd.f32 0.001, %v12052_v59 }
 0x32c   :  { %5046 = vrsqrt.f32 %v2782_v19  ;;  %v5043_v17 = vpop.eup %5042  ;;  %v3212_v19 = vsub.f32 %v3020_v54, %v12049_v26  ;;  %v2740_v24 = vadd.f32 0.001, %v12056_v49 }
 0x32d   :  { %v8536_v43 = vpop.xlane.xlu0 %2225  ;;  %v2781_v44 = vadd.f32 0.001, %v12043_v38 }
 0x32e   :  { %12036 = vst [vmem:[#allocation4_spill] sm:$0xff] %v8536_v43 }
 0x32f   :  { %5048 = vrsqrt.f32 %v2781_v44  ;;  %v2686_v44 = vld [vmem:[%s11199_s3 + $0x1b8] sm:$0xff] }
 0x335   :  { %v3983_v12 = vpop.permute.xlu0 %3982  ;;  %v5045_v29 = vpop.eup %5044 }
 0x336   :  { %v4457_v43 = vadd.f32 %v3983_v12, %v3785_v51  ;;  %v4458_v28 = vadd.f32 %v3983_v12, %v3786_v18  ;;  %v5047_v38 = vpop.eup %5046  ;;  %v2685_v51 = vld [vmem:[%s11199_s3 + $0x1b0] sm:$0xff]  ;;  %v3022_v12 = vld [vmem:[%s11200_s4 + $0x38] sm:$0xff] }
 0x337   :  { %v8582_v33 = vmul.f32 %v5047_v38, %v2686_v44  ;;  %v8627_v44 = vmul.f32 0.0051020407, %v8003_v22 }
 0x338   :  { %4649 = vst [vmem:[%s11201_s5 + $0x10] sm:$0xff] %v4457_v43  ;;  %4650 = vst.msk [vmem:[%s11201_s5 + $0x18] sm:$0xff] %vm1286_vm1, %v4458_v28  ;;  %v2638_v43 = vld [vmem:[%s11199_s3 + $0x38] sm:$0xff]  ;;  %v12048_v28 = vsub.f32 %v7762_v35, %v7760_v60  ;;  %v8580_v60 = vmul.f32 %v5045_v29, %v2637_v53  ;;  %v8613_v29 = vmul.f32 0.0051020407, %v7933_v14 }
 0x339   :  { %v8575_v46 = vmul.f32 %v5043_v17, %v2638_v43  ;;  %v5049_v35 = vpop.eup %5048  ;;  %12050 = vst [vmem:[#allocation219_spill] sm:$0xff] %v8582_v33  ;;  %v2406_v53 = vmul.f32 0.0051020407, %v7994_v4  ;;  %v2456_v22 = vmul.f32 %v8627_v44, %v8627_v44 }
 0x33a   :  { %v2784_v9 = vadd.f32 0.001, %v12048_v28  ;;  %v8597_v8 = vmul.f32 %v5049_v35, %v2685_v51  ;;  %v2688_v28 = vld [vmem:[%s11199_s3 + $0x1c8] sm:$0xff]  ;;  %12058 = vst [vmem:[#allocation109_spill] sm:$0xff] %v8613_v29  ;;  %v2502_v14 = vmul.f32 %v8613_v29, %v8613_v29  ;;  %v2642_v35 = vld [vmem:[%s11199_s3 + $0x58] sm:$0xff]  ;;  %v8632_v51 = vpop.permute.xlu1 %3315 }
 0x33b   :  { %3330 = vperm.xlu1 %5013, %v12047_v61   ;;  %v3118_v18 = vmul.f32 %v8575_v46, %v12051_v21  ;;  %v12054_v61 = vsub.f32 %v7823_v7, %v7821_v48  ;;  %v3024_v48 = vld [vmem:[%s11200_s4 + $0x48] sm:$0xff]  ;;  %v12059_v7 = vld [vmem:[#allocation240_spill] sm:$0xff] }
 0x33c   :  { %5050 = vrsqrt.f32 %v2784_v9  ;;  %12053 = vst [vmem:[#allocation103_spill] sm:$0xff] %v8597_v8  ;;  %v12055_v9 = vld [vmem:[#allocation137_spill] sm:$0xff]  ;;  %v12060_v26 = vsub.f32 %v7907_v56, %v12059_v7  ;;  %v3216_v42 = vsub.f32 %v3024_v48, %v12061_v1  ;;  %v12062_v56 = vsub.f32 %v7979_v23, %v7975_v45 }
 0x33d   :  { %v3214_v17 = vsub.f32 %v3022_v12, %v3118_v18  ;;  %5052 = vrsqrt.f32 %v2738_v11  ;;  %v2786_v54 = vadd.f32 0.001, %v12054_v61  ;;  %v2598_v21 = vsub.f32 %v2406_v53, %v2502_v14  ;;  %v2692_v53 = vld [vmem:[%s11199_s3 + $0x1e8] sm:$0xff] }
 0x33e   :  { %v2742_v4 = vadd.f32 0.001, %v12062_v56  ;;  %v2360_v18 = vmul.f32 0.0051020407, %v8023_v3  ;;  %v8643_v11 = vmul.f32 0.0051020407, %v8009_v57  ;;  %v8650_v61 = vpop.permute.xlu1 %3555 }
 0x33f   :  { %3997 = vperm.xlu1 %5013, %v3211_v37   ;;  %5054 = vrsqrt.f32 %v2786_v54  ;;  %v2790_v23 = vadd.f32 0.001, %v2598_v21  ;;  %v2408_v3 = vmul.f32 0.0051020407, %v8027_v6  ;;  %12064 = vst [vmem:[#allocation9_spill] sm:$0xff] %v8650_v61  ;;  %v2646_v21 = vld [vmem:[%s11199_s3 + $0x78] sm:$0xff] }
 0x340   :  { %4002 = vperm.xlu0 %5012, %v3212_v19   ;;  %5056 = vrsqrt.f32 %v2740_v24  ;;  %v2788_v19 = vadd.f32 0.001, %v12060_v26  ;;  %12063 = vst [vmem:[#allocation6_spill] sm:$0xff] %v8643_v11  ;;  %v2552_v45 = vsub.f32 %v2360_v18, %v2456_v22  ;;  %v2504_v57 = vmul.f32 %v8643_v11, %v8643_v11  ;;  %v12108_v11 = vld [vmem:[#allocation229_spill] sm:$0xff] }
 0x341   :  { %v2362_v24 = vmul.f32 0.0051020407, %v8047_v15 }
 0x342   :  { %5058 = vrsqrt.f32 %v2788_v19  ;;  %v2744_v49 = vadd.f32 0.001, %v2552_v45  ;;  %v2600_v6 = vsub.f32 %v2408_v3, %v2504_v57  ;;  %v8671_v19 = vmul.f32 0.0051020407, %v8041_v50  ;;  %v12069_v3 = vld [vmem:[#allocation251_spill] sm:$0xff]  ;;  %v2694_v57 = vld [vmem:[%s11199_s3 + $0x1f8] sm:$0xff] }
 0x343   :  { %3335 = vperm.xlu1 %5013, %v8580_v60   ;;  %5060 = vrsqrt.f32 %v2742_v4  ;;  %v8687_v4 = vmul.f32 0.0051020407, %v8059_v41 }
 0x344   :  { %3580 = vperm.xlu0 %5012, %v8582_v33   ;;  %5062 = vrsqrt.f32 %v2790_v23  ;;  %12066 = vst [vmem:[#allocation110_spill] sm:$0xff] %v8671_v19  ;;  %v2792_v1 = vadd.f32 0.001, %v2600_v6  ;;  %v2506_v50 = vmul.f32 %v8671_v19, %v8671_v19  ;;  %v12165_v33 = vld [vmem:[#allocation206_spill] sm:$0xff] }
 0x345   :  { %5064 = vrsqrt.f32 %v2744_v49  ;;  %v2460_v41 = vmul.f32 %v8687_v4, %v8687_v4  ;;  %v12071_v49 = vld [vmem:[#allocation253_spill] sm:$0xff] }
 0x346   :  { %v5051_v43 = vpop.eup %5050  ;;  %5066 = vrsqrt.f32 %v2792_v1  ;;  %v2412_v6 = vmul.f32 0.0051020407, %v12071_v49 }
 0x347   :  { %3575 = vperm.xlu1 %5013, %v8597_v8   ;;  %v8610_v37 = vmul.f32 %v5051_v43, %v2688_v28  ;;  %v5053_v38 = vpop.eup %5052  ;;  %v8657_v28 = vmul.f32 0.0051020407, %v8035_v2 }
 0x348   :  { %4012 = vperm.xlu0 %5012, %v3214_v17   ;;  %v8638_v12 = vmul.f32 %v5053_v38, %v2642_v35  ;;  %v2690_v17 = vld [vmem:[%s11199_s3 + $0x1d8] sm:$0xff]  ;;  %v8678_v38 = vpop.permute.xlu0 %3560 }
 0x349   :  { %12057 = vst [vmem:[#allocation221_spill] sm:$0xff] %v8610_v37  ;;  %v5055_v59 = vpop.eup %5054  ;;  %v2458_v2 = vmul.f32 %v8657_v28, %v8657_v28  ;;  %12067 = vst [vmem:[#allocation114_spill] sm:$0xff] %v8678_v38 }
 0x34a   :  { %v8652_v54 = vmul.f32 %v5055_v59, %v2690_v17  ;;  %v5057_v43 = vpop.eup %5056  ;;  %v2364_v59 = vmul.f32 0.0051020407, %v8071_v58 }
 0x34b   :  { %v2554_v15 = vsub.f32 %v2362_v24, %v2458_v2  ;;  %v12072_v24 = vld [vmem:[#allocation256_spill] sm:$0xff] }
 0x34c   :  { %3350 = vperm.xlu0 %5012, %v12055_v9   ;;  %12065 = vst [vmem:[#allocation200_spill] sm:$0xff] %v8652_v54  ;;  %v2644_v9 = vld [vmem:[%s11199_s3 + $0x68] sm:$0xff]  ;;  %v5059_v26 = vpop.eup %5058 }
 0x34d   :  { %v8666_v7 = vmul.f32 %v5057_v43, %v2644_v9  ;;  %v8682_v35 = vmul.f32 %v5059_v26, %v2692_v53  ;;  %v5061_v56 = vpop.eup %5060  ;;  %v8703_v43 = vmul.f32 0.0051020407, %v12069_v3  ;;  %v2556_v9 = vsub.f32 %v2364_v59, %v2460_v41 }
 0x34e   :  { %v8696_v17 = vmul.f32 %v5061_v56, %v2646_v21  ;;  %v5063_v45 = vpop.eup %5062  ;;  %v8711_v26 = vmul.f32 0.0051020407, %v12072_v24  ;;  %v2648_v56 = vld [vmem:[%s11199_s3 + $0x88] sm:$0xff] }
 0x34f   :  { %12068 = vst [vmem:[#allocation218_spill] sm:$0xff] %v8682_v35  ;;  %12070 = vst [vmem:[#allocation137_spill] sm:$0xff] %v8703_v43  ;;  %v8715_v53 = vmul.f32 %v5063_v45, %v2694_v57  ;;  %v12075_v45 = vld [vmem:[#allocation260_spill] sm:$0xff] }
 0x350   :  { %3590 = vperm.xlu0 %5012, %v8610_v37   ;;  %v2462_v59 = vmul.f32 %v8711_v26, %v8711_v26  ;;  %v8730_v41 = vmul.f32 0.0051020407, %v12075_v45 }
 0x351   :  { %12073 = vst [vmem:[#allocation240_spill] sm:$0xff] %v8715_v53 }
 0x352   :  { %12076 = vst [vmem:[#allocation230_spill] sm:$0xff] %v8730_v41 }
 0x354   :  { %4022 = vperm.xlu0 %5012, %v3216_v42   ;;  %v2410_v42 = vmul.f32 0.0051020407, %v8051_v13  ;;  %v2746_v13 = vadd.f32 0.001, %v2554_v15  ;;  %v5065_v15 = vpop.eup %5064 }
 0x355   :  { %v8732_v57 = vmul.f32 %v5065_v15, %v2648_v56  ;;  %v5067_v49 = vpop.eup %5066  ;;  %v12079_v56 = vld [vmem:[#allocation12_spill] sm:$0xff] }
 0x356   :  { %v2602_v18 = vsub.f32 %v2410_v42, %v2506_v50  ;;  %5068 = vrsqrt.f32 %v2746_v13  ;;  %v2508_v42 = vmul.f32 %v8703_v43, %v8703_v43  ;;  %v12074_v50 = vld [vmem:[#allocation264_spill] sm:$0xff]  ;;  %v2748_v13 = vadd.f32 0.001, %v2556_v9 }
 0x357   :  { %v2366_v21 = vmul.f32 0.0051020407, %v12074_v50  ;;  %v12078_v50 = vld [vmem:[#allocation10_spill] sm:$0xff]  ;;  %v3788_v45 = vmul.f32 %v8632_v51, %v12079_v56 }
 0x358   :  { %3360 = vperm.xlu0 %5012, %v8638_v12   ;;  %v2794_v58 = vadd.f32 0.001, %v2602_v18  ;;  %v2604_v18 = vsub.f32 %v2412_v6, %v2508_v42  ;;  %v12077_v6 = vld [vmem:[#allocation267_spill] sm:$0xff]  ;;  %v3787_v15 = vmul.f32 %v8632_v51, %v12078_v50  ;;  %v12085_v56 = vld [vmem:[#allocation14_spill] sm:$0xff] }
 0x359   :  { %v2558_v9 = vsub.f32 %v2366_v21, %v2462_v59  ;;  %v2414_v24 = vmul.f32 0.0051020407, %v12077_v6  ;;  %v12081_v21 = vld [vmem:[#allocation271_spill] sm:$0xff] }
 0x35a   :  { %5070 = vrsqrt.f32 %v2794_v58  ;;  %v2696_v58 = vld [vmem:[%s11199_s3 + $0x208] sm:$0xff]  ;;  %v2796_v42 = vadd.f32 0.001, %v2604_v18  ;;  %v8751_v59 = vmul.f32 0.0051020407, %v12081_v21 }
 0x35b   :  { %5072 = vrsqrt.f32 %v2748_v13  ;;  %v8748_v38 = vmul.f32 %v5067_v49, %v2696_v58  ;;  %v2650_v13 = vld [vmem:[%s11199_s3 + $0x98] sm:$0xff]  ;;  %v2750_v18 = vadd.f32 0.001, %v2558_v9  ;;  %v2368_v49 = vmul.f32 0.0051020407, %v8186_v5  ;;  %v12082_v9 = vld [vmem:[#allocation174_spill] sm:$0xff] }
 0x35c   :  { %3600 = vperm.xlu0 %5012, %v8652_v54   ;;  %5074 = vrsqrt.f32 %v2796_v42  ;;  %v2464_v58 = vmul.f32 %v8751_v59, %v8751_v59  ;;  %v2698_v5 = vld [vmem:[%s11199_s3 + $0x218] sm:$0xff]  ;;  %v12140_v54 = vld [vmem:[#allocation168_spill] sm:$0xff] }
 0x35d   :  { %12080 = vst [vmem:[#allocation251_spill] sm:$0xff] %v8748_v38  ;;  %5076 = vrsqrt.f32 %v2750_v18  ;;  %v2361_v37 = vmul.f32 0.0051020407, %v12140_v54 }
 0x35e   :  { %v8664_v48 = vpop.xlane.xlu1 %1461 }
 0x360   :  { %3370 = vperm.xlu0 %5012, %v8666_v7   ;;  %v5069_v43 = vpop.eup %5068 }
 0x362   :  { %v8680_v14 = vpop.xlane.xlu1 %1653 }
 0x364   :  { %3610 = vperm.xlu0 %5012, %v8682_v35  }
 0x366   :  { %v8694_v22 = vpop.xlane.xlu1 %2037  ;;  %v8698_v23 = vpop.xlane.xlu0 %1465 }
 0x368   :  { %3380 = vperm.xlu0 %5012, %v8696_v17  }
 0x36a   :  { %v8713_v2 = vpop.xlane.xlu1 %2229  ;;  %v8717_v1 = vpop.xlane.xlu0 %1657 }
 0x36b   :  { %1477 = vadd.xlane.f32.xlu1 %v8423_v36 }
 0x36c   :  { %3620 = vperm.xlu0 %5012, %v8715_v53   ;;  %v12109_v53 = vld [vmem:[#allocation133_spill] sm:$0xff] }
 0x36d   :  { %v12110_v29 = vsub.f32 %v12108_v11, %v12109_v53  ;;  %v12114_v53 = vld [vmem:[#allocation236_spill] sm:$0xff] }
 0x36e   :  { %v3321_v3 = vpop.permute.xlu1 %3320  ;;  %v8734_v36 = vpop.xlane.xlu0 %2041 }
 0x36f   :  { %1669 = vadd.xlane.f32.xlu1 %v8446_v34  ;;  %v2510_v34 = vmul.f32 %v8730_v41, %v8730_v41  ;;  %v12088_v41 = vld [vmem:[#allocation276_spill] sm:$0xff]  ;;  %v2785_v35 = vadd.f32 0.001, %v12110_v29 }
 0x370   :  { %3390 = vperm.xlu0 %5012, %v8732_v57   ;;  %v8788_v19 = vmul.f32 0.0051020407, %v12088_v41 }
 0x371   :  { %v2606_v51 = vsub.f32 %v2414_v24, %v2510_v34  ;;  %v8773_v24 = vmul.f32 0.0051020407, %v12082_v9  ;;  %v12086_v34 = vld [vmem:[#allocation16_spill] sm:$0xff] }
 0x372   :  { %v3988_v61 = vpop.permute.xlu1 %3987  ;;  %v8758_v50 = vpop.xlane.xlu0 %2233  ;;  %v3790_v21 = vmul.f32 %v3321_v3, %v12086_v34  ;;  %v12093_v34 = vld [vmem:[#allocation117_spill] sm:$0xff] }
 0x373   :  { %v4459_v6 = vadd.f32 %v3988_v61, %v3787_v15  ;;  %v4460_v8 = vadd.f32 %v3988_v61, %v3788_v45  ;;  %2053 = vadd.xlane.f32.xlu1 %v8438_v16  ;;  %v8768_v16 = vmul.f32 %v5069_v43, %v2650_v13  ;;  %v5071_v61 = vpop.eup %5070  ;;  %12083 = vst [vmem:[#allocation253_spill] sm:$0xff] %v8773_v24  ;;  %v2798_v42 = vadd.f32 0.001, %v2606_v51  ;;  %v12084_v43 = vld [vmem:[#allocation273_spill] sm:$0xff] }
 0x374   :  { %3630 = vperm.xlu0 %5012, %v8748_v38   ;;  %v2416_v15 = vmul.f32 0.0051020407, %v12084_v43  ;;  %v3789_v45 = vmul.f32 %v3321_v3, %v12085_v56  ;;  %v8783_v13 = vmul.f32 %v5071_v61, %v2698_v5  ;;  %v5073_v9 = vpop.eup %5072  ;;  %v12089_v61 = vld [vmem:[#allocation281_spill] sm:$0xff]  ;;  %v2466_v56 = vmul.f32 %v8788_v19, %v8788_v19 }
 0x375   :  { %4651 = vst [vmem:[%s11201_s5 + $0x20] sm:$0xff] %v4459_v6  ;;  %4652 = vst.msk [vmem:[%s11201_s5 + $0x28] sm:$0xff] %vm1286_vm1, %v4460_v8  ;;  %v2560_v8 = vsub.f32 %v2368_v49, %v2464_v58  ;;  %v2652_v49 = vld [vmem:[%s11199_s3 + $0xa8] sm:$0xff]  ;;  %5078 = vrsqrt.f32 %v2798_v42  ;;  %v2370_v5 = vmul.f32 0.0051020407, %v12089_v61  ;;  %v5075_v43 = vpop.eup %5074 }
 0x376   :  { %12087 = vst [vmem:[#allocation256_spill] sm:$0xff] %v8783_v13  ;;  %v8802_v41 = vmul.f32 %v5073_v9, %v2652_v49  ;;  %v12090_v42 = vld [vmem:[#allocation279_spill] sm:$0xff]  ;;  %v5077_v49 = vpop.eup %5076 }
 0x377   :  { %2245 = vadd.xlane.f32.xlu1 %v8454_v25  ;;  %v2512_v25 = vmul.f32 %v8773_v24, %v8773_v24  ;;  %v2752_v3 = vadd.f32 0.001, %v2560_v8  ;;  %v8807_v8 = vmul.f32 0.0051020407, %v12090_v42  ;;  %v12097_v24 = vld [vmem:[#allocation285_spill] sm:$0xff] }
 0x378   :  { %3400 = vperm.xlu0 %5012, %v8768_v16  }
 0x379   :  { %v2608_v58 = vsub.f32 %v2416_v15, %v2512_v25  ;;  %12091 = vst [vmem:[#allocation264_spill] sm:$0xff] %v8807_v8  ;;  %v2700_v15 = vld [vmem:[%s11199_s3 + $0x228] sm:$0xff]  ;;  %5080 = vrsqrt.f32 %v2752_v3  ;;  %v2562_v25 = vsub.f32 %v2370_v5, %v2466_v56  ;;  %v2514_v42 = vmul.f32 %v8807_v8, %v8807_v8  ;;  %v12099_v5 = vld [vmem:[#allocation289_spill] sm:$0xff] }
 0x37a   :  { %v3993_v6 = vpop.permute.xlu0 %3992  ;;  %v8817_v61 = vmul.f32 %v5075_v43, %v2700_v15  ;;  %v2372_v56 = vmul.f32 0.0051020407, %v12099_v5  ;;  %v12100_v15 = vld [vmem:[#allocation215_spill] sm:$0xff] }
 0x37b   :  { %v4461_v18 = vadd.f32 %v3993_v6, %v3789_v45  ;;  %v4462_v51 = vadd.f32 %v3993_v6, %v3790_v21  ;;  %v12092_v45 = vld [vmem:[#allocation222_spill] sm:$0xff]  ;;  %v2800_v9 = vadd.f32 0.001, %v2608_v58  ;;  %v2754_v3 = vadd.f32 0.001, %v2562_v25  ;;  %v12103_v25 = vld [vmem:[#allocation225_spill] sm:$0xff] }
 0x37c   :  { %3640 = vperm.xlu0 %5012, %v8783_v13   ;;  %v12094_v21 = vsub.f32 %v12092_v45, %v12093_v34  ;;  %12096 = vst [vmem:[#allocation260_spill] sm:$0xff] %v8817_v61  ;;  %v8822_v13 = vmul.f32 0.0051020407, %v12097_v24  ;;  %v2654_v45 = vld [vmem:[%s11199_s3 + $0xb8] sm:$0xff]  ;;  %v3117_v34 = vmul.f32 %v8580_v60, %v12100_v15  ;;  %v12106_v5 = vld [vmem:[#allocation291_spill] sm:$0xff] }
 0x37d   :  { %4653 = vst [vmem:[%s11201_s5 + $0x30] sm:$0xff] %v4461_v18  ;;  %4654 = vst.msk [vmem:[%s11201_s5 + $0x38] sm:$0xff] %vm1286_vm1, %v4462_v51  ;;  %v12095_v18 = vld [vmem:[#allocation282_spill] sm:$0xff]  ;;  %v8829_v43 = vmul.f32 %v5077_v49, %v2654_v45  ;;  %v2420_v15 = vmul.f32 0.0051020407, %v12106_v5  ;;  %v12117_v5 = vld [vmem:[#allocation239_spill] sm:$0xff] }
 0x37e   :  { %v2783_v6 = vadd.f32 0.001, %v12094_v21  ;;  %v2418_v51 = vmul.f32 0.0051020407, %v12095_v18  ;;  %12098 = vst [vmem:[#allocation267_spill] sm:$0xff] %v8822_v13  ;;  %v2468_v24 = vmul.f32 %v8822_v13, %v8822_v13  ;;  %v12101_v18 = vld [vmem:[#allocation287_spill] sm:$0xff] }
 0x37f   :  { %v5079_v21 = vpop.eup %5078  ;;  %v8836_v8 = vmul.f32 0.0051020407, %v12101_v18  ;;  %v12206_v13 = vld [vmem:[#allocation275_spill] sm:$0xff] }
 0x380   :  { %3410 = vperm.xlu0 %5012, %v8802_v41   ;;  %5082 = vrsqrt.f32 %v2783_v6  ;;  %v2610_v58 = vsub.f32 %v2418_v51, %v2514_v42  ;;  %v2702_v6 = vld [vmem:[%s11199_s3 + $0x238] sm:$0xff]  ;;  %v12104_v51 = vld [vmem:[#allocation223_spill] sm:$0xff]  ;;  %v2564_v45 = vsub.f32 %v2372_v56, %v2468_v24  ;;  %v12113_v56 = vld [vmem:[#allocation302_spill] sm:$0xff] }
 0x381   :  { %5084 = vrsqrt.f32 %v2800_v9  ;;  %12102 = vst [vmem:[#allocation10_spill] sm:$0xff] %v8836_v8  ;;  %v3021_v9 = vld [vmem:[%s11200_s4 + $0x30] sm:$0xff]  ;;  %v12105_v49 = vsub.f32 %v12103_v25, %v12104_v51  ;;  %v8850_v18 = vmul.f32 %v5079_v21, %v2702_v6  ;;  %v2516_v25 = vmul.f32 %v8836_v8, %v8836_v8  ;;  %v12111_v51 = vld [vmem:[#allocation293_spill] sm:$0xff] }
 0x382   :  { %5086 = vrsqrt.f32 %v2754_v3  ;;  %v2802_v60 = vadd.f32 0.001, %v2610_v58  ;;  %v2756_v3 = vadd.f32 0.001, %v2564_v45  ;;  %v2374_v11 = vmul.f32 0.0051020407, %v12113_v56 }
 0x383   :  { %v2737_v42 = vadd.f32 0.001, %v12105_v49  ;;  %12107 = vst [vmem:[#allocation12_spill] sm:$0xff] %v8850_v18  ;;  %v5081_v38 = vpop.eup %5080  ;;  %v8858_v49 = vmul.f32 0.0051020407, %v12111_v51  ;;  %v2612_v58 = vsub.f32 %v2420_v15, %v2516_v25  ;;  %v12118_v51 = vld [vmem:[#allocation145_spill] sm:$0xff] }
 0x384   :  { %3650 = vperm.xlu0 %5012, %v8817_v61   ;;  %v3213_v61 = vsub.f32 %v3021_v9, %v3117_v34  ;;  %v12115_v34 = vld [vmem:[#allocation235_spill] sm:$0xff]  ;;  %v2422_v56 = vmul.f32 0.0051020407, %v8329_v0  ;;  %v3023_v0 = vld [vmem:[%s11200_s4 + $0x40] sm:$0xff] }
 0x385   :  { %12112 = vst [vmem:[#allocation271_spill] sm:$0xff] %v8858_v49  ;;  %5088 = vrsqrt.f32 %v2737_v42  ;;  %v12116_v21 = vsub.f32 %v12114_v53, %v12115_v34  ;;  %v12119_v42 = vsub.f32 %v12117_v5, %v12118_v51  ;;  %v2704_v15 = vld [vmem:[%s11199_s3 + $0x248] sm:$0xff]  ;;  %v2804_v25 = vadd.f32 0.001, %v2612_v58 }
 0x386   :  { %5090 = vrsqrt.f32 %v2802_v60  ;;  %v12120_v60 = vld [vmem:[#allocation191_spill] sm:$0xff]  ;;  %v8888_v53 = vmul.f32 0.0051020407, %v8343_v52  ;;  %v2376_v52 = vmul.f32 0.0051020407, %v8361_v27  ;;  %v2706_v27 = vld [vmem:[%s11199_s3 + $0x258] sm:$0xff] }
 0x387   :  { %v2739_v24 = vadd.f32 0.001, %v12116_v21  ;;  %5092 = vrsqrt.f32 %v2785_v35  ;;  %v2787_v8 = vadd.f32 0.001, %v12119_v42  ;;  %v8876_v45 = vmul.f32 0.0051020407, %v12120_v60 }
 0x388   :  { %3420 = vperm.xlu0 %5012, %v8829_v43   ;;  %3340 = vperm.xlu1 %5013, %v8575_v46   ;;  %v2656_v46 = vld [vmem:[%s11199_s3 + $0xc8] sm:$0xff]  ;;  %v12122_v35 = vld [vmem:[#allocation226_spill] sm:$0xff]  ;;  %5094 = vrsqrt.f32 %v2756_v3  ;;  %12123 = vst [vmem:[#allocation273_spill] sm:$0xff] %v8888_v53  ;;  %v2658_v3 = vld [vmem:[%s11199_s3 + $0xd8] sm:$0xff]  ;;  %v8911_v60 = vmul.f32 0.0051020407, %v8351_v30 }
 0x389   :  { %v8868_v6 = vmul.f32 %v5081_v38, %v2656_v46  ;;  %12121 = vst [vmem:[#allocation174_spill] sm:$0xff] %v8876_v45  ;;  %v2687_v38 = vld [vmem:[%s11199_s3 + $0x1c0] sm:$0xff]  ;;  %5096 = vrsqrt.f32 %v2739_v24  ;;  %v2518_v51 = vmul.f32 %v8876_v45, %v8876_v45  ;;  %v2689_v30 = vld [vmem:[%s11199_s3 + $0x1d0] sm:$0xff] }
 0x38a   :  { %v5083_v29 = vpop.eup %5082  ;;  %5098 = vrsqrt.f32 %v2787_v8  ;;  %12127 = vst [vmem:[#allocation276_spill] sm:$0xff] %v8911_v60 }
 0x38b   :  { %v5085_v9 = vpop.eup %5084  ;;  %v8892_v21 = vmul.f32 %v5083_v29, %v2687_v38  ;;  %5100 = vrsqrt.f32 %v2804_v25  ;;  %v2614_v8 = vsub.f32 %v2422_v56, %v2518_v51  ;;  %v2472_v29 = vmul.f32 %v8888_v53, %v8888_v53  ;;  %v12128_v38 = vld [vmem:[#allocation247_spill] sm:$0xff] }
 0x38c   :  { %3660 = vperm.xlu0 %5012, %v8850_v18   ;;  %4007 = vperm.xlu1 %5013, %v3213_v61   ;;  %v2470_v61 = vmul.f32 %v8858_v49, %v8858_v49  ;;  %v8890_v34 = vmul.f32 %v5085_v9, %v2704_v15  ;;  %v5087_v5 = vpop.eup %5086  ;;  %v12126_v9 = vld [vmem:[#allocation227_spill] sm:$0xff]  ;;  %v2641_v15 = vld [vmem:[%s11199_s3 + $0x50] sm:$0xff] }
 0x38d   :  { %12125 = vst [vmem:[#allocation16_spill] sm:$0xff] %v8892_v21  ;;  %v8907_v24 = vmul.f32 %v5087_v5, %v2658_v3  ;;  %v3215_v42 = vsub.f32 %v3023_v0, %v12126_v9  ;;  %v12131_v56 = vld [vmem:[#allocation155_spill] sm:$0xff]  ;;  %v2568_v51 = vsub.f32 %v2376_v52, %v2472_v29  ;;  %v12133_v0 = vld [vmem:[#allocation170_spill] sm:$0xff]  ;;  %v2806_v45 = vadd.f32 0.001, %v2614_v8  ;;  %v12138_v52 = vld [vmem:[#allocation164_spill] sm:$0xff] }
 0x38e   :  { %v2566_v46 = vsub.f32 %v2374_v11, %v2470_v61  ;;  %12124 = vst [vmem:[#allocation14_spill] sm:$0xff] %v8890_v34  ;;  %v8923_v5 = vmul.f32 0.0051020407, %v12131_v56  ;;  %v8930_v9 = vmul.f32 0.0051020407, %v12133_v0  ;;  %v2520_v0 = vmul.f32 %v8911_v60, %v8911_v60 }
 0x38f   :  { %v5089_v11 = vpop.eup %5088  ;;  %v2407_v29 = vmul.f32 0.0051020407, %v12138_v52 }
 0x390   :  { %3430 = vperm.xlu0 %5012, %v8868_v6   ;;  %3345 = vperm.xlu1 %5013, %v12122_v35   ;;  %v2758_v58 = vadd.f32 0.001, %v2566_v46  ;;  %v5091_v61 = vpop.eup %5090  ;;  %v12129_v35 = vld [vmem:[#allocation245_spill] sm:$0xff]  ;;  %12132 = vst [vmem:[#allocation281_spill] sm:$0xff] %v8923_v5  ;;  %12134 = vst [vmem:[#allocation279_spill] sm:$0xff] %v8930_v9 }
 0x391   :  { %v12130_v25 = vsub.f32 %v12128_v38, %v12129_v35  ;;  %v5093_v3 = vpop.eup %5092  ;;  %v2424_v38 = vmul.f32 0.0051020407, %v8366_v55  ;;  %v12135_v35 = vld [vmem:[#allocation250_spill] sm:$0xff]  ;;  %v8937_v18 = vmul.f32 %v5091_v61, %v2706_v27  ;;  %v2660_v55 = vld [vmem:[%s11199_s3 + $0xe8] sm:$0xff]  ;;  %v2503_v61 = vmul.f32 %v8923_v5, %v8923_v5 }
 0x392   :  { %5102 = vrsqrt.f32 %v2758_v58  ;;  %v8945_v58 = vmul.f32 0.0051020407, %v8370_v40  ;;  %v8954_v54 = vmul.f32 %v5093_v3, %v2689_v30  ;;  %v2457_v40 = vmul.f32 %v8930_v9, %v8930_v9  ;;  %v12143_v30 = vld [vmem:[#allocation171_spill] sm:$0xff] }
 0x393   :  { %v2741_v46 = vadd.f32 0.001, %v12130_v25  ;;  %v12136_v25 = vld [vmem:[#allocation152_spill] sm:$0xff]  ;;  %12139 = vst [vmem:[#allocation222_spill] sm:$0xff] %v8937_v18  ;;  %v8966_v3 = vmul.f32 0.0051020407, %v12143_v30 }
 0x394   :  { %3670 = vperm.xlu0 %5012, %v8890_v34   ;;  %3585 = vperm.xlu1 %5013, %v8892_v21   ;;  %v12137_v56 = vsub.f32 %v12135_v35, %v12136_v25  ;;  %v5095_v21 = vpop.eup %5094  ;;  %12141 = vst [vmem:[#allocation117_spill] sm:$0xff] %v8945_v58  ;;  %12142 = vst [vmem:[#allocation282_spill] sm:$0xff] %v8954_v54  ;;  %v2378_v35 = vmul.f32 0.0051020407, %v8378_v31  ;;  %v2599_v25 = vsub.f32 %v2407_v29, %v2503_v61  ;;  %v12150_v29 = vld [vmem:[#allocation173_spill] sm:$0xff] }
 0x395   :  { %v5097_v8 = vpop.eup %5096  ;;  %5104 = vrsqrt.f32 %v2741_v46  ;;  %v2643_v46 = vld [vmem:[%s11199_s3 + $0x60] sm:$0xff]  ;;  %12144 = vst [vmem:[#allocation285_spill] sm:$0xff] %v8966_v3  ;;  %v2553_v60 = vsub.f32 %v2361_v37, %v2457_v40  ;;  %v2474_v5 = vmul.f32 %v8945_v58, %v8945_v58  ;;  %v2409_v61 = vmul.f32 0.0051020407, %v12150_v29 }
 0x396   :  { %v2789_v34 = vadd.f32 0.001, %v12137_v56  ;;  %v5099_v27 = vpop.eup %5098  ;;  %5106 = vrsqrt.f32 %v2806_v45  ;;  %v8968_v56 = vmul.f32 %v5095_v21, %v2660_v55  ;;  %v12146_v45 = vld [vmem:[#allocation166_spill] sm:$0xff]  ;;  %v8984_v21 = vmul.f32 %v5097_v8, %v2643_v46 }
 0x397   :  { %v5101_v52 = vpop.eup %5100  ;;  %v2570_v40 = vsub.f32 %v2378_v35, %v2474_v5  ;;  %v8990_v30 = vmul.f32 0.0051020407, %v8390_v10  ;;  %v12156_v5 = vld [vmem:[#allocation316_spill] sm:$0xff]  ;;  %v2662_v35 = vld [vmem:[%s11199_s3 + $0xf8] sm:$0xff] }
 0x398   :  { %3440 = vperm.xlu0 %5012, %v8907_v24   ;;  %4017 = vperm.xlu1 %5013, %v3215_v42   ;;  %v8939_v42 = vmul.f32 %v5089_v11, %v2641_v15  ;;  %v2760_v11 = vadd.f32 0.001, %v2568_v51  ;;  %v2616_v15 = vsub.f32 %v2424_v38, %v2520_v0  ;;  %v2691_v51 = vld [vmem:[%s11199_s3 + $0x1e0] sm:$0xff]  ;;  %5108 = vrsqrt.f32 %v2789_v34  ;;  %12145 = vst [vmem:[#allocation289_spill] sm:$0xff] %v8968_v56  ;;  %v12147_v38 = vld [vmem:[#allocation159_spill] sm:$0xff] }
 0x399   :  { %v12148_v0 = vsub.f32 %v12146_v45, %v12147_v38  ;;  %v2708_v34 = vld [vmem:[%s11199_s3 + $0x268] sm:$0xff]  ;;  %v8986_v37 = vmul.f32 %v5099_v27, %v2691_v51  ;;  %12152 = vst [vmem:[#allocation225_spill] sm:$0xff] %v8990_v30  ;;  %v8992_v45 = vpop.permute.xlu1 %3325  ;;  %v2791_v38 = vadd.f32 0.001, %v2599_v25  ;;  %v2380_v10 = vmul.f32 0.0051020407, %v12156_v5 }
 0x39a   :  { %5110 = vrsqrt.f32 %v2760_v11  ;;  %v2808_v55 = vadd.f32 0.001, %v2616_v15  ;;  %v2505_v11 = vmul.f32 %v8966_v3, %v8966_v3  ;;  %v8999_v8 = vmul.f32 %v5101_v52, %v2708_v34  ;;  %v12157_v51 = vld [vmem:[#allocation189_spill] sm:$0xff]  ;;  %v12160_v52 = vld [vmem:[#allocation254_spill] sm:$0xff] }
 0x39b   :  { %v2743_v31 = vadd.f32 0.001, %v12148_v0  ;;  %12151 = vst [vmem:[#allocation287_spill] sm:$0xff] %v8986_v37  ;;  %v12153_v0 = vld [vmem:[#allocation180_spill] sm:$0xff]  ;;  %v2745_v15 = vadd.f32 0.001, %v2553_v60  ;;  %v2476_v5 = vmul.f32 %v8990_v30, %v8990_v30 }
 0x39c   :  { %3680 = vperm.xlu0 %5012, %v8937_v18   ;;  %3355 = vperm.xlu1 %5013, %v8939_v42   ;;  %v8976_v18 = vmul.f32 0.0051020407, %v8374_v47  ;;  %v2426_v47 = vmul.f32 0.0051020407, %v8384_v62  ;;  %v8997_v29 = vmul.f32 0.0051020407, %v12153_v0  ;;  %v5103_v27 = vpop.eup %5102  ;;  %v2601_v46 = vsub.f32 %v2409_v61, %v2505_v11 }
 0x39d   :  { %12155 = vst [vmem:[#allocation291_spill] sm:$0xff] %v8999_v8  ;;  %5112 = vrsqrt.f32 %v2743_v31  ;;  %v9008_v25 = vmul.f32 0.0051020407, %v12157_v51  ;;  %v12159_v0 = vld [vmem:[#allocation186_spill] sm:$0xff]  ;;  %v9012_v34 = vmul.f32 0.0051020407, %v12160_v52 }
 0x39e   :  { %12149 = vst [vmem:[#allocation215_spill] sm:$0xff] %v8976_v18  ;;  %12154 = vst [vmem:[#allocation223_spill] sm:$0xff] %v8997_v29  ;;  %v2522_v62 = vmul.f32 %v8976_v18, %v8976_v18  ;;  %v2363_v3 = vmul.f32 0.0051020407, %v12159_v0  ;;  %5114 = vrsqrt.f32 %v2808_v55  ;;  %v2762_v60 = vadd.f32 0.001, %v2570_v40 }
 0x39f   :  { %12158 = vst [vmem:[#allocation229_spill] sm:$0xff] %v9008_v25  ;;  %12161 = vst [vmem:[#allocation133_spill] sm:$0xff] %v9012_v34  ;;  %v5105_v18 = vpop.eup %5104  ;;  %5116 = vrsqrt.f32 %v2791_v38  ;;  %v2459_v61 = vmul.f32 %v8997_v29, %v8997_v29  ;;  %v12162_v11 = vld [vmem:[#allocation252_spill] sm:$0xff]  ;;  %v9021_v0 = vmul.f32 %v5103_v27, %v2662_v35  ;;  %v9025_v55 = vmul.f32 0.0051020407, %v12165_v33  ;;  %v2710_v38 = vld [vmem:[%s11199_s3 + $0x278] sm:$0xff] }
 0x3a0   :  { %3450 = vperm.xlu0 %5012, %v8968_v56   ;;  %3595 = vperm.xlu1 %5013, %v8954_v54   ;;  %v2618_v31 = vsub.f32 %v2426_v47, %v2522_v62  ;;  %v2411_v51 = vmul.f32 0.0051020407, %v12162_v11  ;;  %v5107_v52 = vpop.eup %5106  ;;  %5118 = vrsqrt.f32 %v2745_v15  ;;  %v2572_v40 = vsub.f32 %v2380_v10, %v2476_v5  ;;  %v9027_v47 = vpop.permute.xlu1 %3565  ;;  %v2645_v27 = vld [vmem:[%s11199_s3 + $0x70] sm:$0xff]  ;;  %v12169_v11 = vld [vmem:[#allocation255_spill] sm:$0xff] }
 0x3a1   :  { %12163 = vst [vmem:[#allocation293_spill] sm:$0xff] %v9021_v0  ;;  %12166 = vst [vmem:[#allocation302_spill] sm:$0xff] %v9025_v55  ;;  %v9029_v62 = vpop.permute.xlu0 %3570  ;;  %v2793_v15 = vadd.f32 0.001, %v2601_v46  ;;  %v2555_v33 = vsub.f32 %v2363_v3, %v2459_v61  ;;  %v9040_v10 = vmul.f32 0.0051020407, %v12169_v11  ;;  %v2461_v5 = vmul.f32 %v9012_v34, %v9012_v34 }
 0x3a2   :  { %12167 = vst [vmem:[#allocation236_spill] sm:$0xff] %v9027_v47  ;;  %12168 = vst [vmem:[#allocation235_spill] sm:$0xff] %v9029_v62  ;;  %v5109_v35 = vpop.eup %5108  ;;  %5120 = vrsqrt.f32 %v2762_v60  ;;  %v2810_v47 = vadd.f32 0.001, %v2618_v31  ;;  %v2428_v62 = vmul.f32 0.0051020407, %v8450_v32  ;;  %v9051_v30 = vmul.f32 %v5107_v52, %v2710_v38 }
 0x3a3   :  { %12170 = vst [vmem:[#allocation239_spill] sm:$0xff] %v9040_v10  ;;  %v2693_v46 = vld [vmem:[%s11199_s3 + $0x1f0] sm:$0xff]  ;;  %v12171_v61 = vld [vmem:[#allocation263_spill] sm:$0xff]  ;;  %v9053_v58 = vmul.f32 %v5105_v18, %v2645_v27  ;;  %v2524_v34 = vmul.f32 %v9025_v55, %v9025_v55  ;;  %v2764_v60 = vadd.f32 0.001, %v2572_v40  ;;  %5122 = vrsqrt.f32 %v2793_v15  ;;  %v2647_v55 = vld [vmem:[%s11199_s3 + $0x80] sm:$0xff] }
 0x3a4   :  { %3690 = vperm.xlu0 %5012, %v8999_v8   ;;  %3365 = vperm.xlu1 %5013, %v8984_v21   ;;  %v12164_v8 = vld [vmem:[#allocation259_spill] sm:$0xff]  ;;  %v2413_v11 = vmul.f32 0.0051020407, %v12171_v61  ;;  %12172 = vst [vmem:[#allocation145_spill] sm:$0xff] %v9051_v30  ;;  %v2509_v18 = vmul.f32 %v9040_v10, %v9040_v10  ;;  %v2747_v40 = vadd.f32 0.001, %v2555_v33  ;;  %5124 = vrsqrt.f32 %v2810_v47 }
 0x3a5   :  { %v2365_v54 = vmul.f32 0.0051020407, %v12164_v8  ;;  %v2507_v8 = vmul.f32 %v9008_v25, %v9008_v25  ;;  %v5111_v25 = vpop.eup %5110  ;;  %v12173_v31 = vld [vmem:[#allocation211_spill] sm:$0xff]  ;;  %v2620_v38 = vsub.f32 %v2428_v62, %v2524_v34  ;;  %v2382_v27 = vmul.f32 0.0051020407, %v8488_v39  ;;  %v12176_v61 = vld [vmem:[#allocation213_spill] sm:$0xff] }
 0x3a6   :  { %v9058_v29 = vmul.f32 0.0051020407, %v12173_v31  ;;  %v9073_v31 = vmul.f32 0.0051020407, %v12176_v61  ;;  %5126 = vrsqrt.f32 %v2764_v60  ;;  %v2712_v39 = vld [vmem:[%s11199_s3 + $0x288] sm:$0xff] }
 0x3a7   :  { %v2603_v3 = vsub.f32 %v2411_v51, %v2507_v8  ;;  %v2664_v51 = vld [vmem:[%s11199_s3 + $0x108] sm:$0xff]  ;;  %v5113_v52 = vpop.eup %5112  ;;  %5128 = vrsqrt.f32 %v2747_v40  ;;  %v2812_v60 = vadd.f32 0.001, %v2620_v38  ;;  %v2649_v40 = vld [vmem:[%s11199_s3 + $0x90] sm:$0xff] }
 0x3a8   :  { %3460 = vperm.xlu0 %5012, %v9021_v0   ;;  %3605 = vperm.xlu1 %5013, %v8986_v37   ;;  %v2557_v37 = vsub.f32 %v2365_v54, %v2461_v5  ;;  %12174 = vst [vmem:[#allocation191_spill] sm:$0xff] %v9058_v29  ;;  %v9069_v54 = vmul.f32 %v5109_v35, %v2693_v46  ;;  %12177 = vst [vmem:[#allocation227_spill] sm:$0xff] %v9073_v31  ;;  %v5115_v10 = vpop.eup %5114  ;;  %v12195_v0 = vld [vmem:[#allocation332_spill] sm:$0xff] }
 0x3a9   :  { %v2795_v8 = vadd.f32 0.001, %v2603_v3  ;;  %v2605_v5 = vsub.f32 %v2413_v11, %v2509_v18  ;;  %v9075_v15 = vmul.f32 %v5111_v25, %v2664_v51  ;;  %v2478_v47 = vmul.f32 %v9058_v29, %v9058_v29  ;;  %v5117_v33 = vpop.eup %5116  ;;  %v12179_v25 = vld [vmem:[#allocation324_spill] sm:$0xff] }
 0x3aa   :  { %12175 = vst [vmem:[#allocation226_spill] sm:$0xff] %v9069_v54  ;;  %v2749_v35 = vadd.f32 0.001, %v2557_v37  ;;  %v2430_v46 = vmul.f32 0.0051020407, %v12179_v25  ;;  %v2695_v37 = vld [vmem:[%s11199_s3 + $0x200] sm:$0xff]  ;;  %v5119_v11 = vpop.eup %5118  ;;  %v9095_v18 = vmul.f32 %v5113_v52, %v2647_v55  ;;  %v9099_v25 = vmul.f32 %v5115_v10, %v2712_v39 }
 0x3ab   :  { %v1470_v32 = vpop.xlane.xlu1 %1469  ;;  %v9060_v53 = vpop.xlane.xlu0 %1473  ;;  %12178 = vst [vmem:[#allocation247_spill] sm:$0xff] %v9075_v15  ;;  %v2574_v51 = vsub.f32 %v2382_v27, %v2478_v47  ;;  %5130 = vrsqrt.f32 %v2795_v8  ;;  %v2797_v61 = vadd.f32 0.001, %v2605_v5  ;;  %v2666_v55 = vld [vmem:[%s11199_s3 + $0x118] sm:$0xff]  ;;  %v9109_v52 = vmul.f32 %v5117_v33, %v2695_v37  ;;  %v12185_v8 = vld [vmem:[#allocation268_spill] sm:$0xff]  ;;  %v12187_v47 = vld [vmem:[#allocation330_spill] sm:$0xff] }
 0x3ac   :  { %3700 = vperm.xlu0 %5012, %v9051_v30   ;;  %3375 = vperm.xlu1 %5013, %v9053_v58   ;;  %v9088_v3 = vmul.f32 0.0051020407, %v1470_v32  ;;  %12180 = vst [vmem:[#allocation245_spill] sm:$0xff] %v9095_v18  ;;  %v2526_v32 = vmul.f32 %v9073_v31, %v9073_v31  ;;  %12181 = vst [vmem:[#allocation155_spill] sm:$0xff] %v9099_v25  ;;  %v5121_v30 = vpop.eup %5120  ;;  %5132 = vrsqrt.f32 %v2749_v35  ;;  %v9121_v5 = vmul.f32 0.0051020407, %v12185_v8 }
 0x3ad   :  { %12184 = vst [vmem:[#allocation250_spill] sm:$0xff] %v9109_v52  ;;  %5134 = vrsqrt.f32 %v2812_v60  ;;  %v2766_v35 = vadd.f32 0.001, %v2574_v51  ;;  %v2384_v39 = vmul.f32 0.0051020407, %v12187_v47  ;;  %v5123_v33 = vpop.eup %5122  ;;  %v9124_v37 = vmul.f32 %v5121_v30, %v2666_v55  ;;  %v12190_v60 = vld [vmem:[#allocation270_spill] sm:$0xff] }
 0x3ae   :  { %v2622_v10 = vsub.f32 %v2430_v46, %v2526_v32  ;;  %v2484_v38 = vmul.f32 %v9088_v3, %v9088_v3  ;;  %12186 = vst [vmem:[#allocation152_spill] sm:$0xff] %v9121_v5  ;;  %5136 = vrsqrt.f32 %v2797_v61  ;;  %v2697_v32 = vld [vmem:[%s11199_s3 + $0x210] sm:$0xff]  ;;  %v5125_v8 = vpop.eup %5124  ;;  %v9135_v51 = vmul.f32 0.0051020407, %v12190_v60  ;;  %v12192_v47 = vld [vmem:[#allocation177_spill] sm:$0xff] }
 0x3af   :  { %v1662_v34 = vpop.xlane.xlu1 %1661  ;;  %v9082_v62 = vpop.xlane.xlu0 %1665  ;;  %12188 = vst [vmem:[#allocation164_spill] sm:$0xff] %v9124_v37  ;;  %v2367_v31 = vmul.f32 0.0051020407, %v12192_v47  ;;  %v12193_v61 = vld [vmem:[#allocation329_spill] sm:$0xff]  ;;  %v2463_v47 = vmul.f32 %v9121_v5, %v9121_v5  ;;  %5138 = vrsqrt.f32 %v2766_v35 }
 0x3b0   :  { %3470 = vperm.xlu0 %5012, %v9075_v15   ;;  %3615 = vperm.xlu1 %5013, %v9069_v54   ;;  %v12182_v54 = vld [vmem:[#allocation328_spill] sm:$0xff]  ;;  %v9116_v27 = vmul.f32 0.0051020407, %v1662_v34  ;;  %v9129_v34 = vmul.f32 %v5119_v11, %v2649_v40  ;;  %12191 = vst [vmem:[#allocation171_spill] sm:$0xff] %v9135_v51  ;;  %v9141_v55 = vmul.f32 0.0051020407, %v12193_v61  ;;  %v5127_v60 = vpop.eup %5126  ;;  %v9161_v5 = vmul.f32 %v9135_v51, %v9135_v51 }
 0x3b1   :  { %v9102_v29 = vmul.f32 0.0051020407, %v12182_v54  ;;  %v2432_v61 = vmul.f32 0.0051020407, %v12195_v0  ;;  %v2559_v35 = vsub.f32 %v2367_v31, %v2463_v47  ;;  %v12203_v51 = vld [vmem:[#allocation24_spill] sm:$0xff] }
 0x3b2   :  { %12189 = vst [vmem:[#allocation168_spill] sm:$0xff] %v9129_v34  ;;  %12194 = vst [vmem:[#allocation166_spill] sm:$0xff] %v9141_v55  ;;  %v2532_v11 = vmul.f32 %v9116_v27, %v9116_v27  ;;  %v2528_v0 = vmul.f32 %v9141_v55, %v9141_v55  ;;  %v12201_v55 = vld [vmem:[#allocation20_spill] sm:$0xff] }
 0x3b3   :  { %12183 = vst [vmem:[#allocation170_spill] sm:$0xff] %v9102_v29  ;;  %v2046_v15 = vpop.xlane.xlu1 %2045  ;;  %v9104_v9 = vpop.xlane.xlu0 %2049  ;;  %v2480_v30 = vmul.f32 %v9102_v29, %v9102_v29 }
 0x3b4   :  { %v2388_v54 = vmul.f32 0.0051020407, %v2046_v15  ;;  %3710 = vperm.xlu0 %5012, %v9099_v25   ;;  %3385 = vperm.xlu1 %5013, %v9095_v18   ;;  %v2714_v15 = vld [vmem:[%s11199_s3 + $0x298] sm:$0xff] }
 0x3b5   :  { %v2576_v29 = vsub.f32 %v2384_v39, %v2480_v30  ;;  %v9166_v39 = vmul.f32 0.0051020407, %v8664_v48  ;;  %v2386_v48 = vmul.f32 0.0051020407, %v8694_v22 }
 0x3b6   :  { %v2580_v46 = vsub.f32 %v2388_v54, %v2484_v38  ;;  %v2814_v54 = vadd.f32 0.001, %v2622_v10  ;;  %v2668_v10 = vld [vmem:[%s11199_s3 + $0x128] sm:$0xff] }
 0x3b7   :  { %v2238_v38 = vpop.xlane.xlu1 %2237  ;;  %v9150_v49 = vpop.xlane.xlu0 %2241  ;;  %12198 = vst [vmem:[#allocation180_spill] sm:$0xff] %v9166_v39  ;;  %v2482_v22 = vmul.f32 %v9166_v39, %v9166_v39 }
 0x3b8   :  { %v2772_v40 = vadd.f32 0.001, %v2580_v46  ;;  %v2436_v25 = vmul.f32 0.0051020407, %v2238_v38  ;;  %3480 = vperm.xlu0 %5012, %v9124_v37   ;;  %3625 = vperm.xlu1 %5013, %v9109_v52   ;;  %v9155_v38 = vmul.f32 %v5125_v8, %v2714_v15  ;;  %v9157_v37 = vmul.f32 %v5123_v33, %v2697_v32  ;;  %v5129_v52 = vpop.eup %5128 }
 0x3b9   :  { %v9168_v18 = vpop.eup %5130  ;;  %v9173_v32 = vmul.f32 %v5127_v60, %v2668_v10  ;;  %v2768_v8 = vadd.f32 0.001, %v2576_v29  ;;  %v2716_v60 = vld [vmem:[%s11199_s3 + $0x2a8] sm:$0xff]  ;;  %v2751_v29 = vadd.f32 0.001, %v2559_v35  ;;  %v2651_v35 = vld [vmem:[%s11199_s3 + $0xa0] sm:$0xff]  ;;  %v2578_v39 = vsub.f32 %v2386_v48, %v2482_v22 }
 0x3ba   :  { %5140 = vrsqrt.f32 %v2772_v40  ;;  %v2628_v46 = vsub.f32 %v2436_v25, %v2532_v11  ;;  %12196 = vst [vmem:[#allocation159_spill] sm:$0xff] %v9155_v38  ;;  %12197 = vst [vmem:[#allocation173_spill] sm:$0xff] %v9157_v37  ;;  %v12199_v25 = vld [vmem:[#allocation272_spill] sm:$0xff]  ;;  %v9175_v31 = vpop.eup %5132  ;;  %v2624_v11 = vsub.f32 %v2432_v61, %v2528_v0  ;;  %v12200_v40 = vld [vmem:[#allocation18_spill] sm:$0xff] }
 0x3bb   :  { %v3331_v30 = vpop.permute.xlu1 %3330  ;;  %v2415_v15 = vmul.f32 0.0051020407, %v12199_v25  ;;  %5142 = vrsqrt.f32 %v2814_v54  ;;  %v3791_v47 = vmul.f32 %v8992_v45, %v12200_v40  ;;  %v3792_v25 = vmul.f32 %v8992_v45, %v12201_v55  ;;  %v12202_v54 = vld [vmem:[#allocation22_spill] sm:$0xff]  ;;  %v5135_v10 = vpop.eup %5134  ;;  %v2670_v48 = vld [vmem:[%s11199_s3 + $0x138] sm:$0xff] }
 0x3bc   :  { %v2820_v33 = vadd.f32 0.001, %v2628_v46  ;;  %3720 = vperm.xlu0 %5012, %v9155_v38   ;;  %3395 = vperm.xlu1 %5013, %v9129_v34   ;;  %v3793_v46 = vmul.f32 %v3331_v30, %v12202_v54  ;;  %v3794_v38 = vmul.f32 %v3331_v30, %v12203_v51  ;;  %v12204_v61 = vld [vmem:[#allocation274_spill] sm:$0xff]  ;;  %v9193_v40 = vmul.f32 0.0051020407, %v8680_v14 }
 0x3bd   :  { %v9188_v0 = vmul.f32 0.0051020407, %v12204_v61  ;;  %v2816_v61 = vadd.f32 0.001, %v2624_v11  ;;  %v2434_v14 = vmul.f32 0.0051020407, %v8713_v2  ;;  %v2607_v56 = vsub.f32 %v2415_v15, %v9161_v5 }
 0x3be   :  { %5144 = vrsqrt.f32 %v2820_v33  ;;  %12205 = vst [vmem:[#allocation316_spill] sm:$0xff] %v9193_v40  ;;  %v9195_v33 = vpop.eup %5136  ;;  %v9222_v2 = vmul.f32 %v5135_v10, %v2716_v60  ;;  %v2530_v15 = vmul.f32 %v9193_v40, %v9193_v40  ;;  %v9231_v11 = vmul.f32 %v5129_v52, %v2651_v35  ;;  %v12211_v60 = vld [vmem:[#allocation280_spill] sm:$0xff]  ;;  %v2699_v22 = vld [vmem:[%s11199_s3 + $0x220] sm:$0xff] }
 0x3bf   :  { %v3998_v45 = vpop.permute.xlu1 %3997  ;;  %v4003_v55 = vpop.permute.xlu0 %4002  ;;  %5146 = vrsqrt.f32 %v2768_v8  ;;  %v2417_v10 = vmul.f32 0.0051020407, %v12211_v60  ;;  %v2770_v52 = vadd.f32 0.001, %v2578_v39  ;;  %v12212_v60 = vld [vmem:[#allocation283_spill] sm:$0xff] }
 0x3c0   :  { %v4463_v51 = vadd.f32 %v3998_v45, %v3791_v47  ;;  %v4464_v30 = vadd.f32 %v3998_v45, %v3792_v25  ;;  %v4465_v54 = vadd.f32 %v4003_v55, %v3793_v46  ;;  %v4466_v34 = vadd.f32 %v4003_v55, %v3794_v38  ;;  %3490 = vperm.xlu0 %5012, %v9173_v32   ;;  %v12208_v25 = vld [vmem:[#allocation278_spill] sm:$0xff]  ;;  %v5139_v5 = vpop.eup %5138 }
 0x3c1   :  { %3635 = vperm.xlu1 %5013, %v9157_v37   ;;  %v9205_v47 = vmul.f32 0.0051020407, %v12206_v13  ;;  %v2369_v38 = vmul.f32 0.0051020407, %v12208_v25  ;;  %12209 = vst [vmem:[#allocation186_spill] sm:$0xff] %v9222_v2  ;;  %v2676_v13 = vld [vmem:[%s11199_s3 + $0x168] sm:$0xff]  ;;  %5148 = vrsqrt.f32 %v2751_v29  ;;  %v2626_v45 = vsub.f32 %v2434_v14, %v2530_v15 }
 0x3c2   :  { %4655 = vst [vmem:[%s11201_s5 + $0x40] sm:$0xff] %v4463_v51  ;;  %4656 = vst.msk [vmem:[%s11201_s5 + $0x48] sm:$0xff] %vm1286_vm1, %v4464_v30  ;;  %5150 = vrsqrt.f32 %v2816_v61  ;;  %v2799_v29 = vadd.f32 0.001, %v2607_v56  ;;  %v9248_v35 = vmul.f32 %v5139_v5, %v2670_v48  ;;  %v2724_v25 = vld [vmem:[%s11199_s3 + $0x2e8] sm:$0xff]  ;;  %v9259_v14 = vmul.f32 %v9168_v18, %v2699_v22  ;;  %v2718_v56 = vld [vmem:[%s11199_s3 + $0x2b8] sm:$0xff] }
 0x3c3   :  { %12207 = vst [vmem:[#allocation189_spill] sm:$0xff] %v9205_v47  ;;  %4657 = vst [vmem:[%s11201_s5 + $0x50] sm:$0xff] %v4465_v54  ;;  %v9229_v8 = vpop.permute.xlu0 %3580  ;;  %v2513_v30 = vmul.f32 %v9205_v47, %v9205_v47  ;;  %v9254_v61 = vmul.f32 0.0051020407, %v12212_v60  ;;  %v2653_v15 = vld [vmem:[%s11199_s3 + $0xb0] sm:$0xff]  ;;  %v12215_v48 = vld [vmem:[#allocation286_spill] sm:$0xff]  ;;  %5152 = vrsqrt.f32 %v2770_v52 }
 0x3c4   :  { %4658 = vst.msk [vmem:[%s11201_s5 + $0x58] sm:$0xff] %vm1286_vm1, %v4466_v34  ;;  %12210 = vst [vmem:[#allocation254_spill] sm:$0xff] %v9229_v8  ;;  %v5141_v46 = vpop.eup %5140  ;;  %v2465_v34 = vmul.f32 %v9188_v0, %v9188_v0  ;;  %3730 = vperm.xlu0 %5012, %v9222_v2   ;;  %v2818_v18 = vadd.f32 0.001, %v2626_v45  ;;  %5154 = vrsqrt.f32 %v2799_v29  ;;  %v2672_v52 = vld [vmem:[%s11199_s3 + $0x148] sm:$0xff] }
 0x3c5   :  { %3405 = vperm.xlu1 %5013, %v9231_v11   ;;  %v9244_v55 = vmul.f32 %v5141_v46, %v2676_v13  ;;  %v5143_v51 = vpop.eup %5142  ;;  %12213 = vst [vmem:[#allocation252_spill] sm:$0xff] %v9259_v14  ;;  %v2609_v5 = vsub.f32 %v2417_v10, %v2513_v30  ;;  %v2371_v46 = vmul.f32 0.0051020407, %v12215_v48  ;;  %v2467_v10 = vmul.f32 %v9254_v61, %v9254_v61  ;;  %v12217_v30 = vld [vmem:[#allocation284_spill] sm:$0xff] }
 0x3c6   :  { %v2561_v54 = vsub.f32 %v2369_v38, %v2465_v34  ;;  %v9281_v8 = vmul.f32 0.0051020407, %v12217_v30  ;;  %v9284_v48 = vmul.f32 %v9175_v31, %v2653_v15  ;;  %5156 = vrsqrt.f32 %v2818_v18 }
 0x3c7   :  { %v9256_v39 = vpop.permute.xlu0 %4012  ;;  %v9266_v38 = vmul.f32 %v9244_v55, %v9088_v3  ;;  %v9276_v3 = vmul.f32 %v5143_v51, %v2718_v56  ;;  %v2701_v51 = vld [vmem:[%s11199_s3 + $0x230] sm:$0xff]  ;;  %v2801_v29 = vadd.f32 0.001, %v2609_v5  ;;  %v2720_v5 = vld [vmem:[%s11199_s3 + $0x2c8] sm:$0xff] }
 0x3c8   :  { %v5145_v13 = vpop.eup %5144  ;;  %3500 = vperm.xlu0 %5012, %v9248_v35   ;;  %v2753_v22 = vadd.f32 0.001, %v2561_v54  ;;  %12218 = vst [vmem:[#allocation255_spill] sm:$0xff] %v9281_v8  ;;  %v2563_v54 = vsub.f32 %v2371_v46, %v2467_v10  ;;  %v12223_v46 = vld [vmem:[#allocation290_spill] sm:$0xff] }
 0x3c9   :  { %12214 = vst [vmem:[#allocation259_spill] sm:$0xff] %v9266_v38  ;;  %3645 = vperm.xlu1 %5013, %v9259_v14   ;;  %v9274_v34 = vmul.f32 %v5145_v13, %v2724_v25  ;;  %12216 = vst [vmem:[#allocation206_spill] sm:$0xff] %v9276_v3  ;;  %v5147_v60 = vpop.eup %5146  ;;  %v12220_v25 = vld [vmem:[#allocation288_spill] sm:$0xff]  ;;  %v9312_v18 = vmul.f32 0.0051020407, %v12223_v46  ;;  %v12239_v14 = vld [vmem:[#allocation197_spill] sm:$0xff] }
 0x3ca   :  { %v2419_v56 = vmul.f32 0.0051020407, %v12220_v25  ;;  %5158 = vrsqrt.f32 %v2753_v22  ;;  %v9299_v13 = vmul.f32 %v5147_v60, %v2672_v52  ;;  %v2655_v22 = vld [vmem:[%s11199_s3 + $0xc0] sm:$0xff]  ;;  %v2755_v60 = vadd.f32 0.001, %v2563_v54 }
 0x3cb   :  { %v3351_v40 = vpop.permute.xlu0 %3350  ;;  %v9291_v45 = vmul.f32 %v9274_v34, %v9116_v27  ;;  %v5149_v31 = vpop.eup %5148  ;;  %v2515_v27 = vmul.f32 %v9281_v8, %v9281_v8  ;;  %12224 = vst [vmem:[#allocation324_spill] sm:$0xff] %v9312_v18  ;;  %5160 = vrsqrt.f32 %v2801_v29  ;;  %v2674_v29 = vld [vmem:[%s11199_s3 + $0x158] sm:$0xff]  ;;  %v9376_v37 = vmul.f32 0.0051020407, %v12239_v14 }
 0x3cc   :  { %3740 = vperm.xlu0 %5012, %v9276_v3   ;;  %v5151_v15 = vpop.eup %5150  ;;  %v9324_v2 = vmul.f32 %v5149_v31, %v2655_v22  ;;  %5162 = vrsqrt.f32 %v2755_v60  ;;  %v2722_v60 = vld [vmem:[%s11199_s3 + $0x2d8] sm:$0xff] }
 0x3cd   :  { %12219 = vst [vmem:[#allocation263_spill] sm:$0xff] %v9291_v45  ;;  %3415 = vperm.xlu1 %5013, %v9284_v48   ;;  %v9306_v45 = vmul.f32 %v9195_v33, %v2701_v51  ;;  %v2611_v10 = vsub.f32 %v2419_v56, %v2515_v27  ;;  %v12225_v33 = vld [vmem:[#allocation294_spill] sm:$0xff]  ;;  %v9322_v47 = vmul.f32 %v5151_v15, %v2720_v5  ;;  %v5153_v46 = vpop.eup %5152  ;;  %v12229_v27 = vld [vmem:[#allocation292_spill] sm:$0xff]  ;;  %12240 = vst [vmem:[#allocation272_spill] sm:$0xff] %v9376_v37 }
 0x3ce   :  { %v2373_v52 = vmul.f32 0.0051020407, %v12225_v33  ;;  %v12226_v51 = vld [vmem:[#allocation38_spill] sm:$0xff]  ;;  %v5155_v54 = vpop.eup %5154  ;;  %v2469_v56 = vmul.f32 %v9312_v18, %v9312_v18  ;;  %v9332_v33 = vmul.f32 0.0051020407, %v12229_v27  ;;  %v2519_v14 = vmul.f32 %v9376_v37, %v9376_v37 }
 0x3cf   :  { %v9303_v30 = vpop.permute.xlu0 %3590  ;;  %12222 = vst [vmem:[#allocation213_spill] sm:$0xff] %v9306_v45  ;;  %v3801_v25 = vmul.f32 %v3351_v40, %v12226_v51  ;;  %12228 = vst [vmem:[#allocation328_spill] sm:$0xff] %v9322_v47  ;;  %v2803_v31 = vadd.f32 0.001, %v2611_v10 }
 0x3d0   :  { %12221 = vst [vmem:[#allocation211_spill] sm:$0xff] %v9303_v30  ;;  %3510 = vperm.xlu0 %5012, %v9299_v13   ;;  %v12227_v30 = vld [vmem:[#allocation40_spill] sm:$0xff]  ;;  %12230 = vst [vmem:[#allocation268_spill] sm:$0xff] %v9332_v33  ;;  %v2565_v15 = vsub.f32 %v2373_v52, %v2469_v56  ;;  %v12234_v56 = vld [vmem:[#allocation303_spill] sm:$0xff] }
 0x3d1   :  { %3655 = vperm.xlu1 %5013, %v9306_v45   ;;  %v3802_v8 = vmul.f32 %v3351_v40, %v12227_v30  ;;  %v2703_v40 = vld [vmem:[%s11199_s3 + $0x240] sm:$0xff]  ;;  %v12231_v30 = vld [vmem:[#allocation296_spill] sm:$0xff]  ;;  %v9359_v27 = vmul.f32 0.0051020407, %v12234_v56  ;;  %5164 = vrsqrt.f32 %v2803_v31 }
 0x3d2   :  { %v2421_v5 = vmul.f32 0.0051020407, %v12231_v30  ;;  %v9351_v10 = vmul.f32 %v5155_v54, %v2703_v40  ;;  %v12236_v54 = vld [vmem:[#allocation304_spill] sm:$0xff] }
 0x3d3   :  { %v4023_v3 = vpop.permute.xlu0 %4022  ;;  %12235 = vst [vmem:[#allocation177_spill] sm:$0xff] %v9359_v27  ;;  %v2705_v31 = vld [vmem:[%s11199_s3 + $0x250] sm:$0xff] }
 0x3d4   :  { %v4473_v51 = vadd.f32 %v4023_v3, %v3801_v25  ;;  %v4474_v45 = vadd.f32 %v4023_v3, %v3802_v8  ;;  %3750 = vperm.xlu0 %5012, %v9322_v47   ;;  %v9347_v8 = vmul.f32 %v5153_v46, %v2674_v29  ;;  %v5157_v3 = vpop.eup %5156  ;;  %12233 = vst [vmem:[#allocation270_spill] sm:$0xff] %v9351_v10  ;;  %v2757_v46 = vadd.f32 0.001, %v2565_v15 }
 0x3d5   :  { %3425 = vperm.xlu1 %5013, %v9324_v2   ;;  %v5159_v52 = vpop.eup %5158  ;;  %v2517_v25 = vmul.f32 %v9332_v33, %v9332_v33  ;;  %v9367_v40 = vmul.f32 %v5157_v3, %v2722_v60  ;;  %v2471_v47 = vmul.f32 %v9359_v27, %v9359_v27  ;;  %v12241_v3 = vld [vmem:[#allocation305_spill] sm:$0xff] }
 0x3d6   :  { %4665 = vst [vmem:[%s11201_s5 + $0x90] sm:$0xff] %v4473_v51  ;;  %4666 = vst.msk [vmem:[%s11201_s5 + $0x98] sm:$0xff] %vm1286_vm1, %v4474_v45  ;;  %v2657_v45 = vld [vmem:[%s11199_s3 + $0xd0] sm:$0xff]  ;;  %v2375_v51 = vmul.f32 0.0051020407, %v12236_v54  ;;  %v5161_v30 = vpop.eup %5160  ;;  %5166 = vrsqrt.f32 %v2757_v46  ;;  %v12244_v54 = vld [vmem:[#allocation306_spill] sm:$0xff] }
 0x3d7   :  { %v9349_v22 = vpop.permute.xlu0 %3360  ;;  %v2613_v29 = vsub.f32 %v2421_v5, %v2517_v25  ;;  %12237 = vst [vmem:[#allocation329_spill] sm:$0xff] %v9367_v40  ;;  %v9371_v56 = vmul.f32 %v5159_v52, %v2657_v45  ;;  %v2423_v60 = vmul.f32 0.0051020407, %v12241_v3  ;;  %v9386_v25 = vmul.f32 %v5161_v30, %v2705_v31  ;;  %v5163_v45 = vpop.eup %5162  ;;  %v2659_v46 = vld [vmem:[%s11199_s3 + $0xe0] sm:$0xff] }
 0x3d8   :  { %12232 = vst [vmem:[#allocation330_spill] sm:$0xff] %v9349_v22  ;;  %3520 = vperm.xlu0 %5012, %v9347_v8   ;;  %v2567_v5 = vsub.f32 %v2375_v51, %v2471_v47  ;;  %v12246_v51 = vld [vmem:[#allocation308_spill] sm:$0xff]  ;;  %v9401_v37 = vmul.f32 %v5163_v45, %v2659_v46 }
 0x3d9   :  { %3665 = vperm.xlu1 %5013, %v9351_v10   ;;  %v2805_v15 = vadd.f32 0.001, %v2613_v29  ;;  %12243 = vst [vmem:[#allocation20_spill] sm:$0xff] %v9386_v25  ;;  %v2615_v29 = vsub.f32 %v2423_v60, %v2519_v14  ;;  %v2377_v30 = vmul.f32 0.0051020407, %v12246_v51  ;;  %v12250_v14 = vld [vmem:[#allocation309_spill] sm:$0xff] }
 0x3da   :  { %v2759_v47 = vadd.f32 0.001, %v2567_v5  ;;  %v2425_v45 = vmul.f32 0.0051020407, %v12250_v14  ;;  %v2661_v10 = vld [vmem:[%s11199_s3 + $0xf0] sm:$0xff] }
 0x3db   :  { %v9369_v33 = vpop.permute.xlu0 %3600  ;;  %5168 = vrsqrt.f32 %v2805_v15  ;;  %v5165_v31 = vpop.eup %5164  ;;  %v2707_v15 = vld [vmem:[%s11199_s3 + $0x260] sm:$0xff]  ;;  %v2807_v5 = vadd.f32 0.001, %v2615_v29 }
 0x3dc   :  { %12238 = vst [vmem:[#allocation332_spill] sm:$0xff] %v9369_v33  ;;  %3760 = vperm.xlu0 %5012, %v9367_v40   ;;  %v9391_v33 = vmul.f32 0.0051020407, %v12244_v54  ;;  %5170 = vrsqrt.f32 %v2759_v47  ;;  %v9416_v51 = vmul.f32 %v5165_v31, %v2707_v15 }
 0x3dd   :  { %3435 = vperm.xlu1 %5013, %v9371_v56   ;;  %5172 = vrsqrt.f32 %v2807_v5 }
 0x3de   :  { %12245 = vst [vmem:[#allocation22_spill] sm:$0xff] %v9391_v33  ;;  %v2473_v54 = vmul.f32 %v9391_v33, %v9391_v33  ;;  %12252 = vst [vmem:[#allocation278_spill] sm:$0xff] %v9416_v51 }
 0x3df   :  { %v9384_v52 = vpop.permute.xlu0 %3370 }
 0x3e0   :  { %12242 = vst [vmem:[#allocation18_spill] sm:$0xff] %v9384_v52  ;;  %3530 = vperm.xlu0 %5012, %v9244_v55   ;;  %v12248_v55 = vld [vmem:[#allocation307_spill] sm:$0xff]  ;;  %v2569_v60 = vsub.f32 %v2377_v30, %v2473_v54  ;;  %v12255_v30 = vld [vmem:[#allocation312_spill] sm:$0xff] }
 0x3e1   :  { %3675 = vperm.xlu1 %5013, %v9386_v25   ;;  %v9406_v40 = vmul.f32 0.0051020407, %v12248_v55  ;;  %v2379_v54 = vmul.f32 0.0051020407, %v12255_v30 }
 0x3e2   :  { %v2761_v47 = vadd.f32 0.001, %v2569_v60 }
 0x3e3   :  { %v9399_v3 = vpop.permute.xlu0 %3610  ;;  %12249 = vst [vmem:[#allocation274_spill] sm:$0xff] %v9406_v40  ;;  %v2521_v55 = vmul.f32 %v9406_v40, %v9406_v40  ;;  %v12258_v40 = vld [vmem:[#allocation311_spill] sm:$0xff] }
 0x3e4   :  { %12247 = vst [vmem:[#allocation24_spill] sm:$0xff] %v9399_v3  ;;  %3770 = vperm.xlu0 %5012, %v9274_v34   ;;  %v5167_v3 = vpop.eup %5166  ;;  %v12253_v34 = vld [vmem:[#allocation310_spill] sm:$0xff]  ;;  %5174 = vrsqrt.f32 %v2761_v47 }
 0x3e5   :  { %3445 = vperm.xlu1 %5013, %v9401_v37   ;;  %v9421_v25 = vmul.f32 0.0051020407, %v12253_v34  ;;  %v2617_v29 = vsub.f32 %v2425_v45, %v2521_v55  ;;  %v9430_v15 = vmul.f32 %v5167_v3, %v2661_v10  ;;  %v5169_v14 = vpop.eup %5168  ;;  %v12260_v45 = vld [vmem:[#allocation313_spill] sm:$0xff]  ;;  %v9442_v10 = vpop.permute.xlu1 %3335  ;;  %v2663_v47 = vld [vmem:[%s11199_s3 + $0x100] sm:$0xff] }
 0x3e6   :  { %v2427_v55 = vmul.f32 0.0051020407, %v12260_v45  ;;  %v12261_v3 = vld [vmem:[#allocation317_spill] sm:$0xff]  ;;  %v5171_v52 = vpop.eup %5170 }
 0x3e7   :  { %v9414_v46 = vpop.permute.xlu0 %3380  ;;  %12254 = vst [vmem:[#allocation280_spill] sm:$0xff] %v9421_v25  ;;  %12257 = vst [vmem:[#allocation286_spill] sm:$0xff] %v9430_v15  ;;  %v2475_v34 = vmul.f32 %v9421_v25, %v9421_v25  ;;  %v2809_v5 = vadd.f32 0.001, %v2617_v29  ;;  %v9445_v30 = vmul.f32 0.0051020407, %v12261_v3  ;;  %v5173_v25 = vpop.eup %5172 }
 0x3e8   :  { %12251 = vst [vmem:[#allocation275_spill] sm:$0xff] %v9414_v46  ;;  %v9435_v46 = vmul.f32 0.0051020407, %v12258_v40  ;;  %v12265_v29 = vld [vmem:[#allocation210_spill] sm:$0xff] }
 0x3e9   :  { %3685 = vperm.xlu1 %5013, %v9416_v51   ;;  %v2709_v51 = vld [vmem:[%s11199_s3 + $0x270] sm:$0xff]  ;;  %v2571_v60 = vsub.f32 %v2379_v54, %v2475_v34  ;;  %12262 = vst [vmem:[#allocation288_spill] sm:$0xff] %v9445_v30  ;;  %v2381_v54 = vmul.f32 0.0051020407, %v12265_v29  ;;  %5176 = vrsqrt.f32 %v2809_v5  ;;  %v2477_v3 = vmul.f32 %v9445_v30, %v9445_v30  ;;  %v9467_v33 = vpop.permute.xlu1 %3575  ;;  %v2711_v29 = vld [vmem:[%s11199_s3 + $0x280] sm:$0xff] }
 0x3ea   :  { %12259 = vst [vmem:[#allocation284_spill] sm:$0xff] %v9435_v46  ;;  %v9449_v40 = vmul.f32 %v5169_v14, %v2709_v51  ;;  %v2523_v22 = vmul.f32 %v9435_v46, %v9435_v46  ;;  %v12266_v51 = vld [vmem:[#allocation212_spill] sm:$0xff]  ;;  %v9465_v46 = vmul.f32 %v5171_v52, %v2663_v47  ;;  %12270 = vst [vmem:[#allocation296_spill] sm:$0xff] %v9467_v33 }
 0x3eb   :  { %v9428_v31 = vpop.permute.xlu0 %3620  ;;  %v2763_v34 = vadd.f32 0.001, %v2571_v60  ;;  %v9461_v14 = vmul.f32 0.0051020407, %v12266_v51  ;;  %v2573_v5 = vsub.f32 %v2381_v54, %v2477_v3  ;;  %v12271_v60 = vld [vmem:[#allocation320_spill] sm:$0xff]  ;;  %v12272_v51 = vld [vmem:[#allocation322_spill] sm:$0xff]  ;;  %v9481_v33 = vmul.f32 %v5173_v25, %v2711_v29 }
 0x3ec   :  { %12256 = vst [vmem:[#allocation283_spill] sm:$0xff] %v9428_v31  ;;  %12264 = vst [vmem:[#allocation294_spill] sm:$0xff] %v9449_v40  ;;  %v2619_v45 = vsub.f32 %v2427_v55, %v2523_v22  ;;  %v2429_v22 = vmul.f32 0.0051020407, %v12271_v60  ;;  %v2665_v54 = vld [vmem:[%s11199_s3 + $0x110] sm:$0xff] }
 0x3ed   :  { %3455 = vperm.xlu1 %5013, %v9430_v15   ;;  %12267 = vst [vmem:[#allocation38_spill] sm:$0xff] %v9461_v14  ;;  %12269 = vst [vmem:[#allocation292_spill] sm:$0xff] %v9465_v46  ;;  %5178 = vrsqrt.f32 %v2763_v34  ;;  %v2525_v52 = vmul.f32 %v9461_v14, %v9461_v14  ;;  %v2765_v3 = vadd.f32 0.001, %v2573_v5  ;;  %v12278_v14 = vld [vmem:[#allocation325_spill] sm:$0xff]  ;;  %v2713_v5 = vld [vmem:[%s11199_s3 + $0x290] sm:$0xff] }
 0x3ee   :  { %v2811_v55 = vadd.f32 0.001, %v2619_v45  ;;  %12275 = vst [vmem:[#allocation197_spill] sm:$0xff] %v9481_v33  ;;  %v12276_v45 = vld [vmem:[#allocation323_spill] sm:$0xff]  ;;  %v2383_v25 = vmul.f32 0.0051020407, %v12278_v14 }
 0x3ef   :  { %v9447_v31 = vpop.permute.xlu0 %3390  ;;  %v2621_v60 = vsub.f32 %v2429_v22, %v2525_v52  ;;  %v12287_v15 = vld [vmem:[#allocation4_spill] sm:$0xff] }
 0x3f0   :  { %12263 = vst [vmem:[#allocation290_spill] sm:$0xff] %v9447_v31  ;;  %5180 = vrsqrt.f32 %v2811_v55  ;;  %v2433_v18 = vmul.f32 0.0051020407, %v12287_v15 }
 0x3f1   :  { %3695 = vperm.xlu1 %5013, %v9449_v40   ;;  %v9475_v40 = vmul.f32 0.0051020407, %v12272_v51  ;;  %v9490_v51 = vmul.f32 0.0051020407, %v12276_v45  ;;  %5182 = vrsqrt.f32 %v2765_v3  ;;  %v2813_v22 = vadd.f32 0.001, %v2621_v60 }
 0x3f2   :  { %v12281_v45 = vld [vmem:[#allocation327_spill] sm:$0xff]  ;;  %v9514_v3 = vmul.f32 0.0051020407, %v8518_v20  ;;  %v2667_v60 = vld [vmem:[%s11199_s3 + $0x120] sm:$0xff] }
 0x3f3   :  { %v9463_v31 = vpop.permute.xlu0 %3630  ;;  %12273 = vst [vmem:[#allocation303_spill] sm:$0xff] %v9475_v40  ;;  %v2479_v34 = vmul.f32 %v9475_v40, %v9475_v40  ;;  %12277 = vst [vmem:[#allocation305_spill] sm:$0xff] %v9490_v51  ;;  %v2527_v52 = vmul.f32 %v9490_v51, %v9490_v51  ;;  %5184 = vrsqrt.f32 %v2813_v22 }
 0x3f4   :  { %12268 = vst [vmem:[#allocation40_spill] sm:$0xff] %v9463_v31  ;;  %v5175_v31 = vpop.eup %5174  ;;  %12284 = vst [vmem:[#allocation310_spill] sm:$0xff] %v9514_v3 }
 0x3f5   :  { %3465 = vperm.xlu1 %5013, %v9465_v46   ;;  %v5177_v38 = vpop.eup %5176  ;;  %v2575_v14 = vsub.f32 %v2383_v25, %v2479_v34 }
 0x3f7   :  { %v9479_v47 = vpop.permute.xlu0 %3400  ;;  %v5179_v40 = vpop.eup %5178 }
 0x3f8   :  { %12274 = vst [vmem:[#allocation304_spill] sm:$0xff] %v9479_v47  ;;  %v1478_v30 = vpop.xlane.xlu1 %1477  ;;  %v9495_v47 = vmul.f32 %v5175_v31, %v2665_v54  ;;  %v9507_v31 = vmul.f32 0.0051020407, %v8512_v63  ;;  %v9529_v27 = vmul.f32 %v5179_v40, %v2667_v60 }
 0x3f9   :  { %3705 = vperm.xlu1 %5013, %v9481_v33   ;;  %v9500_v55 = vmul.f32 0.0051020407, %v1478_v30  ;;  %v9511_v33 = vmul.f32 %v5177_v38, %v2713_v5  ;;  %v2767_v38 = vadd.f32 0.001, %v2575_v14 }
 0x3fa   :  { %12280 = vst [vmem:[#allocation308_spill] sm:$0xff] %v9495_v47  ;;  %v2481_v20 = vmul.f32 %v9507_v31, %v9507_v31  ;;  %v5181_v22 = vpop.eup %5180 }
 0x3fb   :  { %v9493_v29 = vpop.permute.xlu0 %3640  ;;  %12283 = vst [vmem:[#allocation309_spill] sm:$0xff] %v9511_v33  ;;  %v2486_v34 = vmul.f32 %v9500_v55, %v9500_v55  ;;  %5186 = vrsqrt.f32 %v2767_v38 }
 0x3fc   :  { %12279 = vst [vmem:[#allocation306_spill] sm:$0xff] %v9493_v29  ;;  %v1670_v46 = vpop.xlane.xlu1 %1669  ;;  %v2431_v29 = vmul.f32 0.0051020407, %v12281_v45  ;;  %v12285_v45 = vld [vmem:[#allocation2_spill] sm:$0xff] }
 0x3fd   :  { %3475 = vperm.xlu1 %5013, %v9495_v47   ;;  %v9521_v25 = vmul.f32 0.0051020407, %v1670_v46  ;;  %v2385_v51 = vmul.f32 0.0051020407, %v12285_v45  ;;  %v2529_v46 = vmul.f32 %v9514_v3, %v9514_v3  ;;  %v5183_v45 = vpop.eup %5182  ;;  %v2669_v3 = vld [vmem:[%s11199_s3 + $0x130] sm:$0xff] }
 0x3fe   :  { %v2623_v5 = vsub.f32 %v2431_v29, %v2527_v52  ;;  %v2715_v52 = vld [vmem:[%s11199_s3 + $0x2a0] sm:$0xff] }
 0x3ff   :  { %v9509_v54 = vpop.permute.xlu0 %3410  ;;  %v2534_v14 = vmul.f32 %v9521_v25, %v9521_v25 }
 0x400   :  { %12282 = vst [vmem:[#allocation307_spill] sm:$0xff] %v9509_v54  ;;  %v2054_v30 = vpop.xlane.xlu1 %2053  ;;  %v2815_v60 = vadd.f32 0.001, %v2623_v5 }
 0x401   :  { %3715 = vperm.xlu1 %5013, %v9511_v33   ;;  %v2390_v63 = vmul.f32 0.0051020407, %v2054_v30  ;;  %v9535_v30 = vmul.f32 0.0051020407, %v8698_v23  ;;  %v2625_v33 = vsub.f32 %v2433_v18, %v2529_v46  ;;  %v9561_v46 = vmul.f32 %v5183_v45, %v2669_v3  ;;  %v2717_v3 = vld [vmem:[%s11199_s3 + $0x2b0] sm:$0xff] }
 0x403   :  { %v2582_v54 = vsub.f32 %v2390_v63, %v2486_v34  ;;  %v9527_v47 = vpop.permute.xlu0 %3650  ;;  %12288 = vst [vmem:[#allocation311_spill] sm:$0xff] %v9535_v30  ;;  %v2577_v63 = vsub.f32 %v2385_v51, %v2481_v20  ;;  %v2387_v51 = vmul.f32 0.0051020407, %v8734_v36  ;;  %v12291_v20 = vld [vmem:[#allocation30_spill] sm:$0xff] }
 0x404   :  { %12286 = vst [vmem:[#allocation312_spill] sm:$0xff] %v9527_v47  ;;  %v2246_v29 = vpop.xlane.xlu1 %2245  ;;  %v9545_v47 = vmul.f32 %v5181_v22, %v2715_v52  ;;  %v12292_v52 = vld [vmem:[#allocation32_spill] sm:$0xff] }
 0x405   :  { %v2774_v34 = vadd.f32 0.001, %v2582_v54  ;;  %3485 = vperm.xlu1 %5013, %v9529_v27   ;;  %v2438_v40 = vmul.f32 0.0051020407, %v2246_v29  ;;  %v2483_v54 = vmul.f32 %v9535_v30, %v9535_v30  ;;  %v9553_v29 = vmul.f32 0.0051020407, %v8717_v1 }
 0x406   :  { %12290 = vst [vmem:[#allocation317_spill] sm:$0xff] %v9545_v47  ;;  %v12294_v1 = vld [vmem:[#allocation28_spill] sm:$0xff] }
 0x407   :  { %5188 = vrsqrt.f32 %v2774_v34  ;;  %v2630_v15 = vsub.f32 %v2438_v40, %v2534_v14  ;;  %v9543_v23 = vpop.permute.xlu0 %3420  ;;  %v2769_v34 = vadd.f32 0.001, %v2577_v63  ;;  %v12293_v40 = vld [vmem:[#allocation26_spill] sm:$0xff]  ;;  %v3796_v30 = vmul.f32 %v9442_v10, %v12294_v1 }
 0x408   :  { %12289 = vst [vmem:[#allocation313_spill] sm:$0xff] %v9543_v23  ;;  %v3341_v38 = vpop.permute.xlu1 %3340  ;;  %5190 = vrsqrt.f32 %v2815_v60  ;;  %v3795_v18 = vmul.f32 %v9442_v10, %v12293_v40  ;;  %v5185_v23 = vpop.eup %5184  ;;  %v2531_v60 = vmul.f32 %v9553_v29, %v9553_v29  ;;  %v2579_v45 = vsub.f32 %v2387_v51, %v2483_v54 }
 0x409   :  { %v2822_v5 = vadd.f32 0.001, %v2630_v15  ;;  %3725 = vperm.xlu1 %5013, %v9545_v47   ;;  %v3797_v22 = vmul.f32 %v3341_v38, %v12291_v20  ;;  %v3798_v14 = vmul.f32 %v3341_v38, %v12292_v52  ;;  %v2817_v20 = vadd.f32 0.001, %v2625_v33  ;;  %v5187_v51 = vpop.eup %5186 }
 0x40a   :  { %v2435_v38 = vmul.f32 0.0051020407, %v8758_v50  ;;  %v9584_v10 = vmul.f32 0.0051020407, %v9060_v53  ;;  %v9595_v54 = vmul.f32 %v5185_v23, %v2717_v3  ;;  %v2771_v52 = vadd.f32 0.001, %v2579_v45 }
 0x40b   :  { %5192 = vrsqrt.f32 %v2822_v5  ;;  %v4469_v36 = vadd.f32 %v9256_v39, %v3797_v22  ;;  %v4470_v15 = vadd.f32 %v9256_v39, %v3798_v14  ;;  %v9567_v47 = vpop.permute.xlu0 %3660  ;;  %v2671_v5 = vld [vmem:[%s11199_s3 + $0x140] sm:$0xff]  ;;  %v2389_v40 = vmul.f32 0.0051020407, %v9104_v9  ;;  %v12298_v45 = vld [vmem:[#allocation224_spill] sm:$0xff] }
 0x40c   :  { %12295 = vst [vmem:[#allocation210_spill] sm:$0xff] %v9567_v47  ;;  %v4008_v63 = vpop.permute.xlu1 %4007  ;;  %5194 = vrsqrt.f32 %v2769_v34  ;;  %v2627_v14 = vsub.f32 %v2435_v38, %v2531_v60  ;;  %v2485_v23 = vmul.f32 %v9584_v10, %v9584_v10  ;;  %v9607_v34 = vmul.f32 0.0051020407, %v9082_v62  ;;  %v2719_v62 = vld [vmem:[%s11199_s3 + $0x2c0] sm:$0xff]  ;;  %v12444_v47 = vld [vmem:[#allocation64_spill] sm:$0xff] }
 0x40d   :  { %4661 = vst [vmem:[%s11201_s5 + $0x70] sm:$0xff] %v4469_v36  ;;  %4662 = vst.msk [vmem:[%s11201_s5 + $0x78] sm:$0xff] %vm1286_vm1, %v4470_v15  ;;  %3495 = vperm.xlu1 %5013, %v9561_v46   ;;  %v4467_v39 = vadd.f32 %v4008_v63, %v3795_v18  ;;  %v4468_v33 = vadd.f32 %v4008_v63, %v3796_v30  ;;  %v2678_v30 = vld [vmem:[%s11199_s3 + $0x178] sm:$0xff]  ;;  %5196 = vrsqrt.f32 %v2817_v20 }
 0x40e   :  { %v9612_v36 = vmul.f32 %v5187_v51, %v2671_v5  ;;  %v2726_v15 = vld [vmem:[%s11199_s3 + $0x2f8] sm:$0xff]  ;;  %5198 = vrsqrt.f32 %v2771_v52  ;;  %v2819_v3 = vadd.f32 0.001, %v2627_v14  ;;  %v3122_v38 = vmul.f32 %v8638_v12, %v12298_v45  ;;  %v12299_v5 = vld [vmem:[#allocation34_spill] sm:$0xff]  ;;  %v12300_v52 = vld [vmem:[#allocation36_spill] sm:$0xff] }
 0x40f   :  { %4659 = vst [vmem:[%s11201_s5 + $0x60] sm:$0xff] %v4467_v39  ;;  %4660 = vst.msk [vmem:[%s11201_s5 + $0x68] sm:$0xff] %vm1286_vm1, %v4468_v33  ;;  %v9593_v50 = vpop.permute.xlu0 %3430  ;;  %v2533_v39 = vmul.f32 %v9607_v34, %v9607_v34  ;;  %v2581_v33 = vsub.f32 %v2389_v40, %v2485_v23 }
 0x410   :  { %v3346_v53 = vpop.permute.xlu1 %3345  ;;  %5200 = vrsqrt.f32 %v2819_v3  ;;  %v3028_v3 = vld [vmem:[%s11200_s4 + $0x68] sm:$0xff] }
 0x411   :  { %v5189_v22 = vpop.eup %5188  ;;  %3735 = vperm.xlu1 %5013, %v9595_v54   ;;  %v3800_v14 = vmul.f32 %v3346_v53, %v12300_v52 }
 0x412   :  { %v2966_v18 = vmul.f32 %v5189_v22, %v2678_v30  ;;  %v5191_v20 = vpop.eup %5190  ;;  %v2437_v30 = vmul.f32 0.0051020407, %v9150_v49  ;;  %v3799_v22 = vmul.f32 %v3346_v53, %v12299_v5  ;;  %v2673_v49 = vld [vmem:[%s11199_s3 + $0x150] sm:$0xff]  ;;  %v2773_v53 = vadd.f32 0.001, %v2581_v33 }
 0x413   :  { %v9610_v1 = vpop.permute.xlu0 %3670 }
 0x414   :  { %12296 = vst [vmem:[#allocation212_spill] sm:$0xff] %v9610_v1  ;;  %3540 = vperm.xlu0 %5012, %v2966_v18   ;;  %v9617_v60 = vpop.permute.xlu1 %3585  ;;  %v9623_v63 = vmul.f32 %v2966_v18, %v9500_v55  ;;  %v3026_v55 = vld [vmem:[%s11200_s4 + $0x58] sm:$0xff]  ;;  %v9638_v1 = vmul.f32 %v5191_v20, %v2719_v62  ;;  %v2629_v5 = vsub.f32 %v2437_v30, %v2533_v39  ;;  %v12301_v20 = vld [vmem:[#allocation234_spill] sm:$0xff]  ;;  %5202 = vrsqrt.f32 %v2773_v53 }
 0x415   :  { %12297 = vst [vmem:[#allocation320_spill] sm:$0xff] %v9617_v60  ;;  %v5193_v9 = vpop.eup %5192  ;;  %3505 = vperm.xlu1 %5013, %v9612_v36   ;;  %v3124_v62 = vmul.f32 %v8666_v7, %v12301_v20  ;;  %v12303_v30 = vld [vmem:[#allocation246_spill] sm:$0xff] }
 0x416   :  { %v3014_v51 = vmul.f32 %v5193_v9, %v2726_v15  ;;  %v5195_v12 = vpop.eup %5194  ;;  %v3218_v9 = vsub.f32 %v3026_v55, %v3122_v38  ;;  %v2721_v38 = vld [vmem:[%s11199_s3 + $0x2d0] sm:$0xff]  ;;  %v2821_v39 = vadd.f32 0.001, %v2629_v5  ;;  %v3126_v55 = vmul.f32 %v8696_v17, %v12303_v30  ;;  %v3032_v5 = vld [vmem:[%s11200_s4 + $0x88] sm:$0xff] }
 0x417   :  { %v9636_v18 = vpop.permute.xlu0 %3440  ;;  %v5197_v52 = vpop.eup %5196  ;;  %v3220_v33 = vsub.f32 %v3028_v3, %v3124_v62 }
 0x418   :  { %3780 = vperm.xlu0 %5012, %v3014_v51   ;;  %v4018_v45 = vpop.permute.xlu1 %4017  ;;  %v9644_v23 = vmul.f32 %v3014_v51, %v9521_v25  ;;  %v9658_v51 = vmul.f32 %v5195_v12, %v2673_v49  ;;  %v9673_v12 = vmul.f32 %v5197_v52, %v2721_v38  ;;  %5204 = vrsqrt.f32 %v2821_v39  ;;  %v2723_v52 = vld [vmem:[%s11199_s3 + $0x2e0] sm:$0xff]  ;;  %v3034_v39 = vld [vmem:[%s11200_s4 + $0x98] sm:$0xff] }
 0x419   :  { %3745 = vperm.xlu1 %5013, %v9638_v1   ;;  %v4471_v40 = vadd.f32 %v4018_v45, %v3799_v22  ;;  %v4472_v15 = vadd.f32 %v4018_v45, %v3800_v14  ;;  %v5199_v22 = vpop.eup %5198  ;;  %v3030_v45 = vld [vmem:[%s11200_s4 + $0x78] sm:$0xff] }
 0x41a   :  { %v3222_v17 = vsub.f32 %v3030_v45, %v3126_v55  ;;  %v5201_v20 = vpop.eup %5200  ;;  %v2677_v55 = vld [vmem:[%s11199_s3 + $0x170] sm:$0xff] }
 0x41b   :  { %4663 = vst [vmem:[%s11201_s5 + $0x80] sm:$0xff] %v4471_v40  ;;  %4664 = vst.msk [vmem:[%s11201_s5 + $0x88] sm:$0xff] %vm1286_vm1, %v4472_v15  ;;  %v9656_v25 = vpop.permute.xlu0 %3680  ;;  %v2675_v40 = vld [vmem:[%s11199_s3 + $0x160] sm:$0xff]  ;;  %v3128_v15 = vmul.f32 %v8732_v57, %v8627_v44  ;;  %v3130_v44 = vmul.f32 %v8768_v16, %v8657_v28  ;;  %v9703_v38 = vmul.f32 %v5201_v20, %v2723_v52 }
 0x41c   :  { %12302 = vst [vmem:[#allocation322_spill] sm:$0xff] %v9656_v25  ;;  %4032 = vperm.xlu0 %5012, %v3218_v9   ;;  %v9663_v7 = vpop.permute.xlu1 %3355  ;;  %v9688_v53 = vmul.f32 %v5199_v22, %v2675_v40  ;;  %v3132_v28 = vmul.f32 %v8802_v41, %v8687_v4  ;;  %v3036_v40 = vld [vmem:[%s11200_s4 + $0xa8] sm:$0xff]  ;;  %v3134_v4 = vmul.f32 %v8829_v43, %v8711_v26 }
 0x41d   :  { %3515 = vperm.xlu1 %5013, %v9658_v51   ;;  %v3224_v3 = vsub.f32 %v3032_v5, %v3128_v15  ;;  %v3226_v22 = vsub.f32 %v3034_v39, %v3130_v44  ;;  %v2725_v5 = vld [vmem:[%s11199_s3 + $0x2f0] sm:$0xff]  ;;  %v3038_v39 = vld [vmem:[%s11200_s4 + $0xb8] sm:$0xff]  ;;  %v3136_v43 = vmul.f32 %v8868_v6, %v8751_v59  ;;  %v3138_v59 = vmul.f32 %v8907_v24, %v8788_v19  ;;  %v12314_v19 = vld [vmem:[#allocation267_spill] sm:$0xff] }
 0x41e   :  { %v3228_v20 = vsub.f32 %v3036_v40, %v3132_v28  ;;  %v3230_v26 = vsub.f32 %v3038_v39, %v3134_v4  ;;  %v12311_v28 = vld [vmem:[#allocation231_spill] sm:$0xff]  ;;  %v3042_v39 = vld [vmem:[%s11200_s4 + $0xd8] sm:$0xff] }
 0x41f   :  { %v9671_v14 = vpop.permute.xlu0 %3450  ;;  %v3123_v40 = vmul.f32 %v8984_v21, %v12311_v28  ;;  %v12312_v21 = vld [vmem:[#allocation241_spill] sm:$0xff] }
 0x420   :  { %4042 = vperm.xlu0 %5012, %v3220_v33   ;;  %v9678_v49 = vpop.permute.xlu1 %3595  ;;  %v5203_v33 = vpop.eup %5202  ;;  %v12315_v24 = vld [vmem:[#allocation289_spill] sm:$0xff] }
 0x421   :  { %12304 = vst [vmem:[#allocation323_spill] sm:$0xff] %v9678_v49  ;;  %3755 = vperm.xlu1 %5013, %v9673_v12   ;;  %v9718_v45 = vmul.f32 %v5203_v33, %v2677_v55  ;;  %v3025_v55 = vld [vmem:[%s11200_s4 + $0x50] sm:$0xff] }
 0x423   :  { %v9686_v9 = vpop.permute.xlu0 %3690 }
 0x424   :  { %12305 = vst [vmem:[#allocation325_spill] sm:$0xff] %v9686_v9  ;;  %4052 = vperm.xlu0 %5012, %v3222_v17   ;;  %v9693_v62 = vpop.permute.xlu1 %3365  ;;  %v5205_v17 = vpop.eup %5204 }
 0x425   :  { %3525 = vperm.xlu1 %5013, %v9688_v53   ;;  %v9733_v52 = vmul.f32 %v5205_v17, %v2725_v5  ;;  %v3040_v17 = vld [vmem:[%s11200_s4 + $0xc8] sm:$0xff] }
 0x426   :  { %v3232_v4 = vsub.f32 %v3040_v17, %v3136_v43  ;;  %v3234_v43 = vsub.f32 %v3042_v39, %v3138_v59  ;;  %v12318_v17 = vld [vmem:[#allocation245_spill] sm:$0xff]  ;;  %v3031_v59 = vld [vmem:[%s11200_s4 + $0x80] sm:$0xff]  ;;  %v12319_v39 = vld [vmem:[#allocation271_spill] sm:$0xff] }
 0x427   :  { %v9701_v57 = vpop.permute.xlu0 %3460 }
 0x428   :  { %4062 = vperm.xlu0 %5012, %v3224_v3   ;;  %v9708_v30 = vpop.permute.xlu1 %3605  ;;  %v12308_v3 = vld [vmem:[#allocation126_spill] sm:$0xff] }
 0x429   :  { %12306 = vst [vmem:[#allocation327_spill] sm:$0xff] %v9708_v30  ;;  %3765 = vperm.xlu1 %5013, %v9703_v38   ;;  %v3121_v44 = vmul.f32 %v8939_v42, %v12308_v3  ;;  %v12433_v30 = vld [vmem:[#allocation56_spill] sm:$0xff] }
 0x42b   :  { %v9716_v16 = vpop.permute.xlu0 %3700  ;;  %v3217_v42 = vsub.f32 %v3025_v55, %v3121_v44  ;;  %v3125_v44 = vmul.f32 %v9053_v58, %v12312_v21  ;;  %v12317_v58 = vld [vmem:[#allocation156_spill] sm:$0xff] }
 0x42c   :  { %12307 = vst [vmem:[#allocation2_spill] sm:$0xff] %v9716_v16  ;;  %4072 = vperm.xlu0 %5012, %v3226_v22   ;;  %v9723_v15 = vpop.permute.xlu1 %3375 }
 0x42d   :  { %3535 = vperm.xlu1 %5013, %v9718_v45  }
 0x42f   :  { %v9731_v41 = vpop.permute.xlu0 %3470 }
 0x430   :  { %4082 = vperm.xlu0 %5012, %v3228_v20   ;;  %v9740_v33 = vpop.permute.xlu1 %3615  ;;  %v3027_v20 = vld [vmem:[%s11200_s4 + $0x60] sm:$0xff] }
 0x431   :  { %12309 = vst [vmem:[#allocation4_spill] sm:$0xff] %v9740_v33  ;;  %3775 = vperm.xlu1 %5013, %v9733_v52   ;;  %v3219_v3 = vsub.f32 %v3027_v20, %v3123_v40  ;;  %v3127_v20 = vmul.f32 %v12318_v17, %v12317_v58  ;;  %v12321_v58 = vld [vmem:[#allocation279_spill] sm:$0xff]  ;;  %v12322_v17 = vld [vmem:[#allocation168_spill] sm:$0xff] }
 0x433   :  { %v9748_v22 = vpop.permute.xlu0 %3710 }
 0x434   :  { %12310 = vst [vmem:[#allocation30_spill] sm:$0xff] %v9748_v22  ;;  %4092 = vperm.xlu0 %5012, %v3230_v26   ;;  %v9755_v5 = vpop.permute.xlu1 %3385  ;;  %v3029_v26 = vld [vmem:[%s11200_s4 + $0x70] sm:$0xff] }
 0x435   :  { %4027 = vperm.xlu1 %5013, %v3217_v42   ;;  %v3140_v42 = vmul.f32 %v12315_v24, %v12314_v19  ;;  %v3221_v40 = vsub.f32 %v3029_v26, %v3125_v44  ;;  %v12320_v19 = vld [vmem:[#allocation293_spill] sm:$0xff]  ;;  %v3223_v26 = vsub.f32 %v3031_v59, %v3127_v20 }
 0x436   :  { %v3142_v24 = vmul.f32 %v12320_v19, %v12319_v39  ;;  %v12325_v39 = vld [vmem:[#allocation247_spill] sm:$0xff] }
 0x437   :  { %v9762_v6 = vpop.permute.xlu0 %3480 }
 0x438   :  { %4102 = vperm.xlu0 %5012, %v3232_v4   ;;  %v9769_v55 = vpop.permute.xlu1 %3625  ;;  %v3044_v4 = vld [vmem:[%s11200_s4 + $0xe8] sm:$0xff] }
 0x439   :  { %12313 = vst [vmem:[#allocation32_spill] sm:$0xff] %v9769_v55  ;;  %4037 = vperm.xlu1 %5013, %v3219_v3   ;;  %v3236_v3 = vsub.f32 %v3044_v4, %v3140_v42  ;;  %v3033_v42 = vld [vmem:[%s11200_s4 + $0x90] sm:$0xff]  ;;  %v12324_v4 = vld [vmem:[#allocation273_spill] sm:$0xff] }
 0x43a   :  { %v3144_v19 = vmul.f32 %v12325_v39, %v12324_v4  ;;  %v12329_v4 = vld [vmem:[#allocation164_spill] sm:$0xff]  ;;  %v12419_v55 = vld [vmem:[#allocation181_spill] sm:$0xff] }
 0x43b   :  { %v9776_v28 = vpop.permute.xlu0 %3720 }
 0x43c   :  { %12316 = vst [vmem:[#allocation26_spill] sm:$0xff] %v9776_v28  ;;  %4112 = vperm.xlu0 %5012, %v3234_v43   ;;  %v9783_v21 = vpop.permute.xlu1 %3395  ;;  %v3129_v28 = vmul.f32 %v12322_v17, %v12321_v58  ;;  %v3046_v43 = vld [vmem:[%s11200_s4 + $0xf8] sm:$0xff]  ;;  %v3048_v58 = vld [vmem:[%s11200_s4 + $0x108] sm:$0xff] }
 0x43d   :  { %4047 = vperm.xlu1 %5013, %v3221_v40   ;;  %v3238_v40 = vsub.f32 %v3046_v43, %v3142_v24  ;;  %v12327_v17 = vld [vmem:[#allocation223_spill] sm:$0xff]  ;;  %v3035_v24 = vld [vmem:[%s11200_s4 + $0xa0] sm:$0xff]  ;;  %v12328_v43 = vld [vmem:[#allocation117_spill] sm:$0xff] }
 0x43e   :  { %v3225_v59 = vsub.f32 %v3033_v42, %v3129_v28  ;;  %v3146_v39 = vmul.f32 %v12329_v4, %v12328_v43  ;;  %v3052_v4 = vld [vmem:[%s11200_s4 + $0x128] sm:$0xff] }
 0x43f   :  { %v9790_v44 = vpop.permute.xlu0 %3490 }
 0x440   :  { %4122 = vperm.xlu0 %5012, %v3236_v3   ;;  %v9797_v22 = vpop.permute.xlu1 %3635  ;;  %v3131_v3 = vmul.f32 %v9231_v11, %v12327_v17  ;;  %v12330_v11 = vld [vmem:[#allocation133_spill] sm:$0xff] }
 0x441   :  { %12323 = vst [vmem:[#allocation28_spill] sm:$0xff] %v9797_v22  ;;  %4057 = vperm.xlu1 %5013, %v3223_v26   ;;  %v3240_v26 = vsub.f32 %v3048_v58, %v3144_v19  ;;  %v3037_v19 = vld [vmem:[%s11200_s4 + $0xb0] sm:$0xff]  ;;  %v12332_v58 = vld [vmem:[#allocation225_spill] sm:$0xff] }
 0x442   :  { %v3227_v42 = vsub.f32 %v3035_v24, %v3131_v3  ;;  %v3148_v43 = vmul.f32 %v9173_v32, %v12332_v58  ;;  %v12335_v32 = vld [vmem:[#allocation191_spill] sm:$0xff]  ;;  %v3054_v58 = vld [vmem:[%s11200_s4 + $0x138] sm:$0xff] }
 0x443   :  { %v9804_v20 = vpop.permute.xlu0 %3730 }
 0x444   :  { %12326 = vst [vmem:[#allocation224_spill] sm:$0xff] %v9804_v20  ;;  %4132 = vperm.xlu0 %5012, %v3238_v40   ;;  %v9811_v22 = vpop.permute.xlu1 %3405  ;;  %v3050_v20 = vld [vmem:[%s11200_s4 + $0x118] sm:$0xff]  ;;  %v3133_v40 = vmul.f32 %v9284_v48, %v12330_v11  ;;  %v12334_v48 = vld [vmem:[#allocation152_spill] sm:$0xff] }
 0x445   :  { %4067 = vperm.xlu1 %5013, %v3225_v59   ;;  %v3242_v59 = vsub.f32 %v3050_v20, %v3146_v39  ;;  %v3039_v20 = vld [vmem:[%s11200_s4 + $0xc0] sm:$0xff]  ;;  %v3244_v39 = vsub.f32 %v3052_v4, %v3148_v43  ;;  %v3041_v43 = vld [vmem:[%s11200_s4 + $0xd0] sm:$0xff] }
 0x446   :  { %v3229_v24 = vsub.f32 %v3037_v19, %v3133_v40 }
 0x447   :  { %v9818_v28 = vpop.permute.xlu0 %3500 }
 0x448   :  { %4142 = vperm.xlu0 %5012, %v3240_v26   ;;  %v9825_v17 = vpop.permute.xlu1 %3645  ;;  %v3135_v26 = vmul.f32 %v9324_v2, %v12334_v48  ;;  %v3137_v2 = vmul.f32 %v9371_v56, %v9188_v0  ;;  %v3139_v0 = vmul.f32 %v9401_v37, %v9254_v61  ;;  %v12341_v37 = vld [vmem:[#allocation286_spill] sm:$0xff] }
 0x449   :  { %12331 = vst [vmem:[#allocation34_spill] sm:$0xff] %v9825_v17  ;;  %4077 = vperm.xlu1 %5013, %v3227_v42   ;;  %v3150_v42 = vmul.f32 %v9248_v35, %v12335_v32  ;;  %v12337_v35 = vld [vmem:[#allocation170_spill] sm:$0xff]  ;;  %v12362_v17 = vld [vmem:[#allocation301_spill] sm:$0xff] }
 0x44a   :  { %v3231_v19 = vsub.f32 %v3039_v20, %v3135_v26  ;;  %v3152_v4 = vmul.f32 %v9299_v13, %v12337_v35  ;;  %v3233_v26 = vsub.f32 %v3041_v43, %v3137_v2  ;;  %v3056_v20 = vld [vmem:[%s11200_s4 + $0x148] sm:$0xff]  ;;  %v12339_v13 = vld [vmem:[#allocation180_spill] sm:$0xff]  ;;  %v3058_v2 = vld [vmem:[%s11200_s4 + $0x158] sm:$0xff] }
 0x44b   :  { %v9832_v3 = vpop.permute.xlu0 %3740  ;;  %v12340_v43 = vld [vmem:[#allocation324_spill] sm:$0xff] }
 0x44c   :  { %12333 = vst [vmem:[#allocation36_spill] sm:$0xff] %v9832_v3  ;;  %4152 = vperm.xlu0 %5012, %v3242_v59   ;;  %v9839_v11 = vpop.permute.xlu1 %3415  ;;  %v3248_v32 = vsub.f32 %v3056_v20, %v3152_v4  ;;  %v3141_v61 = vmul.f32 %v12341_v37, %v12340_v43  ;;  %v12346_v43 = vld [vmem:[#allocation292_spill] sm:$0xff] }
 0x44d   :  { %4087 = vperm.xlu1 %5013, %v3229_v24   ;;  %v3246_v24 = vsub.f32 %v3054_v58, %v3150_v42  ;;  %v3154_v42 = vmul.f32 %v9347_v8, %v12339_v13  ;;  %v3045_v8 = vld [vmem:[%s11200_s4 + $0xf0] sm:$0xff]  ;;  %v12345_v13 = vld [vmem:[#allocation177_spill] sm:$0xff] }
 0x44e   :  { %v3143_v37 = vmul.f32 %v12346_v43, %v12345_v13  ;;  %v3062_v13 = vld [vmem:[%s11200_s4 + $0x178] sm:$0xff]  ;;  %v12352_v43 = vld [vmem:[#allocation22_spill] sm:$0xff] }
 0x44f   :  { %v9846_v40 = vpop.permute.xlu0 %3510 }
 0x450   :  { %4162 = vperm.xlu0 %5012, %v3244_v39   ;;  %v9853_v59 = vpop.permute.xlu1 %3655  ;;  %v3043_v39 = vld [vmem:[%s11200_s4 + $0xe0] sm:$0xff] }
 0x451   :  { %12336 = vst [vmem:[#allocation234_spill] sm:$0xff] %v9853_v59  ;;  %4097 = vperm.xlu1 %5013, %v3231_v19   ;;  %v3235_v58 = vsub.f32 %v3043_v39, %v3139_v0  ;;  %v3237_v0 = vsub.f32 %v3045_v8, %v3141_v61  ;;  %v3060_v39 = vld [vmem:[%s11200_s4 + $0x168] sm:$0xff] }
 0x453   :  { %v9860_v48 = vpop.permute.xlu0 %3750 }
 0x454   :  { %12338 = vst [vmem:[#allocation246_spill] sm:$0xff] %v9860_v48  ;;  %4172 = vperm.xlu0 %5012, %v3246_v24   ;;  %v9867_v56 = vpop.permute.xlu1 %3425  ;;  %v12342_v24 = vld [vmem:[#allocation176_spill] sm:$0xff]  ;;  %v12343_v48 = vld [vmem:[#allocation175_spill] sm:$0xff] }
 0x455   :  { %4107 = vperm.xlu1 %5013, %v3233_v26   ;;  %v3250_v26 = vsub.f32 %v3058_v2, %v3154_v42  ;;  %v3047_v42 = vld [vmem:[%s11200_s4 + $0x100] sm:$0xff] }
 0x456   :  { %v3239_v8 = vsub.f32 %v3047_v42, %v3143_v37  ;;  %v12357_v37 = vld [vmem:[#allocation169_spill] sm:$0xff] }
 0x457   :  { %v3521_v19 = vpop.permute.xlu0 %3520  ;;  %v12358_v42 = vld [vmem:[#allocation277_spill] sm:$0xff] }
 0x458   :  { %v9880_v35 = vmul.f32 %v3521_v19, %v12342_v24  ;;  %v9883_v3 = vmul.f32 %v3521_v19, %v12343_v48  ;;  %4182 = vperm.xlu0 %5012, %v3248_v32   ;;  %v9885_v4 = vpop.permute.xlu1 %3665  ;;  %v12347_v48 = vld [vmem:[#allocation257_spill] sm:$0xff]  ;;  %v12349_v32 = vld [vmem:[#allocation258_spill] sm:$0xff] }
 0x459   :  { %12344 = vst [vmem:[#allocation126_spill] sm:$0xff] %v9885_v4  ;;  %4117 = vperm.xlu1 %5013, %v3235_v58   ;;  %v12351_v58 = vld [vmem:[#allocation259_spill] sm:$0xff] }
 0x45a   :  { %v3252_v2 = vsub.f32 %v3060_v39, %v12351_v58  ;;  %v3254_v39 = vsub.f32 %v3062_v13, %v9623_v63  ;;  %v3160_v58 = vmul.f32 %v12358_v42, %v12357_v37 }
 0x45b   :  { %v3761_v20 = vpop.permute.xlu0 %3760 }
 0x45c   :  { %v9896_v19 = vmul.f32 %v3761_v20, %v12347_v48  ;;  %v9899_v24 = vmul.f32 %v3761_v20, %v12349_v32  ;;  %4192 = vperm.xlu0 %5012, %v3250_v26   ;;  %v9901_v4 = vpop.permute.xlu1 %3435  ;;  %v12353_v48 = vld [vmem:[#allocation308_spill] sm:$0xff]  ;;  %v12354_v32 = vld [vmem:[#allocation295_spill] sm:$0xff] }
 0x45d   :  { %4127 = vperm.xlu1 %5013, %v3237_v0   ;;  %v3145_v20 = vmul.f32 %v12353_v48, %v12352_v43  ;;  %v3049_v0 = vld [vmem:[%s11200_s4 + $0x110] sm:$0xff] }
 0x45e   :  { %12348 = vst [vmem:[#allocation231_spill] sm:$0xff] %v9896_v19  ;;  %12350 = vst [vmem:[#allocation241_spill] sm:$0xff] %v9899_v24  ;;  %v12355_v24 = vld [vmem:[#allocation297_spill] sm:$0xff] }
 0x45f   :  { %v3531_v61 = vpop.permute.xlu0 %3530  ;;  %v3241_v48 = vsub.f32 %v3049_v0, %v3145_v20  ;;  %v12364_v20 = vld [vmem:[#allocation193_spill] sm:$0xff]  ;;  %v12365_v0 = vld [vmem:[#allocation204_spill] sm:$0xff] }
 0x460   :  { %v9913_v26 = vmul.f32 %v3531_v61, %v12354_v32  ;;  %v9916_v19 = vmul.f32 %v3531_v61, %v12355_v24  ;;  %4202 = vperm.xlu0 %5012, %v3252_v2   ;;  %v9918_v59 = vpop.permute.xlu1 %3675  ;;  %v3064_v24 = vld [vmem:[%s11200_s4 + $0x188] sm:$0xff]  ;;  %v12359_v61 = vld [vmem:[#allocation280_spill] sm:$0xff]  ;;  %v3162_v37 = vmul.f32 %v12365_v0, %v12364_v20  ;;  %v3055_v0 = vld [vmem:[%s11200_s4 + $0x140] sm:$0xff] }
 0x461   :  { %12356 = vst [vmem:[#allocation267_spill] sm:$0xff] %v9918_v59  ;;  %4137 = vperm.xlu1 %5013, %v3239_v8   ;;  %v3147_v2 = vmul.f32 %v9529_v27, %v12359_v61  ;;  %v12360_v32 = vld [vmem:[#allocation299_spill] sm:$0xff]  ;;  %v3051_v8 = vld [vmem:[%s11200_s4 + $0x120] sm:$0xff]  ;;  %v3256_v13 = vsub.f32 %v3064_v24, %v3160_v58  ;;  %v3066_v27 = vld [vmem:[%s11200_s4 + $0x198] sm:$0xff] }
 0x462   :  { %v12366_v61 = vld [vmem:[#allocation288_spill] sm:$0xff]  ;;  %v3258_v58 = vsub.f32 %v3066_v27, %v3162_v37  ;;  %v12369_v24 = vld [vmem:[#allocation321_spill] sm:$0xff]  ;;  %v12370_v20 = vld [vmem:[#allocation303_spill] sm:$0xff] }
 0x463   :  { %v3771_v43 = vpop.permute.xlu0 %3770  ;;  %v3243_v42 = vsub.f32 %v3051_v8, %v3147_v2  ;;  %v3068_v8 = vld [vmem:[%s11200_s4 + $0x1a8] sm:$0xff] }
 0x464   :  { %v9932_v59 = vmul.f32 %v3771_v43, %v12360_v32  ;;  %v9935_v16 = vmul.f32 %v3771_v43, %v12362_v17  ;;  %4212 = vperm.xlu0 %5012, %v3254_v39   ;;  %v9937_v63 = vpop.permute.xlu1 %3445  ;;  %v3149_v17 = vmul.f32 %v9561_v46, %v12366_v61  ;;  %v3053_v43 = vld [vmem:[%s11200_s4 + $0x130] sm:$0xff]  ;;  %v3151_v46 = vmul.f32 %v9612_v36, %v12370_v20  ;;  %v12372_v27 = vld [vmem:[#allocation219_spill] sm:$0xff] }
 0x465   :  { %4147 = vperm.xlu1 %5013, %v3241_v48   ;;  %v12368_v48 = vld [vmem:[#allocation209_spill] sm:$0xff]  ;;  %v3153_v36 = vmul.f32 %v9658_v51, %v9507_v31 }
 0x466   :  { %12361 = vst [vmem:[#allocation289_spill] sm:$0xff] %v9932_v59  ;;  %12363 = vst [vmem:[#allocation156_spill] sm:$0xff] %v9935_v16  ;;  %v3164_v32 = vmul.f32 %v12369_v24, %v12368_v48  ;;  %v3245_v2 = vsub.f32 %v3053_v43, %v3149_v17  ;;  %v3247_v17 = vsub.f32 %v3055_v0, %v3151_v46  ;;  %v3070_v43 = vld [vmem:[%s11200_s4 + $0x1b8] sm:$0xff]  ;;  %v3057_v48 = vld [vmem:[%s11200_s4 + $0x150] sm:$0xff] }
 0x467   :  { %v3249_v20 = vsub.f32 %v3057_v48, %v3153_v36  ;;  %v3072_v46 = vld [vmem:[%s11200_s4 + $0x1c8] sm:$0xff]  ;;  %v3074_v36 = vld [vmem:[%s11200_s4 + $0x1d8] sm:$0xff]  ;;  %v12401_v16 = vld [vmem:[#allocation16_spill] sm:$0xff] }
 0x468   :  { %4222 = vperm.xlu0 %5012, %v3256_v13   ;;  %v9949_v39 = vpop.permute.xlu1 %3685  ;;  %v3260_v37 = vsub.f32 %v3068_v8, %v3164_v32  ;;  %v12374_v32 = vld [vmem:[#allocation122_spill] sm:$0xff]  ;;  %v12376_v0 = vld [vmem:[#allocation311_spill] sm:$0xff]  ;;  %v12409_v59 = vld [vmem:[#allocation233_spill] sm:$0xff] }
 0x469   :  { %12367 = vst [vmem:[#allocation245_spill] sm:$0xff] %v9949_v39  ;;  %4157 = vperm.xlu1 %5013, %v3243_v42   ;;  %v12371_v42 = vld [vmem:[#allocation220_spill] sm:$0xff]  ;;  %v3155_v31 = vmul.f32 %v9688_v53, %v12376_v0  ;;  %v3157_v53 = vmul.f32 %v9718_v45, %v9584_v10  ;;  %v3076_v0 = vld [vmem:[%s11200_s4 + $0x1e8] sm:$0xff] }
 0x46a   :  { %v3166_v61 = vmul.f32 %v12372_v27, %v12371_v42  ;;  %v12377_v27 = vld [vmem:[#allocation228_spill] sm:$0xff] }
 0x46c   :  { %4232 = vperm.xlu0 %5012, %v3258_v58   ;;  %v9961_v13 = vpop.permute.xlu1 %3455  ;;  %v3262_v24 = vsub.f32 %v3070_v43, %v3166_v61  ;;  %v12378_v61 = vld [vmem:[#allocation200_spill] sm:$0xff] }
 0x46d   :  { %4167 = vperm.xlu1 %5013, %v3245_v2   ;;  %v12375_v2 = vld [vmem:[#allocation221_spill] sm:$0xff] }
 0x46e   :  { %v3168_v8 = vmul.f32 %v12375_v2, %v12374_v32  ;;  %v12380_v2 = vld [vmem:[#allocation238_spill] sm:$0xff] }
 0x470   :  { %4242 = vperm.xlu0 %5012, %v3260_v37   ;;  %v9973_v58 = vpop.permute.xlu1 %3695  ;;  %v3059_v37 = vld [vmem:[%s11200_s4 + $0x160] sm:$0xff]  ;;  %v3264_v42 = vsub.f32 %v3072_v46, %v3168_v8 }
 0x471   :  { %12373 = vst [vmem:[#allocation271_spill] sm:$0xff] %v9973_v58  ;;  %4177 = vperm.xlu1 %5013, %v3247_v17   ;;  %v3170_v17 = vmul.f32 %v12378_v61, %v12377_v27  ;;  %v3251_v43 = vsub.f32 %v3059_v37, %v3155_v31  ;;  %v12381_v8 = vld [vmem:[#allocation218_spill] sm:$0xff]  ;;  %v12382_v31 = vld [vmem:[#allocation172_spill] sm:$0xff]  ;;  %v12383_v37 = vld [vmem:[#allocation269_spill] sm:$0xff] }
 0x472   :  { %v3159_v10 = vmul.f32 %v12383_v37, %v12382_v31  ;;  %v12384_v61 = vld [vmem:[#allocation109_spill] sm:$0xff]  ;;  %v3065_v31 = vld [vmem:[%s11200_s4 + $0x190] sm:$0xff] }
 0x473   :  { %v3266_v32 = vsub.f32 %v3074_v36, %v3170_v17  ;;  %v12385_v17 = vld [vmem:[#allocation240_spill] sm:$0xff] }
 0x474   :  { %4252 = vperm.xlu0 %5012, %v3262_v24   ;;  %v9985_v51 = vpop.permute.xlu1 %3465  ;;  %v3061_v24 = vld [vmem:[%s11200_s4 + $0x170] sm:$0xff] }
 0x475   :  { %4187 = vperm.xlu1 %5013, %v3249_v20   ;;  %v3172_v20 = vmul.f32 %v12381_v8, %v12380_v2  ;;  %v3253_v46 = vsub.f32 %v3061_v24, %v3157_v53  ;;  %v3078_v53 = vld [vmem:[%s11200_s4 + $0x1f8] sm:$0xff]  ;;  %v12386_v24 = vld [vmem:[#allocation190_spill] sm:$0xff]  ;;  %v12387_v2 = vld [vmem:[#allocation196_spill] sm:$0xff] }
 0x476   :  { %v3161_v8 = vmul.f32 %v12387_v2, %v12386_v24  ;;  %v3067_v2 = vld [vmem:[%s11200_s4 + $0x1a0] sm:$0xff] }
 0x477   :  { %v3268_v27 = vsub.f32 %v3076_v0, %v3172_v20  ;;  %v12390_v0 = vld [vmem:[#allocation251_spill] sm:$0xff] }
 0x478   :  { %4262 = vperm.xlu0 %5012, %v3264_v42   ;;  %v9997_v48 = vpop.permute.xlu1 %3705  ;;  %v3063_v42 = vld [vmem:[%s11200_s4 + $0x180] sm:$0xff] }
 0x479   :  { %12379 = vst [vmem:[#allocation293_spill] sm:$0xff] %v9997_v48  ;;  %4197 = vperm.xlu1 %5013, %v3251_v43   ;;  %v3174_v43 = vmul.f32 %v12385_v17, %v12384_v61  ;;  %v3255_v36 = vsub.f32 %v3063_v42, %v3159_v10  ;;  %v3257_v10 = vsub.f32 %v3065_v31, %v3161_v8  ;;  %v3080_v42 = vld [vmem:[%s11200_s4 + $0x208] sm:$0xff]  ;;  %v3082_v31 = vld [vmem:[%s11200_s4 + $0x218] sm:$0xff] }
 0x47a   :  { %v12391_v61 = vld [vmem:[#allocation207_spill] sm:$0xff] }
 0x47b   :  { %v3270_v20 = vsub.f32 %v3078_v53, %v3174_v43  ;;  %v12392_v17 = vld [vmem:[#allocation319_spill] sm:$0xff]  ;;  %v12394_v53 = vld [vmem:[#allocation256_spill] sm:$0xff] }
 0x47c   :  { %4272 = vperm.xlu0 %5012, %v3266_v32   ;;  %v10009_v45 = vpop.permute.xlu1 %3475  ;;  %v3163_v24 = vmul.f32 %v12392_v17, %v12391_v61  ;;  %v3069_v17 = vld [vmem:[%s11200_s4 + $0x1b0] sm:$0xff]  ;;  %v12412_v48 = vld [vmem:[#allocation315_spill] sm:$0xff] }
 0x47d   :  { %4207 = vperm.xlu1 %5013, %v3253_v46   ;;  %v12389_v46 = vld [vmem:[#allocation6_spill] sm:$0xff] }
 0x47e   :  { %v3176_v37 = vmul.f32 %v12390_v0, %v12389_v46  ;;  %v3259_v8 = vsub.f32 %v3067_v2, %v3163_v24  ;;  %v12395_v0 = vld [vmem:[#allocation217_spill] sm:$0xff]  ;;  %v3084_v2 = vld [vmem:[%s11200_s4 + $0x228] sm:$0xff] }
 0x480   :  { %4282 = vperm.xlu0 %5012, %v3268_v27   ;;  %v10021_v32 = vpop.permute.xlu1 %3715  ;;  %v3272_v43 = vsub.f32 %v3080_v42, %v3176_v37  ;;  %v12399_v42 = vld [vmem:[#allocation260_spill] sm:$0xff] }
 0x481   :  { %12388 = vst [vmem:[#allocation279_spill] sm:$0xff] %v10021_v32  ;;  %4217 = vperm.xlu1 %5013, %v3255_v36   ;;  %v12393_v36 = vld [vmem:[#allocation110_spill] sm:$0xff]  ;;  %v12396_v32 = vld [vmem:[#allocation103_spill] sm:$0xff] }
 0x482   :  { %v3178_v46 = vmul.f32 %v12394_v53, %v12393_v36  ;;  %v3165_v61 = vmul.f32 %v12396_v32, %v12395_v0  ;;  %v12400_v53 = vld [vmem:[#allocation116_spill] sm:$0xff]  ;;  %v3071_v0 = vld [vmem:[%s11200_s4 + $0x1c0] sm:$0xff] }
 0x483   :  { %v3167_v32 = vmul.f32 %v12401_v16, %v12400_v53  ;;  %v3073_v53 = vld [vmem:[%s11200_s4 + $0x1d0] sm:$0xff] }
 0x484   :  { %4292 = vperm.xlu0 %5012, %v3270_v20   ;;  %v10033_v27 = vpop.permute.xlu1 %3485  ;;  %v3274_v37 = vsub.f32 %v3082_v31, %v3178_v46  ;;  %v3261_v24 = vsub.f32 %v3069_v17, %v3165_v61  ;;  %v12403_v31 = vld [vmem:[#allocation12_spill] sm:$0xff]  ;;  %v3086_v17 = vld [vmem:[%s11200_s4 + $0x238] sm:$0xff] }
 0x485   :  { %4227 = vperm.xlu1 %5013, %v3257_v10   ;;  %v12398_v10 = vld [vmem:[#allocation137_spill] sm:$0xff]  ;;  %v3263_v61 = vsub.f32 %v3071_v0, %v3167_v32 }
 0x486   :  { %v3180_v36 = vmul.f32 %v12399_v42, %v12398_v10  ;;  %v12404_v42 = vld [vmem:[#allocation128_spill] sm:$0xff] }
 0x488   :  { %4302 = vperm.xlu0 %5012, %v3272_v43   ;;  %v10045_v20 = vpop.permute.xlu1 %3725  ;;  %v3276_v46 = vsub.f32 %v3084_v2, %v3180_v36  ;;  %v12408_v2 = vld [vmem:[#allocation14_spill] sm:$0xff] }
 0x489   :  { %12397 = vst [vmem:[#allocation168_spill] sm:$0xff] %v10045_v20  ;;  %4237 = vperm.xlu1 %5013, %v3259_v8   ;;  %v12402_v8 = vld [vmem:[#allocation230_spill] sm:$0xff] }
 0x48a   :  { %v3182_v10 = vmul.f32 %v12403_v31, %v12402_v8  ;;  %v12405_v20 = vld [vmem:[#allocation282_spill] sm:$0xff]  ;;  %v3088_v31 = vld [vmem:[%s11200_s4 + $0x248] sm:$0xff] }
 0x48b   :  { %v3169_v16 = vmul.f32 %v12405_v20, %v12404_v42  ;;  %v12410_v20 = vld [vmem:[#allocation287_spill] sm:$0xff]  ;;  %v12411_v42 = vld [vmem:[#allocation314_spill] sm:$0xff] }
 0x48c   :  { %4312 = vperm.xlu0 %5012, %v3274_v37   ;;  %v10057_v43 = vpop.permute.xlu1 %3495  ;;  %v3278_v36 = vsub.f32 %v3086_v17, %v3182_v10 }
 0x48d   :  { %4247 = vperm.xlu1 %5013, %v3261_v24   ;;  %v12407_v24 = vld [vmem:[#allocation253_spill] sm:$0xff]  ;;  %v3265_v0 = vsub.f32 %v3073_v53, %v3169_v16  ;;  %v12413_v16 = vld [vmem:[#allocation264_spill] sm:$0xff]  ;;  %v12414_v53 = vld [vmem:[#allocation222_spill] sm:$0xff] }
 0x48e   :  { %v3184_v8 = vmul.f32 %v12408_v2, %v12407_v24  ;;  %v3186_v24 = vmul.f32 %v12414_v53, %v12413_v16  ;;  %v12424_v16 = vld [vmem:[#allocation48_spill] sm:$0xff] }
 0x490   :  { %4322 = vperm.xlu0 %5012, %v3276_v46   ;;  %v10069_v37 = vpop.permute.xlu1 %3735  ;;  %v3171_v46 = vmul.f32 %v12410_v20, %v12409_v59  ;;  %v3280_v17 = vsub.f32 %v3088_v31, %v3184_v8  ;;  %v3090_v20 = vld [vmem:[%s11200_s4 + $0x258] sm:$0xff]  ;;  %v12422_v31 = vld [vmem:[#allocation46_spill] sm:$0xff] }
 0x491   :  { %12406 = vst [vmem:[#allocation273_spill] sm:$0xff] %v10069_v37  ;;  %4257 = vperm.xlu1 %5013, %v3263_v61   ;;  %v3075_v61 = vld [vmem:[%s11200_s4 + $0x1e0] sm:$0xff] }
 0x492   :  { %v3267_v59 = vsub.f32 %v3075_v61, %v3171_v46  ;;  %v12423_v46 = vld [vmem:[#allocation330_spill] sm:$0xff] }
 0x493   :  { %v3541_v32 = vpop.permute.xlu0 %3540  ;;  %v3805_v61 = vmul.f32 %v12423_v46, %v12422_v31  ;;  %v3806_v53 = vmul.f32 %v12423_v46, %v12424_v16  ;;  %v12431_v16 = vld [vmem:[#allocation54_spill] sm:$0xff] }
 0x494   :  { %v10082_v37 = vmul.f32 %v3541_v32, %v12411_v42  ;;  %v10085_v58 = vmul.f32 %v3541_v32, %v12412_v48  ;;  %4332 = vperm.xlu0 %5012, %v3278_v36   ;;  %v10087_v10 = vpop.permute.xlu1 %3505  ;;  %v12415_v48 = vld [vmem:[#allocation244_spill] sm:$0xff]  ;;  %v12416_v32 = vld [vmem:[#allocation226_spill] sm:$0xff] }
 0x495   :  { %4267 = vperm.xlu1 %5013, %v3265_v0   ;;  %v3173_v36 = vmul.f32 %v12416_v32, %v12415_v48  ;;  %v12417_v42 = vld [vmem:[#allocation318_spill] sm:$0xff]  ;;  %v3077_v0 = vld [vmem:[%s11200_s4 + $0x1f0] sm:$0xff]  ;;  %v3282_v48 = vsub.f32 %v3090_v20, %v3186_v24 }
 0x496   :  { %v12425_v32 = vld [vmem:[#allocation10_spill] sm:$0xff] }
 0x497   :  { %v3781_v2 = vpop.permute.xlu0 %3780  ;;  %v3079_v24 = vld [vmem:[%s11200_s4 + $0x200] sm:$0xff] }
 0x498   :  { %v10100_v39 = vmul.f32 %v3781_v2, %v12417_v42  ;;  %v10103_v9 = vmul.f32 %v3781_v2, %v12419_v55  ;;  %4342 = vperm.xlu0 %5012, %v3280_v17   ;;  %v10105_v8 = vpop.permute.xlu1 %3745  ;;  %v12426_v42 = vld [vmem:[#allocation291_spill] sm:$0xff]  ;;  %v3269_v2 = vsub.f32 %v3077_v0, %v3173_v36  ;;  %v12429_v20 = vld [vmem:[#allocation242_spill] sm:$0xff] }
 0x499   :  { %12421 = vst [vmem:[#allocation117_spill] sm:$0xff] %v10105_v8  ;;  %4277 = vperm.xlu1 %5013, %v3267_v59   ;;  %v3092_v17 = vld [vmem:[%s11200_s4 + $0x268] sm:$0xff]  ;;  %v12427_v8 = vld [vmem:[#allocation281_spill] sm:$0xff] }
 0x49a   :  { %12418 = vst [vmem:[#allocation247_spill] sm:$0xff] %v10100_v39  ;;  %12420 = vst [vmem:[#allocation223_spill] sm:$0xff] %v10103_v9  ;;  %v3188_v39 = vmul.f32 %v12426_v42, %v12425_v32  ;;  %v12428_v9 = vld [vmem:[#allocation250_spill] sm:$0xff]  ;;  %v12430_v36 = vld [vmem:[#allocation243_spill] sm:$0xff] }
 0x49b   :  { %v4033_v55 = vpop.permute.xlu0 %4032  ;;  %v3175_v33 = vmul.f32 %v12428_v9, %v12427_v8  ;;  %v12432_v32 = vld [vmem:[#allocation18_spill] sm:$0xff] }
 0x49c   :  { %v4477_v59 = vadd.f32 %v4033_v55, %v3805_v61  ;;  %v4478_v25 = vadd.f32 %v4033_v55, %v3806_v53  ;;  %4352 = vperm.xlu0 %5012, %v3282_v48   ;;  %v3516_v31 = vpop.permute.xlu1 %3515  ;;  %v3809_v42 = vmul.f32 %v12432_v32, %v12431_v16  ;;  %v3810_v9 = vmul.f32 %v12432_v32, %v12433_v30  ;;  %v12434_v61 = vld [vmem:[#allocation174_spill] sm:$0xff]  ;;  %v12435_v53 = vld [vmem:[#allocation145_spill] sm:$0xff] }
 0x49d   :  { %4287 = vperm.xlu1 %5013, %v3269_v2   ;;  %v10125_v46 = vmul.f32 %v3516_v31, %v12429_v20  ;;  %v10128_v0 = vmul.f32 %v3516_v31, %v12430_v36  ;;  %v3284_v8 = vsub.f32 %v3092_v17, %v3188_v39  ;;  %v3190_v48 = vmul.f32 %v12435_v53, %v12434_v61  ;;  %v3094_v31 = vld [vmem:[%s11200_s4 + $0x278] sm:$0xff]  ;;  %v12438_v39 = vld [vmem:[#allocation248_spill] sm:$0xff]  ;;  %v12442_v61 = vld [vmem:[#allocation62_spill] sm:$0xff] }
 0x49e   :  { %4669 = vst [vmem:[%s11201_s5 + $0xb0] sm:$0xff] %v4477_v59  ;;  %4670 = vst.msk [vmem:[%s11201_s5 + $0xb8] sm:$0xff] %vm1286_vm1, %v4478_v25  ;;  %v3271_v2 = vsub.f32 %v3079_v24, %v3175_v33  ;;  %v12436_v30 = vld [vmem:[#allocation285_spill] sm:$0xff]  ;;  %v3081_v25 = vld [vmem:[%s11200_s4 + $0x210] sm:$0xff] }
 0x49f   :  { %v4043_v55 = vpop.permute.xlu0 %4042  ;;  %v12437_v20 = vld [vmem:[#allocation173_spill] sm:$0xff]  ;;  %v12443_v53 = vld [vmem:[#allocation275_spill] sm:$0xff] }
 0x4a0   :  { %v3177_v36 = vmul.f32 %v12437_v20, %v12436_v30  ;;  %v4481_v16 = vadd.f32 %v4043_v55, %v3809_v42  ;;  %v4482_v59 = vadd.f32 %v4043_v55, %v3810_v9  ;;  %4362 = vperm.xlu0 %5012, %v3284_v8   ;;  %v3756_v32 = vpop.permute.xlu1 %3755  ;;  %v12440_v33 = vld [vmem:[#allocation249_spill] sm:$0xff]  ;;  %v3813_v49 = vmul.f32 %v12443_v53, %v12442_v61  ;;  %v12445_v8 = vld [vmem:[#allocation276_spill] sm:$0xff]  ;;  %v12446_v55 = vld [vmem:[#allocation155_spill] sm:$0xff] }
 0x4a1   :  { %4297 = vperm.xlu1 %5013, %v3271_v2   ;;  %v10152_v17 = vmul.f32 %v3756_v32, %v12438_v39  ;;  %v10155_v24 = vmul.f32 %v3756_v32, %v12440_v33  ;;  %v3814_v42 = vmul.f32 %v12443_v53, %v12444_v47  ;;  %v3286_v9 = vsub.f32 %v3094_v31, %v3190_v48  ;;  %v3096_v32 = vld [vmem:[%s11200_s4 + $0x288] sm:$0xff]  ;;  %v12447_v47 = vld [vmem:[#allocation229_spill] sm:$0xff]  ;;  %v12448_v39 = vld [vmem:[#allocation252_spill] sm:$0xff] }
 0x4a2   :  { %4673 = vst [vmem:[%s11201_s5 + $0xd0] sm:$0xff] %v4481_v16  ;;  %4674 = vst.msk [vmem:[%s11201_s5 + $0xd8] sm:$0xff] %vm1286_vm1, %v4482_v59  ;;  %v3192_v2 = vmul.f32 %v12446_v55, %v12445_v8  ;;  %v3273_v20 = vsub.f32 %v3081_v25, %v3177_v36  ;;  %v3179_v33 = vmul.f32 %v12448_v39, %v12447_v47  ;;  %v3083_v48 = vld [vmem:[%s11200_s4 + $0x220] sm:$0xff]  ;;  %v12449_v31 = vld [vmem:[#allocation261_spill] sm:$0xff] }
 0x4a3   :  { %12439 = vst [vmem:[#allocation164_spill] sm:$0xff] %v10152_v17  ;;  %12441 = vst [vmem:[#allocation133_spill] sm:$0xff] %v10155_v24  ;;  %v4053_v30 = vpop.permute.xlu0 %4052  ;;  %v12450_v36 = vld [vmem:[#allocation262_spill] sm:$0xff]  ;;  %v12454_v17 = vld [vmem:[#allocation72_spill] sm:$0xff] }
 0x4a4   :  { %v4485_v61 = vadd.f32 %v4053_v30, %v3813_v49  ;;  %v4486_v16 = vadd.f32 %v4053_v30, %v3814_v42  ;;  %4372 = vperm.xlu0 %5012, %v3286_v9   ;;  %v3526_v53 = vpop.permute.xlu1 %3525  ;;  %v12452_v8 = vld [vmem:[#allocation70_spill] sm:$0xff]  ;;  %v3288_v42 = vsub.f32 %v3096_v32, %v3192_v2  ;;  %v12455_v9 = vld [vmem:[#allocation215_spill] sm:$0xff]  ;;  %v3275_v39 = vsub.f32 %v3083_v48, %v3179_v33  ;;  %v3085_v2 = vld [vmem:[%s11200_s4 + $0x230] sm:$0xff] }
 0x4a5   :  { %4307 = vperm.xlu1 %5013, %v3273_v20   ;;  %v10179_v59 = vmul.f32 %v3526_v53, %v12449_v31  ;;  %v10182_v25 = vmul.f32 %v3526_v53, %v12450_v36  ;;  %v12453_v55 = vld [vmem:[#allocation290_spill] sm:$0xff]  ;;  %v12456_v30 = vld [vmem:[#allocation159_spill] sm:$0xff]  ;;  %v3098_v53 = vld [vmem:[%s11200_s4 + $0x298] sm:$0xff] }
 0x4a6   :  { %v3817_v24 = vmul.f32 %v12453_v55, %v12452_v8  ;;  %v3818_v49 = vmul.f32 %v12453_v55, %v12454_v17  ;;  %4677 = vst [vmem:[%s11201_s5 + $0xf0] sm:$0xff] %v4485_v61  ;;  %4678 = vst.msk [vmem:[%s11201_s5 + $0xf8] sm:$0xff] %vm1286_vm1, %v4486_v16  ;;  %v3194_v20 = vmul.f32 %v12456_v30, %v12455_v9  ;;  %v12457_v17 = vld [vmem:[#allocation239_spill] sm:$0xff]  ;;  %v12458_v31 = vld [vmem:[#allocation213_spill] sm:$0xff] }
 0x4a7   :  { %12451 = vst [vmem:[#allocation225_spill] sm:$0xff] %v10182_v25  ;;  %v4063_v47 = vpop.permute.xlu0 %4062  ;;  %v3181_v36 = vmul.f32 %v12458_v31, %v12457_v17  ;;  %v12459_v32 = vld [vmem:[#allocation265_spill] sm:$0xff]  ;;  %v12461_v33 = vld [vmem:[#allocation266_spill] sm:$0xff]  ;;  %v12464_v30 = vld [vmem:[#allocation304_spill] sm:$0xff] }
 0x4a8   :  { %v4489_v8 = vadd.f32 %v4063_v47, %v3817_v24  ;;  %v4490_v61 = vadd.f32 %v4063_v47, %v3818_v49  ;;  %4382 = vperm.xlu0 %5012, %v3288_v42   ;;  %v3766_v55 = vpop.permute.xlu1 %3765  ;;  %v12463_v9 = vld [vmem:[#allocation78_spill] sm:$0xff]  ;;  %v12465_v25 = vld [vmem:[#allocation80_spill] sm:$0xff]  ;;  %v3290_v49 = vsub.f32 %v3098_v53, %v3194_v20 }
 0x4a9   :  { %4317 = vperm.xlu1 %5013, %v3275_v39   ;;  %v10206_v16 = vmul.f32 %v3766_v55, %v12459_v32  ;;  %v10209_v48 = vmul.f32 %v3766_v55, %v12461_v33  ;;  %v3821_v60 = vmul.f32 %v12464_v30, %v12463_v9  ;;  %v3822_v24 = vmul.f32 %v12464_v30, %v12465_v25  ;;  %v12466_v42 = vld [vmem:[#allocation302_spill] sm:$0xff]  ;;  %v3100_v55 = vld [vmem:[%s11200_s4 + $0x2a8] sm:$0xff] }
 0x4aa   :  { %4681 = vst [vmem:[%s11201_s5 + $0x110] sm:$0xff] %v4489_v8  ;;  %4682 = vst.msk [vmem:[%s11201_s5 + $0x118] sm:$0xff] %vm1286_vm1, %v4490_v61  ;;  %v12467_v47 = vld [vmem:[#allocation186_spill] sm:$0xff]  ;;  %v3277_v31 = vsub.f32 %v3085_v2, %v3181_v36  ;;  %v12468_v25 = vld [vmem:[#allocation171_spill] sm:$0xff] }
 0x4ab   :  { %12460 = vst [vmem:[#allocation152_spill] sm:$0xff] %v10206_v16  ;;  %12462 = vst [vmem:[#allocation191_spill] sm:$0xff] %v10209_v48  ;;  %v3196_v39 = vmul.f32 %v12467_v47, %v12466_v42  ;;  %v4073_v17 = vpop.permute.xlu0 %4072  ;;  %v12469_v32 = vld [vmem:[#allocation270_spill] sm:$0xff]  ;;  %v12472_v36 = vld [vmem:[#allocation300_spill] sm:$0xff] }
 0x4ac   :  { %v3183_v33 = vmul.f32 %v12469_v32, %v12468_v25  ;;  %v4493_v9 = vadd.f32 %v4073_v17, %v3821_v60  ;;  %v4494_v8 = vadd.f32 %v4073_v17, %v3822_v24  ;;  %4392 = vperm.xlu0 %5012, %v3290_v49   ;;  %v3536_v30 = vpop.permute.xlu1 %3535  ;;  %v3087_v20 = vld [vmem:[%s11200_s4 + $0x240] sm:$0xff]  ;;  %v12475_v47 = vld [vmem:[#allocation307_spill] sm:$0xff]  ;;  %v12476_v16 = vld [vmem:[#allocation88_spill] sm:$0xff] }
 0x4ad   :  { %4327 = vperm.xlu1 %5013, %v3277_v31   ;;  %v12470_v53 = vld [vmem:[#allocation298_spill] sm:$0xff]  ;;  %v10236_v2 = vmul.f32 %v3536_v30, %v12472_v36  ;;  %v3826_v60 = vmul.f32 %v12475_v47, %v12476_v16  ;;  %v3292_v24 = vsub.f32 %v3100_v55, %v3196_v39  ;;  %v12477_v49 = vld [vmem:[#allocation227_spill] sm:$0xff]  ;;  %v12479_v16 = vld [vmem:[#allocation189_spill] sm:$0xff] }
 0x4ae   :  { %v10233_v61 = vmul.f32 %v3536_v30, %v12470_v53  ;;  %v12474_v42 = vld [vmem:[#allocation86_spill] sm:$0xff]  ;;  %4685 = vst [vmem:[%s11201_s5 + $0x130] sm:$0xff] %v4493_v9  ;;  %4686 = vst.msk [vmem:[%s11201_s5 + $0x138] sm:$0xff] %vm1286_vm1, %v4494_v8  ;;  %v3279_v32 = vsub.f32 %v3087_v20, %v3183_v33  ;;  %v3102_v30 = vld [vmem:[%s11200_s4 + $0x2b8] sm:$0xff] }
 0x4af   :  { %12473 = vst [vmem:[#allocation180_spill] sm:$0xff] %v10236_v2  ;;  %v3825_v48 = vmul.f32 %v12475_v47, %v12474_v42  ;;  %v12478_v17 = vld [vmem:[#allocation206_spill] sm:$0xff]  ;;  %v4083_v25 = vpop.permute.xlu0 %4082  ;;  %v12480_v53 = vld [vmem:[#allocation20_spill] sm:$0xff]  ;;  %v12481_v55 = vld [vmem:[#allocation203_spill] sm:$0xff] }
 0x4b0   :  { %12471 = vst [vmem:[#allocation170_spill] sm:$0xff] %v10233_v61  ;;  %v3198_v31 = vmul.f32 %v12478_v17, %v12477_v49  ;;  %v3185_v36 = vmul.f32 %v12480_v53, %v12479_v16  ;;  %v4498_v9 = vadd.f32 %v4083_v25, %v3826_v60  ;;  %4402 = vperm.xlu0 %5012, %v3292_v24   ;;  %v3776_v47 = vpop.permute.xlu1 %3775  ;;  %v3089_v39 = vld [vmem:[%s11200_s4 + $0x250] sm:$0xff]  ;;  %v12484_v49 = vld [vmem:[#allocation94_spill] sm:$0xff]  ;;  %v12485_v17 = vld [vmem:[#allocation313_spill] sm:$0xff] }
 0x4b1   :  { %v4497_v42 = vadd.f32 %v4083_v25, %v3825_v48  ;;  %4337 = vperm.xlu1 %5013, %v3279_v32   ;;  %v10260_v8 = vmul.f32 %v3776_v47, %v12481_v55  ;;  %v12482_v33 = vld [vmem:[#allocation192_spill] sm:$0xff]  ;;  %v3829_v2 = vmul.f32 %v12485_v17, %v12484_v49  ;;  %v12487_v24 = vld [vmem:[#allocation166_spill] sm:$0xff]  ;;  %v12491_v49 = vld [vmem:[#allocation255_spill] sm:$0xff] }
 0x4b2   :  { %v10263_v20 = vmul.f32 %v3776_v47, %v12482_v33  ;;  %v12486_v61 = vld [vmem:[#allocation96_spill] sm:$0xff]  ;;  %4690 = vst.msk [vmem:[%s11201_s5 + $0x158] sm:$0xff] %vm1286_vm1, %v4498_v9  ;;  %v3294_v60 = vsub.f32 %v3102_v30, %v3198_v31  ;;  %v12489_v16 = vld [vmem:[#allocation42_spill] sm:$0xff]  ;;  %v3281_v33 = vsub.f32 %v3089_v39, %v3185_v36  ;;  %v12494_v39 = vld [vmem:[#allocation107_spill] sm:$0xff] }
 0x4b3   :  { %v3830_v48 = vmul.f32 %v12485_v17, %v12486_v61  ;;  %4689 = vst [vmem:[%s11201_s5 + $0x150] sm:$0xff] %v4497_v42  ;;  %v12488_v25 = vld [vmem:[#allocation328_spill] sm:$0xff]  ;;  %v3803_v53 = vmul.f32 %v9663_v7, %v12489_v16  ;;  %v4093_v61 = vpop.permute.xlu0 %4092  ;;  %v3104_v42 = vld [vmem:[%s11200_s4 + $0x2c8] sm:$0xff]  ;;  %v12492_v17 = vld [vmem:[#allocation278_spill] sm:$0xff] }
 0x4b4   :  { %12483 = vst [vmem:[#allocation324_spill] sm:$0xff] %v10263_v20  ;;  %v3200_v32 = vmul.f32 %v12488_v25, %v12487_v24  ;;  %v12490_v47 = vld [vmem:[#allocation44_spill] sm:$0xff]  ;;  %v3187_v20 = vmul.f32 %v12492_v17, %v12491_v49  ;;  %v4501_v9 = vadd.f32 %v4093_v61, %v3829_v2  ;;  %4412 = vperm.xlu0 %5012, %v3294_v60   ;;  %v4028_v30 = vpop.permute.xlu1 %4027  ;;  %v3091_v24 = vld [vmem:[%s11200_s4 + $0x260] sm:$0xff]  ;;  %v12496_v60 = vld [vmem:[#allocation329_spill] sm:$0xff] }
 0x4b5   :  { %v3804_v55 = vmul.f32 %v9663_v7, %v12490_v47  ;;  %v4502_v31 = vadd.f32 %v4093_v61, %v3830_v48  ;;  %4347 = vperm.xlu1 %5013, %v3281_v33   ;;  %v4475_v25 = vadd.f32 %v4028_v30, %v3803_v53  ;;  %v12493_v16 = vld [vmem:[#allocation104_spill] sm:$0xff]  ;;  %v3834_v47 = vmul.f32 %v9593_v50, %v12494_v39 }
 0x4b6   :  { %v3833_v36 = vmul.f32 %v9593_v50, %v12493_v16  ;;  %4693 = vst [vmem:[%s11201_s5 + $0x170] sm:$0xff] %v4501_v9  ;;  %v3296_v2 = vsub.f32 %v3104_v42, %v3200_v32  ;;  %v12495_v48 = vld [vmem:[#allocation316_spill] sm:$0xff]  ;;  %v3283_v32 = vsub.f32 %v3091_v24, %v3187_v20  ;;  %v3106_v42 = vld [vmem:[%s11200_s4 + $0x2d8] sm:$0xff]  ;;  %v12500_v9 = vld [vmem:[#allocation294_spill] sm:$0xff] }
 0x4b7   :  { %v4476_v7 = vadd.f32 %v4028_v30, %v3804_v55  ;;  %4694 = vst.msk [vmem:[%s11201_s5 + $0x178] sm:$0xff] %vm1286_vm1, %v4502_v31  ;;  %v3202_v53 = vmul.f32 %v12496_v60, %v12495_v48  ;;  %v12497_v55 = vld [vmem:[#allocation50_spill] sm:$0xff]  ;;  %v12498_v33 = vld [vmem:[#allocation52_spill] sm:$0xff]  ;;  %4667 = vst [vmem:[%s11201_s5 + $0xa0] sm:$0xff] %v4475_v25  ;;  %v4103_v50 = vpop.permute.xlu0 %4102 }
 0x4b8   :  { %v3807_v61 = vmul.f32 %v9693_v62, %v12497_v55  ;;  %v3808_v49 = vmul.f32 %v9693_v62, %v12498_v33  ;;  %v12499_v17 = vld [vmem:[#allocation268_spill] sm:$0xff]  ;;  %v4505_v30 = vadd.f32 %v4103_v50, %v3833_v36  ;;  %v4506_v62 = vadd.f32 %v4103_v50, %v3834_v47  ;;  %4422 = vperm.xlu0 %5012, %v3296_v2   ;;  %v4038_v16 = vpop.permute.xlu1 %4037  ;;  %v12501_v48 = vld [vmem:[#allocation118_spill] sm:$0xff]  ;;  %v12506_v50 = vld [vmem:[#allocation197_spill] sm:$0xff] }
 0x4b9   :  { %4668 = vst.msk [vmem:[%s11201_s5 + $0xa8] sm:$0xff] %vm1286_vm1, %v4476_v7  ;;  %v3189_v31 = vmul.f32 %v12500_v9, %v12499_v17  ;;  %v3093_v25 = vld [vmem:[%s11200_s4 + $0x270] sm:$0xff]  ;;  %4357 = vperm.xlu1 %5013, %v3283_v32   ;;  %v3837_v20 = vmul.f32 %v9636_v18, %v12501_v48  ;;  %v3298_v36 = vsub.f32 %v3106_v42, %v3202_v53  ;;  %v12503_v47 = vld [vmem:[#allocation58_spill] sm:$0xff]  ;;  %v3108_v53 = vld [vmem:[%s11200_s4 + $0x2e8] sm:$0xff] }
 0x4ba   :  { %v4479_v39 = vadd.f32 %v4038_v16, %v3807_v61  ;;  %v4480_v7 = vadd.f32 %v4038_v16, %v3808_v49  ;;  %v12502_v24 = vld [vmem:[#allocation120_spill] sm:$0xff]  ;;  %4697 = vst [vmem:[%s11201_s5 + $0x190] sm:$0xff] %v4505_v30  ;;  %4698 = vst.msk [vmem:[%s11201_s5 + $0x198] sm:$0xff] %vm1286_vm1, %v4506_v62  ;;  %v3811_v2 = vmul.f32 %v9723_v15, %v12503_v47  ;;  %v3095_v9 = vld [vmem:[%s11200_s4 + $0x280] sm:$0xff] }
 0x4bb   :  { %v3838_v60 = vmul.f32 %v9636_v18, %v12502_v24  ;;  %v12504_v55 = vld [vmem:[#allocation60_spill] sm:$0xff]  ;;  %v4113_v18 = vpop.permute.xlu0 %4112  ;;  %v3285_v33 = vsub.f32 %v3093_v25, %v3189_v31  ;;  %v12507_v16 = vld [vmem:[#allocation129_spill] sm:$0xff]  ;;  %v12508_v25 = vld [vmem:[#allocation131_spill] sm:$0xff] }
 0x4bc   :  { %v3812_v61 = vmul.f32 %v9723_v15, %v12504_v55  ;;  %4671 = vst [vmem:[%s11201_s5 + $0xc0] sm:$0xff] %v4479_v39  ;;  %4672 = vst.msk [vmem:[%s11201_s5 + $0xc8] sm:$0xff] %vm1286_vm1, %v4480_v7  ;;  %v12505_v49 = vld [vmem:[#allocation272_spill] sm:$0xff]  ;;  %v4509_v42 = vadd.f32 %v4113_v18, %v3837_v20  ;;  %4432 = vperm.xlu0 %5012, %v3298_v36   ;;  %v4048_v17 = vpop.permute.xlu1 %4047  ;;  %v3841_v31 = vmul.f32 %v9671_v14, %v12507_v16  ;;  %v12509_v7 = vld [vmem:[#allocation263_spill] sm:$0xff] }
 0x4bd   :  { %v3191_v32 = vmul.f32 %v12506_v50, %v12505_v49  ;;  %v4510_v15 = vadd.f32 %v4113_v18, %v3838_v60  ;;  %4367 = vperm.xlu1 %5013, %v3285_v33   ;;  %v4483_v30 = vadd.f32 %v4048_v17, %v3811_v2  ;;  %v3842_v39 = vmul.f32 %v9671_v14, %v12508_v25  ;;  %v12510_v20 = vld [vmem:[#allocation66_spill] sm:$0xff]  ;;  %v12511_v60 = vld [vmem:[#allocation68_spill] sm:$0xff]  ;;  %v3110_v2 = vld [vmem:[%s11200_s4 + $0x2f8] sm:$0xff] }
 0x4be   :  { %v4484_v62 = vadd.f32 %v4048_v17, %v3812_v61  ;;  %4701 = vst [vmem:[%s11201_s5 + $0x1b0] sm:$0xff] %v4509_v42  ;;  %v3300_v48 = vsub.f32 %v3108_v53, %v12509_v7  ;;  %v3815_v24 = vmul.f32 %v9755_v5, %v12510_v20  ;;  %v3816_v36 = vmul.f32 %v9755_v5, %v12511_v60  ;;  %v12512_v55 = vld [vmem:[#allocation274_spill] sm:$0xff]  ;;  %v12513_v61 = vld [vmem:[#allocation309_spill] sm:$0xff]  ;;  %v3097_v49 = vld [vmem:[%s11200_s4 + $0x290] sm:$0xff] }
 0x4bf   :  { %4702 = vst.msk [vmem:[%s11201_s5 + $0x1b8] sm:$0xff] %vm1286_vm1, %v4510_v15  ;;  %4675 = vst [vmem:[%s11201_s5 + $0xe0] sm:$0xff] %v4483_v30  ;;  %v4123_v14 = vpop.permute.xlu0 %4122  ;;  %v3287_v47 = vsub.f32 %v3095_v9, %v3191_v32  ;;  %v3193_v18 = vmul.f32 %v12513_v61, %v12512_v55  ;;  %v12514_v15 = vld [vmem:[#allocation141_spill] sm:$0xff]  ;;  %v12515_v17 = vld [vmem:[#allocation143_spill] sm:$0xff]  ;;  %v3302_v30 = vsub.f32 %v3110_v2, %v9644_v23 }
 0x4c0   :  { %4676 = vst.msk [vmem:[%s11201_s5 + $0xe8] sm:$0xff] %vm1286_vm1, %v4484_v62  ;;  %v4513_v33 = vadd.f32 %v4123_v14, %v3841_v31  ;;  %v4514_v5 = vadd.f32 %v4123_v14, %v3842_v39  ;;  %4442 = vperm.xlu0 %5012, %v3300_v48   ;;  %v4058_v53 = vpop.permute.xlu1 %4057  ;;  %v3845_v32 = vmul.f32 %v9701_v57, %v12514_v15  ;;  %v12516_v62 = vld [vmem:[#allocation74_spill] sm:$0xff]  ;;  %v12517_v31 = vld [vmem:[#allocation76_spill] sm:$0xff]  ;;  %v12519_v48 = vld [vmem:[#allocation317_spill] sm:$0xff] }
 0x4c1   :  { %4377 = vperm.xlu1 %5013, %v3287_v47   ;;  %v4487_v50 = vadd.f32 %v4058_v53, %v3815_v24  ;;  %v4488_v42 = vadd.f32 %v4058_v53, %v3816_v36  ;;  %v3846_v9 = vmul.f32 %v9701_v57, %v12515_v17  ;;  %v3819_v16 = vmul.f32 %v9783_v21, %v12516_v62  ;;  %v12518_v7 = vld [vmem:[#allocation284_spill] sm:$0xff]  ;;  %v12520_v47 = vld [vmem:[#allocation149_spill] sm:$0xff]  ;;  %v12521_v55 = vld [vmem:[#allocation151_spill] sm:$0xff] }
 0x4c2   :  { %4705 = vst [vmem:[%s11201_s5 + $0x1d0] sm:$0xff] %v4513_v33  ;;  %4706 = vst.msk [vmem:[%s11201_s5 + $0x1d8] sm:$0xff] %vm1286_vm1, %v4514_v5  ;;  %v3820_v25 = vmul.f32 %v9783_v21, %v12517_v31  ;;  %v3289_v39 = vsub.f32 %v3097_v49, %v3193_v18  ;;  %v3195_v23 = vmul.f32 %v12519_v48, %v12518_v7  ;;  %v3099_v21 = vld [vmem:[%s11200_s4 + $0x2a0] sm:$0xff]  ;;  %v12523_v5 = vld [vmem:[#allocation84_spill] sm:$0xff] }
 0x4c3   :  { %4679 = vst [vmem:[%s11201_s5 + $0x100] sm:$0xff] %v4487_v50  ;;  %4680 = vst.msk [vmem:[%s11201_s5 + $0x108] sm:$0xff] %vm1286_vm1, %v4488_v42  ;;  %v4133_v57 = vpop.permute.xlu0 %4132  ;;  %v3849_v2 = vmul.f32 %v9731_v41, %v12520_v47  ;;  %v3850_v61 = vmul.f32 %v9731_v41, %v12521_v55  ;;  %v12522_v18 = vld [vmem:[#allocation82_spill] sm:$0xff]  ;;  %v3824_v53 = vmul.f32 %v9811_v22, %v12523_v5  ;;  %v12525_v62 = vld [vmem:[#allocation161_spill] sm:$0xff] }
 0x4c4   :  { %v4517_v20 = vadd.f32 %v4133_v57, %v3845_v32  ;;  %v4518_v24 = vadd.f32 %v4133_v57, %v3846_v9  ;;  %4452 = vperm.xlu0 %5012, %v3302_v30   ;;  %v4068_v60 = vpop.permute.xlu1 %4067  ;;  %v3823_v33 = vmul.f32 %v9811_v22, %v12522_v18  ;;  %v3291_v49 = vsub.f32 %v3099_v21, %v3195_v23  ;;  %v12524_v50 = vld [vmem:[#allocation38_spill] sm:$0xff]  ;;  %v3101_v22 = vld [vmem:[%s11200_s4 + $0x2b0] sm:$0xff]  ;;  %v12529_v23 = vld [vmem:[#allocation305_spill] sm:$0xff] }
 0x4c5   :  { %4387 = vperm.xlu1 %5013, %v3289_v39   ;;  %v4491_v36 = vadd.f32 %v4068_v60, %v3819_v16  ;;  %v4492_v14 = vadd.f32 %v4068_v60, %v3820_v25  ;;  %v3197_v42 = vmul.f32 %v9595_v54, %v12524_v50  ;;  %v3853_v16 = vmul.f32 %v9762_v6, %v12525_v62  ;;  %v12526_v31 = vld [vmem:[#allocation162_spill] sm:$0xff]  ;;  %v12528_v39 = vld [vmem:[#allocation92_spill] sm:$0xff]  ;;  %v12530_v47 = vld [vmem:[#allocation183_spill] sm:$0xff] }
 0x4c6   :  { %4709 = vst [vmem:[%s11201_s5 + $0x1f0] sm:$0xff] %v4517_v20  ;;  %4710 = vst.msk [vmem:[%s11201_s5 + $0x1f8] sm:$0xff] %vm1286_vm1, %v4518_v24  ;;  %v3854_v25 = vmul.f32 %v9762_v6, %v12526_v31  ;;  %v12527_v54 = vld [vmem:[#allocation90_spill] sm:$0xff]  ;;  %v3828_v7 = vmul.f32 %v9839_v11, %v12528_v39  ;;  %v3199_v20 = vmul.f32 %v9638_v1, %v12529_v23  ;;  %v12531_v55 = vld [vmem:[#allocation184_spill] sm:$0xff] }
 0x4c7   :  { %4683 = vst [vmem:[%s11201_s5 + $0x120] sm:$0xff] %v4491_v36  ;;  %4684 = vst.msk [vmem:[%s11201_s5 + $0x128] sm:$0xff] %vm1286_vm1, %v4492_v14  ;;  %v4143_v41 = vpop.permute.xlu0 %4142  ;;  %v3827_v57 = vmul.f32 %v9839_v11, %v12527_v54  ;;  %v3293_v48 = vsub.f32 %v3101_v22, %v3197_v42  ;;  %v3103_v11 = vld [vmem:[%s11200_s4 + $0x2c0] sm:$0xff]  ;;  %v12535_v22 = vld [vmem:[#allocation199_spill] sm:$0xff] }
 0x4c8   :  { %v4521_v15 = vadd.f32 %v4143_v41, %v3849_v2  ;;  %v4522_v32 = vadd.f32 %v4143_v41, %v3850_v61  ;;  %v4078_v17 = vpop.permute.xlu1 %4077  ;;  %v3857_v2 = vmul.f32 %v9790_v44, %v12530_v47  ;;  %v3858_v61 = vmul.f32 %v9790_v44, %v12531_v55  ;;  %v12532_v1 = vld [vmem:[#allocation98_spill] sm:$0xff]  ;;  %v12538_v31 = vld [vmem:[#allocation113_spill] sm:$0xff] }
 0x4c9   :  { %4397 = vperm.xlu1 %5013, %v3291_v49   ;;  %v4495_v9 = vadd.f32 %v4078_v17, %v3823_v33  ;;  %v4496_v30 = vadd.f32 %v4078_v17, %v3824_v53  ;;  %v3831_v18 = vmul.f32 %v9867_v56, %v12532_v1  ;;  %v12533_v33 = vld [vmem:[#allocation100_spill] sm:$0xff]  ;;  %v3295_v53 = vsub.f32 %v3103_v11, %v3199_v20  ;;  %v12534_v41 = vld [vmem:[#allocation310_spill] sm:$0xff]  ;;  %v12539_v20 = vld [vmem:[#allocation139_spill] sm:$0xff] }
 0x4ca   :  { %4713 = vst [vmem:[%s11201_s5 + $0x210] sm:$0xff] %v4521_v15  ;;  %4714 = vst.msk [vmem:[%s11201_s5 + $0x218] sm:$0xff] %vm1286_vm1, %v4522_v32  ;;  %v3832_v5 = vmul.f32 %v9867_v56, %v12533_v33  ;;  %v3201_v49 = vmul.f32 %v9673_v12, %v12534_v41  ;;  %v3105_v56 = vld [vmem:[%s11200_s4 + $0x2d0] sm:$0xff]  ;;  %v12537_v12 = vld [vmem:[#allocation111_spill] sm:$0xff]  ;;  %v3205_v47 = vmul.f32 %v9733_v52, %v9607_v34 }
 0x4cb   :  { %4687 = vst [vmem:[%s11201_s5 + $0x140] sm:$0xff] %v4495_v9  ;;  %4688 = vst.msk [vmem:[%s11201_s5 + $0x148] sm:$0xff] %vm1286_vm1, %v4496_v30  ;;  %v4153_v6 = vpop.permute.xlu0 %4152  ;;  %v3861_v9 = vmul.f32 %v9818_v28, %v12535_v22  ;;  %v12536_v30 = vld [vmem:[#allocation201_spill] sm:$0xff]  ;;  %v12543_v34 = vld [vmem:[#allocation134_spill] sm:$0xff] }
 0x4cc   :  { %v4525_v24 = vadd.f32 %v4153_v6, %v3853_v16  ;;  %v4526_v60 = vadd.f32 %v4153_v6, %v3854_v25  ;;  %v4088_v21 = vpop.permute.xlu1 %4087  ;;  %v3862_v62 = vmul.f32 %v9818_v28, %v12536_v30  ;;  %v3835_v16 = vmul.f32 %v9901_v4, %v12537_v12  ;;  %v12542_v11 = vld [vmem:[#allocation125_spill] sm:$0xff]  ;;  %v12544_v33 = vld [vmem:[#allocation136_spill] sm:$0xff] }
 0x4cd   :  { %4407 = vperm.xlu1 %5013, %v3293_v48   ;;  %v4499_v36 = vadd.f32 %v4088_v21, %v3827_v57  ;;  %v4500_v14 = vadd.f32 %v4088_v21, %v3828_v7  ;;  %v3836_v25 = vmul.f32 %v9901_v4, %v12538_v31  ;;  %v3297_v54 = vsub.f32 %v3105_v56, %v3201_v49  ;;  %v3107_v4 = vld [vmem:[%s11200_s4 + $0x2e0] sm:$0xff] }
 0x4ce   :  { %4717 = vst [vmem:[%s11201_s5 + $0x230] sm:$0xff] %v4525_v24  ;;  %4718 = vst.msk [vmem:[%s11201_s5 + $0x238] sm:$0xff] %vm1286_vm1, %v4526_v60  ;;  %v3203_v57 = vmul.f32 %v9703_v38, %v9553_v29  ;;  %v3865_v24 = vmul.f32 %v9846_v40, %v12539_v20  ;;  %v12540_v60 = vld [vmem:[#allocation232_spill] sm:$0xff]  ;;  %v12541_v29 = vld [vmem:[#allocation123_spill] sm:$0xff]  ;;  %v3843_v52 = vmul.f32 %v9961_v13, %v12543_v34 }
 0x4cf   :  { %4691 = vst [vmem:[%s11201_s5 + $0x160] sm:$0xff] %v4499_v36  ;;  %4692 = vst.msk [vmem:[%s11201_s5 + $0x168] sm:$0xff] %vm1286_vm1, %v4500_v14  ;;  %v4163_v44 = vpop.permute.xlu0 %4162  ;;  %v3866_v21 = vmul.f32 %v9846_v40, %v12540_v60  ;;  %v3839_v38 = vmul.f32 %v9937_v63, %v12541_v29  ;;  %v3840_v36 = vmul.f32 %v9937_v63, %v12542_v11  ;;  %v3109_v63 = vld [vmem:[%s11200_s4 + $0x2f0] sm:$0xff]  ;;  %v12554_v11 = vld [vmem:[#allocation15_spill] sm:$0xff] }
 0x4d0   :  { %v4529_v50 = vadd.f32 %v4163_v44, %v3857_v2  ;;  %v4530_v42 = vadd.f32 %v4163_v44, %v3858_v61  ;;  %v4098_v15 = vpop.permute.xlu1 %4097  ;;  %v3299_v14 = vsub.f32 %v3107_v4, %v3203_v57 }
 0x4d1   :  { %4417 = vperm.xlu1 %5013, %v3295_v53   ;;  %v4503_v32 = vadd.f32 %v4098_v15, %v3831_v18  ;;  %v4504_v17 = vadd.f32 %v4098_v15, %v3832_v5  ;;  %v3844_v5 = vmul.f32 %v9961_v13, %v12544_v33  ;;  %v3301_v53 = vsub.f32 %v3109_v63, %v3205_v47  ;;  %v12545_v13 = vld [vmem:[#allocation146_spill] sm:$0xff] }
 0x4d2   :  { %4721 = vst [vmem:[%s11201_s5 + $0x250] sm:$0xff] %v4529_v50  ;;  %4722 = vst.msk [vmem:[%s11201_s5 + $0x258] sm:$0xff] %vm1286_vm1, %v4530_v42  ;;  %v3847_v56 = vmul.f32 %v9985_v51, %v12545_v13  ;;  %v12557_v47 = vld [vmem:[#allocation194_spill] sm:$0xff] }
 0x4d3   :  { %4695 = vst [vmem:[%s11201_s5 + $0x180] sm:$0xff] %v4503_v32  ;;  %4696 = vst.msk [vmem:[%s11201_s5 + $0x188] sm:$0xff] %vm1286_vm1, %v4504_v17  ;;  %v4173_v28 = vpop.permute.xlu0 %4172  ;;  %v12546_v32 = vld [vmem:[#allocation147_spill] sm:$0xff] }
 0x4d4   :  { %v4533_v39 = vadd.f32 %v4173_v28, %v3861_v9  ;;  %v4534_v7 = vadd.f32 %v4173_v28, %v3862_v62  ;;  %v4108_v6 = vpop.permute.xlu1 %4107 }
 0x4d5   :  { %4427 = vperm.xlu1 %5013, %v3297_v54   ;;  %v4507_v48 = vadd.f32 %v4108_v6, %v3835_v16  ;;  %v4508_v23 = vadd.f32 %v4108_v6, %v3836_v25  ;;  %v12548_v16 = vld [vmem:[#allocation158_spill] sm:$0xff]  ;;  %v12551_v6 = vld [vmem:[#allocation8_spill] sm:$0xff] }
 0x4d6   :  { %4725 = vst [vmem:[%s11201_s5 + $0x270] sm:$0xff] %v4533_v39  ;;  %4726 = vst.msk [vmem:[%s11201_s5 + $0x278] sm:$0xff] %vm1286_vm1, %v4534_v7  ;;  %v12549_v39 = vld [vmem:[#allocation7_spill] sm:$0xff] }
 0x4d7   :  { %4699 = vst [vmem:[%s11201_s5 + $0x1a0] sm:$0xff] %v4507_v48  ;;  %4700 = vst.msk [vmem:[%s11201_s5 + $0x1a8] sm:$0xff] %vm1286_vm1, %v4508_v23  ;;  %v4183_v40 = vpop.permute.xlu0 %4182  ;;  %v12550_v7 = vld [vmem:[#allocation331_spill] sm:$0xff] }
 0x4d8   :  { %v4537_v2 = vadd.f32 %v4183_v40, %v3865_v24  ;;  %v4538_v55 = vadd.f32 %v4183_v40, %v3866_v21  ;;  %v4118_v61 = vpop.permute.xlu1 %4117  ;;  %v3882_v4 = vmul.f32 %v12550_v7, %v12551_v6  ;;  %v12553_v48 = vld [vmem:[#allocation179_spill] sm:$0xff] }
 0x4d9   :  { %4437 = vperm.xlu1 %5013, %v3299_v14   ;;  %v4511_v1 = vadd.f32 %v4118_v61, %v3839_v38  ;;  %v4512_v18 = vadd.f32 %v4118_v61, %v3840_v36  ;;  %v3856_v23 = vmul.f32 %v10033_v27, %v12553_v48  ;;  %v12555_v36 = vld [vmem:[#allocation114_spill] sm:$0xff]  ;;  %v12556_v14 = vld [vmem:[#allocation17_spill] sm:$0xff]  ;;  %v12572_v48 = vld [vmem:[#allocation332_spill] sm:$0xff] }
 0x4da   :  { %4729 = vst [vmem:[%s11201_s5 + $0x290] sm:$0xff] %v4537_v2  ;;  %4730 = vst.msk [vmem:[%s11201_s5 + $0x298] sm:$0xff] %vm1286_vm1, %v4538_v55  ;;  %v3885_v40 = vmul.f32 %v12555_v36, %v12554_v11  ;;  %v3859_v2 = vmul.f32 %v10057_v43, %v12557_v47  ;;  %v12558_v55 = vld [vmem:[#allocation195_spill] sm:$0xff] }
 0x4db   :  { %4703 = vst [vmem:[%s11201_s5 + $0x1c0] sm:$0xff] %v4511_v1  ;;  %4704 = vst.msk [vmem:[%s11201_s5 + $0x1c8] sm:$0xff] %vm1286_vm1, %v4512_v18  ;;  %v4193_v44 = vpop.permute.xlu0 %4192  ;;  %v3860_v61 = vmul.f32 %v10057_v43, %v12558_v55 }
 0x4dc   :  { %v4541_v41 = vadd.f32 %v4193_v44, %v9880_v35  ;;  %v4542_v49 = vadd.f32 %v4193_v44, %v9883_v3  ;;  %v4128_v50 = vpop.permute.xlu1 %4127  ;;  %v3848_v35 = vmul.f32 %v9985_v51, %v12546_v32  ;;  %v12547_v51 = vld [vmem:[#allocation157_spill] sm:$0xff]  ;;  %v12560_v44 = vld [vmem:[#allocation235_spill] sm:$0xff] }
 0x4dd   :  { %4447 = vperm.xlu1 %5013, %v3301_v53   ;;  %v4515_v42 = vadd.f32 %v4128_v50, %v3843_v52  ;;  %v4516_v15 = vadd.f32 %v4128_v50, %v3844_v5  ;;  %v3851_v12 = vmul.f32 %v10009_v45, %v12547_v51  ;;  %v12559_v5 = vld [vmem:[#allocation23_spill] sm:$0xff] }
 0x4de   :  { %4733 = vst [vmem:[%s11201_s5 + $0x2b0] sm:$0xff] %v4541_v41  ;;  %4734 = vst.msk [vmem:[%s11201_s5 + $0x2b8] sm:$0xff] %vm1286_vm1, %v4542_v49  ;;  %v3889_v53 = vmul.f32 %v12560_v44, %v12559_v5  ;;  %v12561_v41 = vld [vmem:[#allocation25_spill] sm:$0xff] }
 0x4df   :  { %4707 = vst [vmem:[%s11201_s5 + $0x1e0] sm:$0xff] %v4515_v42  ;;  %4708 = vst.msk [vmem:[%s11201_s5 + $0x1e8] sm:$0xff] %vm1286_vm1, %v4516_v15  ;;  %v4203_v3 = vpop.permute.xlu0 %4202  ;;  %v3890_v43 = vmul.f32 %v12560_v44, %v12561_v41  ;;  %v12562_v49 = vld [vmem:[#allocation101_spill] sm:$0xff]  ;;  %v12563_v42 = vld [vmem:[#allocation214_spill] sm:$0xff] }
 0x4e0   :  { %v4545_v17 = vadd.f32 %v4203_v3, %v9913_v26  ;;  %v4546_v22 = vadd.f32 %v4203_v3, %v9916_v19  ;;  %v4138_v9 = vpop.permute.xlu1 %4137  ;;  %v3852_v26 = vmul.f32 %v10009_v45, %v12548_v16  ;;  %v3881_v45 = vmul.f32 %v12550_v7, %v12549_v39 }
 0x4e1   :  { %v4519_v30 = vadd.f32 %v4138_v9, %v3847_v56  ;;  %v4520_v62 = vadd.f32 %v4138_v9, %v3848_v35  ;;  %v3863_v50 = vmul.f32 %v10087_v10, %v12562_v49  ;;  %v3864_v15 = vmul.f32 %v10087_v10, %v12563_v42  ;;  %v12565_v9 = vld [vmem:[#allocation254_spill] sm:$0xff]  ;;  %v12583_v49 = vld [vmem:[#allocation283_spill] sm:$0xff]  ;;  %v12584_v42 = vld [vmem:[#allocation65_spill] sm:$0xff] }
 0x4e2   :  { %4737 = vst [vmem:[%s11201_s5 + $0x2d0] sm:$0xff] %v4545_v17  ;;  %4738 = vst.msk [vmem:[%s11201_s5 + $0x2d8] sm:$0xff] %vm1286_vm1, %v4546_v22  ;;  %v12564_v22 = vld [vmem:[#allocation31_spill] sm:$0xff] }
 0x4e3   :  { %4711 = vst [vmem:[%s11201_s5 + $0x200] sm:$0xff] %v4519_v30  ;;  %4712 = vst.msk [vmem:[%s11201_s5 + $0x208] sm:$0xff] %vm1286_vm1, %v4520_v62  ;;  %v4213_v19 = vpop.permute.xlu0 %4212  ;;  %v3893_v30 = vmul.f32 %v12565_v9, %v12564_v22  ;;  %v12566_v62 = vld [vmem:[#allocation33_spill] sm:$0xff] }
 0x4e4   :  { %v4549_v31 = vadd.f32 %v4213_v19, %v10082_v37  ;;  %v4550_v25 = vadd.f32 %v4213_v19, %v10085_v58  ;;  %v4148_v28 = vpop.permute.xlu1 %4147  ;;  %v12552_v37 = vld [vmem:[#allocation178_spill] sm:$0xff]  ;;  %v3894_v10 = vmul.f32 %v12565_v9, %v12566_v62 }
 0x4e5   :  { %v4523_v54 = vadd.f32 %v4148_v28, %v3851_v12  ;;  %v4524_v57 = vadd.f32 %v4148_v28, %v3852_v26  ;;  %v3855_v58 = vmul.f32 %v10033_v27, %v12552_v37  ;;  %v3886_v27 = vmul.f32 %v12555_v36, %v12556_v14  ;;  %v12568_v28 = vld [vmem:[#allocation211_spill] sm:$0xff]  ;;  %v12575_v36 = vld [vmem:[#allocation180_spill] sm:$0xff] }
 0x4e6   :  { %4741 = vst [vmem:[%s11201_s5 + $0x2f0] sm:$0xff] %v4549_v31  ;;  %4742 = vst.msk [vmem:[%s11201_s5 + $0x2f8] sm:$0xff] %vm1286_vm1, %v4550_v25  ;;  %v12567_v25 = vld [vmem:[#allocation39_spill] sm:$0xff] }
 0x4e7   :  { %4715 = vst [vmem:[%s11201_s5 + $0x220] sm:$0xff] %v4523_v54  ;;  %4716 = vst.msk [vmem:[%s11201_s5 + $0x228] sm:$0xff] %vm1286_vm1, %v4524_v57  ;;  %v4223_v20 = vpop.permute.xlu0 %4222  ;;  %v3897_v54 = vmul.f32 %v12568_v28, %v12567_v25  ;;  %v12569_v57 = vld [vmem:[#allocation41_spill] sm:$0xff]  ;;  %v12576_v14 = vld [vmem:[#allocation55_spill] sm:$0xff] }
 0x4e8   :  { %v4553_v24 = vadd.f32 %v4223_v20, %v3881_v45  ;;  %v4554_v60 = vadd.f32 %v4223_v20, %v3882_v4  ;;  %v4158_v21 = vpop.permute.xlu1 %4157  ;;  %v3898_v39 = vmul.f32 %v12568_v28, %v12569_v57  ;;  %v12570_v4 = vld [vmem:[#allocation225_spill] sm:$0xff]  ;;  %v12592_v25 = vld [vmem:[#allocation236_spill] sm:$0xff] }
 0x4e9   :  { %v4527_v29 = vadd.f32 %v4158_v21, %v3855_v58  ;;  %v4528_v38 = vadd.f32 %v4158_v21, %v3856_v23  ;;  %v12571_v58 = vld [vmem:[#allocation47_spill] sm:$0xff]  ;;  %v12573_v20 = vld [vmem:[#allocation49_spill] sm:$0xff] }
 0x4ea   :  { %4745 = vst [vmem:[%s11201_s5 + $0x310] sm:$0xff] %v4553_v24  ;;  %4746 = vst.msk [vmem:[%s11201_s5 + $0x318] sm:$0xff] %vm1286_vm1, %v4554_v60  ;;  %v3901_v23 = vmul.f32 %v12572_v48, %v12571_v58  ;;  %v3902_v24 = vmul.f32 %v12572_v48, %v12573_v20  ;;  %v12596_v48 = vld [vmem:[#allocation81_spill] sm:$0xff]  ;;  %v12597_v20 = vld [vmem:[#allocation27_spill] sm:$0xff] }
 0x4eb   :  { %4719 = vst [vmem:[%s11201_s5 + $0x240] sm:$0xff] %v4527_v29  ;;  %4720 = vst.msk [vmem:[%s11201_s5 + $0x248] sm:$0xff] %vm1286_vm1, %v4528_v38  ;;  %v4233_v63 = vpop.permute.xlu0 %4232  ;;  %v12574_v38 = vld [vmem:[#allocation170_spill] sm:$0xff] }
 0x4ec   :  { %v4557_v1 = vadd.f32 %v4233_v63, %v3885_v40  ;;  %v4558_v18 = vadd.f32 %v4233_v63, %v3886_v27  ;;  %v4168_v34 = vpop.permute.xlu1 %4167  ;;  %v12577_v27 = vld [vmem:[#allocation24_spill] sm:$0xff]  ;;  %v12580_v63 = vld [vmem:[#allocation326_spill] sm:$0xff] }
 0x4ed   :  { %v4531_v52 = vadd.f32 %v4168_v34, %v3859_v2  ;;  %v4532_v33 = vadd.f32 %v4168_v34, %v3860_v61  ;;  %v3905_v47 = vmul.f32 %v12577_v27, %v12576_v14  ;;  %v12578_v2 = vld [vmem:[#allocation57_spill] sm:$0xff]  ;;  %v12579_v61 = vld [vmem:[#allocation3_spill] sm:$0xff] }
 0x4ee   :  { %4749 = vst [vmem:[%s11201_s5 + $0x330] sm:$0xff] %v4557_v1  ;;  %4750 = vst.msk [vmem:[%s11201_s5 + $0x338] sm:$0xff] %vm1286_vm1, %v4558_v18  ;;  %v3906_v55 = vmul.f32 %v12577_v27, %v12578_v2  ;;  %v3879_v1 = vmul.f32 %v12580_v63, %v12579_v61  ;;  %v12581_v18 = vld [vmem:[#allocation5_spill] sm:$0xff]  ;;  %v12600_v27 = vld [vmem:[#allocation87_spill] sm:$0xff] }
 0x4ef   :  { %4723 = vst [vmem:[%s11201_s5 + $0x260] sm:$0xff] %v4531_v52  ;;  %4724 = vst.msk [vmem:[%s11201_s5 + $0x268] sm:$0xff] %vm1286_vm1, %v4532_v33  ;;  %v4243_v13 = vpop.permute.xlu0 %4242  ;;  %v3880_v34 = vmul.f32 %v12580_v63, %v12581_v18  ;;  %v12603_v63 = vld [vmem:[#allocation35_spill] sm:$0xff] }
 0x4f0   :  { %v4561_v56 = vadd.f32 %v4243_v13, %v3889_v53  ;;  %v4562_v32 = vadd.f32 %v4243_v13, %v3890_v43  ;;  %v4178_v35 = vpop.permute.xlu1 %4177  ;;  %v12582_v43 = vld [vmem:[#allocation63_spill] sm:$0xff] }
 0x4f1   :  { %v4535_v3 = vadd.f32 %v4178_v35, %v3863_v50  ;;  %v4536_v17 = vadd.f32 %v4178_v35, %v3864_v15  ;;  %v3909_v50 = vmul.f32 %v12583_v49, %v12582_v43  ;;  %v3910_v15 = vmul.f32 %v12583_v49, %v12584_v42  ;;  %v12585_v13 = vld [vmem:[#allocation11_spill] sm:$0xff]  ;;  %v12587_v35 = vld [vmem:[#allocation13_spill] sm:$0xff] }
 0x4f2   :  { %4753 = vst [vmem:[%s11201_s5 + $0x350] sm:$0xff] %v4561_v56  ;;  %4754 = vst.msk [vmem:[%s11201_s5 + $0x358] sm:$0xff] %vm1286_vm1, %v4562_v32  ;;  %v12586_v56 = vld [vmem:[#allocation9_spill] sm:$0xff]  ;;  %v12606_v49 = vld [vmem:[#allocation95_spill] sm:$0xff] }
 0x4f3   :  { %4727 = vst [vmem:[%s11201_s5 + $0x280] sm:$0xff] %v4535_v3  ;;  %4728 = vst.msk [vmem:[%s11201_s5 + $0x288] sm:$0xff] %vm1286_vm1, %v4536_v17  ;;  %v4253_v51 = vpop.permute.xlu0 %4252  ;;  %v3883_v32 = vmul.f32 %v12586_v56, %v12585_v13  ;;  %v3884_v3 = vmul.f32 %v12586_v56, %v12587_v35  ;;  %v12609_v56 = vld [vmem:[#allocation43_spill] sm:$0xff] }
 0x4f4   :  { %v4565_v12 = vadd.f32 %v4253_v51, %v3893_v30  ;;  %v4566_v16 = vadd.f32 %v4253_v51, %v3894_v10  ;;  %v4188_v26 = vpop.permute.xlu1 %4187  ;;  %v12588_v51 = vld [vmem:[#allocation71_spill] sm:$0xff] }
 0x4f5   :  { %v4539_v19 = vadd.f32 %v4188_v26, %v10125_v46  ;;  %v4540_v31 = vadd.f32 %v4188_v26, %v10128_v0  ;;  %v12590_v26 = vld [vmem:[#allocation73_spill] sm:$0xff] }
 0x4f6   :  { %4757 = vst [vmem:[%s11201_s5 + $0x370] sm:$0xff] %v4565_v12  ;;  %4758 = vst.msk [vmem:[%s11201_s5 + $0x378] sm:$0xff] %vm1286_vm1, %v4566_v16  ;;  %v12589_v12 = vld [vmem:[#allocation40_spill] sm:$0xff] }
 0x4f7   :  { %4731 = vst [vmem:[%s11201_s5 + $0x2a0] sm:$0xff] %v4539_v19  ;;  %4732 = vst.msk [vmem:[%s11201_s5 + $0x2a8] sm:$0xff] %vm1286_vm1, %v4540_v31  ;;  %v4263_v46 = vpop.permute.xlu0 %4262  ;;  %v3913_v16 = vmul.f32 %v12589_v12, %v12588_v51  ;;  %v3914_v19 = vmul.f32 %v12589_v12, %v12590_v26  ;;  %v12591_v31 = vld [vmem:[#allocation19_spill] sm:$0xff]  ;;  %v12612_v12 = vld [vmem:[#allocation106_spill] sm:$0xff] }
 0x4f8   :  { %v4569_v0 = vadd.f32 %v4263_v46, %v3897_v54  ;;  %v4570_v7 = vadd.f32 %v4263_v46, %v3898_v39  ;;  %v4198_v45 = vpop.permute.xlu1 %4197  ;;  %v3887_v28 = vmul.f32 %v12592_v25, %v12591_v31  ;;  %v12593_v54 = vld [vmem:[#allocation21_spill] sm:$0xff] }
 0x4f9   :  { %v4543_v6 = vadd.f32 %v4198_v45, %v10179_v59  ;;  %v4544_v37 = vadd.f32 %v4198_v45, %v12570_v4  ;;  %v3888_v57 = vmul.f32 %v12592_v25, %v12593_v54  ;;  %v12594_v4 = vld [vmem:[#allocation79_spill] sm:$0xff] }
 0x4fa   :  { %4761 = vst [vmem:[%s11201_s5 + $0x390] sm:$0xff] %v4569_v0  ;;  %4762 = vst.msk [vmem:[%s11201_s5 + $0x398] sm:$0xff] %vm1286_vm1, %v4570_v7  ;;  %v12615_v25 = vld [vmem:[#allocation51_spill] sm:$0xff] }
 0x4fb   :  { %4735 = vst [vmem:[%s11201_s5 + $0x2c0] sm:$0xff] %v4543_v6  ;;  %4736 = vst.msk [vmem:[%s11201_s5 + $0x2c8] sm:$0xff] %vm1286_vm1, %v4544_v37  ;;  %v4273_v59 = vpop.permute.xlu0 %4272  ;;  %v12595_v37 = vld [vmem:[#allocation306_spill] sm:$0xff] }
 0x4fc   :  { %v4573_v60 = vadd.f32 %v4273_v59, %v3901_v23  ;;  %v4574_v21 = vadd.f32 %v4273_v59, %v3902_v24  ;;  %v4208_v29 = vpop.permute.xlu1 %4207  ;;  %v3917_v58 = vmul.f32 %v12595_v37, %v12594_v4  ;;  %v3918_v23 = vmul.f32 %v12595_v37, %v12596_v48  ;;  %v12598_v24 = vld [vmem:[#allocation296_spill] sm:$0xff]  ;;  %v12618_v37 = vld [vmem:[#allocation119_spill] sm:$0xff] }
 0x4fd   :  { %v4547_v11 = vadd.f32 %v4208_v29, %v12574_v38  ;;  %v4548_v40 = vadd.f32 %v4208_v29, %v12575_v36  ;;  %v3891_v59 = vmul.f32 %v12598_v24, %v12597_v20 }
 0x4fe   :  { %4765 = vst [vmem:[%s11201_s5 + $0x3b0] sm:$0xff] %v4573_v60  ;;  %4766 = vst.msk [vmem:[%s11201_s5 + $0x3b8] sm:$0xff] %vm1286_vm1, %v4574_v21  ;;  %v12599_v60 = vld [vmem:[#allocation29_spill] sm:$0xff] }
 0x4ff   :  { %4739 = vst [vmem:[%s11201_s5 + $0x2e0] sm:$0xff] %v4547_v11  ;;  %4740 = vst.msk [vmem:[%s11201_s5 + $0x2e8] sm:$0xff] %vm1286_vm1, %v4548_v40  ;;  %v4283_v52 = vpop.permute.xlu0 %4282  ;;  %v3892_v21 = vmul.f32 %v12598_v24, %v12599_v60  ;;  %v12621_v24 = vld [vmem:[#allocation59_spill] sm:$0xff] }
 0x500   :  { %v4577_v33 = vadd.f32 %v4283_v52, %v3905_v47  ;;  %v4578_v5 = vadd.f32 %v4283_v52, %v3906_v55  ;;  %v4218_v44 = vpop.permute.xlu1 %4217  ;;  %v12601_v47 = vld [vmem:[#allocation312_spill] sm:$0xff]  ;;  %v12602_v55 = vld [vmem:[#allocation89_spill] sm:$0xff] }
 0x501   :  { %v4551_v53 = vadd.f32 %v4218_v44, %v3879_v1  ;;  %v4552_v41 = vadd.f32 %v4218_v44, %v3880_v34  ;;  %v3921_v2 = vmul.f32 %v12601_v47, %v12600_v27  ;;  %v3922_v61 = vmul.f32 %v12601_v47, %v12602_v55  ;;  %v12604_v1 = vld [vmem:[#allocation320_spill] sm:$0xff]  ;;  %v12605_v34 = vld [vmem:[#allocation37_spill] sm:$0xff]  ;;  %v12624_v47 = vld [vmem:[#allocation130_spill] sm:$0xff] }
 0x502   :  { %4769 = vst [vmem:[%s11201_s5 + $0x3d0] sm:$0xff] %v4577_v33  ;;  %4770 = vst.msk [vmem:[%s11201_s5 + $0x3d8] sm:$0xff] %vm1286_vm1, %v4578_v5  ;;  %v3895_v18 = vmul.f32 %v12604_v1, %v12603_v63  ;;  %v3896_v52 = vmul.f32 %v12604_v1, %v12605_v34  ;;  %v12627_v1 = vld [vmem:[#allocation67_spill] sm:$0xff] }
 0x503   :  { %4743 = vst [vmem:[%s11201_s5 + $0x300] sm:$0xff] %v4551_v53  ;;  %4744 = vst.msk [vmem:[%s11201_s5 + $0x308] sm:$0xff] %vm1286_vm1, %v4552_v41  ;;  %v4293_v17 = vpop.permute.xlu0 %4292 }
 0x504   :  { %v4581_v22 = vadd.f32 %v4293_v17, %v3909_v50  ;;  %v4582_v9 = vadd.f32 %v4293_v17, %v3910_v15  ;;  %v4228_v30 = vpop.permute.xlu1 %4227  ;;  %v12607_v50 = vld [vmem:[#allocation210_spill] sm:$0xff]  ;;  %v12608_v15 = vld [vmem:[#allocation97_spill] sm:$0xff] }
 0x505   :  { %v4555_v62 = vadd.f32 %v4228_v30, %v3883_v32  ;;  %v4556_v10 = vadd.f32 %v4228_v30, %v3884_v3  ;;  %v3925_v42 = vmul.f32 %v12607_v50, %v12606_v49  ;;  %v3926_v13 = vmul.f32 %v12607_v50, %v12608_v15  ;;  %v12610_v32 = vld [vmem:[#allocation323_spill] sm:$0xff]  ;;  %v12611_v3 = vld [vmem:[#allocation45_spill] sm:$0xff]  ;;  %v12630_v50 = vld [vmem:[#allocation142_spill] sm:$0xff] }
 0x506   :  { %4773 = vst [vmem:[%s11201_s5 + $0x3f0] sm:$0xff] %v4581_v22  ;;  %4774 = vst.msk [vmem:[%s11201_s5 + $0x3f8] sm:$0xff] %vm1286_vm1, %v4582_v9  ;;  %v3899_v35 = vmul.f32 %v12610_v32, %v12609_v56  ;;  %v3900_v17 = vmul.f32 %v12610_v32, %v12611_v3  ;;  %v12633_v32 = vld [vmem:[#allocation75_spill] sm:$0xff] }
 0x507   :  { %4747 = vst [vmem:[%s11201_s5 + $0x320] sm:$0xff] %v4555_v62  ;;  %4748 = vst.msk [vmem:[%s11201_s5 + $0x328] sm:$0xff] %vm1286_vm1, %v4556_v10  ;;  %v4303_v39 = vpop.permute.xlu0 %4302 }
 0x508   :  { %v4585_v46 = vadd.f32 %v4303_v39, %v3913_v16  ;;  %v4586_v0 = vadd.f32 %v4303_v39, %v3914_v19  ;;  %v4238_v7 = vpop.permute.xlu1 %4237  ;;  %v12613_v16 = vld [vmem:[#allocation212_spill] sm:$0xff] }
 0x509   :  { %v4559_v45 = vadd.f32 %v4238_v7, %v3887_v28  ;;  %v4560_v6 = vadd.f32 %v4238_v7, %v3888_v57  ;;  %v3929_v26 = vmul.f32 %v12613_v16, %v12612_v12  ;;  %v12614_v19 = vld [vmem:[#allocation108_spill] sm:$0xff]  ;;  %v12616_v28 = vld [vmem:[#allocation327_spill] sm:$0xff]  ;;  %v12617_v57 = vld [vmem:[#allocation53_spill] sm:$0xff] }
 0x50a   :  { %4777 = vst [vmem:[%s11201_s5 + $0x410] sm:$0xff] %v4585_v46  ;;  %4778 = vst.msk [vmem:[%s11201_s5 + $0x418] sm:$0xff] %vm1286_vm1, %v4586_v0  ;;  %v3930_v31 = vmul.f32 %v12613_v16, %v12614_v19  ;;  %v3903_v54 = vmul.f32 %v12616_v28, %v12615_v25  ;;  %v3904_v39 = vmul.f32 %v12616_v28, %v12617_v57  ;;  %v12636_v16 = vld [vmem:[#allocation153_spill] sm:$0xff]  ;;  %v12639_v28 = vld [vmem:[#allocation83_spill] sm:$0xff] }
 0x50b   :  { %4751 = vst [vmem:[%s11201_s5 + $0x340] sm:$0xff] %v4559_v45  ;;  %4752 = vst.msk [vmem:[%s11201_s5 + $0x348] sm:$0xff] %vm1286_vm1, %v4560_v6  ;;  %v4313_v29 = vpop.permute.xlu0 %4312 }
 0x50c   :  { %v4589_v38 = vadd.f32 %v4313_v29, %v3917_v58  ;;  %v4590_v11 = vadd.f32 %v4313_v29, %v3918_v23  ;;  %v4248_v36 = vpop.permute.xlu1 %4247  ;;  %v12619_v58 = vld [vmem:[#allocation322_spill] sm:$0xff]  ;;  %v12620_v23 = vld [vmem:[#allocation121_spill] sm:$0xff] }
 0x50d   :  { %v4563_v40 = vadd.f32 %v4248_v36, %v3891_v59  ;;  %v4564_v14 = vadd.f32 %v4248_v36, %v3892_v21  ;;  %v3933_v48 = vmul.f32 %v12619_v58, %v12618_v37  ;;  %v3934_v20 = vmul.f32 %v12619_v58, %v12620_v23  ;;  %v12622_v59 = vld [vmem:[#allocation4_spill] sm:$0xff]  ;;  %v12623_v21 = vld [vmem:[#allocation61_spill] sm:$0xff] }
 0x50e   :  { %4781 = vst [vmem:[%s11201_s5 + $0x430] sm:$0xff] %v4589_v38  ;;  %4782 = vst.msk [vmem:[%s11201_s5 + $0x438] sm:$0xff] %vm1286_vm1, %v4590_v11  ;;  %v3907_v60 = vmul.f32 %v12622_v59, %v12621_v24  ;;  %v3908_v29 = vmul.f32 %v12622_v59, %v12623_v21  ;;  %v12642_v58 = vld [vmem:[#allocation165_spill] sm:$0xff]  ;;  %v12645_v59 = vld [vmem:[#allocation91_spill] sm:$0xff] }
 0x50f   :  { %4755 = vst [vmem:[%s11201_s5 + $0x360] sm:$0xff] %v4563_v40  ;;  %4756 = vst.msk [vmem:[%s11201_s5 + $0x368] sm:$0xff] %vm1286_vm1, %v4564_v14  ;;  %v4323_v33 = vpop.permute.xlu0 %4322 }
 0x510   :  { %v4593_v5 = vadd.f32 %v4323_v33, %v3921_v2  ;;  %v4594_v44 = vadd.f32 %v4323_v33, %v3922_v61  ;;  %v4258_v53 = vpop.permute.xlu1 %4257  ;;  %v12625_v2 = vld [vmem:[#allocation325_spill] sm:$0xff]  ;;  %v12626_v61 = vld [vmem:[#allocation132_spill] sm:$0xff] }
 0x511   :  { %v4567_v41 = vadd.f32 %v4258_v53, %v3895_v18  ;;  %v4568_v43 = vadd.f32 %v4258_v53, %v3896_v52  ;;  %v3937_v55 = vmul.f32 %v12625_v2, %v12624_v47  ;;  %v3938_v63 = vmul.f32 %v12625_v2, %v12626_v61  ;;  %v12628_v18 = vld [vmem:[#allocation32_spill] sm:$0xff]  ;;  %v12629_v52 = vld [vmem:[#allocation69_spill] sm:$0xff]  ;;  %v12648_v2 = vld [vmem:[#allocation187_spill] sm:$0xff] }
 0x512   :  { %4785 = vst [vmem:[%s11201_s5 + $0x450] sm:$0xff] %v4593_v5  ;;  %4786 = vst.msk [vmem:[%s11201_s5 + $0x458] sm:$0xff] %vm1286_vm1, %v4594_v44  ;;  %v3911_v34 = vmul.f32 %v12628_v18, %v12627_v1  ;;  %v3912_v33 = vmul.f32 %v12628_v18, %v12629_v52  ;;  %v12651_v18 = vld [vmem:[#allocation99_spill] sm:$0xff] }
 0x513   :  { %4759 = vst [vmem:[%s11201_s5 + $0x380] sm:$0xff] %v4567_v41  ;;  %4760 = vst.msk [vmem:[%s11201_s5 + $0x388] sm:$0xff] %vm1286_vm1, %v4568_v43  ;;  %v4333_v22 = vpop.permute.xlu0 %4332 }
 0x514   :  { %v4597_v9 = vadd.f32 %v4333_v22, %v3925_v42  ;;  %v4598_v30 = vadd.f32 %v4333_v22, %v3926_v13  ;;  %v4268_v62 = vpop.permute.xlu1 %4267  ;;  %v12631_v42 = vld [vmem:[#allocation2_spill] sm:$0xff]  ;;  %v12632_v13 = vld [vmem:[#allocation144_spill] sm:$0xff] }
 0x515   :  { %v4571_v10 = vadd.f32 %v4268_v62, %v3899_v35  ;;  %v4572_v51 = vadd.f32 %v4268_v62, %v3900_v17  ;;  %v3941_v15 = vmul.f32 %v12631_v42, %v12630_v50  ;;  %v3942_v56 = vmul.f32 %v12631_v42, %v12632_v13  ;;  %v12634_v35 = vld [vmem:[#allocation28_spill] sm:$0xff]  ;;  %v12635_v17 = vld [vmem:[#allocation77_spill] sm:$0xff] }
 0x516   :  { %4789 = vst [vmem:[%s11201_s5 + $0x470] sm:$0xff] %v4597_v9  ;;  %4790 = vst.msk [vmem:[%s11201_s5 + $0x478] sm:$0xff] %vm1286_vm1, %v4598_v30  ;;  %v3915_v3 = vmul.f32 %v12634_v35, %v12633_v32  ;;  %v3916_v22 = vmul.f32 %v12634_v35, %v12635_v17  ;;  %v12654_v42 = vld [vmem:[#allocation205_spill] sm:$0xff]  ;;  %v12657_v35 = vld [vmem:[#allocation112_spill] sm:$0xff] }
 0x517   :  { %4763 = vst [vmem:[%s11201_s5 + $0x3a0] sm:$0xff] %v4571_v10  ;;  %4764 = vst.msk [vmem:[%s11201_s5 + $0x3a8] sm:$0xff] %vm1286_vm1, %v4572_v51  ;;  %v4343_v46 = vpop.permute.xlu0 %4342 }
 0x518   :  { %v4601_v0 = vadd.f32 %v4343_v46, %v3929_v26  ;;  %v4602_v7 = vadd.f32 %v4343_v46, %v3930_v31  ;;  %v4278_v45 = vpop.permute.xlu1 %4277  ;;  %v12637_v26 = vld [vmem:[#allocation30_spill] sm:$0xff] }
 0x519   :  { %v4575_v6 = vadd.f32 %v4278_v45, %v3903_v54  ;;  %v4576_v4 = vadd.f32 %v4278_v45, %v3904_v39  ;;  %v3945_v19 = vmul.f32 %v12637_v26, %v12636_v16  ;;  %v12638_v31 = vld [vmem:[#allocation154_spill] sm:$0xff]  ;;  %v12641_v39 = vld [vmem:[#allocation85_spill] sm:$0xff] }
 0x51a   :  { %4793 = vst [vmem:[%s11201_s5 + $0x490] sm:$0xff] %v4601_v0  ;;  %4794 = vst.msk [vmem:[%s11201_s5 + $0x498] sm:$0xff] %vm1286_vm1, %v4602_v7  ;;  %v3946_v25 = vmul.f32 %v12637_v26, %v12638_v31  ;;  %v12640_v54 = vld [vmem:[#allocation34_spill] sm:$0xff]  ;;  %v12660_v26 = vld [vmem:[#allocation140_spill] sm:$0xff] }
 0x51b   :  { %4767 = vst [vmem:[%s11201_s5 + $0x3c0] sm:$0xff] %v4575_v6  ;;  %4768 = vst.msk [vmem:[%s11201_s5 + $0x3c8] sm:$0xff] %vm1286_vm1, %v4576_v4  ;;  %v4353_v38 = vpop.permute.xlu0 %4352  ;;  %v3919_v57 = vmul.f32 %v12640_v54, %v12639_v28  ;;  %v3920_v46 = vmul.f32 %v12640_v54, %v12641_v39  ;;  %v12663_v54 = vld [vmem:[#allocation124_spill] sm:$0xff] }
 0x51c   :  { %v4605_v11 = vadd.f32 %v4353_v38, %v3933_v48  ;;  %v4606_v36 = vadd.f32 %v4353_v38, %v3934_v20  ;;  %v4288_v40 = vpop.permute.xlu1 %4287  ;;  %v12643_v48 = vld [vmem:[#allocation26_spill] sm:$0xff]  ;;  %v12644_v20 = vld [vmem:[#allocation167_spill] sm:$0xff] }
 0x51d   :  { %v4579_v14 = vadd.f32 %v4288_v40, %v3907_v60  ;;  %v4580_v27 = vadd.f32 %v4288_v40, %v3908_v29  ;;  %v3949_v23 = vmul.f32 %v12643_v48, %v12642_v58  ;;  %v3950_v24 = vmul.f32 %v12643_v48, %v12644_v20  ;;  %v12646_v60 = vld [vmem:[#allocation234_spill] sm:$0xff]  ;;  %v12647_v29 = vld [vmem:[#allocation93_spill] sm:$0xff]  ;;  %v12666_v48 = vld [vmem:[#allocation135_spill] sm:$0xff] }
 0x51e   :  { %4797 = vst [vmem:[%s11201_s5 + $0x4b0] sm:$0xff] %v4605_v11  ;;  %4798 = vst.msk [vmem:[%s11201_s5 + $0x4b8] sm:$0xff] %vm1286_vm1, %v4606_v36  ;;  %v3923_v21 = vmul.f32 %v12646_v60, %v12645_v59  ;;  %v3924_v38 = vmul.f32 %v12646_v60, %v12647_v29 }
 0x51f   :  { %4771 = vst [vmem:[%s11201_s5 + $0x3e0] sm:$0xff] %v4579_v14  ;;  %4772 = vst.msk [vmem:[%s11201_s5 + $0x3e8] sm:$0xff] %vm1286_vm1, %v4580_v27  ;;  %v4363_v5 = vpop.permute.xlu0 %4362 }
 0x520   :  { %v4609_v44 = vadd.f32 %v4363_v5, %v3937_v55  ;;  %v4610_v53 = vadd.f32 %v4363_v5, %v3938_v63  ;;  %v4298_v41 = vpop.permute.xlu1 %4297  ;;  %v12649_v55 = vld [vmem:[#allocation224_spill] sm:$0xff] }
 0x521   :  { %v4583_v43 = vadd.f32 %v4298_v41, %v3911_v34  ;;  %v4584_v49 = vadd.f32 %v4298_v41, %v3912_v33  ;;  %v3953_v61 = vmul.f32 %v12649_v55, %v12648_v2  ;;  %v12650_v63 = vld [vmem:[#allocation188_spill] sm:$0xff]  ;;  %v12652_v34 = vld [vmem:[#allocation126_spill] sm:$0xff] }
 0x522   :  { %4801 = vst [vmem:[%s11201_s5 + $0x4d0] sm:$0xff] %v4609_v44  ;;  %4802 = vst.msk [vmem:[%s11201_s5 + $0x4d8] sm:$0xff] %vm1286_vm1, %v4610_v53  ;;  %v3954_v1 = vmul.f32 %v12649_v55, %v12650_v63  ;;  %v3927_v52 = vmul.f32 %v12652_v34, %v12651_v18  ;;  %v12653_v33 = vld [vmem:[#allocation102_spill] sm:$0xff] }
 0x523   :  { %4775 = vst [vmem:[%s11201_s5 + $0x400] sm:$0xff] %v4583_v43  ;;  %4776 = vst.msk [vmem:[%s11201_s5 + $0x408] sm:$0xff] %vm1286_vm1, %v4584_v49  ;;  %v4373_v9 = vpop.permute.xlu0 %4372  ;;  %v3928_v5 = vmul.f32 %v12652_v34, %v12653_v33  ;;  %v12673_v55 = vld [vmem:[#allocation150_spill] sm:$0xff]  ;;  %v12675_v34 = vld [vmem:[#allocation156_spill] sm:$0xff] }
 0x524   :  { %v4613_v30 = vadd.f32 %v4373_v9, %v3941_v15  ;;  %v4614_v62 = vadd.f32 %v4373_v9, %v3942_v56  ;;  %v4308_v10 = vpop.permute.xlu1 %4307  ;;  %v12655_v15 = vld [vmem:[#allocation36_spill] sm:$0xff] }
 0x525   :  { %v4587_v51 = vadd.f32 %v4308_v10, %v3915_v3  ;;  %v4588_v12 = vadd.f32 %v4308_v10, %v3916_v22  ;;  %v3957_v13 = vmul.f32 %v12655_v15, %v12654_v42  ;;  %v12656_v56 = vld [vmem:[#allocation208_spill] sm:$0xff]  ;;  %v12658_v3 = vld [vmem:[#allocation267_spill] sm:$0xff] }
 0x526   :  { %4805 = vst [vmem:[%s11201_s5 + $0x4f0] sm:$0xff] %v4613_v30  ;;  %4806 = vst.msk [vmem:[%s11201_s5 + $0x4f8] sm:$0xff] %vm1286_vm1, %v4614_v62  ;;  %v3958_v32 = vmul.f32 %v12655_v15, %v12656_v56  ;;  %v3931_v17 = vmul.f32 %v12658_v3, %v12657_v35  ;;  %v12659_v22 = vld [vmem:[#allocation115_spill] sm:$0xff] }
 0x527   :  { %4779 = vst [vmem:[%s11201_s5 + $0x420] sm:$0xff] %v4587_v51  ;;  %4780 = vst.msk [vmem:[%s11201_s5 + $0x428] sm:$0xff] %vm1286_vm1, %v4588_v12  ;;  %v4383_v0 = vpop.permute.xlu0 %4382  ;;  %v3932_v9 = vmul.f32 %v12658_v3, %v12659_v22  ;;  %v12679_v15 = vld [vmem:[#allocation247_spill] sm:$0xff]  ;;  %v12681_v22 = vld [vmem:[#allocation182_spill] sm:$0xff] }
 0x528   :  { %v4617_v7 = vadd.f32 %v4383_v0, %v3945_v19  ;;  %v4618_v45 = vadd.f32 %v4383_v0, %v3946_v25  ;;  %v4318_v6 = vpop.permute.xlu1 %4317  ;;  %v12661_v19 = vld [vmem:[#allocation246_spill] sm:$0xff]  ;;  %v12662_v25 = vld [vmem:[#allocation237_spill] sm:$0xff]  ;;  %v12680_v56 = vld [vmem:[#allocation223_spill] sm:$0xff] }
 0x529   :  { %v4591_v4 = vadd.f32 %v4318_v6, %v3919_v57  ;;  %v4592_v37 = vadd.f32 %v4318_v6, %v3920_v46  ;;  %v3961_v31 = vmul.f32 %v12661_v19, %v12660_v26  ;;  %v3962_v28 = vmul.f32 %v12661_v19, %v12662_v25  ;;  %v12664_v57 = vld [vmem:[#allocation245_spill] sm:$0xff]  ;;  %v12665_v46 = vld [vmem:[#allocation127_spill] sm:$0xff]  ;;  %v12684_v26 = vld [vmem:[#allocation198_spill] sm:$0xff] }
 0x52a   :  { %4809 = vst [vmem:[%s11201_s5 + $0x510] sm:$0xff] %v4617_v7  ;;  %4810 = vst.msk [vmem:[%s11201_s5 + $0x518] sm:$0xff] %vm1286_vm1, %v4618_v45  ;;  %v3935_v39 = vmul.f32 %v12664_v57, %v12663_v54  ;;  %v3936_v0 = vmul.f32 %v12664_v57, %v12665_v46  ;;  %v12685_v19 = vld [vmem:[#allocation273_spill] sm:$0xff]  ;;  %v12686_v25 = vld [vmem:[#allocation202_spill] sm:$0xff] }
 0x52b   :  { %4783 = vst [vmem:[%s11201_s5 + $0x440] sm:$0xff] %v4591_v4  ;;  %4784 = vst.msk [vmem:[%s11201_s5 + $0x448] sm:$0xff] %vm1286_vm1, %v4592_v37  ;;  %v4393_v11 = vpop.permute.xlu0 %4392  ;;  %v12687_v46 = vld [vmem:[#allocation105_spill] sm:$0xff] }
 0x52c   :  { %v4621_v36 = vadd.f32 %v4393_v11, %v3949_v23  ;;  %v4622_v40 = vadd.f32 %v4393_v11, %v3950_v24  ;;  %v4328_v14 = vpop.permute.xlu1 %4327  ;;  %v12667_v23 = vld [vmem:[#allocation271_spill] sm:$0xff]  ;;  %v12668_v24 = vld [vmem:[#allocation138_spill] sm:$0xff] }
 0x52d   :  { %v4595_v27 = vadd.f32 %v4328_v14, %v3923_v21  ;;  %v4596_v47 = vadd.f32 %v4328_v14, %v3924_v38  ;;  %v3939_v20 = vmul.f32 %v12667_v23, %v12666_v48  ;;  %v3940_v59 = vmul.f32 %v12667_v23, %v12668_v24  ;;  %v12669_v21 = vld [vmem:[#allocation231_spill] sm:$0xff]  ;;  %v12670_v38 = vld [vmem:[#allocation241_spill] sm:$0xff]  ;;  %v12690_v23 = vld [vmem:[#allocation164_spill] sm:$0xff] }
 0x52e   :  { %4813 = vst [vmem:[%s11201_s5 + $0x530] sm:$0xff] %v4621_v36  ;;  %4814 = vst.msk [vmem:[%s11201_s5 + $0x538] sm:$0xff] %vm1286_vm1, %v4622_v40  ;;  %v12691_v24 = vld [vmem:[#allocation133_spill] sm:$0xff] }
 0x52f   :  { %4787 = vst [vmem:[%s11201_s5 + $0x460] sm:$0xff] %v4595_v27  ;;  %4788 = vst.msk [vmem:[%s11201_s5 + $0x468] sm:$0xff] %vm1286_vm1, %v4596_v47  ;;  %v4403_v44 = vpop.permute.xlu0 %4402  ;;  %v12671_v27 = vld [vmem:[#allocation148_spill] sm:$0xff]  ;;  %v12672_v47 = vld [vmem:[#allocation293_spill] sm:$0xff] }
 0x530   :  { %v4625_v53 = vadd.f32 %v4403_v44, %v3953_v61  ;;  %v4626_v41 = vadd.f32 %v4403_v44, %v3954_v1  ;;  %v4338_v43 = vpop.permute.xlu1 %4337  ;;  %v3943_v2 = vmul.f32 %v12672_v47, %v12671_v27  ;;  %v3944_v61 = vmul.f32 %v12672_v47, %v12673_v55  ;;  %v12674_v1 = vld [vmem:[#allocation289_spill] sm:$0xff] }
 0x531   :  { %v4599_v49 = vadd.f32 %v4338_v43, %v3927_v52  ;;  %v4600_v50 = vadd.f32 %v4338_v43, %v3928_v5 }
 0x532   :  { %4817 = vst [vmem:[%s11201_s5 + $0x550] sm:$0xff] %v4625_v53  ;;  %4818 = vst.msk [vmem:[%s11201_s5 + $0x558] sm:$0xff] %vm1286_vm1, %v4626_v41  ;;  %v12676_v53 = vld [vmem:[#allocation160_spill] sm:$0xff]  ;;  %v12677_v41 = vld [vmem:[#allocation279_spill] sm:$0xff] }
 0x533   :  { %4791 = vst [vmem:[%s11201_s5 + $0x480] sm:$0xff] %v4599_v49  ;;  %4792 = vst.msk [vmem:[%s11201_s5 + $0x488] sm:$0xff] %vm1286_vm1, %v4600_v50  ;;  %v4413_v30 = vpop.permute.xlu0 %4412  ;;  %v3947_v43 = vmul.f32 %v12677_v41, %v12676_v53  ;;  %v12678_v49 = vld [vmem:[#allocation163_spill] sm:$0xff] }
 0x534   :  { %v4629_v62 = vadd.f32 %v4413_v30, %v3957_v13  ;;  %v4630_v10 = vadd.f32 %v4413_v30, %v3958_v32  ;;  %v4348_v51 = vpop.permute.xlu1 %4347  ;;  %v3948_v50 = vmul.f32 %v12677_v41, %v12678_v49 }
 0x535   :  { %v4603_v12 = vadd.f32 %v4348_v51, %v3931_v17  ;;  %v4604_v16 = vadd.f32 %v4348_v51, %v3932_v9  ;;  %v12682_v9 = vld [vmem:[#allocation168_spill] sm:$0xff] }
 0x536   :  { %4821 = vst [vmem:[%s11201_s5 + $0x570] sm:$0xff] %v4629_v62  ;;  %4822 = vst.msk [vmem:[%s11201_s5 + $0x578] sm:$0xff] %vm1286_vm1, %v4630_v10  ;;  %v3951_v30 = vmul.f32 %v12682_v9, %v12681_v22  ;;  %v12683_v62 = vld [vmem:[#allocation185_spill] sm:$0xff] }
 0x537   :  { %4795 = vst [vmem:[%s11201_s5 + $0x4a0] sm:$0xff] %v4603_v12  ;;  %4796 = vst.msk [vmem:[%s11201_s5 + $0x4a8] sm:$0xff] %vm1286_vm1, %v4604_v16  ;;  %v4423_v7 = vpop.permute.xlu0 %4422  ;;  %v3952_v10 = vmul.f32 %v12682_v9, %v12683_v62 }
 0x538   :  { %v4633_v45 = vadd.f32 %v4423_v7, %v3961_v31  ;;  %v4634_v6 = vadd.f32 %v4423_v7, %v3962_v28  ;;  %v4358_v4 = vpop.permute.xlu1 %4357  ;;  %v3955_v31 = vmul.f32 %v12685_v19, %v12684_v26  ;;  %v3956_v28 = vmul.f32 %v12685_v19, %v12686_v25 }
 0x539   :  { %v4607_v37 = vadd.f32 %v4358_v4, %v3935_v39  ;;  %v4608_v58 = vadd.f32 %v4358_v4, %v3936_v0  ;;  %v12688_v0 = vld [vmem:[#allocation117_spill] sm:$0xff] }
 0x53a   :  { %4825 = vst [vmem:[%s11201_s5 + $0x590] sm:$0xff] %v4633_v45  ;;  %4826 = vst.msk [vmem:[%s11201_s5 + $0x598] sm:$0xff] %vm1286_vm1, %v4634_v6  ;;  %v3959_v7 = vmul.f32 %v12688_v0, %v12687_v46  ;;  %v12689_v45 = vld [vmem:[#allocation216_spill] sm:$0xff] }
 0x53b   :  { %4799 = vst [vmem:[%s11201_s5 + $0x4c0] sm:$0xff] %v4607_v37  ;;  %4800 = vst.msk [vmem:[%s11201_s5 + $0x4c8] sm:$0xff] %vm1286_vm1, %v4608_v58  ;;  %v4433_v60 = vpop.permute.xlu0 %4432  ;;  %v3960_v6 = vmul.f32 %v12688_v0, %v12689_v45 }
 0x53c   :  { %v4637_v29 = vadd.f32 %v4433_v60, %v12669_v21  ;;  %v4638_v11 = vadd.f32 %v4433_v60, %v12670_v38  ;;  %v4368_v36 = vpop.permute.xlu1 %4367  ;;  %v12692_v21 = vld [vmem:[#allocation152_spill] sm:$0xff]  ;;  %v12693_v38 = vld [vmem:[#allocation191_spill] sm:$0xff] }
 0x53d   :  { %v4611_v40 = vadd.f32 %v4368_v36, %v3939_v20  ;;  %v4612_v14 = vadd.f32 %v4368_v36, %v3940_v59 }
 0x53e   :  { %4829 = vst [vmem:[%s11201_s5 + $0x5b0] sm:$0xff] %v4637_v29  ;;  %4830 = vst.msk [vmem:[%s11201_s5 + $0x5b8] sm:$0xff] %vm1286_vm1, %v4638_v11 }
 0x53f   :  { %4803 = vst [vmem:[%s11201_s5 + $0x4e0] sm:$0xff] %v4611_v40  ;;  %4804 = vst.msk [vmem:[%s11201_s5 + $0x4e8] sm:$0xff] %vm1286_vm1, %v4612_v14  ;;  %v4443_v63 = vpop.permute.xlu0 %4442  ;;  %v12694_v14 = vld [vmem:[#allocation324_spill] sm:$0xff] }
 0x540   :  { %v4641_v18 = vadd.f32 %v4443_v63, %v12674_v1  ;;  %v4642_v52 = vadd.f32 %v4443_v63, %v12675_v34  ;;  %v4378_v33 = vpop.permute.xlu1 %4377 }
 0x541   :  { %v4615_v5 = vadd.f32 %v4378_v33, %v3943_v2  ;;  %v4616_v44 = vadd.f32 %v4378_v33, %v3944_v61 }
 0x542   :  { %4833 = vst [vmem:[%s11201_s5 + $0x5d0] sm:$0xff] %v4641_v18  ;;  %4834 = vst.msk [vmem:[%s11201_s5 + $0x5d8] sm:$0xff] %vm1286_vm1, %v4642_v52 }
 0x543   :  { %4807 = vst [vmem:[%s11201_s5 + $0x500] sm:$0xff] %v4615_v5  ;;  %4808 = vst.msk [vmem:[%s11201_s5 + $0x508] sm:$0xff] %vm1286_vm1, %v4616_v44  ;;  %v4453_v42 = vpop.permute.xlu0 %4452 }
 0x544   :  { %v4645_v13 = vadd.f32 %v4453_v42, %v12679_v15  ;;  %v4646_v32 = vadd.f32 %v4453_v42, %v12680_v56  ;;  %v4388_v35 = vpop.permute.xlu1 %4387 }
 0x545   :  { %v4619_v3 = vadd.f32 %v4388_v35, %v3947_v43  ;;  %v4620_v17 = vadd.f32 %v4388_v35, %v3948_v50 }
 0x546   :  { %4837 = vst [vmem:[%s11201_s5 + $0x5f0] sm:$0xff] %v4645_v13  ;;  %4838 = vst.msk [vmem:[%s11201_s5 + $0x5f8] sm:$0xff] %vm1286_vm1, %v4646_v32 }
 0x547   :  { %4811 = vst [vmem:[%s11201_s5 + $0x520] sm:$0xff] %v4619_v3  ;;  %4812 = vst.msk [vmem:[%s11201_s5 + $0x528] sm:$0xff] %vm1286_vm1, %v4620_v17 }
 0x548   :  { %v4398_v51 = vpop.permute.xlu1 %4397 }
 0x549   :  { %v4623_v12 = vadd.f32 %v4398_v51, %v3951_v30  ;;  %v4624_v16 = vadd.f32 %v4398_v51, %v3952_v10 }
 0x54b   :  { %4815 = vst [vmem:[%s11201_s5 + $0x540] sm:$0xff] %v4623_v12  ;;  %4816 = vst.msk [vmem:[%s11201_s5 + $0x548] sm:$0xff] %vm1286_vm1, %v4624_v16 }
 0x54c   :  { %v4408_v54 = vpop.permute.xlu1 %4407 }
 0x54d   :  { %v4627_v57 = vadd.f32 %v4408_v54, %v3955_v31  ;;  %v4628_v39 = vadd.f32 %v4408_v54, %v3956_v28 }
 0x54f   :  { %4819 = vst [vmem:[%s11201_s5 + $0x560] sm:$0xff] %v4627_v57  ;;  %4820 = vst.msk [vmem:[%s11201_s5 + $0x568] sm:$0xff] %vm1286_vm1, %v4628_v39 }
 0x550   :  { %v4418_v4 = vpop.permute.xlu1 %4417 }
 0x551   :  { %v4631_v37 = vadd.f32 %v4418_v4, %v3959_v7  ;;  %v4632_v58 = vadd.f32 %v4418_v4, %v3960_v6 }
 0x553   :  { %4823 = vst [vmem:[%s11201_s5 + $0x580] sm:$0xff] %v4631_v37  ;;  %4824 = vst.msk [vmem:[%s11201_s5 + $0x588] sm:$0xff] %vm1286_vm1, %v4632_v58 }
 0x554   :  { %v4428_v48 = vpop.permute.xlu1 %4427 }
 0x555   :  { %v4635_v20 = vadd.f32 %v4428_v48, %v12690_v23  ;;  %v4636_v59 = vadd.f32 %v4428_v48, %v12691_v24 }
 0x557   :  { %4827 = vst [vmem:[%s11201_s5 + $0x5a0] sm:$0xff] %v4635_v20  ;;  %4828 = vst.msk [vmem:[%s11201_s5 + $0x5a8] sm:$0xff] %vm1286_vm1, %v4636_v59 }
 0x558   :  { %v4438_v60 = vpop.permute.xlu1 %4437 }
 0x559   :  { %v4639_v29 = vadd.f32 %v4438_v60, %v12692_v21  ;;  %v4640_v11 = vadd.f32 %v4438_v60, %v12693_v38 }
 0x55b   :  { %4831 = vst [vmem:[%s11201_s5 + $0x5c0] sm:$0xff] %v4639_v29  ;;  %4832 = vst.msk [vmem:[%s11201_s5 + $0x5c8] sm:$0xff] %vm1286_vm1, %v4640_v11 }
 0x55c   :  { %v4448_v36 = vpop.permute.xlu1 %4447 }
 0x55d   :  { %v4643_v40 = vadd.f32 %v4448_v36, %v10260_v8  ;;  %v4644_v27 = vadd.f32 %v4448_v36, %v12694_v14 }
 0x55f   :  { %4835 = vst [vmem:[%s11201_s5 + $0x5e0] sm:$0xff] %v4643_v40  ;;  %4836 = vst.msk [vmem:[%s11201_s5 + $0x5e8] sm:$0xff] %vm1286_vm1, %v4644_v27 }

</bundles_post_ra>
